<compile_context>
chip_gen: v6e
topology: v6e:2x2x1
jax: 0.10.0
libtpu: 0.0.40
codegen_flags: <defaults>
</compile_context>

<pallas_src>
import functools

import jax
import jax.numpy as jnp
from jax import lax
from jax.experimental import pallas as pl
from jax.experimental.pallas import tpu as pltpu


# ----------------------------------------------------------------------------
# Fused per-level Pallas kernel
# ----------------------------------------------------------------------------
def _rpn_level_kernel(x_ref, *args, H, W, n_stem):
    """Fused RPN head for one image (one grid step).

    Argument layout (after x_ref):
        w_0, b_0, ..., w_{n_stem-1}, b_{n_stem-1},  # stem conv weights (9*Cin, Cout) / biases
        w_head, b_head,                             # merged obj|box 1x1 head, padded to 128
        o_ref,                                      # (1, H*W, 128) f32 output block
        buf_0, ..., buf_{n_stem-1}                  # (2*H*W, Cin_l) bf16 VMEM staging scratch
    """
    HW = H * W
    o_ref = args[2 * n_stem + 2]
    bufs = args[2 * n_stem + 3:]

    cur = x_ref[0]                                   # (H*W, Cin) bf16

    for l in range(n_stem):
        w_ref = args[2 * l]                          # (9*Cin, Cout) bf16
        b_ref = args[2 * l + 1]                      # (1, Cout)     f32
        buf = bufs[l]                                # (2*H*W, Cin)  bf16 scratch
        C = cur.shape[-1]

        # Stage the activation twice (aligned full-width stores) so that any circular
        # row shift by `off` becomes a plain contiguous window read at a static offset.
        buf[0:HW, :] = cur
        buf[HW:2 * HW, :] = cur

        # Spatial index helpers used to zero out-of-image taps (the conv halo).
        pidx = lax.broadcasted_iota(jnp.int32, (HW, C), 0)   # flat index h*W + w
        wcol = pidx % W                                      # column w

        # im2col: 9 shifted + masked windows -> (H*W, 9*Cin).  K-order is (dy, dx, cin),
        # matching the (3, 3, Cin, Cout) -> (9*Cin, Cout) weight reshape in the wrapper.
        pieces = []
        for dy in range(3):
            for dx in range(3):
                off = (dy - 1) * W + (dx - 1)
                if off == 0:
                    win = cur
                else:
                    start = off % HW                          # python mod, in [0, HW)
                    win = buf[start:start + HW, :]            # (HW, C) bf16
                conds = []
                if dy == 0:
                    conds.append(pidx >= W)                   # h - 1 >= 0
                if dy == 2:
                    conds.append(pidx < (H - 1) * W)          # h + 1 <  H
                if dx == 0:
                    conds.append(wcol >= 1)                   # w - 1 >= 0
                if dx == 2:
                    conds.append(wcol < (W - 1))              # w + 1 <  W
                if conds:
                    valid = conds[0]
                    for c in conds[1:]:
                        valid = valid & c
                    win = jnp.where(valid, win, jnp.zeros_like(win))
                pieces.append(win)
        patches = jnp.concatenate(pieces, axis=-1)            # (HW, 9*Cin)

        # One MXU matmul per stem layer (K = 9*Cin), f32 accumulate; bias + ReLU in f32.
        y = jnp.dot(patches, w_ref[...], preferred_element_type=jnp.float32)
        y = jnp.maximum(y + b_ref[...], 0.0)
        cur = y.astype(jnp.bfloat16)

    # Merged 1x1 heads (obj | box), zero-padded to 128 lanes -> single lane-dense store.
    w_head = args[2 * n_stem]                        # (C_last, 128) bf16
    b_head = args[2 * n_stem + 1]                    # (1, 128)      f32
    out = jnp.dot(cur, w_head[...], preferred_element_type=jnp.float32) + b_head[...]
    o_ref[0] = out.astype(o_ref.dtype)


# ----------------------------------------------------------------------------
# Wrapper (pallas_call plumbing)
# ----------------------------------------------------------------------------
def rpn_level_fused(x_nhwc, stem_params, head_w, head_b):
    """x_nhwc: (B, H, W, Cin) f32; stem_params: list of ((3,3,Cin,Cout), (Cout,));
    head_w: (C_last, 5A); head_b: (5A,).

    Returns (B, H*W, 128) f32 where channels [:5A] are [obj(A) | box(4A)] and the
    rest is zero padding used only to make the kernel's HBM store lane-dense.
    """
    B, H, W, Cin = x_nhwc.shape
    HW = H * W
    A5 = head_w.shape[1]
    c_pad = max(128, ((A5 + 127) // 128) * 128)
    nb = jnp.bfloat16
    n_stem = len(stem_params)

    # TODO(synk): for production RPN shapes (C=256, ~200x300 feature maps) add a
    # row-band grid axis (halo of n_stem rows) sized to the generation's VMEM
    # (v7x: 64 MiB) instead of one whole image per grid step, and pad H*W to a
    # multiple of 8 for the staging buffer.

    args = [x_nhwc.reshape(B, HW, Cin).astype(nb)]
    in_specs = [pl.BlockSpec((1, HW, Cin), lambda i: (i, 0, 0))]
    scratch_shapes = []
    for (w, b) in stem_params:
        cin, cout = w.shape[2], w.shape[3]
        args.append(w.reshape(9 * cin, cout).astype(nb))       # K-order (dy, dx, cin)
        in_specs.append(pl.BlockSpec((9 * cin, cout), lambda i: (0, 0)))
        args.append(b.reshape(1, cout).astype(jnp.float32))
        in_specs.append(pl.BlockSpec((1, cout), lambda i: (0, 0)))
        scratch_shapes.append(pltpu.VMEM((2 * HW, cin), nb))

    c_last = stem_params[-1][0].shape[3]
    wh = jnp.zeros((c_last, c_pad), nb).at[:, :A5].set(head_w.astype(nb))
    bh = jnp.zeros((1, c_pad), jnp.float32).at[0, :A5].set(head_b.astype(jnp.float32))
    args += [wh, bh]
    in_specs += [pl.BlockSpec((c_last, c_pad), lambda i: (0, 0)),
                 pl.BlockSpec((1, c_pad), lambda i: (0, 0))]

    kernel = functools.partial(_rpn_level_kernel, H=H, W=W, n_stem=n_stem)
    return pl.pallas_call(
        kernel,
        out_shape=jax.ShapeDtypeStruct((B, HW, c_pad), jnp.float32),
        grid=(B,),
        in_specs=in_specs,
        out_specs=pl.BlockSpec((1, HW, c_pad), lambda i: (i, 0, 0)),
        scratch_shapes=scratch_shapes,
        compiler_params=pltpu.CompilerParams(
            dimension_semantics=("parallel",),
            vmem_limit_bytes=32 * 1024 * 1024),
    )(*args)


# ----------------------------------------------------------------------------
# RPNPredictionNetwork in JAX + Pallas
# ----------------------------------------------------------------------------
def init_rpn_params(key, in_channels, stem_channels, num_anchors=3):
    """Synthetic init matching nn.init.normal_(std=0.01), zero bias.
    Weights stored HWIO (3,3,Cin,Cout) for the stem and (Cin,Cout) for the heads."""
    params = {"stem": []}
    chans = [in_channels] + list(stem_channels)
    for i in range(len(stem_channels)):
        key, k = jax.random.split(key)
        w = 0.01 * jax.random.normal(k, (3, 3, chans[i], chans[i + 1]), jnp.float32)
        b = jnp.zeros((chans[i + 1],), jnp.float32)
        params["stem"].append((w, b))
    key, k1 = jax.random.split(key)
    key, k2 = jax.random.split(key)
    params["obj_w"] = 0.01 * jax.random.normal(k1, (stem_channels[-1], num_anchors), jnp.float32)
    params["obj_b"] = jnp.zeros((num_anchors,), jnp.float32)
    params["box_w"] = 0.01 * jax.random.normal(k2, (stem_channels[-1], num_anchors * 4), jnp.float32)
    params["box_b"] = jnp.zeros((num_anchors * 4,), jnp.float32)
    return params


def rpn_forward(params, feats_per_fpn_level):
    """feats_per_fpn_level: dict {"p3","p4","p5"} of NCHW tensors (PyTorch layout).

    Returns [object_logits, boxreg_deltas]:
      object_logits[level]: (B, H*W*A)
      boxreg_deltas[level]: (B, H*W*A, 4)
    """
    A = params["obj_w"].shape[1]
    head_w = jnp.concatenate([params["obj_w"], params["box_w"]], axis=1)   # (C_last, 5A)
    head_b = jnp.concatenate([params["obj_b"], params["box_b"]], axis=0)   # (5A,)

    object_logits = {}
    boxreg_deltas = {}
    for level, x_nchw in feats_per_fpn_level.items():
        # NCHW -> NHWC: makes PyTorch's trailing permute a no-op in our layout.
        x = jnp.transpose(x_nchw, (0, 2, 3, 1)).astype(jnp.float32)
        head = rpn_level_fused(x, params["stem"], head_w, head_b)   # (B, H*W, 128)
        B = head.shape[0]
        # Slice the real channels off BEFORE reshaping so element order matches PyTorch.
        object_logits[level] = head[:, :, :A].reshape(B, -1)              # (B, H*W*A)
        boxreg_deltas[level] = head[:, :, A:5 * A].reshape(B, -1, 4)      # (B, H*W*A, 4)
    return [object_logits, boxreg_deltas]


# ----------------------------------------------------------------------------
# Pure-JAX reference (bf16-aware, for correctness check)
# ----------------------------------------------------------------------------
def _bf16(x):
    return x.astype(jnp.bfloat16).astype(jnp.float32)


def _ref_forward(params, feats_per_fpn_level):
    dn = ("NHWC", "HWIO", "NHWC")
    hp = lax.Precision.HIGHEST
    object_logits = {}
    boxreg_deltas = {}
    for level, x_nchw in feats_per_fpn_level.items():
        x = jnp.transpose(x_nchw, (0, 2, 3, 1)).astype(jnp.float32)
        for (w, b) in params["stem"]:
            x = lax.conv_general_dilated(_bf16(x), _bf16(w), (1, 1), "SAME",
                                         dimension_numbers=dn, precision=hp)
            x = jnp.maximum(x + b, 0.0)
        xb = _bf16(x)
        obj = jnp.einsum("bhwc,co->bhwo", xb, _bf16(params["obj_w"]),
                         precision=hp) + params["obj_b"]
        box = jnp.einsum("bhwc,co->bhwo", xb, _bf16(params["box_w"]),
                         precision=hp) + params["box_b"]
        B = obj.shape[0]
        object_logits[level] = obj.reshape(B, -1)
        boxreg_deltas[level] = box.reshape(B, -1, 4)
    return [object_logits, boxreg_deltas]


if __name__ == "__main__":
    key = jax.random.PRNGKey(0)

    batch = 2
    in_channels = 8
    stem_channels = [16, 16]
    num_anchors = 3

    params = init_rpn_params(key, in_channels, stem_channels, num_anchors)

    # FPN feature maps in PyTorch NCHW layout, halving spatial per level.
    key, k3, k4, k5 = jax.random.split(key, 4)
    feats = {
        "p3": jax.random.normal(k3, (batch, in_channels, 16, 16), jnp.float32),
        "p4": jax.random.normal(k4, (batch, in_channels, 8, 8), jnp.float32),
        "p5": jax.random.normal(k5, (batch, in_channels, 4, 4), jnp.float32),
    }

    out = rpn_forward(params, feats)
    out = jax.block_until_ready(out)

    # Correctness check against a bf16-aware plain-JAX reference (kernel uses bf16
    # inputs/weights with f32 accumulation, so f32-tight tolerances do not apply).
    ref = _ref_forward(params, feats)
    for level in ("p3", "p4", "p5"):
        assert out[0][level].shape == ref[0][level].shape
        assert out[1][level].shape == ref[1][level].shape
        assert jnp.allclose(out[0][level], ref[0][level], rtol=2e-2, atol=1e-5)
        assert jnp.allclose(out[1][level], ref[1][level], rtol=2e-2, atol=1e-5)

    print("KERNEL_OK")
</pallas_src>

<mosaic_0001>
module attributes {stable_mosaic.version = 11 : i64} {
  func.func @_rpn_level_kernel(%arg0: i32, %arg1: memref<1x256x8xbf16, #tpu.memory_space<vmem>>, %arg2: memref<72x16xbf16, #tpu.memory_space<vmem>>, %arg3: memref<1x16xf32, #tpu.memory_space<vmem>>, %arg4: memref<144x16xbf16, #tpu.memory_space<vmem>>, %arg5: memref<1x16xf32, #tpu.memory_space<vmem>>, %arg6: memref<16x128xbf16, #tpu.memory_space<vmem>>, %arg7: memref<1x128xf32, #tpu.memory_space<vmem>>, %arg8: memref<1x256x128xf32, #tpu.memory_space<vmem>>, %arg9: memref<512x8xbf16, #tpu.memory_space<vmem>>, %arg10: memref<512x16xbf16, #tpu.memory_space<vmem>>) attributes {dimension_semantics = [#tpu.dimension_semantics<parallel>], iteration_bounds = array<i64: 2>, scalar_prefetch = 0 : i64, scratch_operands = 2 : i64, tpu.core_type = #tpu.core_type<tc>, window_params = [{transform_indices = @transform_0, window_bounds = array<i64: 1, 256, 8>}, {pipeline_mode = #tpu.pipeline_mode<synchronous>, transform_indices = @transform_1, window_bounds = array<i64: 72, 16>}, {pipeline_mode = #tpu.pipeline_mode<synchronous>, transform_indices = @transform_2, window_bounds = array<i64: 1, 16>}, {pipeline_mode = #tpu.pipeline_mode<synchronous>, transform_indices = @transform_3, window_bounds = array<i64: 144, 16>}, {pipeline_mode = #tpu.pipeline_mode<synchronous>, transform_indices = @transform_4, window_bounds = array<i64: 1, 16>}, {pipeline_mode = #tpu.pipeline_mode<synchronous>, transform_indices = @transform_5, window_bounds = array<i64: 16, 128>}, {pipeline_mode = #tpu.pipeline_mode<synchronous>, transform_indices = @transform_6, window_bounds = array<i64: 1, 128>}, {transform_indices = @transform_7, window_bounds = array<i64: 1, 256, 128>}]} {
    %c0 = arith.constant 0 : index
    %c0_0 = arith.constant 0 : index
    %c0_1 = arith.constant 0 : index
    %0 = vector.load %arg1[%c0, %c0_0, %c0_1] : memref<1x256x8xbf16, #tpu.memory_space<vmem>>, vector<1x256x8xbf16>
    %1 = vector.shape_cast %0 : vector<1x256x8xbf16> to vector<256x8xbf16>
    %c0_2 = arith.constant 0 : index
    %c0_3 = arith.constant 0 : index
    %2 = vector.load %arg9[%c0_2, %c0_3] : memref<512x8xbf16, #tpu.memory_space<vmem>>, vector<256x8xbf16>
    tpu.vector_store %arg9[%c0_2, %c0_3], %1 {strides = array<i32>} : memref<512x8xbf16, #tpu.memory_space<vmem>>, vector<256x8xbf16>,
    %c256 = arith.constant 256 : index
    %c0_4 = arith.constant 0 : index
    %3 = vector.load %arg9[%c256, %c0_4] : memref<512x8xbf16, #tpu.memory_space<vmem>>, vector<256x8xbf16>
    tpu.vector_store %arg9[%c256, %c0_4], %1 {strides = array<i32>} : memref<512x8xbf16, #tpu.memory_space<vmem>>, vector<256x8xbf16>,
    %4 = tpu.iota {dimensions = array<i32: 0>} : vector<256x8xi32>
    %c16_i32 = arith.constant 16 : i32
    %c0_i32 = arith.constant 0 : i32
    %5 = arith.cmpi eq, %c16_i32, %c0_i32 : i32
    %c1_i32 = arith.constant 1 : i32
    %6 = arith.select %5, %c1_i32, %c16_i32 : i32
    %7 = vector.broadcast %6 : i32 to vector<256x8xi32>
    %8 = arith.remsi %4, %7 : vector<256x8xi32>
    %c0_i32_5 = arith.constant 0 : i32
    %9 = vector.broadcast %c0_i32_5 : i32 to vector<256x8xi32>
    %10 = arith.cmpi ne, %8, %9 : vector<256x8xi32>
    %c0_i32_6 = arith.constant 0 : i32
    %11 = vector.broadcast %c0_i32_6 : i32 to vector<256x8xi32>
    %12 = arith.cmpi slt, %8, %11 : vector<256x8xi32>
    %c0_i32_7 = arith.constant 0 : i32
    %13 = arith.cmpi slt, %6, %c0_i32_7 : i32
    %14 = vector.broadcast %13 : i1 to vector<256x8xi1>
    %15 = vector.broadcast %14 : vector<256x8xi1> to vector<256x8xi1>
    %16 = arith.xori %12, %15 : vector<256x8xi1>
    %17 = arith.andi %16, %10 : vector<256x8xi1>
    %18 = vector.broadcast %6 : i32 to vector<256x8xi32>
    %19 = arith.addi %8, %18 : vector<256x8xi32>
    %20 = arith.select %17, %19, %8 : vector<256x8xi1>, vector<256x8xi32>
    %c239 = arith.constant 239 : index
    %c0_8 = arith.constant 0 : index
    %21 = vector.load %arg9[%c239, %c0_8] : memref<512x8xbf16, #tpu.memory_space<vmem>>, vector<256x8xbf16>
    %c16_i32_9 = arith.constant 16 : i32
    %22 = vector.broadcast %c16_i32_9 : i32 to vector<256x8xi32>
    %23 = arith.cmpi sge, %4, %22 : vector<256x8xi32>
    %c1_i32_10 = arith.constant 1 : i32
    %24 = vector.broadcast %c1_i32_10 : i32 to vector<256x8xi32>
    %25 = arith.cmpi sge, %20, %24 : vector<256x8xi32>
    %26 = arith.andi %23, %25 : vector<256x8xi1>
    %cst = arith.constant 0.000000e+00 : bf16
    %27 = vector.broadcast %cst : bf16 to vector<256x8xbf16>
    %28 = arith.select %26, %21, %27 : vector<256x8xi1>, vector<256x8xbf16>
    %c240 = arith.constant 240 : index
    %c0_11 = arith.constant 0 : index
    %29 = vector.load %arg9[%c240, %c0_11] : memref<512x8xbf16, #tpu.memory_space<vmem>>, vector<256x8xbf16>
    %c16_i32_12 = arith.constant 16 : i32
    %30 = vector.broadcast %c16_i32_12 : i32 to vector<256x8xi32>
    %31 = arith.cmpi sge, %4, %30 : vector<256x8xi32>
    %cst_13 = arith.constant 0.000000e+00 : bf16
    %32 = vector.broadcast %cst_13 : bf16 to vector<256x8xbf16>
    %33 = arith.select %31, %29, %32 : vector<256x8xi1>, vector<256x8xbf16>
    %c241 = arith.constant 241 : index
    %c0_14 = arith.constant 0 : index
    %34 = vector.load %arg9[%c241, %c0_14] : memref<512x8xbf16, #tpu.memory_space<vmem>>, vector<256x8xbf16>
    %c16_i32_15 = arith.constant 16 : i32
    %35 = vector.broadcast %c16_i32_15 : i32 to vector<256x8xi32>
    %36 = arith.cmpi sge, %4, %35 : vector<256x8xi32>
    %c15_i32 = arith.constant 15 : i32
    %37 = vector.broadcast %c15_i32 : i32 to vector<256x8xi32>
    %38 = arith.cmpi slt, %20, %37 : vector<256x8xi32>
    %39 = arith.andi %36, %38 : vector<256x8xi1>
    %cst_16 = arith.constant 0.000000e+00 : bf16
    %40 = vector.broadcast %cst_16 : bf16 to vector<256x8xbf16>
    %41 = arith.select %39, %34, %40 : vector<256x8xi1>, vector<256x8xbf16>
    %c255 = arith.constant 255 : index
    %c0_17 = arith.constant 0 : index
    %42 = vector.load %arg9[%c255, %c0_17] : memref<512x8xbf16, #tpu.memory_space<vmem>>, vector<256x8xbf16>
    %c1_i32_18 = arith.constant 1 : i32
    %43 = vector.broadcast %c1_i32_18 : i32 to vector<256x8xi32>
    %44 = arith.cmpi sge, %20, %43 : vector<256x8xi32>
    %cst_19 = arith.constant 0.000000e+00 : bf16
    %45 = vector.broadcast %cst_19 : bf16 to vector<256x8xbf16>
    %46 = arith.select %44, %42, %45 : vector<256x8xi1>, vector<256x8xbf16>
    %c1 = arith.constant 1 : index
    %c0_20 = arith.constant 0 : index
    %47 = vector.load %arg9[%c1, %c0_20] : memref<512x8xbf16, #tpu.memory_space<vmem>>, vector<256x8xbf16>
    %c15_i32_21 = arith.constant 15 : i32
    %48 = vector.broadcast %c15_i32_21 : i32 to vector<256x8xi32>
    %49 = arith.cmpi slt, %20, %48 : vector<256x8xi32>
    %cst_22 = arith.constant 0.000000e+00 : bf16
    %50 = vector.broadcast %cst_22 : bf16 to vector<256x8xbf16>
    %51 = arith.select %49, %47, %50 : vector<256x8xi1>, vector<256x8xbf16>
    %c15 = arith.constant 15 : index
    %c0_23 = arith.constant 0 : index
    %52 = vector.load %arg9[%c15, %c0_23] : memref<512x8xbf16, #tpu.memory_space<vmem>>, vector<256x8xbf16>
    %c240_i32 = arith.constant 240 : i32
    %53 = vector.broadcast %c240_i32 : i32 to vector<256x8xi32>
    %54 = arith.cmpi slt, %4, %53 : vector<256x8xi32>
    %c1_i32_24 = arith.constant 1 : i32
    %55 = vector.broadcast %c1_i32_24 : i32 to vector<256x8xi32>
    %56 = arith.cmpi sge, %20, %55 : vector<256x8xi32>
    %57 = arith.andi %54, %56 : vector<256x8xi1>
    %cst_25 = arith.constant 0.000000e+00 : bf16
    %58 = vector.broadcast %cst_25 : bf16 to vector<256x8xbf16>
    %59 = arith.select %57, %52, %58 : vector<256x8xi1>, vector<256x8xbf16>
    %c16 = arith.constant 16 : index
    %c0_26 = arith.constant 0 : index
    %60 = vector.load %arg9[%c16, %c0_26] : memref<512x8xbf16, #tpu.memory_space<vmem>>, vector<256x8xbf16>
    %c240_i32_27 = arith.constant 240 : i32
    %61 = vector.broadcast %c240_i32_27 : i32 to vector<256x8xi32>
    %62 = arith.cmpi slt, %4, %61 : vector<256x8xi32>
    %cst_28 = arith.constant 0.000000e+00 : bf16
    %63 = vector.broadcast %cst_28 : bf16 to vector<256x8xbf16>
    %64 = arith.select %62, %60, %63 : vector<256x8xi1>, vector<256x8xbf16>
    %c17 = arith.constant 17 : index
    %c0_29 = arith.constant 0 : index
    %65 = vector.load %arg9[%c17, %c0_29] : memref<512x8xbf16, #tpu.memory_space<vmem>>, vector<256x8xbf16>
    %c240_i32_30 = arith.constant 240 : i32
    %66 = vector.broadcast %c240_i32_30 : i32 to vector<256x8xi32>
    %67 = arith.cmpi slt, %4, %66 : vector<256x8xi32>
    %c15_i32_31 = arith.constant 15 : i32
    %68 = vector.broadcast %c15_i32_31 : i32 to vector<256x8xi32>
    %69 = arith.cmpi slt, %20, %68 : vector<256x8xi32>
    %70 = arith.andi %67, %69 : vector<256x8xi1>
    %cst_32 = arith.constant 0.000000e+00 : bf16
    %71 = vector.broadcast %cst_32 : bf16 to vector<256x8xbf16>
    %72 = arith.select %70, %65, %71 : vector<256x8xi1>, vector<256x8xbf16>
    %73 = tpu.concatenate %28, %33, %41, %46, %1, %51, %59, %64, %72 in 1 : vector<256x8xbf16>, vector<256x8xbf16>, vector<256x8xbf16>, vector<256x8xbf16>, vector<256x8xbf16>, vector<256x8xbf16>, vector<256x8xbf16>, vector<256x8xbf16>, vector<256x8xbf16> -> vector<256x72xbf16>
    %c0_33 = arith.constant 0 : index
    %c0_34 = arith.constant 0 : index
    %74 = vector.load %arg2[%c0_33, %c0_34] : memref<72x16xbf16, #tpu.memory_space<vmem>>, vector<72x16xbf16>
    %cst_35 = arith.constant dense<0.000000e+00> : vector<256x16xf32>
    %75 = tpu.matmul %73, %74, %cst_35 {dimension_numbers = #tpu.dot_dimension_numbers<[1], [0], [0], [1], [0, 0, 1, 1], [], []>} : vector<256x72xbf16>, vector<72x16xbf16>, vector<256x16xf32> -> vector<256x16xf32>
    %c0_36 = arith.constant 0 : index
    %c0_37 = arith.constant 0 : index
    %76 = vector.load %arg3[%c0_36, %c0_37] : memref<1x16xf32, #tpu.memory_space<vmem>>, vector<1x16xf32>
    %77 = vector.broadcast %76 : vector<1x16xf32> to vector<256x16xf32>
    %78 = arith.addf %75, %77 : vector<256x16xf32>
    %cst_38 = arith.constant 0.000000e+00 : f32
    %79 = vector.broadcast %cst_38 : f32 to vector<256x16xf32>
    %80 = arith.maximumf %78, %79 : vector<256x16xf32>
    %81 = arith.truncf %80 : vector<256x16xf32> to vector<256x16xbf16>
    %c0_39 = arith.constant 0 : index
    %c0_40 = arith.constant 0 : index
    %82 = vector.load %arg10[%c0_39, %c0_40] : memref<512x16xbf16, #tpu.memory_space<vmem>>, vector<256x16xbf16>
    tpu.vector_store %arg10[%c0_39, %c0_40], %81 {strides = array<i32>} : memref<512x16xbf16, #tpu.memory_space<vmem>>, vector<256x16xbf16>,
    %c256_41 = arith.constant 256 : index
    %c0_42 = arith.constant 0 : index
    %83 = vector.load %arg10[%c256_41, %c0_42] : memref<512x16xbf16, #tpu.memory_space<vmem>>, vector<256x16xbf16>
    tpu.vector_store %arg10[%c256_41, %c0_42], %81 {strides = array<i32>} : memref<512x16xbf16, #tpu.memory_space<vmem>>, vector<256x16xbf16>,
    %84 = tpu.iota {dimensions = array<i32: 0>} : vector<256x16xi32>
    %c16_i32_43 = arith.constant 16 : i32
    %c0_i32_44 = arith.constant 0 : i32
    %85 = arith.cmpi eq, %c16_i32_43, %c0_i32_44 : i32
    %c1_i32_45 = arith.constant 1 : i32
    %86 = arith.select %85, %c1_i32_45, %c16_i32_43 : i32
    %87 = vector.broadcast %86 : i32 to vector<256x16xi32>
    %88 = arith.remsi %84, %87 : vector<256x16xi32>
    %c0_i32_46 = arith.constant 0 : i32
    %89 = vector.broadcast %c0_i32_46 : i32 to vector<256x16xi32>
    %90 = arith.cmpi ne, %88, %89 : vector<256x16xi32>
    %c0_i32_47 = arith.constant 0 : i32
    %91 = vector.broadcast %c0_i32_47 : i32 to vector<256x16xi32>
    %92 = arith.cmpi slt, %88, %91 : vector<256x16xi32>
    %c0_i32_48 = arith.constant 0 : i32
    %93 = arith.cmpi slt, %86, %c0_i32_48 : i32
    %94 = vector.broadcast %93 : i1 to vector<256x16xi1>
    %95 = vector.broadcast %94 : vector<256x16xi1> to vector<256x16xi1>
    %96 = arith.xori %92, %95 : vector<256x16xi1>
    %97 = arith.andi %96, %90 : vector<256x16xi1>
    %98 = vector.broadcast %86 : i32 to vector<256x16xi32>
    %99 = arith.addi %88, %98 : vector<256x16xi32>
    %100 = arith.select %97, %99, %88 : vector<256x16xi1>, vector<256x16xi32>
    %c239_49 = arith.constant 239 : index
    %c0_50 = arith.constant 0 : index
    %101 = vector.load %arg10[%c239_49, %c0_50] : memref<512x16xbf16, #tpu.memory_space<vmem>>, vector<256x16xbf16>
    %c16_i32_51 = arith.constant 16 : i32
    %102 = vector.broadcast %c16_i32_51 : i32 to vector<256x16xi32>
    %103 = arith.cmpi sge, %84, %102 : vector<256x16xi32>
    %c1_i32_52 = arith.constant 1 : i32
    %104 = vector.broadcast %c1_i32_52 : i32 to vector<256x16xi32>
    %105 = arith.cmpi sge, %100, %104 : vector<256x16xi32>
    %106 = arith.andi %103, %105 : vector<256x16xi1>
    %cst_53 = arith.constant 0.000000e+00 : bf16
    %107 = vector.broadcast %cst_53 : bf16 to vector<256x16xbf16>
    %108 = arith.select %106, %101, %107 : vector<256x16xi1>, vector<256x16xbf16>
    %c240_54 = arith.constant 240 : index
    %c0_55 = arith.constant 0 : index
    %109 = vector.load %arg10[%c240_54, %c0_55] : memref<512x16xbf16, #tpu.memory_space<vmem>>, vector<256x16xbf16>
    %c16_i32_56 = arith.constant 16 : i32
    %110 = vector.broadcast %c16_i32_56 : i32 to vector<256x16xi32>
    %111 = arith.cmpi sge, %84, %110 : vector<256x16xi32>
    %cst_57 = arith.constant 0.000000e+00 : bf16
    %112 = vector.broadcast %cst_57 : bf16 to vector<256x16xbf16>
    %113 = arith.select %111, %109, %112 : vector<256x16xi1>, vector<256x16xbf16>
    %c241_58 = arith.constant 241 : index
    %c0_59 = arith.constant 0 : index
    %114 = vector.load %arg10[%c241_58, %c0_59] : memref<512x16xbf16, #tpu.memory_space<vmem>>, vector<256x16xbf16>
    %c16_i32_60 = arith.constant 16 : i32
    %115 = vector.broadcast %c16_i32_60 : i32 to vector<256x16xi32>
    %116 = arith.cmpi sge, %84, %115 : vector<256x16xi32>
    %c15_i32_61 = arith.constant 15 : i32
    %117 = vector.broadcast %c15_i32_61 : i32 to vector<256x16xi32>
    %118 = arith.cmpi slt, %100, %117 : vector<256x16xi32>
    %119 = arith.andi %116, %118 : vector<256x16xi1>
    %cst_62 = arith.constant 0.000000e+00 : bf16
    %120 = vector.broadcast %cst_62 : bf16 to vector<256x16xbf16>
    %121 = arith.select %119, %114, %120 : vector<256x16xi1>, vector<256x16xbf16>
    %c255_63 = arith.constant 255 : index
    %c0_64 = arith.constant 0 : index
    %122 = vector.load %arg10[%c255_63, %c0_64] : memref<512x16xbf16, #tpu.memory_space<vmem>>, vector<256x16xbf16>
    %c1_i32_65 = arith.constant 1 : i32
    %123 = vector.broadcast %c1_i32_65 : i32 to vector<256x16xi32>
    %124 = arith.cmpi sge, %100, %123 : vector<256x16xi32>
    %cst_66 = arith.constant 0.000000e+00 : bf16
    %125 = vector.broadcast %cst_66 : bf16 to vector<256x16xbf16>
    %126 = arith.select %124, %122, %125 : vector<256x16xi1>, vector<256x16xbf16>
    %c1_67 = arith.constant 1 : index
    %c0_68 = arith.constant 0 : index
    %127 = vector.load %arg10[%c1_67, %c0_68] : memref<512x16xbf16, #tpu.memory_space<vmem>>, vector<256x16xbf16>
    %c15_i32_69 = arith.constant 15 : i32
    %128 = vector.broadcast %c15_i32_69 : i32 to vector<256x16xi32>
    %129 = arith.cmpi slt, %100, %128 : vector<256x16xi32>
    %cst_70 = arith.constant 0.000000e+00 : bf16
    %130 = vector.broadcast %cst_70 : bf16 to vector<256x16xbf16>
    %131 = arith.select %129, %127, %130 : vector<256x16xi1>, vector<256x16xbf16>
    %c15_71 = arith.constant 15 : index
    %c0_72 = arith.constant 0 : index
    %132 = vector.load %arg10[%c15_71, %c0_72] : memref<512x16xbf16, #tpu.memory_space<vmem>>, vector<256x16xbf16>
    %c240_i32_73 = arith.constant 240 : i32
    %133 = vector.broadcast %c240_i32_73 : i32 to vector<256x16xi32>
    %134 = arith.cmpi slt, %84, %133 : vector<256x16xi32>
    %c1_i32_74 = arith.constant 1 : i32
    %135 = vector.broadcast %c1_i32_74 : i32 to vector<256x16xi32>
    %136 = arith.cmpi sge, %100, %135 : vector<256x16xi32>
    %137 = arith.andi %134, %136 : vector<256x16xi1>
    %cst_75 = arith.constant 0.000000e+00 : bf16
    %138 = vector.broadcast %cst_75 : bf16 to vector<256x16xbf16>
    %139 = arith.select %137, %132, %138 : vector<256x16xi1>, vector<256x16xbf16>
    %c16_76 = arith.constant 16 : index
    %c0_77 = arith.constant 0 : index
    %140 = vector.load %arg10[%c16_76, %c0_77] : memref<512x16xbf16, #tpu.memory_space<vmem>>, vector<256x16xbf16>
    %c240_i32_78 = arith.constant 240 : i32
    %141 = vector.broadcast %c240_i32_78 : i32 to vector<256x16xi32>
    %142 = arith.cmpi slt, %84, %141 : vector<256x16xi32>
    %cst_79 = arith.constant 0.000000e+00 : bf16
    %143 = vector.broadcast %cst_79 : bf16 to vector<256x16xbf16>
    %144 = arith.select %142, %140, %143 : vector<256x16xi1>, vector<256x16xbf16>
    %c17_80 = arith.constant 17 : index
    %c0_81 = arith.constant 0 : index
    %145 = vector.load %arg10[%c17_80, %c0_81] : memref<512x16xbf16, #tpu.memory_space<vmem>>, vector<256x16xbf16>
    %c240_i32_82 = arith.constant 240 : i32
    %146 = vector.broadcast %c240_i32_82 : i32 to vector<256x16xi32>
    %147 = arith.cmpi slt, %84, %146 : vector<256x16xi32>
    %c15_i32_83 = arith.constant 15 : i32
    %148 = vector.broadcast %c15_i32_83 : i32 to vector<256x16xi32>
    %149 = arith.cmpi slt, %100, %148 : vector<256x16xi32>
    %150 = arith.andi %147, %149 : vector<256x16xi1>
    %cst_84 = arith.constant 0.000000e+00 : bf16
    %151 = vector.broadcast %cst_84 : bf16 to vector<256x16xbf16>
    %152 = arith.select %150, %145, %151 : vector<256x16xi1>, vector<256x16xbf16>
    %153 = tpu.concatenate %108, %113, %121, %126, %81, %131, %139, %144, %152 in 1 : vector<256x16xbf16>, vector<256x16xbf16>, vector<256x16xbf16>, vector<256x16xbf16>, vector<256x16xbf16>, vector<256x16xbf16>, vector<256x16xbf16>, vector<256x16xbf16>, vector<256x16xbf16> -> vector<256x144xbf16>
    %c0_85 = arith.constant 0 : index
    %c0_86 = arith.constant 0 : index
    %154 = vector.load %arg4[%c0_85, %c0_86] : memref<144x16xbf16, #tpu.memory_space<vmem>>, vector<144x16xbf16>
    %cst_87 = arith.constant dense<0.000000e+00> : vector<256x16xf32>
    %155 = tpu.matmul %153, %154, %cst_87 {dimension_numbers = #tpu.dot_dimension_numbers<[1], [0], [0], [1], [0, 0, 1, 1], [], []>} : vector<256x144xbf16>, vector<144x16xbf16>, vector<256x16xf32> -> vector<256x16xf32>
    %c0_88 = arith.constant 0 : index
    %c0_89 = arith.constant 0 : index
    %156 = vector.load %arg5[%c0_88, %c0_89] : memref<1x16xf32, #tpu.memory_space<vmem>>, vector<1x16xf32>
    %157 = vector.broadcast %156 : vector<1x16xf32> to vector<256x16xf32>
    %158 = arith.addf %155, %157 : vector<256x16xf32>
    %cst_90 = arith.constant 0.000000e+00 : f32
    %159 = vector.broadcast %cst_90 : f32 to vector<256x16xf32>
    %160 = arith.maximumf %158, %159 : vector<256x16xf32>
    %161 = arith.truncf %160 : vector<256x16xf32> to vector<256x16xbf16>
    %c0_91 = arith.constant 0 : index
    %c0_92 = arith.constant 0 : index
    %162 = vector.load %arg6[%c0_91, %c0_92] : memref<16x128xbf16, #tpu.memory_space<vmem>>, vector<16x128xbf16>
    %cst_93 = arith.constant dense<0.000000e+00> : vector<256x128xf32>
    %163 = tpu.matmul %161, %162, %cst_93 {dimension_numbers = #tpu.dot_dimension_numbers<[1], [0], [0], [1], [0, 0, 1, 1], [], []>} : vector<256x16xbf16>, vector<16x128xbf16>, vector<256x128xf32> -> vector<256x128xf32>
    %c0_94 = arith.constant 0 : index
    %c0_95 = arith.constant 0 : index
    %164 = vector.load %arg7[%c0_94, %c0_95] : memref<1x128xf32, #tpu.memory_space<vmem>>, vector<1x128xf32>
    %165 = vector.broadcast %164 : vector<1x128xf32> to vector<256x128xf32>
    %166 = arith.addf %163, %165 : vector<256x128xf32>
    %c0_96 = arith.constant 0 : index
    %c0_97 = arith.constant 0 : index
    %c0_98 = arith.constant 0 : index
    %167 = vector.load %arg8[%c0_96, %c0_97, %c0_98] : memref<1x256x128xf32, #tpu.memory_space<vmem>>, vector<1x256x128xf32>
    %168 = vector.shape_cast %167 : vector<1x256x128xf32> to vector<256x128xf32>
    %169 = vector.shape_cast %166 : vector<256x128xf32> to vector<1x256x128xf32>
    tpu.vector_store %arg8[%c0_96, %c0_97, %c0_98], %169 {strides = array<i32>} : memref<1x256x128xf32, #tpu.memory_space<vmem>>, vector<1x256x128xf32>,
    return
  }
  func.func @transform_0(%arg0: i32) -> (i32, i32, i32) {
    %c0_i32 = arith.constant 0 : i32
    %c0_i32_0 = arith.constant 0 : i32
    %c0_i32_1 = arith.constant 0 : i32
    return %arg0, %c0_i32, %c0_i32_0 : i32, i32, i32
  }
  func.func @transform_1(%arg0: i32) -> (i32, i32) {
    %c0_i32 = arith.constant 0 : i32
    %c0_i32_0 = arith.constant 0 : i32
    %c0_i32_1 = arith.constant 0 : i32
    return %c0_i32, %c0_i32_0 : i32, i32
  }
  func.func @transform_2(%arg0: i32) -> (i32, i32) {
    %c0_i32 = arith.constant 0 : i32
    %c0_i32_0 = arith.constant 0 : i32
    %c0_i32_1 = arith.constant 0 : i32
    return %c0_i32, %c0_i32_0 : i32, i32
  }
  func.func @transform_3(%arg0: i32) -> (i32, i32) {
    %c0_i32 = arith.constant 0 : i32
    %c0_i32_0 = arith.constant 0 : i32
    %c0_i32_1 = arith.constant 0 : i32
    return %c0_i32, %c0_i32_0 : i32, i32
  }
  func.func @transform_4(%arg0: i32) -> (i32, i32) {
    %c0_i32 = arith.constant 0 : i32
    %c0_i32_0 = arith.constant 0 : i32
    %c0_i32_1 = arith.constant 0 : i32
    return %c0_i32, %c0_i32_0 : i32, i32
  }
  func.func @transform_5(%arg0: i32) -> (i32, i32) {
    %c0_i32 = arith.constant 0 : i32
    %c0_i32_0 = arith.constant 0 : i32
    %c0_i32_1 = arith.constant 0 : i32
    return %c0_i32, %c0_i32_0 : i32, i32
  }
  func.func @transform_6(%arg0: i32) -> (i32, i32) {
    %c0_i32 = arith.constant 0 : i32
    %c0_i32_0 = arith.constant 0 : i32
    %c0_i32_1 = arith.constant 0 : i32
    return %c0_i32, %c0_i32_0 : i32, i32
  }
  func.func @transform_7(%arg0: i32) -> (i32, i32, i32) {
    %c0_i32 = arith.constant 0 : i32
    %c0_i32_0 = arith.constant 0 : i32
    %c0_i32_1 = arith.constant 0 : i32
    return %arg0, %c0_i32, %c0_i32_0 : i32, i32, i32
  }
}

</mosaic_0001>

<bundles_post_ra>
// kernel: tpu_custom_call.1
= control target key start
LH: loop header
LB: loop body
LE: loop exit
PB: predicated region body
PF: predicated region fallthrough
CT: control target
= control target key end

     0   :  { %12 = vsyncpa [#allocation5], 0  ;;  %s15397_s0 = inlined_call_operand.vmem [shape: bf16[2,256,8], index: 0, kind: input, shape index: {}]   ;;  %s15398_s1 = inlined_call_operand.vmem [shape: bf16[72,16], index: 1, kind: input, shape index: {}]   ;;  %s15399_s2 = inlined_call_operand.vmem [shape: f32[1,16], index: 2, kind: input, shape index: {}]   ;;  %s15400_s3 = inlined_call_operand.vmem [shape: bf16[144,16], index: 3, kind: input, shape index: {}]   ;;  %s15401_s4 = inlined_call_operand.vmem [shape: f32[1,16], index: 4, kind: input, shape index: {}]   ;;  %s15402_s5 = inlined_call_operand.vmem [shape: bf16[16,128], index: 5, kind: input, shape index: {}]   ;;  %s15403_s6 = inlined_call_operand.vmem [shape: f32[1,128], index: 6, kind: input, shape index: {}]   ;;  %s15404_s7 = inlined_call_operand.hbm [shape: f32[2,256,128], index: 7, kind: output, shape index: {}]  }
   0x1   :  { %14 = vsyncpa [#allocation5 + $0x1], 0  ;;  %s10079_s24 = smov 0   ;;  %s10081_s25 = smov 0  }
   0x2   :  { %s10083_s26 = smov 0   ;;  %s10085_s27 = smov 0  }
   0x3 LB: > { %s10100_s28 = sadd.s32 4294967295, %s10021_s27   ;;  %s9291_s29 = sadd.s32 4294967294, %s10021_s27   ;;  %s10021_s27 = sphi %s10085_s27, %s17071_s27   ;;  %s10017_s26 = sphi %s10083_s26, %s17070_s26   ;;  %s10013_s25 = sphi %s10081_s25, %s17069_s25   ;;  %s10009_s24 = sphi %s10079_s24, %s17068_s24  }
   0x4   : > { %s10104_s30 = sadd.s32 1, %s10021_s27   ;;  %s179_s8 = sadd.s32 1, %s10017_s26 }
   0x5   : > { %s176_s9 = ssub.s32 %s10021_s27, %s10104_s30  ;;  %p189_p0 = scmp.ne.s32.totalorder %s10017_s26, %s10013_s25 }
   0x6   : > { %p177_p1 = scmp.eq.s32.totalorder %s176_s9, 0  ;;  %p190_p2 = scmp.eq.s32.totalorder %s10100_s28, 1 }
   0x7   : > { %p195_p3 = scmp.ne.s32.totalorder %s10013_s25, %s10009_s24  ;;  %p196_p4 = scmp.eq.s32.totalorder %s9291_s29, 1 }
   0x8   : > { %s10115_s10 = scalar_select %p177_p1, %s10017_s26, %s179_s8  }
   0x9   : > { %p10117_p5 = por %p190_p2, %p189_p0  ;;  %p10121_p6 = por %p196_p4, %p195_p3 }
   0xa   : > { %p9294_p7 = scmp.ge.s32.totalorder %s10021_s27, 1  ;;  %p240_p8 = scmp.lt.s32.totalorder %s10021_s27, 3 }
   0xc   : > { %p241_p9 = pnand %p9294_p7, %p240_p8 }
   0xe   : > { %244 = sbr.rel (%p241_p9) target bundleno = 1516 (0x5ec), region = 48 }
  0x13   : > { %p272_p10 = scmp.lt.s32.totalorder %s10100_s28, 1  ;;  %v377_v0 = vlaneseq  ;;  %vm10023_vm0 = vmmov 1   ;;  %v15783_v1 = vmov 0  ;;  %vm15435_vm2 = vcmask 60416   ;;  %s10026_s18 = smov 32  }
  0x14   : > { %vm10128_vm1 = vmpackc.low %vm10023_vm0, %vm10023_vm0  ;;  %v15417_v3 = vmov 0   ;;  %vm10025_vm3 = vmmov 0   ;;  %v15786_v7 = vmov 0  ;;  %vm1568_vm5 = vsmask.f32 256  ;;  %s10027_s19 = smov 16  }
  0x15   : > { %v15784_v1 = vsel %vm10128_vm1, 4294967295, %v15783_v1  ;;  %s273_s13 = scalar_select %p272_p10, %s10100_s28, 1  ;;  %v10133_v2 = vshrl.u32 %v377_v0, 7  ;;  %v10138_v4 = vsel %vm10128_vm1, 65537, %v15417_v3  ;;  %9833 = vmatprep.subr.bf16.mxu1 %v15417_v3  ;;  %vm10143_vm4 = vmpackc.low %vm10025_vm3, %vm10025_vm3  ;;  %vm1569_vm6 = vsmask.f32 4368 }
  0x16   : > { %15785 = vst [vmem:[#allocation7_spill] sm:$0xff] %v15784_v1  ;;  %v1020_v5 = vshll.u32 %v10138_v4, 16  ;;  %v1024_v6 = vshrl.u32 %v10138_v4, 16  ;;  %v15787_v7 = vsel %vm10143_vm4, 4294967295, %v15786_v7  ;;  %v955_v9 = vsel %vm10143_vm4, 65537, %v15417_v3  ;;  %vm10224_vm11 = vmor %vm1568_vm5, %vm1569_vm6  ;;  %s10028_s20 = smov 24  }
  0x17   : > { %15788 = vst [vmem:[#allocation8_spill] sm:$0xff] %v15787_v7  ;;  %s9685_s14 = sshll.u32 %s273_s13, 7  ;;  %v414_v8 = vand.u32 15, %v10133_v2  ;;  %v10152_v10 = vadd.s32 16, %v10133_v2  ;;  %v10155_v11 = vadd.s32 32, %v10133_v2  ;;  %v991_v13 = vshll.u32 %v955_v9, 16 }
  0x18   : > { %s10160_s17 = scalar_lea.vmem %s15397_s0, %s9685_s14  ;;  %vm15407_vm7 = vsmask.f32 3328  ;;  %v10164_v12 = vrot.slane %v1020_v5, 5  ;;  %v994_v14 = vshrl.u32 %v955_v9, 16  ;;  %v10168_v15 = vrot.slane %v1024_v6, 4  ;;  %s10029_s21 = smov 8  }
  0x19   : > { %v280_v16 = vld [vmem:[%s10160_s17] sm:$0xf]  ;;  %v281_v17 = vld [vmem:[%s10160_s17 + $0x4] sm:$0xf]  ;;  %v282_v18 = vld [vmem:[%s10160_s17 + $0x8] sm:$0xf] }
  0x1a   : > { %314 = vst.msk [vmem:[#allocation2 + $0x4] sm:$0xf] %vm15435_vm2, %v281_v17  ;;  %346 = vst.msk [vmem:[#allocation2 + $0x84] sm:$0xf] %vm15435_vm2, %v281_v17  ;;  %v9365_v19 = vcombine.low %v280_v16, %v281_v17  ;;  %v283_v20 = vld [vmem:[%s10160_s17 + $0xc] sm:$0xf]  ;;  %v1027_v23 = vor.u32 %v10168_v15, %v10164_v12 }
  0x1b   : > { %313 = vst.msk [vmem:[#allocation2] sm:$0xf] %vm15435_vm2, %v280_v16  ;;  %345 = vst.msk [vmem:[#allocation2 + $0x80] sm:$0xf] %vm15435_vm2, %v280_v16  ;;  %v284_v21 = vld [vmem:[%s10160_s17 + $0x10] sm:$0xf]  ;;  %v9366_v24 = vcombine.low %v282_v18, %v283_v20 }
  0x1c   : > { %315 = vst.msk [vmem:[#allocation2 + $0x8] sm:$0xf] %vm15435_vm2, %v282_v18  ;;  %347 = vst.msk [vmem:[#allocation2 + $0x88] sm:$0xf] %vm15435_vm2, %v282_v18  ;;  %v285_v22 = vld [vmem:[%s10160_s17 + $0x14] sm:$0xf] }
  0x1d   : > { %vm988_vm8 = vsmask.f32 7440  ;;  %316 = vst.msk [vmem:[#allocation2 + $0xc] sm:$0xf] %vm15435_vm2, %v283_v20  ;;  %348 = vst.msk [vmem:[#allocation2 + $0x8c] sm:$0xf] %vm15435_vm2, %v283_v20  ;;  %v9367_v25 = vcombine.low %v284_v21, %v285_v22 }
  0x1e   : > { %317 = vst.msk [vmem:[#allocation2 + $0x10] sm:$0xf] %vm15435_vm2, %v284_v21  ;;  %318 = vst.msk [vmem:[#allocation2 + $0x14] sm:$0xf] %vm15435_vm2, %v285_v22  ;;  %v10191_v26 = vld [vmem:[%s10160_s17 + $0x7c] sm:$0xf] }
  0x1f   : > { %349 = vst.msk [vmem:[#allocation2 + $0x90] sm:$0xf] %vm15435_vm2, %v284_v21  ;;  %350 = vst.msk [vmem:[#allocation2 + $0x94] sm:$0xf] %vm15435_vm2, %v285_v22  ;;  %vm10193_vm9 = vcmp.ge.s32.totalorder %v414_v8, 1  ;;  %v10200_v29 = vrot.slane %v991_v13, 5 }
  0x20   : > { %15789 = vst [vmem:[#allocation9_spill] sm:$0xff] %v10191_v26  ;;  %v10198_v28 = vld [vmem:[%s10160_s17 + $0x78] sm:$0xf]  ;;  %v4541_v30 = vshrl.u32 %v9365_v19, 16  ;;  %v4544_v31 = vshll.u32 %v9365_v19, 16  ;;  %vm1927_vm10 = vmpackc.low %vm10193_vm9, %vm10193_vm9  ;;  %v10211_v32 = vrot.slane %v994_v14, 4 }
  0x21   : > { %15792 = vst [vmem:[#allocation10_spill] sm:$0xff] %v10198_v28  ;;  %15793 = vst [vmem:[#allocation11_spill] sm:$0xff] %v10200_v29  ;;  %v1574_v33 = vrot.slane %v994_v14, 7  ;;  %v286_v34 = vld [vmem:[%s10160_s17 + $0x18] sm:$0xf]  ;;  %v4549_v35 = vshrl.u32 %v9366_v24, 16 }
  0x22   : > { %344 = vst.msk [vmem:[#allocation2 + $0x7c] sm:$0xf] %vm15435_vm2, %v10191_v26  ;;  %376 = vst.msk [vmem:[#allocation2 + $0xfc] sm:$0xf] %vm15435_vm2, %v10191_v26  ;;  %v4552_v36 = vshll.u32 %v9366_v24, 16  ;;  %v4558_v37 = vshrl.u32 %v9367_v25, 16 }
  0x23   : > { %343 = vst.msk [vmem:[#allocation2 + $0x78] sm:$0xf] %vm15435_vm2, %v10198_v28  ;;  %375 = vst.msk [vmem:[#allocation2 + $0xf8] sm:$0xf] %vm15435_vm2, %v10198_v28  ;;  %v4561_v38 = vshll.u32 %v9367_v25, 16  ;;  %v4543_v39 = vrot.slane %v4541_v30, 4  ;;  %v10219_v42 = vor.u32 %v1574_v33, %v991_v13 }
  0x24   : > { %319 = vst.msk [vmem:[#allocation2 + $0x18] sm:$0xf] %vm15435_vm2, %v286_v34  ;;  %351 = vst.msk [vmem:[#allocation2 + $0x98] sm:$0xf] %vm15435_vm2, %v286_v34  ;;  %v4546_v40 = vrot.slane %v4544_v31, 5  ;;  %v1959_v41 = vsel %vm1927_vm10, 65537, %v15417_v3 }
  0x25   : > { %15794 = vst [vmem:[#allocation12_spill] sm:$0xff] %v10219_v42  ;;  %v287_v43 = vld [vmem:[%s10160_s17 + $0x1c] sm:$0xf]  ;;  %v4551_v44 = vrot.slane %v4549_v35, 4  ;;  %v4554_v45 = vrot.slane %v4552_v36, 5  ;;  %v4560_v46 = vrot.slane %v4558_v37, 4  ;;  %vm10273_vm15 = vmor %vm15407_vm7, %vm988_vm8 }
  0x26   : > { %v4563_v47 = vrot.slane %v4561_v38, 5  ;;  %320 = vst.msk [vmem:[#allocation2 + $0x1c] sm:$0xf] %vm15435_vm2, %v287_v43  ;;  %352 = vst.msk [vmem:[#allocation2 + $0x9c] sm:$0xf] %vm15435_vm2, %v287_v43  ;;  %v4547_v50 = vor.u32 %v4546_v40, %v4543_v39  ;;  %v1992_v51 = vshll.u32 %v1959_v41, 16  ;;  %v10256_v13 = vcombine.low %v286_v34, %v287_v43 }
  0x27   : > { %v288_v49 = vld [vmem:[%s10160_s17 + $0x20] sm:$0xf]  ;;  %v1995_v52 = vshrl.u32 %v1959_v41, 16  ;;  %v10231_v53 = vrot.slane %v1574_v33, 4  ;;  %v289_v54 = vld [vmem:[%s10160_s17 + $0x24] sm:$0xf]  ;;  %v4555_v55 = vor.u32 %v4554_v45, %v4551_v44 }
  0x28   : > { %353 = vst.msk [vmem:[#allocation2 + $0xa0] sm:$0xf] %vm15435_vm2, %v288_v49  ;;  %321 = vst.msk [vmem:[#allocation2 + $0x20] sm:$0xf] %vm15435_vm2, %v288_v49  ;;  %v10236_v56 = vor.u32 %v4563_v47, %v4560_v46  ;;  %vm15405_vm12 = vcmp.ne.s16.totalorder %v10219_v42, 0  ;;  %v428_v57 = vand.u32 15, %v10152_v10  ;;  %4683 = vrot.lane.b32.xlu1 %v4547_v50, %s10026_s18  ;;  %v10258_v14 = vcombine.low %v288_v49, %v289_v54 }
  0x29   : > { %15797 = vst [vmem:[#allocation13_spill] sm:$0xff] %v10231_v53  ;;  %322 = vst.msk [vmem:[#allocation2 + $0x24] sm:$0xf] %vm15435_vm2, %v289_v54  ;;  %v10243_v58 = vrot.slane %v1992_v51, 5  ;;  %v1997_v59 = vrot.slane %v1995_v52, 4  ;;  %v1586_v60 = vsel %vm10224_vm11, %v10231_v53, %v10219_v42  ;;  %v10251_v62 = vrot.slane %v1027_v23, 4 }
  0x2a   : > { %354 = vst.msk [vmem:[#allocation2 + $0xa4] sm:$0xf] %vm15435_vm2, %v289_v54  ;;  %v10249_v61 = vld [vmem:[#allocation2 + $0x84] sm:$0xf]  ;;  %v4556_v63 = vsel %vm15407_vm7, %v4547_v50, %v4555_v55  ;;  %v4565_v0 = vsel %vm15407_vm7, %v4555_v55, %v10236_v56  ;;  %v1924_v8 = vld [vmem:[#allocation2 + $0x7c] sm:$0x8] }
  0x2b   : > { %15798 = vst [vmem:[#allocation14_spill] sm:$0xff] %v10243_v58  ;;  %15799 = vst [vmem:[#allocation15_spill] sm:$0xff] %v10251_v62  ;;  %v795_v9 = vld [vmem:[#allocation2 + $0x78] sm:$0xf]  ;;  %v796_v10 = vld [vmem:[#allocation2 + $0x7c] sm:$0xf]  ;;  %4685 = vrot.lane.b32.xlu0 %v4556_v63, %s10026_s18  ;;  %v1998_v15 = vor.u32 %v1997_v59, %v10243_v58 }
  0x2c   : > { %vm15408_vm13 = vcmp.ne.s16.totalorder %v10243_v58, 0  ;;  %vm10263_vm14 = vcmp.ne.s16.totalorder %v1586_v60, 0  ;;  %v15800_v16 = vmov 0  ;;  %v1891_v17 = vsel %vm15405_vm12, %v795_v9, 0  ;;  %v10269_v18 = vld [vmem:[#allocation2 + $0x88] sm:$0xf]  ;;  %4687 = vrot.lane.b32.xlu1 %v4565_v0, %s10026_s18 }
  0x2d   : > { %v15801_v16 = vsel %vm10263_vm14, 4294967295, %v15800_v16  ;;  %v2343_v20 = vsel %vm15408_vm13, %v1924_v8, 0  ;;  %v1892_v21 = vsel %vm10263_vm14, %v796_v10, 0  ;;  %v1407_v22 = vsel %vm10143_vm4, %v795_v9, 0  ;;  %v10286_v24 = vld [vmem:[#allocation2 + $0x80] sm:$0xf] }
  0x2e   : > { %15802 = vst [vmem:[#allocation16_spill] sm:$0xff] %v15801_v16  ;;  %v1408_v23 = vsel %vm10143_vm4, %v796_v10, 0  ;;  %v1999_v25 = vrot.slane %v1998_v15, 4  ;;  %v10288_v27 = vcombine.low %v1891_v17, %v1892_v21  ;;  %vm861_vm0 = vcmp.ge.s32.totalorder %v428_v57, 1  ;;  %v10290_v31 = vld [vmem:[#allocation2 + $0x8c] sm:$0xf] }
  0x2f   : > { %v9315_v30 = vcombine.low %v1407_v22, %v1408_v23  ;;  %vm925_vm3 = vmpackc.low %vm861_vm0, %vm861_vm0  ;;  %v442_v33 = vand.u32 15, %v10155_v11  ;;  %v1409_v34 = vsel %vm10128_vm1, %v10286_v24, 0  ;;  %v1410_v35 = vsel %vm10128_vm1, %v10249_v61, 0  ;;  %s10030_s22 = smov 40   ;;  %v10627_v26 = vld [vmem:[#allocation2 + $0x94] sm:$0xf] }
  0x30   : > { %v1411_v36 = vsel %vm10128_vm1, %v10269_v18, 0  ;;  %v2004_v37 = vsel %vm10273_vm15, %v1999_v25, %v10164_v12  ;;  %v15409_v38 = vrot.slane %v10288_v27, 5  ;;  %v15805_v40 = vmov 0  ;;  %s10031_s23 = smov 48   ;;  %s10032_s29 = smov 56  }
  0x31   : > { %v4016_v39 = vshrl.u32 %v9315_v30, 16  ;;  %v4019_v11 = vshll.u32 %v9315_v30, 16  ;;  %vm10306_vm5 = vcmp.ne.s16.totalorder %v2004_v37, 0  ;;  %v957_v41 = vsel %vm925_vm3, 65537, %v15417_v3  ;;  %s10033_s8 = smov 64   ;;  %s10035_s16 = smov 96  }
  0x32   : > { %v15806_v40 = vsel %vm10306_vm5, 4294967295, %v15805_v40  ;;  %vm863_vm6 = vcmp.ge.s32.totalorder %v442_v33, 1  ;;  %v1412_v43 = vsel %vm10128_vm1, %v10290_v31, 0  ;;  %v2344_v44 = vsel %vm10306_vm5, %v10286_v24, 0  ;;  %4309 = vrot.lane.b32.xlu1 %v15409_v38, %s10027_s19  ;;  %s9718_s9 = sshll.u32 %s10100_s28, 12 }
  0x33   : > { %15807 = vst [vmem:[#allocation17_spill] sm:$0xff] %v15806_v40  ;;  %v4018_v45 = vrot.slane %v4016_v39, 4  ;;  %v4021_v46 = vrot.slane %v4019_v11, 5  ;;  %v1010_v47 = vshll.u32 %v957_v41, 16  ;;  %vm927_vm8 = vmpackc.low %vm863_vm6, %vm863_vm6  ;;  %v9348_v49 = vcombine.low %v2343_v20, %v2344_v44 }
  0x34   : > { %v1014_v50 = vshrl.u32 %v957_v41, 16  ;;  %v959_v51 = vsel %vm927_vm8, 65537, %v15417_v3  ;;  %v9316_v52 = vcombine.low %v1409_v34, %v1410_v35  ;;  %v9317_v63 = vcombine.low %v1411_v36, %v1412_v43  ;;  %v10344_v36 = vld [vmem:[#allocation2 + $0x90] sm:$0xf] }
  0x35   : > { %v10321_v54 = vor.u32 %v4021_v46, %v4018_v45  ;;  %v10323_v55 = vrot.slane %v1010_v47, 5  ;;  %v1030_v57 = vshll.u32 %v959_v51, 16  ;;  %v1034_v59 = vshrl.u32 %v959_v51, 16  ;;  %4426 = vrot.lane.b32.xlu0 %v9348_v49, %s10028_s20  ;;  %v10356_v46 = vld [vmem:[%s10160_s17 + $0x28] sm:$0xf] }
  0x36   : > { %v1016_v60 = vrot.slane %v1014_v50, 4  ;;  %v4024_v0 = vshrl.u32 %v9316_v52, 16  ;;  %v4027_v8 = vshll.u32 %v9316_v52, 16  ;;  %v379_v17 = vadd.s32 8, %v10133_v2  ;;  %323 = vst.msk [vmem:[#allocation2 + $0x28] sm:$0xf] %vm15435_vm2, %v10356_v46 }
  0x37   : > { %v2014_v9 = vsel %vm10273_vm15, %v10251_v62, %v10323_v55  ;;  %v1032_v10 = vrot.slane %v1030_v57, 5  ;;  %v1036_v15 = vrot.slane %v1034_v59, 4  ;;  %v15808_v21 = vmov 0  ;;  %355 = vst.msk [vmem:[#allocation2 + $0xa8] sm:$0xf] %vm15435_vm2, %v10356_v46 }
  0x38   : > { %v1017_v20 = vor.u32 %v1016_v60, %v10323_v55  ;;  %vm10332_vm9 = vcmp.ne.s16.totalorder %v2014_v9, 0  ;;  %v4026_v22 = vrot.slane %v4024_v0, 4  ;;  %v4029_v23 = vrot.slane %v4027_v8, 5  ;;  %v10369_v52 = vld [vmem:[%s10160_s17 + $0x2c] sm:$0xf] }
  0x39   : > { %v15809_v21 = vsel %vm10332_vm9, 4294967295, %v15808_v21  ;;  %v2345_v25 = vsel %vm10332_vm9, %v10249_v61, 0  ;;  %v1033_v30 = vsel %vm10273_vm15, %v10251_v62, %v1032_v10  ;;  %v1037_v33 = vor.u32 %v1036_v15, %v1032_v10  ;;  %4158 = vrot.lane.b32.xlu0 %v10321_v54, %s10029_s21  ;;  %v2376_v60 = vld [vmem:[#allocation2] sm:$0xf]  ;;  %324 = vst.msk [vmem:[#allocation2 + $0x2c] sm:$0xf] %vm15435_vm2, %v10369_v52 }
  0x3a   : > { %15810 = vst [vmem:[#allocation18_spill] sm:$0xff] %v15809_v21  ;;  %v4033_v34 = vshrl.u32 %v9317_v63, 16  ;;  %v1018_v35 = vrot.slane %v1017_v20, 4  ;;  %vm10346_vm10 = vcmp.ne.s16.totalorder %v1033_v30, 0  ;;  %v15811_v37 = vmov 0 }
  0x3b   : > { %v15812_v37 = vsel %vm10346_vm10, 4294967295, %v15811_v37  ;;  %v10350_v39 = vor.u32 %v4029_v23, %v4026_v22  ;;  %v4036_v11 = vshll.u32 %v9317_v63, 16  ;;  %v1038_v41 = vrot.slane %v1037_v33, 4  ;;  %356 = vst.msk [vmem:[#allocation2 + $0xac] sm:$0xf] %vm15435_vm2, %v10369_v52 }
  0x3c   : > { %15813 = vst [vmem:[#allocation19_spill] sm:$0xff] %v15812_v37  ;;  %v2347_v43 = vsel %vm10346_vm10, %v10290_v31, 0  ;;  %v4035_v44 = vrot.slane %v4033_v34, 4  ;;  %v421_v45 = vand.u32 15, %v379_v17  ;;  %v1023_v47 = vsel %vm10273_vm15, %v1018_v35, %v10164_v12  ;;  %v2824_v15 = vld [vmem:[#allocation2 + $0x4] sm:$0x8] }
  0x3d   : > { %v4038_v49 = vrot.slane %v4036_v11, 5  ;;  %v1591_v50 = vrot.slane %v1024_v6, 7  ;;  %v381_v51 = vadd.s32 24, %v10133_v2  ;;  %vm10371_vm0 = vcmp.ne.s16.totalorder %v1023_v47, 0  ;;  %v10404_v17 = vld [vmem:[%s10160_s17 + $0x30] sm:$0xf] }
  0x3e   : > { %v15814_v57 = vmov 0  ;;  %v1043_v6 = vsel %vm10273_vm15, %v1038_v41, %v10164_v12  ;;  %vm10378_vm3 = vcmp.lt.s32.totalorder %v421_v45, 15  ;;  %v383_v63 = vadd.s32 40, %v10133_v2  ;;  %v10407_v20 = vld [vmem:[%s10160_s17 + $0x34] sm:$0xf] }
  0x3f   : > { %v15815_v57 = vsel %vm10371_vm0, 4294967295, %v15814_v57  ;;  %v2346_v0 = vsel %vm10371_vm0, %v10269_v18, 0  ;;  %vm10390_vm6 = vcmp.ne.s16.totalorder %v1043_v6, 0  ;;  %v15819_v8 = vmov 0  ;;  %vm2408_vm8 = vmpackc.low %vm10378_vm3, %vm10378_vm3  ;;  %357 = vst.msk [vmem:[#allocation2 + $0xb0] sm:$0xf] %vm15435_vm2, %v10404_v17 }
  0x40   : > { %15816 = vst [vmem:[#allocation20_spill] sm:$0xff] %v15815_v57  ;;  %v15820_v8 = vsel %vm10390_vm6, 4294967295, %v15819_v8  ;;  %v10394_v9 = vor.u32 %v4038_v49, %v4035_v44  ;;  %v10398_v10 = vor.u32 %v1591_v50, %v1020_v5  ;;  %v9349_v22 = vcombine.low %v2345_v25, %v2346_v0  ;;  %325 = vst.msk [vmem:[#allocation2 + $0x30] sm:$0xf] %vm15435_vm2, %v10404_v17  ;;  %v10424_v5 = vld [vmem:[%s10160_s17 + $0x38] sm:$0xf] }
  0x41   : > { %15821 = vst [vmem:[#allocation21_spill] sm:$0xff] %v15820_v8  ;;  %v2348_v23 = vsel %vm10390_vm6, %v10344_v36, 0  ;;  %v10412_v30 = vrot.slane %v1591_v50, 4  ;;  %v2440_v4 = vsel %vm2408_vm8, 65537, %v15417_v3  ;;  %326 = vst.msk [vmem:[#allocation2 + $0x34] sm:$0xf] %vm15435_vm2, %v10407_v20 }
  0x42   : > { %358 = vst.msk [vmem:[#allocation2 + $0xb4] sm:$0xf] %vm15435_vm2, %v10407_v20  ;;  %v9350_v25 = vcombine.low %v2347_v43, %v2348_v23  ;;  %v4040_v33 = vsel %vm15407_vm7, %v10350_v39, %v10394_v9  ;;  %v2480_v34 = vshrl.u32 %v2440_v4, 16  ;;  %v2483_v35 = vshll.u32 %v2440_v4, 16  ;;  %v10429_v11 = vld [vmem:[#allocation2 + $0x18] sm:$0xf]  ;;  %4428 = vrot.lane.b32.xlu1 %v9349_v22, %s10028_s20 }
  0x43   : > { %15822 = vst [vmem:[#allocation22_spill] sm:$0xff] %v10412_v30  ;;  %327 = vst.msk [vmem:[#allocation2 + $0x38] sm:$0xf] %vm15435_vm2, %v10424_v5  ;;  %v10436_v41 = vld [vmem:[%s10160_s17 + $0x3c] sm:$0xf]  ;;  %vm15406_vm3 = vcmp.ne.s16.totalorder %v10398_v10, 0  ;;  %v1595_v47 = vsel %vm10224_vm11, %v10231_v53, %v10398_v10 }
  0x44   : > { %359 = vst.msk [vmem:[#allocation2 + $0xb8] sm:$0xf] %vm15435_vm2, %v10424_v5  ;;  %v10439_v44 = vld [vmem:[%s10160_s17 + $0x40] sm:$0xf]  ;;  %v435_v43 = vand.u32 15, %v381_v51  ;;  %v449_v45 = vand.u32 15, %v383_v63  ;;  %4430 = vrot.lane.b32.xlu0 %v9350_v25, %s10028_s20  ;;  %v10470_v63 = vsel %vm15407_vm7, %v10321_v54, %v10350_v39 }
  0x45   : > { %v10447_v49 = vld [vmem:[#allocation2 + $0x8] sm:$0xf]  ;;  %328 = vst.msk [vmem:[#allocation2 + $0x3c] sm:$0xf] %vm15435_vm2, %v10436_v41  ;;  %360 = vst.msk [vmem:[#allocation2 + $0xbc] sm:$0xf] %vm15435_vm2, %v10436_v41 }
  0x46   : > { %361 = vst.msk [vmem:[#allocation2 + $0xc0] sm:$0xf] %vm15435_vm2, %v10439_v44  ;;  %329 = vst.msk [vmem:[#allocation2 + $0x40] sm:$0xf] %vm15435_vm2, %v10439_v44  ;;  %v10458_v50 = vld [vmem:[%s10160_s17 + $0x44] sm:$0xf]  ;;  %4162 = vrot.lane.b32.xlu1 %v4040_v33, %s10029_s21 }
  0x47   : > { %v2482_v51 = vrot.slane %v2480_v34, 7  ;;  %v2791_v6 = vsel %vm15406_vm3, %v2376_v60, 0  ;;  %vm10463_vm8 = vcmp.ne.s16.totalorder %v1595_v47, 0  ;;  %v15823_v59 = vmov 0  ;;  %330 = vst.msk [vmem:[#allocation2 + $0x44] sm:$0xf] %vm15435_vm2, %v10458_v50 }
  0x48   : > { %v15824_v59 = vsel %vm10463_vm8, 4294967295, %v15823_v59  ;;  %362 = vst.msk [vmem:[#allocation2 + $0xc4] sm:$0xf] %vm15435_vm2, %v10458_v50  ;;  %v10477_v0 = vld [vmem:[%s10160_s17 + $0x74] sm:$0xf]  ;;  %vm10479_vm12 = vcmp.lt.s32.totalorder %v435_v43, 15 }
  0x49   : > { %15825 = vst [vmem:[#allocation23_spill] sm:$0xff] %v15824_v59  ;;  %15826 = vst [vmem:[#allocation24_spill] sm:$0xff] %v10477_v0  ;;  %vm10483_vm3 = vcmp.lt.s32.totalorder %v449_v45, 15  ;;  %v1893_v54 = vsel %vm10463_vm8, %v10286_v24, 0  ;;  %v3305_v39 = vsel %vm15408_vm13, %v2824_v15, 0  ;;  %v2485_v4 = vor.u32 %v2483_v35, %v2482_v51 }
  0x4a   : > { %v10492_v23 = vld [vmem:[#allocation2 + $0x14] sm:$0xf]  ;;  %342 = vst.msk [vmem:[#allocation2 + $0x74] sm:$0xf] %vm15435_vm2, %v10477_v0  ;;  %374 = vst.msk [vmem:[#allocation2 + $0xf4] sm:$0xf] %vm15435_vm2, %v10477_v0 }
  0x4b   : > { %vm1507_vm7 = vmpackc.low %vm10479_vm12, %vm10479_vm12  ;;  %v10501_v25 = vld [vmem:[#allocation2 + $0xc] sm:$0xf]  ;;  %v2487_v34 = vrot.slane %v2482_v51, 4  ;;  %v3306_v24 = vsel %vm10306_vm5, %v10447_v49, 0  ;;  %v3309_v15 = vsel %vm10346_vm10, %v10492_v23, 0  ;;  %v3310_v47 = vsel %vm10390_vm6, %v10429_v11, 0 }
  0x4c   : > { %v2377_v43 = vld [vmem:[#allocation2 + $0x4] sm:$0xf]  ;;  %vm1509_vm13 = vmpackc.low %vm10483_vm3, %vm10483_vm3  ;;  %v1539_v35 = vsel %vm1507_vm7, 65537, %v15417_v3  ;;  %v10514_v45 = vcombine.low %v3305_v39, %v3306_v24  ;;  %v3307_v51 = vsel %vm10332_vm9, %v10501_v25, 0  ;;  %v2486_v33 = vsel %vm10224_vm11, %v10412_v30, %v2485_v4  ;;  %v10538_v4 = vld [vmem:[#allocation2 + $0x10] sm:$0xf] }
  0x4d   : > { %v1541_v22 = vsel %vm1509_vm13, 65537, %v15417_v3  ;;  %v1598_v60 = vshrl.u32 %v1539_v35, 16  ;;  %v1601_v38 = vshll.u32 %v1539_v35, 16  ;;  %vm10526_vm12 = vcmp.ne.s16.totalorder %v2486_v33, 0  ;;  %v10602_v53 = vld [vmem:[%s10160_s17 + $0x48] sm:$0xf] }
  0x4e   : > { %v15831_v58 = vmov 0  ;;  %v1616_v39 = vshrl.u32 %v1541_v22, 16  ;;  %v1619_v24 = vshll.u32 %v1541_v22, 16  ;;  %v10533_v40 = vsel %vm10224_vm11, %v2487_v34, %v10398_v10  ;;  %15842 = vst [vmem:[#allocation30_spill] sm:$0xff] %v10602_v53  ;;  %331 = vst.msk [vmem:[#allocation2 + $0x48] sm:$0xf] %vm15435_vm2, %v10602_v53 }
  0x4f   : > { %v15832_v58 = vsel %vm10526_vm12, 4294967295, %v15831_v58  ;;  %15834 = vst [vmem:[#allocation26_spill] sm:$0xff] %v10533_v40  ;;  %v2792_v21 = vsel %vm10526_vm12, %v2377_v43, 0  ;;  %v1600_v59 = vrot.slane %v1598_v60, 7  ;;  %vm15421_vm7 = vcmp.ne.s16.totalorder %v10533_v40, 0 }
  0x50   : > { %15833 = vst [vmem:[#allocation25_spill] sm:$0xff] %v15832_v58  ;;  %v10540_v35 = vcombine.low %v3309_v15, %v3310_v47  ;;  %v9381_v33 = vcombine.low %v2791_v6, %v2792_v21  ;;  %v10542_v3 = vrot.slane %v1616_v39, 7  ;;  %v2793_v22 = vsel %vm15421_vm7, %v10447_v49, 0  ;;  %363 = vst.msk [vmem:[#allocation2 + $0xc8] sm:$0xf] %vm15435_vm2, %v10602_v53 }
  0x51   : > { %v3308_v34 = vsel %vm10371_vm0, %v10538_v4, 0  ;;  %v1603_v43 = vor.u32 %v1601_v38, %v1600_v59  ;;  %v1605_v60 = vrot.slane %v1600_v59, 4  ;;  %v3370_v15 = vsel %vm10128_vm1, %v10447_v49, 0  ;;  %v10642_v57 = vld [vmem:[#allocation2 + $0x9c] sm:$0xf] }
  0x52   : > { %v10550_v16 = vcombine.low %v3307_v51, %v3308_v34  ;;  %v4800_v21 = vrot.slane %v9381_v33, 5  ;;  %v1621_v6 = vor.u32 %v1619_v24, %v10542_v3  ;;  %v3371_v47 = vsel %vm10128_vm1, %v10501_v25, 0 }
  0x53   : > { %v3372_v39 = vsel %vm10128_vm1, %v10538_v4, 0  ;;  %v1604_v38 = vsel %vm10224_vm11, %v10412_v30, %v1603_v43  ;;  %v10568_v59 = vsel %vm10224_vm11, %v1605_v60, %v10398_v10  ;;  %v3373_v51 = vsel %vm10128_vm1, %v10492_v23, 0 }
  0x54   : > { %15835 = vst [vmem:[#allocation27_spill] sm:$0xff] %v10568_v59  ;;  %v9415_v24 = vcombine.low %v3370_v15, %v3371_v47  ;;  %4833 = vrot.lane.b32.xlu0 %v4800_v21, %s10030_s22  ;;  %v1622_v33 = vsel %vm10224_vm11, %v10412_v30, %v1621_v6  ;;  %vm10577_vm3 = vcmp.ne.s16.totalorder %v1604_v38, 0  ;;  %v15836_v34 = vmov 0 }
  0x55   : > { %v15837_v34 = vsel %vm10577_vm3, 4294967295, %v15836_v34  ;;  %vm15430_vm7 = vcmp.ne.s16.totalorder %v10568_v59, 0  ;;  %v9416_v43 = vcombine.low %v3372_v39, %v3373_v51  ;;  %vm10582_vm13 = vcmp.ne.s16.totalorder %v1622_v33, 0  ;;  %v11442_v37 = vld [vmem:[#allocation2 + $0x48] sm:$0xf] }
  0x56   : > { %15838 = vst [vmem:[#allocation28_spill] sm:$0xff] %v15837_v34  ;;  %v15839_v60 = vmov 0  ;;  %v1894_v15 = vsel %vm10577_vm3, %v10249_v61, 0  ;;  %v1895_v6 = vsel %vm15430_vm7, %v10269_v18, 0  ;;  %v2794_v47 = vsel %vm10577_vm3, %v10501_v25, 0 }
  0x57   : > { %v15840_v60 = vsel %vm10582_vm13, 4294967295, %v15839_v60  ;;  %v1896_v39 = vsel %vm10582_vm13, %v10290_v31, 0  ;;  %v9332_v38 = vcombine.low %v1893_v54, %v1894_v15  ;;  %v9382_v51 = vcombine.low %v2793_v22, %v2794_v47  ;;  %v10614_v31 = vld [vmem:[%s10160_s17 + $0x4c] sm:$0xf]  ;;  %v10620_v47 = vld [vmem:[#allocation2 + $0x1c] sm:$0xf] }
  0x58   : > { %15841 = vst [vmem:[#allocation29_spill] sm:$0xff] %v15840_v60  ;;  %v2795_v33 = vsel %vm15430_vm7, %v10538_v4, 0  ;;  %v10604_v61 = vcombine.low %v1895_v6, %v1896_v39  ;;  %v2796_v18 = vsel %vm10582_vm13, %v10492_v23, 0  ;;  %v5065_v42 = vshrl.u32 %v9415_v24, 16  ;;  %15843 = vst [vmem:[#allocation31_spill] sm:$0xff] %v10614_v31  ;;  %4160 = vrot.lane.b32.xlu0 %v10470_v63, %s10029_s21 }
  0x59   : > { %v5068_v7 = vshll.u32 %v9415_v24, 16  ;;  %v4277_v54 = vrot.slane %v9332_v38, 5  ;;  %v4801_v22 = vrot.slane %v9382_v51, 5  ;;  %v10618_v15 = vcombine.low %v2795_v33, %v2796_v18  ;;  %332 = vst.msk [vmem:[#allocation2 + $0x4c] sm:$0xf] %vm15435_vm2, %v10614_v31 }
  0x5a   : > { %v5073_v6 = vshrl.u32 %v9416_v43, 16  ;;  %364 = vst.msk [vmem:[#allocation2 + $0xcc] sm:$0xf] %vm15435_vm2, %v10614_v31  ;;  %v15442_v24 = vrot.slane %v10604_v61, 5  ;;  %v5067_v39 = vrot.slane %v5065_v42, 4  ;;  %v5076_v38 = vshll.u32 %v9416_v43, 16 }
  0x5b   : > { %v5070_v28 = vrot.slane %v5068_v7, 5  ;;  %v10629_v63 = vld [vmem:[#allocation2 + $0x98] sm:$0xf]  ;;  %vm15844_vm7 = vcmask 1042432   ;;  %v15845_v33 = vrot.slane %v10288_v27, 5  ;;  %v15441_v0 = vrot.slane %v10618_v15, 5 }
  0x5c   : > { %v4802_v51 = vsel %vm15844_vm7, %v4800_v21, %v4801_v22  ;;  %vm15846_vm5 = vmmov %vm15844_vm7  ;;  %v5075_v53 = vrot.slane %v5073_v6, 4  ;;  %v5078_v7 = vrot.slane %v5076_v38, 5  ;;  %vm15848_vm9 = vcmp.ne.s16.totalorder %v10398_v10, 0 }
  0x5d   : > { %v4278_v18 = vsel %vm15846_vm5, %v15845_v33, %v4277_v54  ;;  %vm15847_vm2 = vmmov %vm15846_vm5  ;;  %v5071_v42 = vor.u32 %v5070_v28, %v5067_v39  ;;  %v3819_v43 = vsel %vm15848_vm9, %v10447_v49, 0  ;;  %v3820_v21 = vsel %vm10526_vm12, %v10501_v25, 0 }
  0x5e   : > { %v4280_v31 = vsel %vm15847_vm2, %v4277_v54, %v15442_v24  ;;  %4311 = vrot.lane.b32.xlu0 %v4278_v18, %s10027_s19  ;;  %vm15849_vm5 = vmmov %vm15847_vm2  ;;  %v3374_v28 = vsel %vm10128_vm1, %v10429_v11, 0  ;;  %v3375_v49 = vsel %vm10128_vm1, %v10620_v47, 0  ;;  %v5079_v54 = vor.u32 %v5078_v7, %v5075_v53 }
  0x5f   : > { %4313 = vrot.lane.b32.xlu1 %v4280_v31, %s10027_s19  ;;  %v4804_v27 = vsel %vm15849_vm5, %v4801_v22, %v15441_v0  ;;  %v10658_v31 = vcombine.low %v3819_v43, %v3820_v21  ;;  %v9417_v6 = vcombine.low %v3374_v28, %v3375_v49  ;;  %v1413_v22 = vsel %vm10128_vm1, %v10344_v36, 0 }
  0x60   : > { %v1414_v25 = vsel %vm10128_vm1, %v10627_v26, 0  ;;  %vm15850_vm2 = vcmp.ne.s16.totalorder %v10533_v40, 0  ;;  %v3822_v38 = vsel %vm10577_vm3, %v10492_v23, 0  ;;  %v1415_v53 = vsel %vm10128_vm1, %v10629_v63, 0 }
  0x61   : > { %v3821_v39 = vsel %vm15850_vm2, %v10538_v4, 0  ;;  %vm15851_vm9 = vsmask.f32 3328  ;;  %v5082_v7 = vshrl.u32 %v9417_v6, 16  ;;  %v5085_v43 = vshll.u32 %v9417_v6, 16 }
  0x62   : > { %v10676_v33 = vsel %vm15851_vm9, %v5071_v42, %v5079_v54  ;;  %4837 = vrot.lane.b32.xlu0 %v4804_v27, %s10030_s22  ;;  %v9318_v4 = vcombine.low %v1413_v22, %v1414_v25  ;;  %v9432_v21 = vcombine.low %v3821_v39, %v3822_v38  ;;  %v1416_v23 = vsel %vm10128_vm1, %v10642_v57, 0  ;;  %vm15854_vm2 = vmmov %vm15851_vm9 }
  0x63   : > { %4835 = vrot.lane.b32.xlu1 %v4802_v51, %s10030_s22  ;;  %vm15852_vm7 = vcmp.ne.s16.totalorder %v10568_v59, 0  ;;  %v5084_v49 = vrot.slane %v5082_v7, 4  ;;  %v5087_v0 = vrot.slane %v5085_v43, 5  ;;  %v9319_v24 = vcombine.low %v1415_v53, %v1416_v23  ;;  %vm15855_vm9 = vmmov %vm15849_vm5 }
  0x64   : > { %v3823_v28 = vsel %vm15852_vm7, %v10429_v11, 0  ;;  %v3824_v6 = vsel %vm10582_vm13, %v10620_v47, 0  ;;  %v4042_v51 = vshrl.u32 %v9318_v4, 16  ;;  %v4045_v18 = vshll.u32 %v9318_v4, 16  ;;  %vm15856_vm7 = vmmov %vm15854_vm2 }
  0x65   : > { %v5325_v27 = vrot.slane %v9432_v21, 5  ;;  %v10690_v22 = vcombine.low %v3823_v28, %v3824_v6  ;;  %v10692_v25 = vor.u32 %v5087_v0, %v5084_v49  ;;  %v4051_v39 = vshrl.u32 %v9319_v24, 16 }
  0x66   : > { %v4054_v38 = vshll.u32 %v9319_v24, 16  ;;  %v385_v58 = vadd.s32 56, %v10133_v2  ;;  %4952 = vrot.lane.b32.xlu0 %v10550_v16, %s10031_s23  ;;  %v4044_v53 = vrot.slane %v4042_v51, 4  ;;  %v4047_v7 = vrot.slane %v4045_v18, 5 }
  0x67   : > { %4950 = vrot.lane.b32.xlu1 %v10514_v45, %s10031_s23  ;;  %v15853_v43 = vrot.slane %v10658_v31, 5  ;;  %v15452_v0 = vrot.slane %v10690_v22, 5  ;;  %v5089_v24 = vsel %vm15854_vm2, %v5079_v54, %v10692_v25  ;;  %v4053_v21 = vrot.slane %v4051_v39, 4  ;;  %v10730_v39 = vld [vmem:[%s10160_s17 + $0x50] sm:$0xf] }
  0x68   : > { %v4056_v23 = vrot.slane %v4054_v38, 5  ;;  %v387_v28 = vadd.s32 72, %v10133_v2  ;;  %v4048_v45 = vor.u32 %v4047_v7, %v4044_v53  ;;  %v463_v18 = vand.u32 15, %v385_v58  ;;  %15858 = vst [vmem:[#allocation33_spill] sm:$0xff] %v10730_v39 }
  0x69   : > { %v5326_v4 = vsel %vm15849_vm5, %v15853_v43, %v5325_v27  ;;  %v10709_v16 = vsel %vm15855_vm9, %v5325_v27, %v15452_v0  ;;  %v1623_v49 = vrot.slane %v10542_v3, 4  ;;  %v386_v43 = vadd.s32 64, %v10133_v2 }
  0x6a   : > { %v10712_v6 = vor.u32 %v4056_v23, %v4053_v21  ;;  %v477_v51 = vand.u32 15, %v387_v28  ;;  %v384_v54 = vadd.s32 48, %v10133_v2  ;;  %5207 = vrot.lane.b32.xlu0 %v5071_v42, %s10032_s29  ;;  %v10721_v27 = vsel %vm15856_vm7, %v10394_v9, %v4048_v45 }
  0x6b   : > { %4954 = vrot.lane.b32.xlu1 %v10540_v35, %s10031_s23  ;;  %vm1447_vm5 = vcmp.lt.s32.totalorder %v463_v18, 15  ;;  %v10726_v3 = vsel %vm10224_vm11, %v1623_v49, %v10398_v10  ;;  %v4567_v58 = vshrl.u32 %v10256_v13, 16  ;;  %v470_v9 = vand.u32 15, %v386_v43 }
  0x6c   : > { %15857 = vst [vmem:[#allocation32_spill] sm:$0xff] %v10726_v3  ;;  %v10734_v35 = vsel %vm15854_vm2, %v4048_v45, %v10712_v6  ;;  %vm1449_vm9 = vcmp.lt.s32.totalorder %v477_v51, 15  ;;  %vm1511_vm12 = vmpackc.low %vm1447_vm5, %vm1447_vm5  ;;  %vm15460_vm8 = vcmp.ne.s16.totalorder %v10726_v3, 0  ;;  %vm15859_vm7 = vcmask 60416  }
  0x6d   : > { %365 = vst.msk [vmem:[#allocation2 + $0xd0] sm:$0xf] %vm15859_vm7, %v10730_v39  ;;  %vm15860_vm3 = vmmov %vm15859_vm7  ;;  %v15861_v42 = vmov 0   ;;  %v1897_v53 = vsel %vm15460_vm8, %v10344_v36, 0  ;;  %v456_v7 = vand.u32 15, %v384_v54  ;;  %v4569_v21 = vrot.slane %v4567_v58, 4 }
  0x6e   : > { %333 = vst.msk [vmem:[#allocation2 + $0x50] sm:$0xf] %vm15860_vm3, %v10730_v39  ;;  %vm1513_vm13 = vmpackc.low %vm1449_vm9, %vm1449_vm9  ;;  %v1543_v38 = vsel %vm1511_vm12, 65537, %v15861_v42  ;;  %vm867_vm5 = vcmp.ge.s32.totalorder %v470_v9, 1  ;;  %5211 = vrot.lane.b32.xlu0 %v5089_v24, %s10032_s29  ;;  %v4570_v51 = vshll.u32 %v10256_v13, 16  ;;  %v4576_v54 = vshrl.u32 %v10258_v14, 16 }
  0x6f   : > { %v1545_v23 = vsel %vm1513_vm13, 65537, %v15861_v42  ;;  %v1634_v28 = vshrl.u32 %v1543_v38, 16  ;;  %v1637_v45 = vshll.u32 %v1543_v38, 16  ;;  %5209 = vrot.lane.b32.xlu1 %v10676_v33, %s10032_s29  ;;  %vm931_vm3 = vmpackc.low %vm867_vm5, %vm867_vm5  ;;  %vm865_vm12 = vcmp.ge.s32.totalorder %v456_v7, 1 }
  0x70   : > { %v1652_v18 = vshrl.u32 %v1545_v23, 16  ;;  %v1655_v49 = vshll.u32 %v1545_v23, 16  ;;  %v963_v36 = vsel %vm931_vm3, 65537, %v15861_v42  ;;  %vm929_vm2 = vmpackc.low %vm865_vm12, %vm865_vm12  ;;  %v4579_v58 = vshll.u32 %v10258_v14, 16 }
  0x71   : > { %v1636_v43 = vrot.slane %v1634_v28, 7  ;;  %v1070_v38 = vshll.u32 %v963_v36, 16  ;;  %v1074_v33 = vshrl.u32 %v963_v36, 16  ;;  %v961_v24 = vsel %vm929_vm2, 65537, %v15861_v42  ;;  %vm15867_vm5 = vmmov %vm15859_vm7 }
  0x72   : > { %v10753_v9 = vrot.slane %v1652_v18, 7  ;;  %v1050_v7 = vshll.u32 %v961_v24, 16  ;;  %v1054_v40 = vshrl.u32 %v961_v24, 16  ;;  %v15862_v13 = vrot.slane %v10658_v31, 5  ;;  %5359 = vrot.lane.b32.xlu0 %v5326_v4, %s10033_s8  ;;  %v10770_v31 = vld [vmem:[%s10160_s17 + $0x54] sm:$0xf] }
  0x73   : > { %v1639_v23 = vor.u32 %v1637_v45, %v1636_v43  ;;  %v1641_v0 = vrot.slane %v1636_v43, 4  ;;  %v1072_v28 = vrot.slane %v1070_v38, 5  ;;  %v1076_v18 = vrot.slane %v1074_v33, 4  ;;  %334 = vst.msk [vmem:[#allocation2 + $0x54] sm:$0xf] %vm15859_vm7, %v10770_v31  ;;  %vm15878_vm7 = vmmov %vm15867_vm5 }
  0x74   : > { %5357 = vrot.lane.b32.xlu1 %v15862_v13, %s10033_s8  ;;  %v1657_v14 = vor.u32 %v1655_v49, %v10753_v9  ;;  %v4572_v34 = vrot.slane %v4570_v51, 5  ;;  %v1052_v43 = vrot.slane %v1050_v7, 5  ;;  %v1056_v24 = vrot.slane %v1054_v40, 4  ;;  %366 = vst.msk [vmem:[#allocation2 + $0xd4] sm:$0xf] %vm15867_vm5, %v10770_v31 }
  0x75   : > { %v1640_v36 = vsel %vm10224_vm11, %v10412_v30, %v1639_v23  ;;  %v10767_v45 = vsel %vm10224_vm11, %v1641_v0, %v10398_v10  ;;  %v15864_v49 = vmov 0  ;;  %v1073_v51 = vsel %vm10273_vm15, %v10251_v62, %v1072_v28 }
  0x76   : > { %15863 = vst [vmem:[#allocation34_spill] sm:$0xff] %v10767_v45  ;;  %v1658_v4 = vsel %vm10224_vm11, %v10412_v30, %v1657_v14  ;;  %vm10775_vm13 = vcmp.ne.s16.totalorder %v1640_v36, 0  ;;  %vm15459_vm9 = vcmp.ne.s16.totalorder %v10767_v45, 0  ;;  %v15868_v40 = vmov 0  ;;  %5361 = vrot.lane.b32.xlu0 %v10709_v16, %s10033_s8 }
  0x77   : > { %v15865_v49 = vsel %vm10775_vm13, 4294967295, %v15864_v49  ;;  %vm10787_vm3 = vcmp.ne.s16.totalorder %v1658_v4, 0  ;;  %v1898_v0 = vsel %vm10775_vm13, %v10627_v26, 0  ;;  %v1899_v38 = vsel %vm15459_vm9, %v10629_v63, 0  ;;  %v10819_v4 = vld [vmem:[%s10160_s17 + $0x58] sm:$0xf]  ;;  %vm15880_vm9 = vmmov %vm15867_vm5 }
  0x78   : > { %15866 = vst [vmem:[#allocation35_spill] sm:$0xff] %v15865_v49  ;;  %v15869_v40 = vsel %vm10787_vm3, 4294967295, %v15868_v40  ;;  %v1077_v33 = vor.u32 %v1076_v18, %v1072_v28  ;;  %4164 = vrot.lane.b32.xlu1 %v10721_v27, %s10029_s21  ;;  %v1900_v23 = vsel %vm10787_vm3, %v10642_v57, 0  ;;  %v9334_v7 = vcombine.low %v1897_v53, %v1898_v0  ;;  %v10813_v27 = vld [vmem:[#allocation2 + $0xa0] sm:$0xf]  ;;  %15874 = vst [vmem:[#allocation38_spill] sm:$0xff] %v10819_v4 }
  0x79   : > { %15870 = vst [vmem:[#allocation36_spill] sm:$0xff] %v15869_v40  ;;  %vm10804_vm12 = vcmp.ne.s16.totalorder %v1073_v51, 0  ;;  %v15871_v13 = vmov 0  ;;  %v1053_v14 = vsel %vm10273_vm15, %v10251_v62, %v1052_v43  ;;  %v10811_v28 = vcombine.low %v1899_v38, %v1900_v23  ;;  %335 = vst.msk [vmem:[#allocation2 + $0x58] sm:$0xf] %vm15878_vm7, %v10819_v4 }
  0x7a   : > { %v15872_v13 = vsel %vm10804_vm12, 4294967295, %v15871_v13  ;;  %v1078_v18 = vrot.slane %v1077_v33, 4  ;;  %v2351_v16 = vsel %vm10804_vm12, %v10642_v57, 0  ;;  %v1057_v36 = vor.u32 %v1056_v24, %v1052_v43  ;;  %367 = vst.msk [vmem:[#allocation2 + $0xd8] sm:$0xf] %vm15867_vm5, %v10819_v4  ;;  %vm15881_vm7 = vmmov %vm15867_vm5 }
  0x7b   : > { %15873 = vst [vmem:[#allocation37_spill] sm:$0xff] %v15872_v13  ;;  %v4281_v53 = vrot.slane %v9334_v7, 5  ;;  %vm10821_vm2 = vcmp.ne.s16.totalorder %v1053_v14, 0  ;;  %v15875_v51 = vmov 0  ;;  %v4573_v0 = vor.u32 %v4572_v34, %v4569_v21  ;;  %v10830_v38 = vld [vmem:[%s10160_s17 + $0x5c] sm:$0xf] }
  0x7c   : > { %v15876_v51 = vsel %vm10821_vm2, 4294967295, %v15875_v51  ;;  %v4578_v60 = vrot.slane %v4576_v54, 4  ;;  %15879 = vst [vmem:[#allocation40_spill] sm:$0xff] %v10830_v38  ;;  %v15463_v57 = vrot.slane %v10811_v28, 5  ;;  %v1083_v43 = vsel %vm10273_vm15, %v1078_v18, %v10164_v12  ;;  %336 = vst.msk [vmem:[#allocation2 + $0x5c] sm:$0xf] %vm15880_vm9, %v10830_v38  ;;  %4166 = vrot.lane.b32.xlu1 %v10734_v35, %s10029_s21 }
  0x7d   : > { %15877 = vst [vmem:[#allocation39_spill] sm:$0xff] %v15876_v51  ;;  %v1058_v24 = vrot.slane %v1057_v36, 4  ;;  %v2349_v34 = vsel %vm10821_vm2, %v10627_v26, 0  ;;  %368 = vst.msk [vmem:[#allocation2 + $0xdc] sm:$0xf] %vm15881_vm7, %v10830_v38  ;;  %v15882_v21 = vrot.slane %v10604_v61, 5 }
  0x7e   : > { %vm15883_vm5 = vcmask 1042432   ;;  %vm10848_vm8 = vcmp.ne.s16.totalorder %v1083_v43, 0  ;;  %v15884_v33 = vmov 0  ;;  %v4581_v23 = vrot.slane %v4579_v58, 5  ;;  %v2384_v7 = vld [vmem:[#allocation2 + $0x20] sm:$0xf] }
  0x7f   : > { %v4282_v54 = vsel %vm15883_vm5, %v15882_v21, %v4281_v53  ;;  %v15885_v33 = vsel %vm10848_vm8, 4294967295, %v15884_v33  ;;  %vm15887_vm14 = vsmask.f32 3328  ;;  %v2385_v14 = vld [vmem:[#allocation2 + $0x24] sm:$0xf]  ;;  %vm15888_vm9 = vmmov %vm15883_vm5  ;;  %v2352_v61 = vsel %vm10848_vm8, %v10813_v27, 0 }
  0x80   : > { %15886 = vst [vmem:[#allocation41_spill] sm:$0xff] %v15885_v33  ;;  %v4574_v26 = vsel %vm15887_vm14, %v10236_v56, %v4573_v0  ;;  %v4284_v18 = vsel %vm15888_vm9, %v4281_v53, %v15463_v57  ;;  %4315 = vrot.lane.b32.xlu0 %v4282_v54, %s10027_s19  ;;  %v1063_v35 = vsel %vm10273_vm15, %v1058_v24, %v10164_v12  ;;  %vm15889_vm7 = vcmp.ne.s16.totalorder %v10726_v3, 0 }
  0x81   : > { %v2797_v56 = vsel %vm15889_vm7, %v10429_v11, 0  ;;  %v9352_v58 = vcombine.low %v2351_v16, %v2352_v61  ;;  %vm10867_vm14 = vcmp.ne.s16.totalorder %v1063_v35, 0  ;;  %v15890_v36 = vmov 0  ;;  %4317 = vrot.lane.b32.xlu1 %v4284_v18, %s10027_s19  ;;  %v10888_v61 = vld [vmem:[#allocation2 + $0x28] sm:$0xf] }
  0x82   : > { %v15891_v36 = vsel %vm10867_vm14, 4294967295, %v15890_v36  ;;  %v10871_v53 = vor.u32 %v4581_v23, %v4578_v60  ;;  %v2798_v43 = vsel %vm10775_vm13, %v10620_v47, 0  ;;  %v2350_v21 = vsel %vm10867_vm14, %v10629_v63, 0  ;;  %v10892_v35 = vld [vmem:[#allocation2 + $0x2c] sm:$0xf] }
  0x83   : > { %15892 = vst [vmem:[#allocation42_spill] sm:$0xff] %v15891_v36  ;;  %vm15893_vm5 = vcmp.ne.s16.totalorder %v10767_v45, 0  ;;  %v2800_v11 = vsel %vm10787_vm3, %v2385_v14, 0  ;;  %v9384_v16 = vcombine.low %v2797_v56, %v2798_v43  ;;  %v9351_v54 = vcombine.low %v2349_v34, %v2350_v21 }
  0x84   : > { %v2799_v24 = vsel %vm15893_vm5, %v2384_v7, 0  ;;  %vm15894_vm9 = vsmask.f32 3328  ;;  %v3313_v63 = vsel %vm10804_vm12, %v2385_v14, 0  ;;  %v3314_v56 = vsel %vm10848_vm8, %v10888_v61, 0 }
  0x85   : > { %v4583_v60 = vsel %vm15894_vm9, %v4573_v0, %v10871_v53  ;;  %v10886_v23 = vcombine.low %v2799_v24, %v2800_v11  ;;  %v4805_v57 = vrot.slane %v9384_v16, 5  ;;  %v3311_v34 = vsel %vm10821_vm2, %v10620_v47, 0  ;;  %4432 = vrot.lane.b32.xlu0 %v9351_v54, %s10028_s20  ;;  %v10908_v11 = vld [vmem:[#allocation2 + $0xa4] sm:$0xf]  ;;  %v10910_v16 = vld [vmem:[#allocation2 + $0xa8] sm:$0xf]  ;;  %4434 = vrot.lane.b32.xlu1 %v9352_v58, %s10028_s20 }
  0x86   : > { %v3312_v0 = vsel %vm10867_vm14, %v2384_v7, 0  ;;  %v10904_v43 = vcombine.low %v3313_v63, %v3314_v56  ;;  %v3376_v24 = vsel %vm10128_vm1, %v2384_v7, 0  ;;  %v15895_v59 = vrot.slane %v10618_v15, 5 }
  0x87   : > { %v15470_v18 = vrot.slane %v10886_v23, 5  ;;  %v9401_v21 = vcombine.low %v3311_v34, %v3312_v0  ;;  %vm15896_vm7 = vcmask 1042432   ;;  %v3377_v4 = vsel %vm10128_vm1, %v2385_v14, 0  ;;  %v10930_v0 = vld [vmem:[#allocation2 + $0xac] sm:$0xf] }
  0x88   : > { %v4806_v47 = vsel %vm15896_vm7, %v15895_v59, %v4805_v57  ;;  %v3378_v54 = vsel %vm10128_vm1, %v10888_v61, 0  ;;  %v3379_v63 = vsel %vm10128_vm1, %v10892_v35, 0  ;;  %vm15897_vm5 = vmmov %vm15896_vm7  ;;  %v9418_v15 = vcombine.low %v3376_v24, %v3377_v4 }
  0x89   : > { %v4808_v56 = vsel %vm15897_vm5, %v4805_v57, %v15470_v18  ;;  %v9419_v34 = vcombine.low %v3378_v54, %v3379_v63  ;;  %v1417_v59 = vsel %vm10128_vm1, %v10813_v27, 0  ;;  %v1418_v38 = vsel %vm10128_vm1, %v10908_v11, 0  ;;  %4689 = vrot.lane.b32.xlu0 %v4574_v26, %s10026_s18  ;;  %4691 = vrot.lane.b32.xlu1 %v4583_v60, %s10026_s18 }
  0x8a   : > { %vm15898_vm9 = vcmp.ne.s16.totalorder %v10726_v3, 0  ;;  %v3826_v58 = vsel %vm10775_vm13, %v2385_v14, 0  ;;  %v1419_v4 = vsel %vm10128_vm1, %v10910_v16, 0  ;;  %v5091_v57 = vshrl.u32 %v9418_v15, 16 }
  0x8b   : > { %v3825_v33 = vsel %vm15898_vm9, %v2384_v7, 0  ;;  %v5094_v24 = vshll.u32 %v9418_v15, 16  ;;  %v5100_v54 = vshrl.u32 %v9419_v34, 16  ;;  %v5103_v63 = vshll.u32 %v9419_v34, 16 }
  0x8c   : > { %v9320_v18 = vcombine.low %v1417_v59, %v1418_v38  ;;  %v9434_v13 = vcombine.low %v3825_v33, %v3826_v58  ;;  %v1420_v3 = vsel %vm10128_vm1, %v10930_v0, 0  ;;  %vm15899_vm7 = vcmp.ne.s16.totalorder %v10767_v45, 0 }
  0x8d   : > { %v3827_v7 = vsel %vm15899_vm7, %v10888_v61, 0  ;;  %v5093_v14 = vrot.slane %v5091_v57, 4  ;;  %v5096_v49 = vrot.slane %v5094_v24, 5  ;;  %v5102_v36 = vrot.slane %v5100_v54, 4  ;;  %4839 = vrot.lane.b32.xlu0 %v4806_v47, %s10030_s22  ;;  %4841 = vrot.lane.b32.xlu1 %v4808_v56, %s10030_s22 }
  0x8e   : > { %v5105_v26 = vrot.slane %v5103_v63, 5  ;;  %v4060_v51 = vshrl.u32 %v9320_v18, 16  ;;  %v4063_v15 = vshll.u32 %v9320_v18, 16  ;;  %v5329_v39 = vrot.slane %v9434_v13, 5 }
  0x8f   : > { %v9321_v34 = vcombine.low %v1419_v4, %v1420_v3  ;;  %v5097_v38 = vor.u32 %v5096_v49, %v5093_v14  ;;  %v3828_v59 = vsel %vm10787_vm3, %v10892_v35, 0  ;;  %v389_v58 = vadd.s32 88, %v10133_v2 }
  0x90   : > { %v10951_v33 = vor.u32 %v5105_v26, %v5102_v36  ;;  %v4062_v60 = vrot.slane %v4060_v51, 4  ;;  %v4065_v57 = vrot.slane %v4063_v15, 5  ;;  %v15900_v24 = vrot.slane %v10690_v22, 5 }
  0x91   : > { %v4069_v18 = vshrl.u32 %v9321_v34, 16  ;;  %vm15901_vm9 = vsmask.f32 3328  ;;  %v4072_v13 = vshll.u32 %v9321_v34, 16  ;;  %v10965_v36 = vcombine.low %v3827_v7, %v3828_v59  ;;  %4956 = vrot.lane.b32.xlu0 %v9401_v21, %s10031_s23  ;;  %4958 = vrot.lane.b32.xlu1 %v10904_v43, %s10031_s23 }
  0x92   : > { %v5330_v54 = vsel %vm15897_vm5, %v15900_v24, %v5329_v39  ;;  %v5107_v3 = vsel %vm15901_vm9, %v5097_v38, %v10951_v33  ;;  %vm15902_vm7 = vmmov %vm15901_vm9  ;;  %v4066_v47 = vor.u32 %v4065_v57, %v4062_v60  ;;  %v391_v51 = vadd.s32 104, %v10133_v2 }
  0x93   : > { %v5098_v49 = vsel %vm15902_vm7, %v10692_v25, %v5097_v38  ;;  %v4071_v4 = vrot.slane %v4069_v18, 4  ;;  %v491_v63 = vand.u32 15, %v389_v58  ;;  %v4074_v22 = vrot.slane %v4072_v13, 5  ;;  %vm15903_vm5 = vmmov %vm15902_vm7 }
  0x94   : > { %v15500_v14 = vrot.slane %v10965_v36, 5  ;;  %v1659_v56 = vrot.slane %v10753_v9, 4  ;;  %v390_v26 = vadd.s32 96, %v10133_v2  ;;  %v4067_v25 = vsel %vm15903_vm5, %v10712_v6, %v4066_v47 }
  0x95   : > { %v505_v15 = vand.u32 15, %v391_v51  ;;  %vm1451_vm9 = vcmp.lt.s32.totalorder %v491_v63, 15  ;;  %v388_v7 = vadd.s32 80, %v10133_v2  ;;  %v10977_v34 = vor.u32 %v4074_v22, %v4071_v4  ;;  %5213 = vrot.lane.b32.xlu0 %v5098_v49, %s10032_s29  ;;  %5215 = vrot.lane.b32.xlu1 %v5107_v3, %s10032_s29 }
  0x96   : > { %vm15904_vm7 = vcmask 1042432   ;;  %vm1515_vm3 = vmpackc.low %vm1451_vm9, %vm1451_vm9  ;;  %v10985_v9 = vsel %vm10224_vm11, %v1659_v56, %v10398_v10  ;;  %v498_v6 = vand.u32 15, %v390_v26  ;;  %vm15906_vm4 = vsmask.f32 3328 }
  0x97   : > { %v5332_v21 = vsel %vm15904_vm7, %v5329_v39, %v15500_v14  ;;  %15905 = vst [vmem:[#allocation43_spill] sm:$0xff] %v10985_v9  ;;  %vm1453_vm5 = vcmp.lt.s32.totalorder %v505_v15, 15  ;;  %v1547_v38 = vsel %vm1515_vm3, 65537, %v15861_v42  ;;  %vm15490_vm13 = vcmp.ne.s16.totalorder %v10985_v9, 0 }
  0x98   : > { %v484_v59 = vand.u32 15, %v388_v7  ;;  %v4076_v43 = vsel %vm15906_vm4, %v4066_v47, %v10977_v34  ;;  %vm1517_vm8 = vmpackc.low %vm1453_vm5, %vm1453_vm5  ;;  %v1670_v39 = vshrl.u32 %v1547_v38, 16  ;;  %v1673_v58 = vshll.u32 %v1547_v38, 16 }
  0x99   : > { %v1901_v60 = vsel %vm15490_vm13, %v10813_v27, 0  ;;  %v1549_v57 = vsel %vm1517_vm8, 65537, %v15861_v42  ;;  %vm871_vm9 = vcmp.ge.s32.totalorder %v498_v6, 1  ;;  %v9370_v18 = vcombine.low %v10356_v46, %v10369_v52  ;;  %5363 = vrot.lane.b32.xlu0 %v5330_v54, %s10033_s8  ;;  %4168 = vrot.lane.b32.xlu1 %v4067_v25, %s10029_s21 }
  0x9a   : > { %vm10996_vm7 = vcmp.ge.s32.totalorder %v484_v59, 1  ;;  %v1672_v49 = vrot.slane %v1670_v39, 7  ;;  %v1688_v13 = vshrl.u32 %v1549_v57, 16  ;;  %v1691_v47 = vshll.u32 %v1549_v57, 16  ;;  %vm935_vm4 = vmpackc.low %vm871_vm9, %vm871_vm9 }
  0x9b   : > { %v11005_v4 = vcombine.low %v10404_v17, %v10407_v20  ;;  %v967_v27 = vsel %vm935_vm4, 65537, %v15861_v42  ;;  %vm933_vm8 = vmpackc.low %vm10996_vm7, %vm10996_vm7  ;;  %v4585_v51 = vshrl.u32 %v9370_v18, 16  ;;  %v4588_v63 = vshll.u32 %v9370_v18, 16 }
  0x9c   : > { %v11014_v46 = vsel %vm15490_vm13, %v10888_v61, 0  ;;  %v1675_v52 = vor.u32 %v1673_v58, %v1672_v49  ;;  %v1677_v3 = vrot.slane %v1672_v49, 4  ;;  %v11017_v22 = vrot.slane %v1688_v13, 7 }
  0x9d   : > { %v1110_v17 = vshll.u32 %v967_v27, 16  ;;  %v1114_v20 = vshrl.u32 %v967_v27, 16  ;;  %v965_v56 = vsel %vm933_vm8, 65537, %v15861_v42  ;;  %v4587_v26 = vrot.slane %v4585_v51, 4  ;;  %5365 = vrot.lane.b32.xlu0 %v5332_v21, %s10033_s8  ;;  %4170 = vrot.lane.b32.xlu1 %v4076_v43, %s10029_s21 }
  0x9e   : > { %v4590_v15 = vrot.slane %v4588_v63, 5  ;;  %v1676_v7 = vsel %vm10224_vm11, %v10412_v30, %v1675_v52  ;;  %v11027_v61 = vsel %vm10224_vm11, %v1677_v3, %v10398_v10  ;;  %v1693_v54 = vor.u32 %v1691_v47, %v11017_v22 }
  0x9f   : > { %15909 = vst [vmem:[#allocation44_spill] sm:$0xff] %v11027_v61  ;;  %v1112_v6 = vrot.slane %v1110_v17, 5  ;;  %vm11030_vm3 = vcmp.ne.s16.totalorder %v1676_v7, 0  ;;  %v15910_v38 = vmov 0  ;;  %vm15491_vm5 = vcmp.ne.s16.totalorder %v11027_v61, 0 }
  0xa0   : > { %v15911_v38 = vsel %vm11030_vm3, 4294967295, %v15910_v38  ;;  %v1116_v59 = vrot.slane %v1114_v20, 4  ;;  %v1090_v25 = vshll.u32 %v965_v56, 16  ;;  %v1694_v39 = vsel %vm10224_vm11, %v10412_v30, %v1693_v54  ;;  %v11066_v20 = vld [vmem:[%s10160_s17 + $0x60] sm:$0xf] }
  0xa1   : > { %15912 = vst [vmem:[#allocation45_spill] sm:$0xff] %v15911_v38  ;;  %v1902_v58 = vsel %vm11030_vm3, %v10908_v11, 0  ;;  %v1903_v57 = vsel %vm15491_vm5, %v10910_v16, 0  ;;  %v1113_v24 = vsel %vm10273_vm15, %v10251_v62, %v1112_v6  ;;  %vm11048_vm9 = vcmp.ne.s16.totalorder %v1694_v39, 0  ;;  %v11068_v7 = vld [vmem:[#allocation2 + $0xb0] sm:$0xf] }
  0xa2   : > { %v15913_v18 = vmov 0  ;;  %v9336_v21 = vcombine.low %v1901_v60, %v1902_v58  ;;  %v1117_v49 = vor.u32 %v1116_v59, %v1112_v6  ;;  %vm11052_vm7 = vcmp.ne.s16.totalorder %v1113_v24, 0  ;;  %v2389_v24 = vld [vmem:[#allocation2 + $0x34] sm:$0xf] }
  0xa3   : > { %v15914_v18 = vsel %vm11048_vm9, 4294967295, %v15913_v18  ;;  %v15916_v13 = vmov 0  ;;  %v1904_v47 = vsel %vm11048_vm9, %v10930_v0, 0  ;;  %v2355_v27 = vsel %vm11052_vm7, %v10930_v0, 0 }
  0xa4   : > { %15915 = vst [vmem:[#allocation46_spill] sm:$0xff] %v15914_v18  ;;  %v15917_v13 = vsel %vm11052_vm7, 4294967295, %v15916_v13  ;;  %v1092_v51 = vrot.slane %v1090_v25, 5  ;;  %v1094_v63 = vshrl.u32 %v965_v56, 16  ;;  %v11063_v52 = vcombine.low %v1903_v57, %v1904_v47  ;;  %v9922_v18 = vld [vmem:[#allocation2 + $0x84] sm:$0xf] }
  0xa5   : > { %15918 = vst [vmem:[#allocation47_spill] sm:$0xff] %v15917_v13  ;;  %v4285_v60 = vrot.slane %v9336_v21, 5  ;;  %v1118_v3 = vrot.slane %v1117_v49, 4  ;;  %v4591_v17 = vor.u32 %v4590_v15, %v4587_v26  ;;  %v4594_v6 = vshrl.u32 %v11005_v4, 16 }
  0xa6   : > { %v1093_v43 = vsel %vm10273_vm15, %v10251_v62, %v1092_v51  ;;  %v1096_v54 = vrot.slane %v1094_v63, 4  ;;  %v4597_v0 = vshll.u32 %v11005_v4, 16  ;;  %vm15919_vm4 = vcmask 60416   ;;  %v2388_v4 = vld [vmem:[#allocation2 + $0x30] sm:$0xf] }
  0xa7   : > { %369 = vst.msk [vmem:[#allocation2 + $0xe0] sm:$0xf] %vm15919_vm4, %v11066_v20  ;;  %vm15920_vm8 = vmmov %vm15919_vm4  ;;  %v15499_v56 = vrot.slane %v11063_v52, 5  ;;  %v15921_v26 = vrot.slane %v10811_v28, 5  ;;  %vm15922_vm13 = vcmask 1042432   ;;  %v1123_v59 = vsel %vm10273_vm15, %v1118_v3, %v10164_v12 }
  0xa8   : > { %337 = vst.msk [vmem:[#allocation2 + $0x60] sm:$0xf] %vm15920_vm8, %v11066_v20  ;;  %vm11086_vm5 = vcmp.ne.s16.totalorder %v1093_v43, 0  ;;  %v15923_v25 = vmov 0  ;;  %vm11091_vm4 = vcmp.ne.s16.totalorder %v1123_v59, 0  ;;  %v15926_v39 = vmov 0 }
  0xa9   : > { %v4286_v15 = vsel %vm15922_vm13, %v15921_v26, %v4285_v60  ;;  %v15924_v25 = vsel %vm11086_vm5, 4294967295, %v15923_v25  ;;  %v15927_v39 = vsel %vm11091_vm4, 4294967295, %v15926_v39  ;;  %v1097_v58 = vor.u32 %v1096_v54, %v1092_v51 }
  0xaa   : > { %15925 = vst [vmem:[#allocation48_spill] sm:$0xff] %v15924_v25  ;;  %4319 = vrot.lane.b32.xlu0 %v4286_v15, %s10027_s19  ;;  %15928 = vst [vmem:[#allocation49_spill] sm:$0xff] %v15927_v39  ;;  %v2353_v28 = vsel %vm11086_vm5, %v10908_v11, 0  ;;  %v4596_v57 = vrot.slane %v4594_v6, 4  ;;  %v4288_v21 = vsel %vm15922_vm13, %v4285_v60, %v15499_v56  ;;  %v2356_v49 = vsel %vm11091_vm4, %v11068_v7, 0 }
  0xab   : > { %v4599_v47 = vrot.slane %v4597_v0, 5  ;;  %vm15929_vm8 = vsmask.f32 3328  ;;  %4321 = vrot.lane.b32.xlu1 %v4288_v21, %s10027_s19  ;;  %v9354_v51 = vcombine.low %v2355_v27, %v2356_v49  ;;  %v1098_v3 = vrot.slane %v1097_v58, 4  ;;  %v11113_v60 = vld [vmem:[%s10160_s17 + $0x64] sm:$0xf] }
  0xac   : > { %v4592_v63 = vsel %vm15929_vm8, %v10871_v53, %v4591_v17  ;;  %v2802_v11 = vsel %vm11030_vm3, %v10892_v35, 0  ;;  %vm15930_vm12 = vcmp.ne.s16.totalorder %v11027_v61, 0  ;;  %v2804_v6 = vsel %vm11048_vm9, %v2389_v24, 0  ;;  %v11120_v0 = vld [vmem:[#allocation2 + $0x38] sm:$0xf] }
  0xad   : > { %v2803_v43 = vsel %vm15930_vm12, %v2388_v4, 0  ;;  %v11115_v54 = vor.u32 %v4599_v47, %v4596_v57  ;;  %v9386_v53 = vcombine.low %v11014_v46, %v2802_v11  ;;  %v3317_v27 = vsel %vm11052_vm7, %v2389_v24, 0  ;;  %v11147_v47 = vld [vmem:[#allocation2 + $0x3c] sm:$0xf] }
  0xae   : > { %vm15931_vm13 = vcmask 60416   ;;  %v1103_v26 = vsel %vm10273_vm15, %v1098_v3, %v10164_v12  ;;  %v11131_v15 = vcombine.low %v2803_v43, %v2804_v6  ;;  %v3318_v46 = vsel %vm11091_vm4, %v11120_v0, 0  ;;  %v11149_v3 = vld [vmem:[#allocation2 + $0xb4] sm:$0xf]  ;;  %v11161_v6 = vld [vmem:[%s10160_s17 + $0x68] sm:$0xf] }
  0xaf   : > { %338 = vst.msk [vmem:[#allocation2 + $0x64] sm:$0xf] %vm15931_vm13, %v11113_v60  ;;  %vm15932_vm8 = vmmov %vm15931_vm13  ;;  %v3315_v59 = vsel %vm11086_vm5, %v10892_v35, 0  ;;  %vm11139_vm12 = vcmp.ne.s16.totalorder %v1103_v26, 0  ;;  %v15933_v58 = vmov 0  ;;  %v4809_v21 = vrot.slane %v9386_v53, 5  ;;  %4438 = vrot.lane.b32.xlu1 %v9354_v51, %s10028_s20 }
  0xb0   : > { %370 = vst.msk [vmem:[#allocation2 + $0xe4] sm:$0xf] %vm15932_vm8, %v11113_v60  ;;  %v15934_v58 = vsel %vm11139_vm12, 4294967295, %v15933_v58  ;;  %vm15936_vm13 = vsmask.f32 3328  ;;  %v11145_v49 = vcombine.low %v3317_v27, %v3318_v46  ;;  %v2354_v35 = vsel %vm11139_vm12, %v10910_v16, 0 }
  0xb1   : > { %15935 = vst [vmem:[#allocation50_spill] sm:$0xff] %v15934_v58  ;;  %v4601_v57 = vsel %vm15936_vm13, %v4591_v17, %v11115_v54  ;;  %v15498_v11 = vrot.slane %v11131_v15, 5  ;;  %v3316_v43 = vsel %vm11139_vm12, %v2388_v4, 0  ;;  %v3380_v17 = vsel %vm10128_vm1, %v2388_v4, 0  ;;  %15937 = vst [vmem:[#allocation51_spill] sm:$0xff] %v11161_v6  ;;  %v16057_v58 = vld [vmem:[#allocation42_spill] sm:$0xff] }
  0xb2   : > { %v9353_v53 = vcombine.low %v2353_v28, %v2354_v35  ;;  %v15938_v27 = vrot.slane %v10886_v23, 5  ;;  %vm15939_vm8 = vcmask 1042432   ;;  %v11166_v51 = vcombine.low %v3315_v59, %v3316_v43  ;;  %v11175_v46 = vld [vmem:[%s10160_s17 + $0x6c] sm:$0xf]  ;;  %v11186_v43 = vld [vmem:[#allocation2 + $0xb8] sm:$0xf] }
  0xb3   : > { %v3381_v16 = vsel %vm10128_vm1, %v2389_v24, 0  ;;  %vm15940_vm13 = vcmask 60416   ;;  %15942 = vst [vmem:[#allocation52_spill] sm:$0xff] %v11175_v46  ;;  %vm15943_vm7 = vmmov %vm15939_vm8  ;;  %v3382_v23 = vsel %vm10128_vm1, %v11120_v0, 0  ;;  %v3383_v59 = vsel %vm10128_vm1, %v11147_v47, 0  ;;  %4695 = vrot.lane.b32.xlu1 %v4601_v57, %s10026_s18 }
  0xb4   : > { %v4810_v26 = vsel %vm15939_vm8, %v15938_v27, %v4809_v21  ;;  %339 = vst.msk [vmem:[#allocation2 + $0x68] sm:$0xf] %vm15940_vm13, %v11161_v6  ;;  %vm15941_vm4 = vmmov %vm15940_vm13  ;;  %v4812_v28 = vsel %vm15943_vm7, %v4809_v21, %v15498_v11  ;;  %v9420_v35 = vcombine.low %v3380_v17, %v3381_v16  ;;  %4436 = vrot.lane.b32.xlu0 %v9353_v53, %s10028_s20  ;;  %v1421_v27 = vsel %vm10128_vm1, %v11068_v7, 0  ;;  %v11823_v25 = vld [vmem:[#allocation2 + $0x5c] sm:$0xf] }
  0xb5   : > { %371 = vst.msk [vmem:[#allocation2 + $0xe8] sm:$0xf] %vm15941_vm4, %v11161_v6  ;;  %vm15944_vm8 = vmmov %vm15941_vm4  ;;  %v9421_v21 = vcombine.low %v3382_v23, %v3383_v59  ;;  %v1422_v11 = vsel %vm10128_vm1, %v11149_v3, 0  ;;  %vm15945_vm7 = vcmp.ne.s16.totalorder %v10985_v9, 0  ;;  %v3830_v53 = vsel %vm11030_vm3, %v2389_v24, 0 }
  0xb6   : > { %340 = vst.msk [vmem:[#allocation2 + $0x6c] sm:$0xf] %vm15944_vm8, %v11175_v46  ;;  %v3829_v17 = vsel %vm15945_vm7, %v2388_v4, 0  ;;  %v5109_v16 = vshrl.u32 %v9420_v35, 16  ;;  %v5112_v56 = vshll.u32 %v9420_v35, 16  ;;  %v9322_v14 = vcombine.low %v1421_v27, %v1422_v11 }
  0xb7   : > { %372 = vst.msk [vmem:[#allocation2 + $0xec] sm:$0xf] %vm15941_vm4, %v11175_v46  ;;  %v11204_v23 = vld [vmem:[#allocation2 + $0xbc] sm:$0xf]  ;;  %v5118_v59 = vshrl.u32 %v9421_v21, 16  ;;  %v5121_v40 = vshll.u32 %v9421_v21, 16  ;;  %v9436_v45 = vcombine.low %v3829_v17, %v3830_v53  ;;  %4845 = vrot.lane.b32.xlu1 %v4812_v28, %s10030_s22 }
  0xb8   : > { %v1423_v6 = vsel %vm10128_vm1, %v11186_v43, 0  ;;  %v5111_v46 = vrot.slane %v5109_v16, 4  ;;  %v5114_v9 = vrot.slane %v5112_v56, 5  ;;  %v4078_v4 = vshrl.u32 %v9322_v14, 16  ;;  %4693 = vrot.lane.b32.xlu0 %v4592_v63, %s10026_s18 }
  0xb9   : > { %v4081_v39 = vshll.u32 %v9322_v14, 16  ;;  %v5120_v57 = vrot.slane %v5118_v59, 4  ;;  %v5123_v11 = vrot.slane %v5121_v40, 5  ;;  %v5333_v35 = vrot.slane %v9436_v45, 5 }
  0xba   : > { %v1424_v24 = vsel %vm10128_vm1, %v11204_v23, 0  ;;  %v5115_v21 = vor.u32 %v5114_v9, %v5111_v46  ;;  %v4080_v27 = vrot.slane %v4078_v4, 4  ;;  %v15946_v56 = vrot.slane %v10965_v36, 5 }
  0xbb   : > { %v4083_v17 = vrot.slane %v4081_v39, 5  ;;  %v9323_v53 = vcombine.low %v1423_v6, %v1424_v24  ;;  %v11214_v38 = vor.u32 %v5123_v11, %v5120_v57  ;;  %vm15947_vm13 = vcmask 1042432   ;;  %4962 = vrot.lane.b32.xlu1 %v11145_v49, %s10031_s23 }
  0xbc   : > { %v11219_v14 = vsel %vm15947_vm13, %v15946_v56, %v5333_v35  ;;  %vm15948_vm8 = vcmp.ne.s16.totalorder %v11027_v61, 0  ;;  %v3832_v40 = vsel %vm11048_vm9, %v11147_v47, 0  ;;  %vm15949_vm4 = vsmask.f32 3328  ;;  %4843 = vrot.lane.b32.xlu0 %v4810_v26, %s10030_s22  ;;  %v11241_v26 = vpop.permute.xlu0 %4685 }
  0xbd   : > { %v3831_v45 = vsel %vm15948_vm8, %v11120_v0, 0  ;;  %v5116_v9 = vsel %vm15949_vm4, %v10951_v33, %v5115_v21  ;;  %v4084_v39 = vor.u32 %v4083_v17, %v4080_v27  ;;  %v4087_v63 = vshrl.u32 %v9323_v53, 16  ;;  %vm15950_vm7 = vmmov %vm15949_vm4 }
  0xbe   : > { %v4090_v6 = vshll.u32 %v9323_v53, 16  ;;  %v5125_v36 = vsel %vm15950_vm7, %v5115_v21, %v11214_v38  ;;  %v11232_v46 = vcombine.low %v3831_v45, %v3832_v40  ;;  %v393_v28 = vadd.s32 120, %v10133_v2  ;;  %vm15951_vm13 = vmmov %vm15949_vm4  ;;  %v11247_v53 = vpop.permute.xlu1 %4683 }
  0xbf   : > { %v395_v16 = vadd.s32 136, %v10133_v2  ;;  %v4085_v33 = vsel %vm15951_vm13, %v10977_v34, %v4084_v39  ;;  %v4089_v59 = vrot.slane %v4087_v63, 4  ;;  %v1695_v57 = vrot.slane %v11017_v22, 4  ;;  %5219 = vrot.lane.b32.xlu1 %v5125_v36, %s10032_s29 }
  0xc0   : > { %v4092_v4 = vrot.slane %v4090_v6, 5  ;;  %v15519_v11 = vrot.slane %v11232_v46, 5  ;;  %v519_v24 = vand.u32 15, %v393_v28  ;;  %v394_v27 = vadd.s32 128, %v10133_v2  ;;  %4960 = vrot.lane.b32.xlu0 %v11166_v51, %s10031_s23 }
  0xc1   : > { %v533_v21 = vand.u32 15, %v395_v16  ;;  %v11252_v34 = vsel %vm10224_vm11, %v1695_v57, %v10398_v10  ;;  %v392_v49 = vadd.s32 112, %v10133_v2  ;;  %v9372_v22 = vcombine.low %v10424_v5, %v10436_v41  ;;  %v11275_v16 = vpop.permute.xlu0 %4426 }
  0xc2   : > { %v11245_v17 = vor.u32 %v4092_v4, %v4089_v59  ;;  %15952 = vst [vmem:[#allocation53_spill] sm:$0xff] %v11252_v34  ;;  %vm15953_vm8 = vcmask 1042432   ;;  %vm1455_vm4 = vcmp.lt.s32.totalorder %v519_v24, 15  ;;  %vm15523_vm13 = vcmp.ne.s16.totalorder %v11252_v34, 0 }
  0xc3   : > { %v5336_v56 = vsel %vm15953_vm8, %v5333_v35, %v15519_v11  ;;  %vm1457_vm7 = vcmp.lt.s32.totalorder %v533_v21, 15  ;;  %vm15954_vm9 = vsmask.f32 3328  ;;  %vm1519_vm3 = vmpackc.low %vm1455_vm4, %vm1455_vm4  ;;  %v1905_v5 = vsel %vm15523_vm13, %v11068_v7, 0  ;;  %4172 = vrot.lane.b32.xlu1 %v4085_v33, %s10029_s21  ;;  %v11341_v11 = vld [vmem:[#allocation2 + $0xc0] sm:$0xf] }
  0xc4   : > { %v4094_v45 = vsel %vm15954_vm9, %v4084_v39, %v11245_v17  ;;  %v526_v41 = vand.u32 15, %v394_v27  ;;  %v512_v51 = vand.u32 15, %v392_v49  ;;  %vm1521_vm12 = vmpackc.low %vm1457_vm7, %vm1457_vm7  ;;  %v1551_v40 = vsel %vm1519_vm3, 65537, %v15861_v42  ;;  %5217 = vrot.lane.b32.xlu0 %v5116_v9, %s10032_s29 }
  0xc5   : > { %v11272_v35 = vcombine.low %v10439_v44, %v10458_v50  ;;  %v4603_v63 = vshrl.u32 %v9372_v22, 16  ;;  %v4606_v6 = vshll.u32 %v9372_v22, 16  ;;  %v1553_v36 = vsel %vm1521_vm12, 65537, %v15861_v42  ;;  %v11279_v50 = vpop.permute.xlu1 %4687 }
  0xc6   : > { %v1706_v28 = vshrl.u32 %v1551_v40, 16  ;;  %v1709_v39 = vshll.u32 %v1551_v40, 16  ;;  %vm875_vm9 = vcmp.ge.s32.totalorder %v526_v41, 1  ;;  %v1724_v7 = vshrl.u32 %v1553_v36, 16 }
  0xc7   : > { %v1727_v59 = vshll.u32 %v1553_v36, 16  ;;  %vm939_vm8 = vmpackc.low %vm875_vm9, %vm875_vm9  ;;  %vm873_vm4 = vcmp.ge.s32.totalorder %v512_v51, 1  ;;  %v4605_v4 = vrot.slane %v4603_v63, 4  ;;  %v4608_v24 = vrot.slane %v4606_v6, 5  ;;  %4174 = vrot.lane.b32.xlu1 %v4094_v45, %s10029_s21 }
  0xc8   : > { %v1708_v44 = vrot.slane %v1706_v28, 7  ;;  %v971_v57 = vsel %vm939_vm8, 65537, %v15861_v42  ;;  %vm937_vm3 = vmpackc.low %vm873_vm4, %vm873_vm4  ;;  %v4612_v21 = vshrl.u32 %v11272_v35, 16  ;;  %v11283_v27 = vrot.slane %v1724_v7, 7  ;;  %5367 = vrot.lane.b32.xlu0 %v11219_v14, %s10033_s8  ;;  %v11300_v14 = vpop.permute.xlu0 %4158 }
  0xc9   : > { %v1150_v49 = vshll.u32 %v971_v57, 16  ;;  %v1154_v9 = vshrl.u32 %v971_v57, 16  ;;  %v969_v22 = vsel %vm937_vm3, 65537, %v15861_v42  ;;  %v11289_v6 = vor.u32 %v4608_v24, %v4605_v4 }
  0xca   : > { %v1711_v41 = vor.u32 %v1709_v39, %v1708_v44  ;;  %v1713_v51 = vrot.slane %v1708_v44, 4  ;;  %v1130_v40 = vshll.u32 %v969_v22, 16  ;;  %v1134_v63 = vshrl.u32 %v969_v22, 16 }
  0xcb   : > { %v1729_v33 = vor.u32 %v1727_v59, %v11283_v27  ;;  %v1152_v36 = vrot.slane %v1150_v49, 5  ;;  %v1156_v28 = vrot.slane %v1154_v9, 4  ;;  %v15956_v4 = vmov 0 }
  0xcc   : > { %v1712_v7 = vsel %vm10224_vm11, %v10412_v30, %v1711_v41  ;;  %v11298_v39 = vsel %vm10224_vm11, %v1713_v51, %v10398_v10  ;;  %v1132_v44 = vrot.slane %v1130_v40, 5  ;;  %v1136_v57 = vrot.slane %v1134_v63, 4  ;;  %v11323_v41 = vpop.permute.xlu1 %4309  ;;  %5369 = vrot.lane.b32.xlu0 %v5336_v56, %s10033_s8 }
  0xcd   : > { %15955 = vst [vmem:[#allocation54_spill] sm:$0xff] %v11298_v39  ;;  %v1730_v59 = vsel %vm10224_vm11, %v10412_v30, %v1729_v33  ;;  %vm11305_vm12 = vcmp.ne.s16.totalorder %v1712_v7, 0  ;;  %vm15522_vm7 = vcmp.ne.s16.totalorder %v11298_v39, 0  ;;  %v1153_v45 = vsel %vm10273_vm15, %v10251_v62, %v1152_v36 }
  0xce   : > { %v15957_v4 = vsel %vm11305_vm12, 4294967295, %v15956_v4  ;;  %vm11313_vm9 = vcmp.ne.s16.totalorder %v1730_v59, 0  ;;  %v15959_v24 = vmov 0  ;;  %v1906_v49 = vsel %vm11305_vm12, %v11149_v3, 0 }
  0xcf   : > { %15958 = vst [vmem:[#allocation55_spill] sm:$0xff] %v15957_v4  ;;  %v15960_v24 = vsel %vm11313_vm9, 4294967295, %v15959_v24  ;;  %v1907_v9 = vsel %vm15522_vm7, %v11186_v43, 0  ;;  %v1157_v22 = vor.u32 %v1156_v28, %v1152_v36  ;;  %v1908_v51 = vsel %vm11313_vm9, %v11204_v23, 0 }
  0xd0   : > { %15961 = vst [vmem:[#allocation56_spill] sm:$0xff] %v15960_v24  ;;  %v9338_v40 = vcombine.low %v1905_v5, %v1906_v49  ;;  %vm11329_vm8 = vcmp.ne.s16.totalorder %v1153_v45, 0  ;;  %v15962_v63 = vmov 0  ;;  %v1133_v33 = vsel %vm10273_vm15, %v10251_v62, %v1132_v44 }
  0xd1   : > { %v15963_v63 = vsel %vm11329_vm8, 4294967295, %v15962_v63  ;;  %v11336_v7 = vcombine.low %v1907_v9, %v1908_v51  ;;  %v1158_v36 = vrot.slane %v1157_v22, 4  ;;  %v2359_v56 = vsel %vm11329_vm8, %v11204_v23, 0 }
  0xd2   : > { %15964 = vst [vmem:[#allocation57_spill] sm:$0xff] %v15963_v63  ;;  %v1137_v28 = vor.u32 %v1136_v57, %v1132_v44  ;;  %v4289_v59 = vrot.slane %v9338_v40, 5  ;;  %vm11343_vm4 = vcmp.ne.s16.totalorder %v1133_v33, 0  ;;  %v15965_v5 = vmov 0  ;;  %v11355_v44 = vpop.permute.xlu0 %4430  ;;  %v794_v40 = vld [vmem:[#allocation2 + $0x74] sm:$0x8] }
  0xd3   : > { %v15966_v5 = vsel %vm11343_vm4, 4294967295, %v15965_v5  ;;  %v4614_v45 = vrot.slane %v4612_v21, 4  ;;  %v4615_v49 = vshll.u32 %v11272_v35, 16  ;;  %v15531_v61 = vrot.slane %v11336_v7, 5 }
  0xd4   : > { %15967 = vst [vmem:[#allocation58_spill] sm:$0xff] %v15966_v5  ;;  %v1163_v9 = vsel %vm10273_vm15, %v1158_v36, %v10164_v12  ;;  %v1138_v22 = vrot.slane %v1137_v28, 4  ;;  %v2357_v23 = vsel %vm11343_vm4, %v11149_v3, 0  ;;  %v15968_v57 = vrot.slane %v11063_v52, 5  ;;  %v11377_v28 = vpop.permute.xlu1 %4428 }
  0xd5   : > { %vm15969_vm3 = vcmask 1042432   ;;  %vm11360_vm7 = vcmp.ne.s16.totalorder %v1163_v9, 0  ;;  %v15970_v21 = vmov 0  ;;  %v4617_v35 = vrot.slane %v4615_v49, 5 }
  0xd6   : > { %v4290_v51 = vsel %vm15969_vm3, %v15968_v57, %v4289_v59  ;;  %v15971_v21 = vsel %vm11360_vm7, 4294967295, %v15970_v21  ;;  %v997_v33 = vor.u32 %v10211_v32, %v10200_v29  ;;  %vm15973_vm13 = vmmov %vm15969_vm3  ;;  %v2360_v52 = vsel %vm11360_vm7, %v11341_v11, 0  ;;  %v11388_v57 = vld [vmem:[#allocation2 + $0x40] sm:$0xf] }
  0xd7   : > { %15972 = vst [vmem:[#allocation59_spill] sm:$0xff] %v15971_v21  ;;  %v4292_v36 = vsel %vm15973_vm13, %v4289_v59, %v15531_v61  ;;  %4323 = vrot.lane.b32.xlu0 %v4290_v51, %s10027_s19  ;;  %v1143_v3 = vsel %vm10273_vm15, %v1138_v22, %v10164_v12  ;;  %vm15530_vm3 = vcmp.ne.s16.totalorder %v10200_v29, 0  ;;  %v9356_v32 = vcombine.low %v2359_v56, %v2360_v52 }
  0xd8   : > { %4325 = vrot.lane.b32.xlu1 %v4292_v36, %s10027_s19  ;;  %vm11380_vm5 = vcmp.ne.s16.totalorder %v1143_v3, 0  ;;  %v15974_v49 = vmov 0  ;;  %v11384_v59 = vor.u32 %v4617_v35, %v4614_v45  ;;  %v11386_v9 = vrot.slane %v997_v33, 4  ;;  %v11395_v36 = vld [vmem:[#allocation2 + $0x44] sm:$0xf]  ;;  %v11417_v33 = vpop.permute.xlu0 %4833 }
  0xd9   : > { %v15975_v49 = vsel %vm11380_vm5, 4294967295, %v15974_v49  ;;  %v2358_v22 = vsel %vm11380_vm5, %v11186_v43, 0  ;;  %v1342_v51 = vsel %vm15530_vm3, %v794_v40, 0  ;;  %vm15978_vm13 = vsmask.f32 3328 }
  0xda   : > { %15976 = vst [vmem:[#allocation60_spill] sm:$0xff] %v15975_v49  ;;  %15977 = vst [vmem:[#allocation61_spill] sm:$0xff] %v11386_v9  ;;  %v9355_v56 = vcombine.low %v2357_v23, %v2358_v22  ;;  %v4619_v52 = vsel %vm15978_vm13, %v11289_v6, %v11384_v59  ;;  %v1003_v45 = vsel %vm10273_vm15, %v11386_v9, %v10200_v29  ;;  %v15979_v35 = vmov 0  ;;  %v11420_v3 = vld [vmem:[%s10160_s17 + $0x70] sm:$0xf]  ;;  %s10036_s17 = smov 112  }
  0xdb   : > { %vm11404_vm2 = vcmp.ne.s16.totalorder %v1003_v45, 0  ;;  %vm15982_vm3 = vcmp.ne.s16.totalorder %v11252_v34, 0  ;;  %v2806_v23 = vsel %vm11305_vm12, %v11147_v47, 0  ;;  %vm15983_vm13 = vcmp.ne.s16.totalorder %v11298_v39, 0  ;;  %15984 = vst [vmem:[#allocation63_spill] sm:$0xff] %v11420_v3 }
  0xdc   : > { %v15980_v35 = vsel %vm11404_vm2, 4294967295, %v15979_v35  ;;  %v2805_v43 = vsel %vm15982_vm3, %v11120_v0, 0  ;;  %v2807_v40 = vsel %vm15983_vm13, %v11388_v57, 0  ;;  %4442 = vrot.lane.b32.xlu1 %v9356_v32, %s10028_s20  ;;  %4440 = vrot.lane.b32.xlu0 %v9355_v56, %s10028_s20  ;;  %v9921_v22 = vld [vmem:[#allocation2 + $0x78] sm:$0xf]  ;;  %v2808_v45 = vsel %vm11313_vm9, %v11395_v36, 0 }
  0xdd   : > { %15981 = vst [vmem:[#allocation62_spill] sm:$0xff] %v15980_v35  ;;  %v1343_v0 = vsel %vm11404_vm2, %v9921_v22, 0  ;;  %v9388_v61 = vcombine.low %v2805_v43, %v2806_v23  ;;  %v1346_v29 = vsel %vm10346_vm10, %v9922_v18, 0  ;;  %vm15985_vm3 = vcmask 60416   ;;  %v9923_v35 = vld [vmem:[#allocation2 + $0x88] sm:$0xf]  ;;  %v4163_v23 = vpop.permute.xlu1 %4162 }
  0xde   : > { %373 = vst.msk [vmem:[#allocation2 + $0xf0] sm:$0xf] %vm15985_vm3, %v11420_v3  ;;  %vm15986_vm13 = vmmov %vm15985_vm3  ;;  %v9298_v32 = vcombine.low %v1342_v51, %v1343_v0  ;;  %vm15987_vm14 = vsmask.f32 3328  ;;  %v11438_v22 = vcombine.low %v2807_v40, %v2808_v45  ;;  %v1347_v43 = vsel %vm10390_vm6, %v9923_v35, 0  ;;  %v11453_v35 = vpop.permute.xlu0 %4160 }
  0xdf   : > { %341 = vst.msk [vmem:[#allocation2 + $0x70] sm:$0xf] %vm15986_vm13, %v11420_v3  ;;  %v4610_v56 = vsel %vm15987_vm14, %v11115_v54, %v11289_v6  ;;  %vm15558_vm2 = vcmask 130048   ;;  %v4813_v18 = vrot.slane %v9388_v61, 5  ;;  %v3321_v3 = vsel %vm11329_vm8, %v11395_v36, 0 }
  0xe0   : > { %vm15988_vm3 = vcmask 64512   ;;  %v15543_v54 = vrot.slane %v11438_v22, 5  ;;  %v9300_v6 = vcombine.low %v1346_v29, %v1347_v43  ;;  %v3322_v40 = vsel %vm11360_vm7, %v11442_v37, 0  ;;  %4699 = vrot.lane.b32.xlu1 %v4619_v52, %s10026_s18  ;;  %4697 = vrot.lane.b32.xlu0 %v4610_v56, %s10026_s18  ;;  %v11457_v61 = vld [vmem:[#allocation2 + $0x4c] sm:$0xf] }
  0xe1   : > { %v5394_v51 = vsel %vm15988_vm3, %v9298_v32, %v11300_v14  ;;  %vm15555_vm14 = vcmask 195584   ;;  %vm15989_vm13 = vcmask 1042432   ;;  %v15990_v0 = vrot.slane %v11131_v15, 5 }
  0xe2   : > { %v4816_v14 = vsel %vm15989_vm13, %v4813_v18, %v15543_v54  ;;  %vm15991_vm3 = vmmov %vm15989_vm13  ;;  %v3319_v45 = vsel %vm11343_vm4, %v11147_v47, 0  ;;  %v3320_v52 = vsel %vm11380_vm5, %v11388_v57, 0  ;;  %v5445_v32 = vsel %vm15558_vm2, %v5394_v51, %v11323_v41  ;;  %v4312_v51 = vpop.permute.xlu0 %4311 }
  0xe3   : > { %v4814_v29 = vsel %vm15991_vm3, %v15990_v0, %v4813_v18  ;;  %v9406_v56 = vcombine.low %v3321_v3, %v3322_v40  ;;  %v3384_v43 = vsel %vm10128_vm1, %v11388_v57, 0  ;;  %v3385_v15 = vsel %vm10128_vm1, %v11395_v36, 0  ;;  %v4314_v0 = vpop.permute.xlu1 %4313 }
  0xe4   : > { %vm15992_vm13 = vcmask 64512   ;;  %v3386_v47 = vsel %vm10128_vm1, %v11442_v37, 0  ;;  %v3387_v41 = vsel %vm10128_vm1, %v11457_v61, 0  ;;  %v9422_v3 = vcombine.low %v3384_v43, %v3385_v15  ;;  %4849 = vrot.lane.b32.xlu1 %v4816_v14, %s10030_s22  ;;  %4847 = vrot.lane.b32.xlu0 %v4814_v29, %s10030_s22  ;;  %v9924_v43 = vld [vmem:[#allocation2 + $0x80] sm:$0xf] }
  0xe5   : > { %v5400_v18 = vsel %vm15992_vm13, %v9300_v6, %v4163_v23  ;;  %v9405_v40 = vcombine.low %v3319_v45, %v3320_v52  ;;  %v9423_v54 = vcombine.low %v3386_v47, %v3387_v41  ;;  %v1013_v23 = vsel %vm10273_vm15, %v11386_v9, %v10323_v55  ;;  %v11492_v6 = vld [vmem:[#allocation2 + $0xc4] sm:$0xf]  ;;  %v9925_v52 = vld [vmem:[#allocation2 + $0x7c] sm:$0xf] }
  0xe6   : > { %v5127_v8 = vshrl.u32 %v9422_v3, 16  ;;  %v5130_v49 = vshll.u32 %v9422_v3, 16  ;;  %vm11494_vm13 = vcmp.ne.s16.totalorder %v1013_v23, 0  ;;  %v15993_v21 = vmov 0 }
  0xe7   : > { %v15994_v21 = vsel %vm11494_vm13, 4294967295, %v15993_v21  ;;  %v1345_v29 = vsel %vm10371_vm0, %v9924_v43, 0  ;;  %v5136_v15 = vshrl.u32 %v9423_v54, 16  ;;  %v5139_v45 = vshll.u32 %v9423_v54, 16  ;;  %v11507_v9 = vpop.permute.xlu1 %4835  ;;  %v11512_v54 = vpop.permute.xlu0 %4837 }
  0xe8   : > { %15995 = vst [vmem:[#allocation64_spill] sm:$0xff] %v15994_v21  ;;  %v1344_v47 = vsel %vm11494_vm13, %v9925_v52, 0  ;;  %v1425_v55 = vsel %vm10128_vm1, %v11341_v11, 0  ;;  %v5480_v41 = vsel %vm15555_vm14, %v5445_v32, %v11275_v16  ;;  %v5129_v3 = vrot.slane %v5127_v8, 4  ;;  %4966 = vrot.lane.b32.xlu1 %v9406_v56, %s10031_s23  ;;  %4964 = vrot.lane.b32.xlu0 %v9405_v40, %s10031_s23  ;;  %v11517_v16 = vld [vmem:[#allocation2 + $0xc8] sm:$0xf] }
  0xe9   : > { %v5132_v23 = vrot.slane %v5130_v49, 5  ;;  %v1426_v43 = vsel %vm10128_vm1, %v11492_v6, 0  ;;  %v5449_v52 = vsel %vm15558_vm2, %v5400_v18, %v4314_v0  ;;  %v5138_v21 = vrot.slane %v5136_v15, 4  ;;  %v11527_v40 = vld [vmem:[#allocation2 + $0xcc] sm:$0xf] }
  0xea   : > { %v5141_v14 = vrot.slane %v5139_v45, 5  ;;  %v9324_v63 = vcombine.low %v1425_v55, %v1426_v43  ;;  %v9299_v49 = vcombine.low %v1344_v47, %v1345_v29  ;;  %vm15997_vm14 = vcmp.ne.s16.totalorder %v11252_v34, 0 }
  0xeb   : > { %v5133_v8 = vor.u32 %v5132_v23, %v5129_v3  ;;  %v3833_v32 = vsel %vm15997_vm14, %v11388_v57, 0  ;;  %v3834_v5 = vsel %vm11305_vm12, %v11395_v36, 0  ;;  %vm15998_vm2 = vcmask 261120   ;;  %v4951_v45 = vpop.permute.xlu1 %4950  ;;  %v11536_v36 = vpop.permute.xlu0 %4952 }
  0xec   : > { %v11525_v56 = vor.u32 %v5141_v14, %v5138_v21  ;;  %v4096_v18 = vshrl.u32 %v9324_v63, 16  ;;  %v4099_v0 = vshll.u32 %v9324_v63, 16  ;;  %v5515_v15 = vsel %vm15998_vm2, %v5480_v41, %v11247_v53 }
  0xed   : > { %vm15999_vm13 = vsmask.f32 3328  ;;  %v9438_v47 = vcombine.low %v3833_v32, %v3834_v5  ;;  %v1427_v57 = vsel %vm10128_vm1, %v11517_v16, 0  ;;  %vm16000_vm14 = vcmask 195584  }
  0xee   : > { %v5134_v29 = vsel %vm15999_vm13, %v11214_v38, %v5133_v8  ;;  %v5484_v21 = vsel %vm16000_vm14, %v5449_v52, %v11355_v44  ;;  %vm16001_vm3 = vmmov %vm15999_vm13  ;;  %v4098_v53 = vrot.slane %v4096_v18, 4  ;;  %v4101_v14 = vrot.slane %v4099_v0, 5 }
  0xef   : > { %v5143_v63 = vsel %vm16001_vm3, %v5133_v8, %v11525_v56  ;;  %5221 = vrot.lane.b32.xlu0 %v5134_v29, %s10032_s29  ;;  %vm16002_vm2 = vcmask 64512   ;;  %v5337_v5 = vrot.slane %v9438_v47, 5  ;;  %v1428_v55 = vsel %vm10128_vm1, %v11527_v40, 0  ;;  %v11559_v8 = vpop.permute.xlu1 %4954  ;;  %v5208_v0 = vpop.permute.xlu0 %5207 }
  0xf0   : > { %5223 = vrot.lane.b32.xlu1 %v5143_v63, %s10032_s29  ;;  %v5397_v38 = vsel %vm16002_vm2, %v9299_v49, %v11453_v35  ;;  %vm16003_vm13 = vcmp.ne.s16.totalorder %v11298_v39, 0  ;;  %v4102_v41 = vor.u32 %v4101_v14, %v4098_v53  ;;  %vm16004_vm3 = vcmask 130048  }
  0xf1   : > { %v3835_v44 = vsel %vm16003_vm13, %v11442_v37, 0  ;;  %v5447_v3 = vsel %vm16004_vm3, %v5397_v38, %v4312_v51  ;;  %v9325_v23 = vcombine.low %v1427_v57, %v1428_v55  ;;  %v3836_v43 = vsel %vm11313_vm9, %v11457_v61, 0 }
  0xf2   : > { %v16005_v52 = vrot.slane %v11232_v46, 5  ;;  %vm16006_vm14 = vcmask 1042432   ;;  %v11561_v49 = vcombine.low %v3835_v44, %v3836_v43  ;;  %v397_v32 = vadd.s32 152, %v10133_v2 }
  0xf3   : > { %v399_v18 = vadd.s32 168, %v10133_v2  ;;  %vm16007_vm2 = vsmask.f32 3328  ;;  %v4105_v29 = vshrl.u32 %v9325_v23, 16  ;;  %v4108_v47 = vshll.u32 %v9325_v23, 16 }
  0xf4   : > { %v5338_v35 = vsel %vm16006_vm14, %v16005_v52, %v5337_v5  ;;  %v4103_v51 = vsel %vm16007_vm2, %v11245_v17, %v4102_v41  ;;  %v15569_v46 = vrot.slane %v11561_v49, 5  ;;  %v547_v57 = vand.u32 15, %v397_v32 }
  0xf5   : > { %5371 = vrot.lane.b32.xlu0 %v5338_v35, %s10033_s8  ;;  %4176 = vrot.lane.b32.xlu1 %v4103_v51, %s10029_s21  ;;  %v561_v63 = vand.u32 15, %v399_v18  ;;  %v1731_v53 = vrot.slane %v11283_v27, 4  ;;  %vm16008_vm3 = vcmask 326656   ;;  %vm16009_vm14 = vcmask 195584  }
  0xf6   : > { %v5550_v14 = vsel %vm16008_vm3, %v5515_v15, %v11417_v33  ;;  %v5482_v38 = vsel %vm16009_vm14, %v5447_v3, %v11377_v28  ;;  %v4107_v17 = vrot.slane %v4105_v29, 4  ;;  %v4110_v55 = vrot.slane %v4108_v47, 5  ;;  %v11587_v33 = vpop.permute.xlu1 %5209  ;;  %v11589_v15 = vpop.permute.xlu0 %5211 }
  0xf7   : > { %vm16010_vm2 = vcmask 1042432   ;;  %vm1459_vm13 = vcmp.lt.s32.totalorder %v547_v57, 15  ;;  %vm11578_vm9 = vcmp.lt.s32.totalorder %v561_v63, 15  ;;  %v11585_v27 = vsel %vm10224_vm11, %v1731_v53, %v10398_v10 }
  0xf8   : > { %v5340_v44 = vsel %vm16010_vm2, %v5337_v5, %v15569_v46  ;;  %16013 = vst [vmem:[#allocation65_spill] sm:$0xff] %v11585_v27  ;;  %vm16014_vm3 = vcmask 392192   ;;  %v11592_v3 = vor.u32 %v4110_v55, %v4107_v17  ;;  %vm16015_vm14 = vcmask 261120   ;;  %vm1523_vm2 = vmpackc.low %vm1459_vm13, %vm1459_vm13 }
  0xf9   : > { %v5585_v28 = vsel %vm16014_vm3, %v5550_v14, %v4951_v45  ;;  %v5519_v5 = vsel %vm16015_vm14, %v5484_v21, %v11279_v50  ;;  %5373 = vrot.lane.b32.xlu0 %v5340_v44, %s10033_s8  ;;  %v398_v43 = vadd.s32 160, %v10133_v2  ;;  %vm16016_vm12 = vcmask 326656   ;;  %vm1525_vm6 = vmpackc.low %vm11578_vm9, %vm11578_vm9  ;;  %v9906_v21 = vld [vmem:[%s15398_s1 + $0x20] ss:$0 sps:$4 sm:$0xff]  }
  0xfa   : > { %v11600_v52 = vsel %vm16016_vm12, %v5519_v5, %v11512_v54  ;;  %v1555_v45 = vsel %vm1523_vm2, 65537, %v15861_v42  ;;  %vm15582_vm3 = vcmp.ne.s16.totalorder %v11585_v27, 0  ;;  %vm16017_vm10 = vmmov %vm16015_vm14  ;;  %vm16018_vm13 = vsmask.f32 3328  ;;  %v5358_v57 = vpop.permute.xlu1 %5357  ;;  %v11619_v63 = vpop.permute.xlu0 %5359 }
  0xfb   : > { %v5517_v50 = vsel %vm16017_vm10, %v5482_v38, %v11241_v26  ;;  %v4112_v35 = vsel %vm16018_vm13, %v4102_v41, %v11592_v3  ;;  %v1557_v54 = vsel %vm1525_vm6, 65537, %v15861_v42  ;;  %v1742_v32 = vshrl.u32 %v1555_v45, 16  ;;  %v9907_v26 = vld [vmem:[%s15398_s1 + $0x18] sm:$0xff]  }
  0xfc   : > { %v1745_v18 = vshll.u32 %v1555_v45, 16  ;;  %4178 = vrot.lane.b32.xlu1 %v4112_v35, %s10029_s21  ;;  %v1760_v51 = vshrl.u32 %v1557_v54, 16  ;;  %v1763_v29 = vshll.u32 %v1557_v54, 16  ;;  %vm15581_vm12 = vcmask 457728  }
  0xfd   : > { %v554_v47 = vand.u32 15, %v398_v43  ;;  %v1744_v53 = vrot.slane %v1742_v32, 7  ;;  %vm16019_vm10 = vcmask 326656   ;;  %vm5916_vm6 = vcmask 1043456  }
  0xfe   : > { %v5552_v41 = vsel %vm16019_vm10, %v5517_v50, %v11507_v9  ;;  %v396_v14 = vadd.s32 144, %v10133_v2  ;;  %v11624_v38 = vrot.slane %v1760_v51, 7  ;;  %v1909_v17 = vsel %vm15582_vm3, %v11341_v11, 0  ;;  %9851 = vmatprep.subr.msk.bf16.mxu0 %vm5916_vm6, %v9906_v21  ;;  %v11636_v11 = vpop.permute.xlu1 %4164  ;;  %v11641_v35 = vpop.permute.xlu0 %5361  ;;  %v16025_v51 = vld [vmem:[#allocation31_spill] sm:$0xff] }
  0xff   : > { %vm879_vm9 = vcmp.ge.s32.totalorder %v554_v47, 1  ;;  %v5918_v55 = vsel %vm5916_vm6, %v9906_v21, 0  ;;  %v1747_v44 = vor.u32 %v1745_v18, %v1744_v53  ;;  %v1749_v23 = vrot.slane %v1744_v53, 4  ;;  %v9908_v21 = vld [vmem:[%s15398_s1 + $0x10] sm:$0xff]  }
 0x100   : > { %vm16020_vm14 = vcmask 392192   ;;  %vm943_vm2 = vmpackc.low %vm879_vm9, %vm879_vm9  ;;  %v5620_v9 = vsel %vm15581_vm12, %v5585_v28, %v5208_v0  ;;  %9758 = vmatpush3.bf16.msra.mxu0 %v5918_v55  ;;  %v1765_v43 = vor.u32 %v1763_v29, %v11624_v38  ;;  %vm15568_vm13 = vcmask 523264   ;;  %v16026_v29 = vld [vmem:[#allocation30_spill] sm:$0xff] }
 0x101   : > { %v11631_v5 = vsel %vm16020_vm14, %v5552_v41, %v11536_v36  ;;  %v975_v45 = vsel %vm943_vm2, 65537, %v15861_v42  ;;  %v540_v50 = vand.u32 15, %v396_v14  ;;  %9759 = vmatprep.subr.bf16.mxu0 %v9907_v26  ;;  %v1748_v36 = vsel %vm10224_vm11, %v10412_v30, %v1747_v44 }
 0x102   : > { %v11649_v0 = vsel %vm10224_vm11, %v1749_v23, %v10398_v10  ;;  %v1190_v28 = vshll.u32 %v975_v45, 16  ;;  %v1194_v54 = vshrl.u32 %v975_v45, 16  ;;  %v1766_v32 = vsel %vm10224_vm11, %v10412_v30, %v1765_v43 }
 0x103   : > { %16021 = vst [vmem:[#allocation66_spill] sm:$0xff] %v11649_v0  ;;  %vm11654_vm10 = vcmp.ne.s16.totalorder %v1748_v36, 0  ;;  %v16022_v18 = vmov 0  ;;  %vm15570_vm6 = vcmp.ne.s16.totalorder %v11649_v0, 0  ;;  %v9374_v47 = vcombine.low %v16026_v29, %v16025_v51  ;;  %v11677_v36 = vpop.permute.xlu1 %4166 }
 0x104   : > { %v16023_v18 = vsel %vm11654_vm10, 4294967295, %v16022_v18  ;;  %vm11661_vm9 = vcmp.ne.s16.totalorder %v1766_v32, 0  ;;  %v16027_v53 = vmov 0  ;;  %v1910_v41 = vsel %vm11654_vm10, %v11492_v6, 0  ;;  %9760 = vmatpush3.bf16.msra.mxu0 %v9907_v26  ;;  %v9909_v32 = vld [vmem:[%s15398_s1 + $0x8] sm:$0xff]  }
 0x105   : > { %16024 = vst [vmem:[#allocation67_spill] sm:$0xff] %v16023_v18  ;;  %v16028_v53 = vsel %vm11661_vm9, 4294967295, %v16027_v53  ;;  %v1911_v14 = vsel %vm15570_vm6, %v11517_v16, 0  ;;  %v1192_v55 = vrot.slane %v1190_v28, 5  ;;  %v1912_v44 = vsel %vm11661_vm9, %v11527_v40, 0  ;;  %9761 = vmatprep.subr.bf16.mxu0 %v9908_v21 }
 0x106   : > { %16029 = vst [vmem:[#allocation31_spill] sm:$0xff] %v16028_v53  ;;  %v9340_v23 = vcombine.low %v1909_v17, %v1910_v41  ;;  %v1196_v43 = vrot.slane %v1194_v54, 4  ;;  %v11675_v45 = vsel %vm15568_vm13, %v5620_v9, %v5358_v57  ;;  %v11682_v51 = vcombine.low %v1911_v14, %v1912_v44  ;;  %v16031_v17 = vld [vmem:[#allocation33_spill] sm:$0xff]  ;;  %v11689_v54 = vpop.permute.xlu0 %4315  ;;  %v9910_v14 = vld [vmem:[%s15398_s1] sm:$0xff]  }
 0x107   : > { %v1193_v26 = vsel %vm10273_vm15, %v10251_v62, %v1192_v55  ;;  %vm877_vm14 = vcmp.ge.s32.totalorder %v540_v50, 1  ;;  %v9375_v28 = vcombine.low %v16031_v17, %v10770_v31  ;;  %v16032_v29 = vmov 0  ;;  %v11703_v17 = vpop.permute.xlu1 %4317 }
 0x108   : > { %16030 = vst [vmem:[#allocation30_spill] sm:$0xff] %v11682_v51  ;;  %v4293_v57 = vrot.slane %v9340_v23, 5  ;;  %v1197_v9 = vor.u32 %v1196_v43, %v1192_v55  ;;  %vm11691_vm2 = vcmp.ne.s16.totalorder %v1193_v26, 0  ;;  %vm941_vm13 = vmpackc.low %vm877_vm14, %vm877_vm14  ;;  %v4621_v41 = vshrl.u32 %v9374_v47, 16  ;;  %9762 = vmatpush3.bf16.msra.mxu0 %v9908_v21  ;;  %v11712_v21 = vld [vmem:[#allocation2 + $0xd0] sm:$0xf] }
 0x109   : > { %v16033_v29 = vsel %vm11691_vm2, 4294967295, %v16032_v29  ;;  %v2363_v44 = vsel %vm11691_vm2, %v11527_v40, 0  ;;  %v973_v50 = vsel %vm941_vm13, 65537, %v15861_v42  ;;  %v4624_v46 = vshll.u32 %v9374_v47, 16  ;;  %9763 = vmatprep.subr.bf16.mxu0 %v9909_v32 }
 0x10a   : > { %16034 = vst [vmem:[#allocation33_spill] sm:$0xff] %v16033_v29  ;;  %v16035_v31 = vrot.slane %v11336_v7, 5  ;;  %vm16036_vm6 = vcmask 1042432   ;;  %v1198_v23 = vrot.slane %v1197_v9, 4  ;;  %v1170_v43 = vshll.u32 %v973_v50, 16  ;;  %v11718_v4 = vpop.permute.xlu0 %4432 }
 0x10b   : > { %v1174_v26 = vshrl.u32 %v973_v50, 16  ;;  %v16037_v40 = vrot.slane %v11682_v51, 5  ;;  %vm16038_vm14 = vmmov %vm16036_vm6  ;;  %v4623_v7 = vrot.slane %v4621_v41, 4  ;;  %v4626_v47 = vrot.slane %v4624_v46, 5 }
 0x10c   : > { %v4294_v55 = vsel %vm16036_vm6, %v16035_v31, %v4293_v57  ;;  %v4630_v9 = vshrl.u32 %v9375_v28, 16  ;;  %v1203_v50 = vsel %vm10273_vm15, %v1198_v23, %v10164_v12  ;;  %v1172_v31 = vrot.slane %v1170_v43, 5  ;;  %9764 = vmatpush3.bf16.msra.mxu0 %v9909_v32 }
 0x10d   : > { %v4296_v39 = vsel %vm16038_vm14, %v4293_v57, %v16037_v40  ;;  %4327 = vrot.lane.b32.xlu0 %v4294_v55, %s10027_s19  ;;  %v1176_v24 = vrot.slane %v1174_v26, 4  ;;  %v4633_v34 = vshll.u32 %v9375_v28, 16  ;;  %vm11720_vm13 = vcmp.ne.s16.totalorder %v1203_v50, 0  ;;  %v11731_v26 = vld [vmem:[#allocation2 + $0x50] sm:$0xf]  ;;  %9765 = vmatprep.subr.bf16.mxu0 %v9910_v14  ;;  %v11733_v40 = vpop.permute.xlu1 %4434 }
 0x10e   : > { %4329 = vrot.lane.b32.xlu1 %v4296_v39, %s10027_s19  ;;  %v16039_v57 = vmov 0  ;;  %v5705_v55 = vshrl.u32 %v11675_v45, 16  ;;  %v4627_v41 = vor.u32 %v4626_v47, %v4623_v7  ;;  %v4632_v46 = vrot.slane %v4630_v9, 4  ;;  %v11742_v9 = vld [vmem:[#allocation2 + $0x54] sm:$0xf]  ;;  %v11750_v13 = vpop.permute.xlu0 %4689 }
 0x10f   : > { %v16040_v57 = vsel %vm11720_vm13, 4294967295, %v16039_v57  ;;  %v2364_v39 = vsel %vm11720_vm13, %v11712_v21, 0  ;;  %v1173_v23 = vsel %vm10273_vm15, %v10251_v62, %v1172_v31  ;;  %v1177_v28 = vor.u32 %v1176_v24, %v1172_v31 }
 0x110   : > { %16041 = vst [vmem:[#allocation68_spill] sm:$0xff] %v16040_v57  ;;  %v4635_v43 = vrot.slane %v4633_v34, 5  ;;  %vm16042_vm6 = vcmask 392192   ;;  %v9358_v32 = vcombine.low %v2363_v44, %v2364_v39  ;;  %vm11738_vm14 = vcmp.ne.s16.totalorder %v1173_v23, 0  ;;  %9766 = vmatpush3.bf16.msra.mxu0 %v9910_v14 }
 0x111   : > { %v5589_v7 = vsel %vm16042_vm6, %v11600_v52, %v11559_v8  ;;  %v16043_v47 = vmov 0  ;;  %v5622_v34 = vsel %vm15581_vm12, %v11631_v5, %v11587_v33  ;;  %v5708_v24 = vshll.u32 %v11675_v45, 16  ;;  %8750 = vmatprep.subr.bf16.mxu0 %v15861_v42 }
 0x112   : > { %v16044_v47 = vsel %vm11738_vm14, 4294967295, %v16043_v47  ;;  %v1178_v50 = vrot.slane %v1177_v28, 4  ;;  %v11748_v31 = vor.u32 %v4635_v43, %v4632_v46  ;;  %4446 = vrot.lane.b32.xlu1 %v9358_v32, %s10028_s20  ;;  %v11753_v8 = vrot.slane %v5705_v55, 3  ;;  %v11775_v46 = vpop.permute.xlu1 %4691 }
 0x113   : > { %16045 = vst [vmem:[#allocation69_spill] sm:$0xff] %v16044_v47  ;;  %v2809_v52 = vsel %vm15582_vm3, %v11442_v37, 0  ;;  %v2810_v44 = vsel %vm11654_vm10, %v11457_v61, 0  ;;  %vm16047_vm6 = vcmp.ne.s16.totalorder %v11649_v0, 0  ;;  %v2361_v45 = vsel %vm11738_vm14, %v11492_v6, 0 }
 0x114   : > { %16046 = vst [vmem:[#allocation70_spill] sm:$0xff] %v11748_v31  ;;  %v2811_v33 = vsel %vm16047_vm6, %v11731_v26, 0  ;;  %v1183_v5 = vsel %vm10273_vm15, %v1178_v50, %v10164_v12  ;;  %vm16048_vm12 = vsmask.f32 3328  ;;  %v2812_v55 = vsel %vm11661_vm9, %v11742_v9, 0 }
 0x115   : > { %v4637_v37 = vsel %vm16048_vm12, %v4627_v41, %v11748_v31  ;;  %vm11778_vm6 = vcmp.ne.s16.totalorder %v1183_v5, 0  ;;  %v16049_v14 = vmov 0  ;;  %v9390_v39 = vcombine.low %v2809_v52, %v2810_v44  ;;  %v11793_v5 = vpop.permute.xlu0 %4839 }
 0x116   : > { %v16050_v14 = vsel %vm11778_vm6, 4294967295, %v16049_v14  ;;  %v11782_v23 = vcombine.low %v2811_v33, %v2812_v55  ;;  %vm16053_vm3 = vcmask 523264   ;;  %v11786_v28 = vrot.slane %v5708_v24, 4  ;;  %4703 = vrot.lane.b32.xlu1 %v4637_v37, %s10026_s18  ;;  %v9927_v55 = vld [vmem:[#allocation2 + $0x90] sm:$0xf]  ;;  %v11808_v37 = vpop.permute.xlu1 %4841 }
 0x117   : > { %16051 = vst [vmem:[#allocation71_spill] sm:$0xff] %v16050_v14  ;;  %v5657_v6 = vsel %vm16053_vm3, %v5622_v34, %v11619_v63  ;;  %v2362_v43 = vsel %vm11778_vm6, %v11517_v16, 0  ;;  %vm16054_vm12 = vcmask 457728   ;;  %v4817_v52 = vrot.slane %v9390_v39, 5  ;;  %v9926_v63 = vld [vmem:[#allocation2 + $0x8c] sm:$0xf] }
 0x118   : > { %16052 = vst [vmem:[#allocation72_spill] sm:$0xff] %v11782_v23  ;;  %v5624_v32 = vsel %vm16054_vm12, %v5589_v7, %v11589_v15  ;;  %v5712_v50 = vshrl.u32 %v5657_v6, 16  ;;  %v9357_v31 = vcombine.low %v2361_v45, %v2362_v43  ;;  %v15595_v44 = vrot.slane %v11782_v23, 5  ;;  %v16055_v34 = vld [vmem:[#allocation39_spill] sm:$0xff]  ;;  %v11803_v7 = vld [vmem:[#allocation2 + $0x58] sm:$0xf] }
 0x119   : > { %v5715_v33 = vshll.u32 %v5657_v6, 16  ;;  %vm16056_vm3 = vnez %v16055_v34  ;;  %vm16058_vm0 = vnez %v16057_v58  ;;  %vm16059_vm12 = vsmask.f32 3328  ;;  %v9928_v6 = vld [vmem:[#allocation2 + $0x94] sm:$0xf] }
 0x11a   : > { %v1348_v24 = vsel %vm16056_vm3, %v9926_v63, 0  ;;  %v1349_v16 = vsel %vm16058_vm0, %v9927_v55, 0  ;;  %v4628_v15 = vsel %vm16059_vm12, %v11384_v59, %v4627_v41  ;;  %v3325_v45 = vsel %vm11691_vm2, %v11742_v9, 0  ;;  %4444 = vrot.lane.b32.xlu0 %v9357_v31, %s10028_s20  ;;  %v16061_v43 = vld [vmem:[#allocation37_spill] sm:$0xff]  ;;  %v9929_v34 = vld [vmem:[#allocation2 + $0x98] sm:$0xf] }
 0x11b   : > { %vm16060_vm3 = vcmask 1042432   ;;  %vm16062_vm0 = vnez %v16061_v43  ;;  %v3326_v59 = vsel %vm11720_vm13, %v11803_v7, 0  ;;  %vm16063_vm12 = vcmask 523264   ;;  %v16064_v58 = vld [vmem:[#allocation41_spill] sm:$0xff] }
 0x11c   : > { %v4820_v39 = vsel %vm16060_vm3, %v4817_v52, %v15595_v44  ;;  %v1350_v63 = vsel %vm16062_vm0, %v9928_v6, 0  ;;  %v5659_v41 = vsel %vm16063_vm12, %v5624_v32, %v11641_v35  ;;  %v5714_v55 = vrot.slane %v5712_v50, 3  ;;  %v11825_v44 = vpop.permute.xlu0 %4956 }
 0x11d   : > { %vm16065_vm2 = vnez %v16064_v58  ;;  %v5720_v29 = vshrl.u32 %v5659_v41, 16  ;;  %v5723_v23 = vshll.u32 %v5659_v41, 16  ;;  %16066 = vst [vmem:[#allocation73_spill] sm:$0xff] %v11825_v44  ;;  %4853 = vrot.lane.b32.xlu1 %v4820_v39, %s10030_s22  ;;  %v5717_v6 = vrot.slane %v5715_v33, 4  ;;  %v11840_v33 = vpop.permute.xlu1 %4958 }
 0x11e   : > { %v1351_v31 = vsel %vm16065_vm2, %v9929_v34, 0  ;;  %v16067_v43 = vrot.slane %v11438_v22, 5  ;;  %v9408_v51 = vcombine.low %v3325_v45, %v3326_v59  ;;  %v3388_v35 = vsel %vm10128_vm1, %v11731_v26, 0  ;;  %4701 = vrot.lane.b32.xlu0 %v4628_v15, %s10026_s18 }
 0x11f   : > { %v5722_v32 = vrot.slane %v5720_v29, 3  ;;  %v5725_v50 = vrot.slane %v5723_v23, 4  ;;  %v3323_v34 = vsel %vm11738_vm14, %v11457_v61, 0  ;;  %v3389_v39 = vsel %vm10128_vm1, %v11742_v9, 0 }
 0x120   : > { %v4818_v57 = vsel %vm16060_vm3, %v16067_v43, %v4817_v52  ;;  %v3324_v22 = vsel %vm11778_vm6, %v11731_v26, 0  ;;  %v3390_v29 = vsel %vm10128_vm1, %v11803_v7, 0  ;;  %v3391_v61 = vsel %vm10128_vm1, %v11823_v25, 0  ;;  %v11856_v43 = vld [vmem:[#allocation2 + $0xd4] sm:$0xf]  ;;  %v11858_v59 = vpop.permute.xlu0 %5213 }
 0x121   : > { %v9424_v23 = vcombine.low %v3388_v35, %v3389_v39  ;;  %v11852_v52 = vor.u32 %v5725_v50, %v5722_v32  ;;  %v9425_v45 = vcombine.low %v3390_v29, %v3391_v61  ;;  %vm15603_vm12 = vsmask.f32 4352  ;;  %4970 = vrot.lane.b32.xlu1 %v9408_v51, %s10031_s23  ;;  %v11864_v50 = vpop.permute.xlu1 %5215  ;;  %v11872_v29 = vld [vmem:[#allocation2 + $0xd8] sm:$0xf]  ;;  %v11874_v61 = vld [vmem:[#allocation2 + $0xdc] sm:$0xf] }
 0x122   : > { %v5711_v15 = vor.u32 %v11786_v28, %v11753_v8  ;;  %v5718_v14 = vor.u32 %v5717_v6, %v5714_v55  ;;  %vm15604_vm3 = vcmask 588800   ;;  %v9407_v47 = vcombine.low %v3323_v34, %v3324_v22  ;;  %4851 = vrot.lane.b32.xlu0 %v4818_v57, %s10030_s22 }
 0x123   : > { %v5145_v41 = vshrl.u32 %v9424_v23, 16  ;;  %v5148_v58 = vshll.u32 %v9424_v23, 16  ;;  %v5154_v44 = vshrl.u32 %v9425_v45, 16  ;;  %v5157_v35 = vshll.u32 %v9425_v45, 16 }
 0x124   : > { %v1429_v32 = vsel %vm10128_vm1, %v11712_v21, 0  ;;  %v5719_v39 = vsel %vm15603_vm12, %v5711_v15, %v5718_v14  ;;  %v1430_v51 = vsel %vm10128_vm1, %v11856_v43, 0  ;;  %v9301_v55 = vcombine.low %v1348_v24, %v1349_v16  ;;  %v11881_v15 = vpop.permute.xlu0 %5363 }
 0x125   : > { %v5147_v8 = vrot.slane %v5145_v41, 4  ;;  %v5150_v28 = vrot.slane %v5148_v58, 5  ;;  %v5156_v6 = vrot.slane %v5154_v44, 4  ;;  %v5159_v34 = vrot.slane %v5157_v35, 5  ;;  %9767 = vmatprep.mubr.msk.bf16.mxu0 %vm15604_vm3, %v5719_v39 }
 0x126   : > { %v9326_v22 = vcombine.low %v1429_v32, %v1430_v51  ;;  %v9302_v23 = vcombine.low %v1350_v63, %v1351_v31  ;;  %v5727_v58 = vsel %vm15603_vm12, %v5718_v14, %v11852_v52  ;;  %vm16068_vm2 = vcmp.ne.s16.totalorder %v11585_v27, 0  ;;  %v11889_v31 = vpop.permute.xlu1 %4168  ;;  %4968 = vrot.lane.b32.xlu0 %v9407_v47, %s10031_s23 }
 0x127   : > { %v5151_v57 = vor.u32 %v5150_v28, %v5147_v8  ;;  %v3837_v45 = vsel %vm16068_vm2, %v11731_v26, 0  ;;  %v11883_v44 = vor.u32 %v5159_v34, %v5156_v6  ;;  %9768 = vmatmul.mubr.msk.bf16.vlgmr.msra.gmra.mxu0 %vm15604_vm3, %v5727_v58  ;;  %v3838_v63 = vsel %vm11654_vm10, %v11742_v9, 0 }
 0x128   : > { %v4114_v24 = vshrl.u32 %v9326_v22, 16  ;;  %v4117_v16 = vshll.u32 %v9326_v22, 16  ;;  %vm16069_vm12 = vsmask.f32 3328  ;;  %v9440_v26 = vcombine.low %v3837_v45, %v3838_v63 }
 0x129   : > { %v5152_v14 = vsel %vm16069_vm12, %v11525_v56, %v5151_v57  ;;  %v1431_v41 = vsel %vm10128_vm1, %v11872_v29, 0  ;;  %v1432_v35 = vsel %vm10128_vm1, %v11874_v61, 0  ;;  %vm16070_vm2 = vmmov %vm16069_vm12  ;;  %vm16071_vm3 = vcmask 64512  }
 0x12a   : > { %v5161_v32 = vsel %vm16070_vm2, %v5151_v57, %v11883_v44  ;;  %v4116_v9 = vrot.slane %v4114_v24, 4  ;;  %v4119_v8 = vrot.slane %v4117_v16, 5  ;;  %v9327_v28 = vcombine.low %v1431_v41, %v1432_v35  ;;  %vm16072_vm12 = vmmov %vm16071_vm3  ;;  %v11913_v58 = vpop.permute.xlu1 %4170  ;;  %5225 = vrot.lane.b32.xlu0 %v5152_v14, %s10032_s29  ;;  %v11923_v24 = vpop.permute.xlu0 %5365 }
 0x12b   : > { %v5403_v47 = vsel %vm16071_vm3, %v9301_v55, %v11636_v11  ;;  %v5406_v56 = vsel %vm16072_vm12, %v9302_v23, %v11677_v36  ;;  %5227 = vrot.lane.b32.xlu1 %v5161_v32, %s10032_s29  ;;  %v5341_v39 = vrot.slane %v9440_v26, 5  ;;  %vm16073_vm10 = vcmp.ne.s16.totalorder %v11649_v0, 0  ;;  %v12032_v0 = vld [vmem:[#allocation2 + $0xe0] sm:$0xf] }
 0x12c   : > { %v3839_v51 = vsel %vm16073_vm10, %v11803_v7, 0  ;;  %v4120_v6 = vor.u32 %v4119_v8, %v4116_v9  ;;  %v4123_v34 = vshrl.u32 %v9327_v28, 16  ;;  %v4126_v22 = vshll.u32 %v9327_v28, 16  ;;  %vm16076_vm10 = vmmov %vm16070_vm2 }
 0x12d   : > { %v3840_v57 = vsel %vm11661_vm9, %v11823_v25, 0  ;;  %v16074_v11 = vrot.slane %v11561_v49, 5  ;;  %vm16075_vm3 = vcmask 1042432   ;;  %v401_v23 = vadd.s32 184, %v10133_v2 }
 0x12e   : > { %v11919_v55 = vcombine.low %v3839_v51, %v3840_v57  ;;  %v403_v45 = vadd.s32 200, %v10133_v2  ;;  %v4121_v16 = vsel %vm16076_vm10, %v11592_v3, %v4120_v6  ;;  %v4125_v63 = vrot.slane %v4123_v34, 4  ;;  %v11964_v34 = vpop.permute.xlu0 %4319 }
 0x12f   : > { %v5342_v36 = vsel %vm16075_vm3, %v16074_v11, %v5341_v39  ;;  %v4128_v26 = vrot.slane %v4126_v22, 5  ;;  %v1767_v41 = vrot.slane %v11624_v38, 4  ;;  %vm16077_vm2 = vcmask 130048   ;;  %4180 = vrot.lane.b32.xlu1 %v4121_v16, %s10029_s21 }
 0x130   : > { %v5453_v49 = vsel %vm16077_vm2, %v5406_v56, %v11703_v17  ;;  %v15613_v14 = vrot.slane %v11919_v55, 5  ;;  %v575_v35 = vand.u32 15, %v401_v23  ;;  %v589_v32 = vand.u32 15, %v403_v45  ;;  %vm16078_vm12 = vmmov %vm16077_vm2  ;;  %5375 = vrot.lane.b32.xlu0 %v5342_v36, %s10033_s8  ;;  %v16086_v23 = vld [vmem:[#allocation40_spill] sm:$0xff]  ;;  %v16087_v45 = vld [vmem:[#allocation38_spill] sm:$0xff] }
 0x131   : > { %v5451_v9 = vsel %vm16078_vm12, %v5403_v47, %v11689_v54  ;;  %v11934_v8 = vor.u32 %v4128_v26, %v4125_v63  ;;  %v11939_v3 = vsel %vm10224_vm11, %v1767_v41, %v10398_v10  ;;  %v402_v38 = vadd.s32 192, %v10133_v2 }
 0x132   : > { %16079 = vst [vmem:[#allocation74_spill] sm:$0xff] %v11939_v3  ;;  %vm16080_vm3 = vcmask 195584   ;;  %vm1463_vm2 = vcmp.lt.s32.totalorder %v575_v35, 15  ;;  %vm1465_vm9 = vcmp.lt.s32.totalorder %v589_v32, 15  ;;  %vm16082_vm12 = vcmask 261120  }
 0x133   : > { %v5488_v17 = vsel %vm16080_vm3, %v5453_v49, %v11733_v40  ;;  %vm16081_vm10 = vmmov %vm16080_vm3  ;;  %vm16083_vm0 = vsmask.f32 3328  ;;  %vm16084_vm13 = vcmask 1042432   ;;  %v582_v51 = vand.u32 15, %v402_v38  ;;  %v11954_v40 = vpop.permute.xlu1 %4321 }
 0x134   : > { %v5486_v28 = vsel %vm16081_vm10, %v5451_v9, %v11718_v4  ;;  %v5523_v54 = vsel %vm16082_vm12, %v5488_v17, %v11775_v46  ;;  %v4130_v47 = vsel %vm16083_vm0, %v4120_v6, %v11934_v8  ;;  %v5344_v56 = vsel %vm16084_vm13, %v5341_v39, %v15613_v14  ;;  %vm1527_vm6 = vmpackc.low %vm1463_vm2, %vm1463_vm2 }
 0x135   : > { %4182 = vrot.lane.b32.xlu1 %v4130_v47, %s10029_s21  ;;  %vm16085_vm3 = vmmov %vm16082_vm12  ;;  %v1559_v46 = vsel %vm1527_vm6, 65537, %v15861_v42  ;;  %vm15617_vm12 = vcmp.ne.s16.totalorder %v11939_v3, 0  ;;  %v400_v6 = vadd.s32 176, %v10133_v2  ;;  %vm883_vm0 = vcmp.ge.s32.totalorder %v582_v51, 1  ;;  %5377 = vrot.lane.b32.xlu0 %v5344_v56, %s10033_s8 }
 0x136   : > { %v11959_v4 = vsel %vm16085_vm3, %v5486_v28, %v11750_v13  ;;  %vm1529_vm10 = vmpackc.low %vm1465_vm9, %vm1465_vm9  ;;  %v1778_v22 = vshrl.u32 %v1559_v46, 16  ;;  %v1781_v57 = vshll.u32 %v1559_v46, 16  ;;  %v9376_v16 = vcombine.low %v16087_v45, %v16086_v23  ;;  %v11984_v46 = vpop.permute.xlu0 %4436 }
 0x137   : > { %v1561_v39 = vsel %vm1529_vm10, 65537, %v15861_v42  ;;  %vm947_vm13 = vmpackc.low %vm883_vm0, %vm883_vm0  ;;  %v568_v13 = vand.u32 15, %v400_v6  ;;  %vm16088_vm9 = vcmask 326656   ;;  %v1913_v41 = vsel %vm15617_vm12, %v11712_v21, 0  ;;  %v11978_v35 = vpop.permute.xlu1 %4438 }
 0x138   : > { %v1796_v11 = vshrl.u32 %v1561_v39, 16  ;;  %v1799_v36 = vshll.u32 %v1561_v39, 16  ;;  %v11972_v63 = vsel %vm16088_vm9, %v5523_v54, %v11808_v37  ;;  %v1780_v26 = vrot.slane %v1778_v22, 7 }
 0x139   : > { %v979_v49 = vsel %vm947_vm13, 65537, %v15861_v42  ;;  %vm881_vm6 = vcmp.ge.s32.totalorder %v568_v13, 1  ;;  %v4639_v47 = vshrl.u32 %v9376_v16, 16  ;;  %v4642_v37 = vshll.u32 %v9376_v16, 16 }
 0x13a   : > { %v11980_v32 = vrot.slane %v1796_v11, 7  ;;  %v1230_v9 = vshll.u32 %v979_v49, 16  ;;  %v1234_v38 = vshrl.u32 %v979_v49, 16  ;;  %v1783_v17 = vor.u32 %v1781_v57, %v1780_v26  ;;  %vm945_vm2 = vmpackc.low %vm881_vm6, %vm881_vm6 }
 0x13b   : > { %v1785_v28 = vrot.slane %v1780_v26, 4  ;;  %v977_v21 = vsel %vm945_vm2, 65537, %v15861_v42  ;;  %v11994_v11 = vpop.permute.xlu1 %4695  ;;  %v16090_v13 = vmov 0  ;;  %v16093_v45 = vmov 0 }
 0x13c   : > { %v1801_v54 = vor.u32 %v1799_v36, %v11980_v32  ;;  %v1232_v56 = vrot.slane %v1230_v9, 5  ;;  %v1236_v51 = vrot.slane %v1234_v38, 4  ;;  %v1784_v6 = vsel %vm10224_vm11, %v10412_v30, %v1783_v17 }
 0x13d   : > { %v11992_v39 = vsel %vm10224_vm11, %v1785_v28, %v10398_v10  ;;  %v1210_v22 = vshll.u32 %v977_v21, 16  ;;  %v1214_v57 = vshrl.u32 %v977_v21, 16  ;;  %vm11999_vm3 = vcmp.ne.s16.totalorder %v1784_v6, 0 }
 0x13e   : > { %16089 = vst [vmem:[#allocation40_spill] sm:$0xff] %v11992_v39  ;;  %v1802_v36 = vsel %vm10224_vm11, %v10412_v30, %v1801_v54  ;;  %v16091_v13 = vsel %vm11999_vm3, 4294967295, %v16090_v13  ;;  %vm15616_vm10 = vcmp.ne.s16.totalorder %v11992_v39, 0  ;;  %v1233_v23 = vsel %vm10273_vm15, %v10251_v62, %v1232_v56  ;;  %v12024_v54 = vpop.permute.xlu0 %4693 }
 0x13f   : > { %16092 = vst [vmem:[#allocation38_spill] sm:$0xff] %v16091_v13  ;;  %vm12007_vm0 = vcmp.ne.s16.totalorder %v1802_v36, 0  ;;  %v1914_v16 = vsel %vm11999_vm3, %v11856_v43, 0  ;;  %v1915_v26 = vsel %vm15616_vm10, %v11872_v29, 0  ;;  %v1237_v49 = vor.u32 %v1236_v51, %v1232_v56  ;;  %v12030_v56 = vpop.permute.xlu1 %4845 }
 0x140   : > { %v16094_v45 = vsel %vm12007_vm0, 4294967295, %v16093_v45  ;;  %v1916_v9 = vsel %vm12007_vm0, %v11874_v61, 0  ;;  %v9342_v38 = vcombine.low %v1913_v41, %v1914_v16  ;;  %vm12020_vm13 = vcmp.ne.s16.totalorder %v1233_v23, 0 }
 0x141   : > { %16095 = vst [vmem:[#allocation75_spill] sm:$0xff] %v16094_v45  ;;  %v16096_v17 = vmov 0  ;;  %v1212_v28 = vrot.slane %v1210_v22, 5  ;;  %v12026_v21 = vcombine.low %v1915_v26, %v1916_v9  ;;  %v1238_v6 = vrot.slane %v1237_v49, 4  ;;  %v16099_v49 = vld [vmem:[#allocation30_spill] sm:$0xff] }
 0x142   : > { %v16097_v17 = vsel %vm12020_vm13, 4294967295, %v16096_v17  ;;  %v1216_v36 = vrot.slane %v1214_v57, 4  ;;  %v9377_v14 = vcombine.low %v11066_v20, %v11113_v60  ;;  %v4297_v51 = vrot.slane %v9342_v38, 5  ;;  %v12058_v16 = vpop.permute.xlu0 %4843 }
 0x143   : > { %16098 = vst [vmem:[#allocation76_spill] sm:$0xff] %v16097_v17  ;;  %v2367_v41 = vsel %vm12020_vm13, %v11874_v61, 0  ;;  %v1213_v22 = vsel %vm10273_vm15, %v10251_v62, %v1212_v28  ;;  %v4641_v23 = vrot.slane %v4639_v47, 4  ;;  %v1243_v20 = vsel %vm10273_vm15, %v1238_v6, %v10164_v12  ;;  %v16137_v17 = vld [vmem:[#allocation72_spill] sm:$0xff] }
 0x144   : > { %v1217_v60 = vor.u32 %v1216_v36, %v1212_v28  ;;  %v4644_v57 = vrot.slane %v4642_v37, 5  ;;  %v5556_v26 = vsel %vm16088_vm9, %v11959_v4, %v11793_v5  ;;  %v16100_v9 = vrot.slane %v16099_v49, 5  ;;  %v12067_v36 = vpop.permute.xlu1 %4962  ;;  %v16111_v49 = vld [vmem:[#allocation73_spill] sm:$0xff] }
 0x145   : > { %vm16101_vm6 = vcmask 1042432   ;;  %vm12050_vm2 = vcmp.ne.s16.totalorder %v1243_v20, 0  ;;  %v16102_v38 = vmov 0  ;;  %vm12054_vm10 = vcmp.ne.s16.totalorder %v1213_v22, 0 }
 0x146   : > { %v4298_v61 = vsel %vm16101_vm6, %v16100_v9, %v4297_v51  ;;  %v16103_v38 = vsel %vm12050_vm2, 4294967295, %v16102_v38  ;;  %v16105_v47 = vmov 0  ;;  %v16108_v37 = vrot.slane %v12026_v21, 5  ;;  %vm16109_vm12 = vmmov %vm16101_vm6 }
 0x147   : > { %16104 = vst [vmem:[#allocation30_spill] sm:$0xff] %v16103_v38  ;;  %v16106_v47 = vsel %vm12054_vm10, 4294967295, %v16105_v47  ;;  %4331 = vrot.lane.b32.xlu0 %v4298_v61, %s10027_s19  ;;  %v2368_v5 = vsel %vm12050_vm2, %v12032_v0, 0  ;;  %v1218_v4 = vrot.slane %v1217_v60, 4  ;;  %v4648_v6 = vshrl.u32 %v9377_v14, 16 }
 0x148   : > { %16107 = vst [vmem:[#allocation77_spill] sm:$0xff] %v16106_v47  ;;  %v4300_v28 = vsel %vm16109_vm12, %v4297_v51, %v16108_v37  ;;  %vm16110_vm9 = vcmask 392192   ;;  %v9360_v20 = vcombine.low %v2367_v41, %v2368_v5  ;;  %v4651_v9 = vshll.u32 %v9377_v14, 16  ;;  %v12075_v61 = vld [vmem:[#allocation2 + $0x60] sm:$0xf]  ;;  %v12108_v5 = vpop.permute.xlu1 %5219 }
 0x149   : > { %4333 = vrot.lane.b32.xlu1 %v4300_v28, %s10027_s19  ;;  %v5593_v22 = vsel %vm16110_vm9, %v11972_v63, %v11840_v33  ;;  %vm16112_vm6 = vmmov %vm16110_vm9  ;;  %v12077_v37 = vld [vmem:[#allocation2 + $0x64] sm:$0xf]  ;;  %v1223_v60 = vsel %vm10273_vm15, %v1218_v4, %v10164_v12  ;;  %v2365_v28 = vsel %vm12054_vm10, %v11856_v43, 0  ;;  %v4645_v53 = vor.u32 %v4644_v57, %v4641_v23 }
 0x14a   : > { %v5591_v51 = vsel %vm16112_vm6, %v5556_v26, %v16111_v49  ;;  %v4650_v27 = vrot.slane %v4648_v6, 4  ;;  %vm12085_vm12 = vcmp.ne.s16.totalorder %v1223_v60, 0  ;;  %v16113_v33 = vmov 0  ;;  %v12095_v26 = vpop.permute.xlu0 %4960  ;;  %v16122_v60 = vld [vmem:[#allocation48_spill] sm:$0xff] }
 0x14b   : > { %v16114_v33 = vsel %vm12085_vm12, 4294967295, %v16113_v33  ;;  %v4653_v63 = vrot.slane %v4651_v9, 5  ;;  %vm16116_vm9 = vcmp.ne.s16.totalorder %v11939_v3, 0  ;;  %v2814_v41 = vsel %vm11999_vm3, %v11823_v25, 0  ;;  %v9930_v9 = vld [vmem:[#allocation2 + $0x9c] sm:$0xf] }
 0x14c   : > { %16115 = vst [vmem:[#allocation73_spill] sm:$0xff] %v16114_v33  ;;  %v2813_v14 = vsel %vm16116_vm9, %v11803_v7, 0  ;;  %v2366_v43 = vsel %vm12085_vm12, %v11872_v29, 0  ;;  %vm16117_vm6 = vcmask 457728   ;;  %vm16118_vm14 = vcmp.ne.s16.totalorder %v11992_v39, 0 }
 0x14d   : > { %v5626_v23 = vsel %vm16117_vm6, %v5591_v51, %v11858_v59  ;;  %v2815_v57 = vsel %vm16118_vm14, %v12075_v61, 0  ;;  %v2816_v7 = vsel %vm12007_vm0, %v12077_v37, 0  ;;  %4450 = vrot.lane.b32.xlu1 %v9360_v20, %s10028_s20  ;;  %v9359_v4 = vcombine.low %v2365_v28, %v2366_v43  ;;  %vm16121_vm14 = vmmov %vm16117_vm6  ;;  %v9931_v43 = vld [vmem:[#allocation2 + $0xa0] sm:$0xf] }
 0x14e   : > { %v12111_v6 = vor.u32 %v4653_v63, %v4650_v27  ;;  %v9392_v49 = vcombine.low %v2813_v14, %v2814_v41  ;;  %v12113_v29 = vcombine.low %v2815_v57, %v2816_v7  ;;  %v5628_v51 = vsel %vm16121_vm14, %v5593_v22, %v11864_v50  ;;  %v12128_v41 = vpop.permute.xlu0 %5217  ;;  %v16126_v50 = vld [vmem:[#allocation50_spill] sm:$0xff]  ;;  %v16130_v59 = vld [vmem:[#allocation47_spill] sm:$0xff] }
 0x14f   : > { %vm16123_vm9 = vnez %v16122_v60  ;;  %vm16124_vm6 = vcmask 523264   ;;  %4448 = vrot.lane.b32.xlu0 %v9359_v4, %s10028_s20  ;;  %vm16125_vm5 = vsmask.f32 3328  ;;  %vm16127_vm14 = vnez %v16126_v50  ;;  %v16128_v57 = vld [vmem:[#allocation70_spill] sm:$0xff]  ;;  %v12152_v50 = vld [vmem:[#allocation2 + $0x6c] sm:$0xf] }
 0x150   : > { %16119 = vst [vmem:[#allocation78_spill] sm:$0xff] %v12111_v6  ;;  %16120 = vst [vmem:[#allocation79_spill] sm:$0xff] %v12113_v29  ;;  %v1352_v18 = vsel %vm16123_vm9, %v9930_v9, 0  ;;  %v5661_v20 = vsel %vm16124_vm6, %v5626_v23, %v11881_v15  ;;  %v4655_v27 = vsel %vm16125_vm5, %v4645_v53, %v12111_v6  ;;  %v4821_v28 = vrot.slane %v9392_v49, 5  ;;  %v12134_v15 = vld [vmem:[#allocation2 + $0x68] sm:$0xf] }
 0x151   : > { %v5728_v14 = vshrl.u32 %v5661_v20, 16  ;;  %v1353_v22 = vsel %vm16127_vm14, %v9931_v43, 0  ;;  %vm16129_vm9 = vmmov %vm16125_vm5  ;;  %v5731_v9 = vshll.u32 %v5661_v20, 16  ;;  %v5663_v23 = vsel %vm16124_vm6, %v5628_v51, %v11923_v24  ;;  %4707 = vrot.lane.b32.xlu1 %v4655_v27, %s10026_s18  ;;  %v9932_v49 = vld [vmem:[#allocation2 + $0xa4] sm:$0xf]  ;;  %v12147_v20 = vpop.permute.xlu1 %4172 }
 0x152   : > { %v4646_v7 = vsel %vm16129_vm9, %v16128_v57, %v4645_v53  ;;  %vm16131_vm5 = vnez %v16130_v59  ;;  %v3329_v43 = vsel %vm12020_vm13, %v12077_v37, 0  ;;  %v3330_v53 = vsel %vm12050_vm2, %v12134_v15, 0  ;;  %16132 = vst [vmem:[#allocation70_spill] sm:$0xff] %v12147_v20  ;;  %v16135_v59 = vld [vmem:[#allocation49_spill] sm:$0xff] }
 0x153   : > { %v5730_v4 = vrot.slane %v5728_v14, 3  ;;  %v1354_v63 = vsel %vm16131_vm5, %v9932_v49, 0  ;;  %v16133_v57 = vrot.slane %v12113_v29, 5  ;;  %vm16134_vm9 = vcmask 1042432   ;;  %4705 = vrot.lane.b32.xlu0 %v4646_v7, %s10026_s18  ;;  %v9933_v49 = vld [vmem:[#allocation2 + $0xa8] sm:$0xf] }
 0x154   : > { %v5733_v51 = vrot.slane %v5731_v9, 4  ;;  %v5736_v27 = vshrl.u32 %v5663_v23, 16  ;;  %v5739_v14 = vshll.u32 %v5663_v23, 16  ;;  %vm16136_vm6 = vnez %v16135_v59  ;;  %vm16139_vm5 = vmmov %vm16134_vm9  ;;  %v12166_v23 = vpop.permute.xlu0 %5367 }
 0x155   : > { %v4824_v24 = vsel %vm16134_vm9, %v4821_v28, %v16133_v57  ;;  %v1355_v60 = vsel %vm16136_vm6, %v9933_v49, 0  ;;  %v16138_v38 = vrot.slane %v16137_v17, 5  ;;  %v3327_v20 = vsel %vm12054_vm10, %v11823_v25, 0  ;;  %v12171_v17 = vld [vmem:[#allocation2 + $0xe4] sm:$0xf] }
 0x156   : > { %v3392_v9 = vsel %vm10128_vm1, %v12075_v61, 0  ;;  %v5734_v57 = vor.u32 %v5733_v51, %v5730_v4  ;;  %v5738_v7 = vrot.slane %v5736_v27, 3  ;;  %v5741_v29 = vrot.slane %v5739_v14, 4  ;;  %4857 = vrot.lane.b32.xlu1 %v4824_v24, %s10030_s22 }
 0x157   : > { %v4822_v6 = vsel %vm16139_vm5, %v16138_v38, %v4821_v28  ;;  %v3328_v49 = vsel %vm12085_vm12, %v12075_v61, 0  ;;  %v9410_v38 = vcombine.low %v3329_v43, %v3330_v53  ;;  %v3393_v25 = vsel %vm10128_vm1, %v12077_v37, 0 }
 0x158   : > { %v3394_v28 = vsel %vm10128_vm1, %v12134_v15, 0  ;;  %v3395_v4 = vsel %vm10128_vm1, %v12152_v50, 0  ;;  %v12183_v51 = vor.u32 %v5741_v29, %v5738_v7  ;;  %v9426_v27 = vcombine.low %v3392_v9, %v3393_v25  ;;  %4855 = vrot.lane.b32.xlu0 %v4822_v6, %s10030_s22  ;;  %v12195_v7 = vpop.permute.xlu1 %4174 }
 0x159   : > { %v9427_v14 = vcombine.low %v3394_v28, %v3395_v4  ;;  %vm16140_vm5 = vsmask.f32 4352  ;;  %v9303_v43 = vcombine.low %v1352_v18, %v1353_v22  ;;  %v9409_v53 = vcombine.low %v3327_v20, %v3328_v49  ;;  %v12197_v18 = vld [vmem:[#allocation2 + $0xe8] sm:$0xf]  ;;  %v12209_v4 = vld [vmem:[#allocation2 + $0xec] sm:$0xf] }
 0x15a   : > { %v5735_v24 = vsel %vm16140_vm5, %v11852_v52, %v5734_v57  ;;  %vm16141_vm9 = vcmask 588800   ;;  %v1434_v59 = vsel %vm10128_vm1, %v12171_v17, 0  ;;  %vm16142_vm6 = vcmp.ne.s16.totalorder %v11939_v3, 0  ;;  %4974 = vrot.lane.b32.xlu1 %v9410_v38, %s10031_s23 }
 0x15b   : > { %9771 = vmatprep.mubr.msk.bf16.mxu0 %vm16141_vm9, %v5735_v24  ;;  %v3841_v29 = vsel %vm16142_vm6, %v12075_v61, 0  ;;  %v5163_v9 = vshrl.u32 %v9426_v27, 16  ;;  %v5166_v25 = vshll.u32 %v9426_v27, 16  ;;  %v5172_v28 = vshrl.u32 %v9427_v14, 16  ;;  %v12211_v27 = vpop.permute.xlu0 %5369  ;;  %vm16144_vm6 = vmmov %vm16141_vm9 }
 0x15c   : > { %v5175_v52 = vshll.u32 %v9427_v14, 16  ;;  %v9304_v6 = vcombine.low %v1354_v63, %v1355_v60  ;;  %v16143_v22 = vsel %vm10128_vm1, %v12032_v0, 0  ;;  %v5743_v49 = vsel %vm16140_vm5, %v5734_v57, %v12183_v51  ;;  %4972 = vrot.lane.b32.xlu0 %v9409_v53, %s10031_s23 }
 0x15d   : > { %v9328_v20 = vcombine.low %v16143_v22, %v1434_v59  ;;  %v3842_v61 = vsel %vm11999_vm3, %v12077_v37, 0  ;;  %v5165_v14 = vrot.slane %v5163_v9, 4  ;;  %v5168_v60 = vrot.slane %v5166_v25, 5  ;;  %9772 = vmatmul.mubr.msk.bf16.gmra.mxu0 %vm16144_vm6, %v5743_v49 }
 0x15e   : > { %v5174_v63 = vrot.slane %v5172_v28, 4  ;;  %v5177_v38 = vrot.slane %v5175_v52, 5  ;;  %v9442_v22 = vcombine.low %v3841_v29, %v3842_v61  ;;  %v1435_v57 = vsel %vm10128_vm1, %v12197_v18, 0 }
 0x15f   : > { %v4132_v59 = vshrl.u32 %v9328_v20, 16  ;;  %v4135_v24 = vshll.u32 %v9328_v20, 16  ;;  %vm16145_vm9 = vcmask 64512   ;;  %v5169_v3 = vor.u32 %v5168_v60, %v5165_v14  ;;  %v12225_v20 = vpop.permute.xlu1 %4325 }
 0x160   : > { %v5409_v37 = vsel %vm16145_vm9, %v9303_v43, %v11889_v31  ;;  %v12220_v13 = vor.u32 %v5177_v38, %v5174_v63  ;;  %v1436_v9 = vsel %vm10128_vm1, %v12209_v4, 0  ;;  %v5345_v53 = vrot.slane %v9442_v22, 5  ;;  %vm16146_vm5 = vmmov %vm16145_vm9  ;;  %v12241_v63 = vpop.permute.xlu0 %4323 }
 0x161   : > { %v4134_v25 = vrot.slane %v4132_v59, 4  ;;  %v4137_v28 = vrot.slane %v4135_v24, 5  ;;  %v9329_v52 = vcombine.low %v1435_v57, %v1436_v9  ;;  %v5412_v29 = vsel %vm16146_vm5, %v9304_v6, %v11913_v58 }
 0x162   : > { %vm16147_vm6 = vsmask.f32 3328  ;;  %vm16149_vm3 = vcmp.ne.s16.totalorder %v11992_v39, 0  ;;  %v16150_v14 = vrot.slane %v11919_v55, 5  ;;  %vm16151_vm14 = vcmask 1042432  }
 0x163   : > { %v5179_v49 = vsel %vm16147_vm6, %v5169_v3, %v12220_v13  ;;  %vm16148_vm9 = vmmov %vm16147_vm6  ;;  %v3843_v43 = vsel %vm16149_vm3, %v12134_v15, 0  ;;  %v4138_v61 = vor.u32 %v4137_v28, %v4134_v25  ;;  %v4141_v58 = vshrl.u32 %v9329_v52, 16  ;;  %v12253_v9 = vpop.permute.xlu1 %4442 }
 0x164   : > { %v5170_v31 = vsel %vm16148_vm9, %v11883_v44, %v5169_v3  ;;  %5231 = vrot.lane.b32.xlu1 %v5179_v49, %s10032_s29  ;;  %v5346_v60 = vsel %vm16151_vm14, %v16150_v14, %v5345_v53  ;;  %v4144_v6 = vshll.u32 %v9329_v52, 16  ;;  %v3844_v44 = vsel %vm12007_vm0, %v12152_v50, 0  ;;  %vm16152_vm3 = vmmov %vm16147_vm6 }
 0x165   : > { %5229 = vrot.lane.b32.xlu0 %v5170_v31, %s10032_s29  ;;  %v405_v3 = vadd.s32 216, %v10133_v2  ;;  %v407_v38 = vadd.s32 232, %v10133_v2  ;;  %v1803_v59 = vrot.slane %v11980_v32, 4  ;;  %v4139_v24 = vsel %vm16152_vm3, %v11934_v8, %v4138_v61 }
 0x166   : > { %v4143_v55 = vrot.slane %v4141_v58, 4  ;;  %v4146_v22 = vrot.slane %v4144_v6, 5  ;;  %v12251_v57 = vcombine.low %v3843_v43, %v3844_v44  ;;  %vm16154_vm14 = vcmask 130048   ;;  %v16164_v6 = vld [vmem:[#allocation52_spill] sm:$0xff] }
 0x167   : > { %v5457_v25 = vsel %vm16154_vm14, %v5412_v29, %v11954_v40  ;;  %v603_v28 = vand.u32 15, %v405_v3  ;;  %v617_v52 = vand.u32 15, %v407_v38  ;;  %v12260_v49 = vsel %vm10224_vm11, %v1803_v59, %v10398_v10  ;;  %vm16156_vm5 = vmmov %vm16154_vm14  ;;  %v16166_v59 = vld [vmem:[#allocation24_spill] sm:$0xff] }
 0x168   : > { %16153 = vst [vmem:[#allocation72_spill] sm:$0xff] %v12251_v57  ;;  %16155 = vst [vmem:[#allocation80_spill] sm:$0xff] %v12260_v49  ;;  %v5455_v32 = vsel %vm16156_vm5, %v5409_v37, %v11964_v34  ;;  %vm16157_vm6 = vcmask 195584   ;;  %4184 = vrot.lane.b32.xlu1 %v4139_v24, %s10029_s21  ;;  %v12268_v31 = vor.u32 %v4146_v22, %v4143_v55  ;;  %v15646_v40 = vrot.slane %v12251_v57, 5  ;;  %v16167_v24 = vld [vmem:[#allocation63_spill] sm:$0xff]  ;;  %v12302_v22 = vpop.permute.xlu1 %4699 }
 0x169   : > { %v5492_v8 = vsel %vm16157_vm6, %v5457_v25, %v11978_v35  ;;  %5379 = vrot.lane.b32.xlu0 %v5346_v60, %s10033_s8  ;;  %vm16158_vm9 = vmmov %vm16157_vm6  ;;  %vm1467_vm3 = vcmp.lt.s32.totalorder %v603_v28, 15  ;;  %vm12273_vm14 = vcmp.lt.s32.totalorder %v617_v52, 15  ;;  %v406_v34 = vadd.s32 224, %v10133_v2  ;;  %v12359_v57 = vld [vmem:[#allocation2 + $0xf0] sm:$0xf] }
 0x16a   : > { %v5490_v29 = vsel %vm16158_vm9, %v5455_v32, %v11984_v46  ;;  %vm16161_vm5 = vcmask 261120   ;;  %vm16162_vm6 = vsmask.f32 3328  ;;  %vm16163_vm0 = vcmask 1042432   ;;  %vm1531_vm2 = vmpackc.low %vm1467_vm3, %vm1467_vm3  ;;  %v12288_v46 = vpop.permute.xlu0 %4440 }
 0x16b   : > { %v12280_v35 = vsel %vm16161_vm5, %v5492_v8, %v11994_v11  ;;  %v4148_v37 = vsel %vm16162_vm6, %v4138_v61, %v12268_v31  ;;  %v5348_v14 = vsel %vm16163_vm0, %v5345_v53, %v15646_v40  ;;  %vm15659_vm9 = vcmp.ne.s16.totalorder %v12260_v49, 0  ;;  %vm1533_vm13 = vmpackc.low %vm12273_vm14, %vm12273_vm14  ;;  %v16165_v61 = vld [vmem:[#allocation51_spill] sm:$0xff] }
 0x16c   : > { %v1563_v60 = vsel %vm1531_vm2, 65537, %v15861_v42  ;;  %v610_v11 = vand.u32 15, %v406_v34  ;;  %v404_v58 = vadd.s32 208, %v10133_v2  ;;  %v9378_v44 = vcombine.low %v16165_v61, %v16164_v6  ;;  %4186 = vrot.lane.b32.xlu1 %v4148_v37, %s10029_s21  ;;  %vm16168_vm2 = vmmov %vm16161_vm5 }
 0x16d   : > { %5381 = vrot.lane.b32.xlu0 %v5348_v14, %s10033_s8  ;;  %v1565_v53 = vsel %vm1533_vm13, 65537, %v15861_v42  ;;  %v1814_v3 = vshrl.u32 %v1563_v60, 16  ;;  %v1817_v38 = vshll.u32 %v1563_v60, 16  ;;  %v9379_v55 = vcombine.low %v16167_v24, %v16166_v59 }
 0x16e   : > { %v1832_v25 = vshrl.u32 %v1565_v53, 16  ;;  %v1835_v28 = vshll.u32 %v1565_v53, 16  ;;  %vm887_vm0 = vcmp.ge.s32.totalorder %v610_v11, 1  ;;  %v596_v52 = vand.u32 15, %v404_v58  ;;  %v12312_v53 = vpop.permute.xlu0 %4697 }
 0x16f   : > { %v5525_v32 = vsel %vm16168_vm2, %v5490_v29, %v12024_v54  ;;  %v1816_v8 = vrot.slane %v1814_v3, 7  ;;  %v1917_v43 = vsel %vm15659_vm9, %v12032_v0, 0  ;;  %vm951_vm13 = vmpackc.low %vm887_vm0, %vm887_vm0  ;;  %v4657_v34 = vshrl.u32 %v9378_v44, 16  ;;  %16169 = vst [vmem:[#allocation52_spill] sm:$0xff] %v12312_v53 }
 0x170   : > { %v12309_v37 = vrot.slane %v1832_v25, 7  ;;  %v983_v14 = vsel %vm951_vm13, 65537, %v15861_v42  ;;  %vm885_vm3 = vcmp.ge.s32.totalorder %v596_v52, 1  ;;  %v4660_v60 = vshll.u32 %v9378_v44, 16  ;;  %v12324_v25 = vpop.permute.xlu1 %4849 }
 0x171   : > { %v1819_v6 = vor.u32 %v1817_v38, %v1816_v8  ;;  %v1821_v61 = vrot.slane %v1816_v8, 4  ;;  %v1270_v11 = vshll.u32 %v983_v14, 16  ;;  %v1274_v58 = vshrl.u32 %v983_v14, 16  ;;  %vm949_vm14 = vmpackc.low %vm885_vm3, %vm885_vm3  ;;  %16171 = vst [vmem:[#allocation24_spill] sm:$0xff] %v12324_v25 }
 0x172   : > { %v1837_v54 = vor.u32 %v1835_v28, %v12309_v37  ;;  %v981_v29 = vsel %vm949_vm14, 65537, %v15861_v42  ;;  %v4666_v0 = vshrl.u32 %v9379_v55, 16  ;;  %v4669_v3 = vshll.u32 %v9379_v55, 16  ;;  %v12356_v33 = vpop.permute.xlu0 %4847 }
 0x173   : > { %v1820_v59 = vsel %vm10224_vm11, %v10412_v30, %v1819_v6  ;;  %v12322_v44 = vsel %vm10224_vm11, %v1821_v61, %v10398_v10  ;;  %v1272_v38 = vrot.slane %v1270_v11, 5  ;;  %v1276_v24 = vrot.slane %v1274_v58, 4 }
 0x174   : > { %16170 = vst [vmem:[#allocation51_spill] sm:$0xff] %v12322_v44  ;;  %v1838_v28 = vsel %vm10224_vm11, %v10412_v30, %v1837_v54  ;;  %vm12329_vm5 = vcmp.ne.s16.totalorder %v1820_v59, 0  ;;  %v16172_v52 = vmov 0  ;;  %vm15658_vm6 = vcmp.ne.s16.totalorder %v12322_v44, 0 }
 0x175   : > { %v16173_v52 = vsel %vm12329_vm5, 4294967295, %v16172_v52  ;;  %v1250_v55 = vshll.u32 %v981_v29, 16  ;;  %vm12334_vm0 = vcmp.ne.s16.totalorder %v1838_v28, 0  ;;  %v16175_v8 = vmov 0 }
 0x176   : > { %16174 = vst [vmem:[#allocation63_spill] sm:$0xff] %v16173_v52  ;;  %v16176_v8 = vsel %vm12334_vm0, 4294967295, %v16175_v8  ;;  %v1918_v14 = vsel %vm12329_vm5, %v12171_v17, 0  ;;  %v1919_v6 = vsel %vm15658_vm6, %v12197_v18, 0  ;;  %v1273_v61 = vsel %vm10273_vm15, %v10251_v62, %v1272_v38 }
 0x177   : > { %16177 = vst [vmem:[#allocation81_spill] sm:$0xff] %v16176_v8  ;;  %v1920_v11 = vsel %vm12334_vm0, %v12209_v4, 0  ;;  %v9344_v58 = vcombine.low %v1917_v43, %v1918_v14  ;;  %v1277_v54 = vor.u32 %v1276_v24, %v1272_v38  ;;  %v4659_v59 = vrot.slane %v4657_v34, 4  ;;  %v12364_v24 = vpop.permute.xlu1 %4966 }
 0x178   : > { %v12350_v28 = vcombine.low %v1919_v6, %v1920_v11  ;;  %vm12352_vm2 = vcmp.ne.s16.totalorder %v1273_v61, 0  ;;  %v16178_v40 = vmov 0  ;;  %v1252_v39 = vrot.slane %v1250_v55, 5 }
 0x179   : > { %v16179_v40 = vsel %vm12352_vm2, 4294967295, %v16178_v40  ;;  %v1254_v45 = vshrl.u32 %v981_v29, 16  ;;  %v4301_v47 = vrot.slane %v9344_v58, 5  ;;  %v1278_v30 = vrot.slane %v1277_v54, 4  ;;  %v12406_v58 = vpop.permute.xlu0 %4964 }
 0x17a   : > { %16180 = vst [vmem:[#allocation82_spill] sm:$0xff] %v16179_v40  ;;  %v4662_v42 = vrot.slane %v4660_v60, 5  ;;  %v4668_v25 = vrot.slane %v4666_v0, 4  ;;  %v15664_v53 = vrot.slane %v12350_v28, 5  ;;  %v1253_v43 = vsel %vm10273_vm15, %v10251_v62, %v1252_v39 }
 0x17b   : > { %v1256_v34 = vrot.slane %v1254_v45, 4  ;;  %v4671_v38 = vrot.slane %v4669_v3, 5  ;;  %vm16181_vm13 = vcmask 326656   ;;  %v16182_v55 = vrot.slane %v12026_v21, 5 }
 0x17c   : > { %v5562_v29 = vsel %vm16181_vm13, %v12280_v35, %v12030_v56  ;;  %vm16183_vm3 = vcmask 1042432   ;;  %v1283_v0 = vsel %vm10273_vm15, %v1278_v30, %v10164_v12  ;;  %v2371_v14 = vsel %vm12352_vm2, %v12209_v4, 0  ;;  %vm16185_vm6 = vmmov %vm16181_vm13  ;;  %v12388_v35 = vld [vmem:[#allocation2 + $0x70] sm:$0xf] }
 0x17d   : > { %v4302_v60 = vsel %vm16183_vm3, %v16182_v55, %v4301_v47  ;;  %vm16184_vm14 = vmmov %vm16183_vm3  ;;  %v5560_v3 = vsel %vm16185_vm6, %v5525_v32, %v12058_v16  ;;  %vm12384_vm13 = vcmp.ne.s16.totalorder %v1283_v0, 0  ;;  %v16186_v21 = vmov 0  ;;  %v12400_v32 = vld [vmem:[#allocation2 + $0x74] sm:$0xf] }
 0x17e   : > { %v4304_v45 = vsel %vm16184_vm14, %v4301_v47, %v15664_v53  ;;  %4335 = vrot.lane.b32.xlu0 %v4302_v60, %s10027_s19  ;;  %v16187_v21 = vsel %vm12384_vm13, 4294967295, %v16186_v21  ;;  %v1257_v56 = vor.u32 %v1256_v34, %v1252_v39  ;;  %v2372_v30 = vsel %vm12384_vm13, %v12359_v57, 0 }
 0x17f   : > { %16188 = vst [vmem:[#allocation83_spill] sm:$0xff] %v16187_v21  ;;  %4337 = vrot.lane.b32.xlu1 %v4304_v45, %s10027_s19  ;;  %vm12394_vm3 = vcmp.ne.s16.totalorder %v1253_v43, 0  ;;  %v16189_v47 = vmov 0  ;;  %v4663_v16 = vor.u32 %v4662_v42, %v4659_v59  ;;  %v12398_v4 = vor.u32 %v4671_v38, %v4668_v25  ;;  %v12428_v43 = vpop.permute.xlu1 %5223 }
 0x180   : > { %v16190_v47 = vsel %vm12394_vm3, 4294967295, %v16189_v47  ;;  %vm16192_vm6 = vcmask 392192   ;;  %v9362_v6 = vcombine.low %v2371_v14, %v2372_v30  ;;  %v1258_v11 = vrot.slane %v1257_v56, 4  ;;  %v9934_v56 = vld [vmem:[#allocation2 + $0xac] sm:$0xf] }
 0x181   : > { %16191 = vst [vmem:[#allocation84_spill] sm:$0xff] %v16190_v47  ;;  %v5597_v39 = vsel %vm16192_vm6, %v5562_v29, %v12067_v36  ;;  %vm16193_vm14 = vmmov %vm16192_vm6  ;;  %vm16194_vm9 = vcmask 457728   ;;  %vm16195_vm12 = vcmp.ne.s16.totalorder %v12260_v49, 0  ;;  %v2818_v25 = vsel %vm12329_vm5, %v12152_v50, 0 }
 0x182   : > { %v5595_v61 = vsel %vm16193_vm14, %v5560_v3, %v12095_v26  ;;  %v2817_v42 = vsel %vm16195_vm12, %v12134_v15, 0  ;;  %vm16196_vm6 = vcmp.ne.s16.totalorder %v12322_v44, 0  ;;  %v1263_v26 = vsel %vm10273_vm15, %v1258_v11, %v10164_v12 }
 0x183   : > { %v5630_v54 = vsel %vm16194_vm9, %v5595_v61, %v12128_v41  ;;  %v2819_v36 = vsel %vm16196_vm6, %v12388_v35, 0  ;;  %v2369_v41 = vsel %vm12394_vm3, %v12171_v17, 0  ;;  %v2820_v15 = vsel %vm12334_vm0, %v12400_v32, 0  ;;  %4454 = vrot.lane.b32.xlu1 %v9362_v6, %s10028_s20 }
 0x184   : > { %v9394_v59 = vcombine.low %v2817_v42, %v2818_v25  ;;  %vm12431_vm12 = vcmp.ne.s16.totalorder %v1263_v26, 0  ;;  %v16197_v34 = vmov 0  ;;  %vm16200_vm9 = vsmask.f32 3328 }
 0x185   : > { %v16198_v34 = vsel %vm12431_vm12, 4294967295, %v16197_v34  ;;  %v4673_v38 = vsel %vm16200_vm9, %v4663_v16, %v12398_v4  ;;  %v12437_v29 = vcombine.low %v2819_v36, %v2820_v15  ;;  %vm16201_vm14 = vcmask 523264   ;;  %v12453_v15 = vpop.permute.xlu0 %5221 }
 0x186   : > { %16199 = vst [vmem:[#allocation85_spill] sm:$0xff] %v16198_v34  ;;  %v5665_v17 = vsel %vm16201_vm14, %v5630_v54, %v12166_v23  ;;  %v2370_v55 = vsel %vm12431_vm12, %v12197_v18, 0  ;;  %v4825_v60 = vrot.slane %v9394_v59, 5  ;;  %vm16202_vm6 = vcmask 457728   ;;  %v9935_v23 = vld [vmem:[#allocation2 + $0xb4] sm:$0xf] }
 0x187   : > { %v5744_v0 = vshrl.u32 %v5665_v17, 16  ;;  %v5747_v14 = vshll.u32 %v5665_v17, 16  ;;  %v5632_v45 = vsel %vm16202_vm6, %v5597_v39, %v12108_v5  ;;  %v9361_v3 = vcombine.low %v2369_v41, %v2370_v55  ;;  %v9936_v18 = vld [vmem:[#allocation2 + $0xb8] sm:$0xf]  ;;  %4711 = vrot.lane.b32.xlu1 %v4673_v38, %s10026_s18  ;;  %v9937_v5 = vld [vmem:[#allocation2 + $0xb0] sm:$0xf] }
 0x188   : > { %v1356_v6 = vsel %vm11343_vm4, %v9934_v56, 0  ;;  %v15665_v61 = vrot.slane %v12437_v29, 5  ;;  %v1358_v25 = vsel %vm11329_vm8, %v9935_v23, 0  ;;  %v1359_v26 = vsel %vm11360_vm7, %v9936_v18, 0  ;;  %v16206_v39 = vld [vmem:[#allocation60_spill] sm:$0xff]  ;;  %v16208_v59 = vld [vmem:[#allocation78_spill] sm:$0xff] }
 0x189   : > { %v5746_v11 = vrot.slane %v5744_v0, 3  ;;  %v5749_v42 = vrot.slane %v5747_v14, 4  ;;  %4452 = vrot.lane.b32.xlu0 %v9361_v3, %s10028_s20  ;;  %vm16207_vm9 = vnez %v16206_v39  ;;  %vm16209_vm14 = vsmask.f32 3328  ;;  %v12469_v38 = vld [vmem:[#allocation2 + $0x78] sm:$0xf] }
 0x18a   : > { %v1357_v41 = vsel %vm16207_vm9, %v9937_v5, 0  ;;  %v4664_v17 = vsel %vm16209_vm14, %v16208_v59, %v4663_v16  ;;  %v3333_v55 = vsel %vm12352_vm2, %v12400_v32, 0  ;;  %vm16210_vm6 = vcmask 523264   ;;  %v12474_v16 = vpop.permute.xlu1 %4176  ;;  %v16212_v5 = vld [vmem:[#allocation79_spill] sm:$0xff] }
 0x18b   : > { %v5667_v0 = vsel %vm16210_vm6, %v5632_v45, %v12211_v27  ;;  %vm16211_vm7 = vcmask 1042432   ;;  %v5750_v3 = vor.u32 %v5749_v42, %v5746_v11  ;;  %v3334_v56 = vsel %vm12384_vm13, %v12469_v38, 0 }
 0x18c   : > { %v4828_v14 = vsel %vm16211_vm7, %v4825_v60, %v15665_v61  ;;  %v5752_v23 = vshrl.u32 %v5667_v0, 16  ;;  %v9306_v18 = vcombine.low %v1358_v25, %v1359_v26  ;;  %v16213_v59 = vrot.slane %v16212_v5, 5  ;;  %vm16214_vm14 = vmmov %vm16211_vm7  ;;  %v12491_v26 = vld [vmem:[#allocation2 + $0xf4] sm:$0xf] }
 0x18d   : > { %v5755_v27 = vshll.u32 %v5667_v0, 16  ;;  %v3396_v45 = vsel %vm10128_vm1, %v12388_v35, 0  ;;  %v3331_v42 = vsel %vm12394_vm3, %v12152_v50, 0  ;;  %v3397_v61 = vsel %vm10128_vm1, %v12400_v32, 0  ;;  %4709 = vrot.lane.b32.xlu0 %v4664_v17, %s10026_s18  ;;  %4861 = vrot.lane.b32.xlu1 %v4828_v14, %s10030_s22 }
 0x18e   : > { %v4826_v53 = vsel %vm16214_vm14, %v16213_v59, %v4825_v60  ;;  %v5754_v11 = vrot.slane %v5752_v23, 3  ;;  %v3398_v25 = vsel %vm10128_vm1, %v12469_v38, 0  ;;  %v9412_v60 = vcombine.low %v3333_v55, %v3334_v56  ;;  %v12495_v23 = vld [vmem:[#allocation2 + $0x7c] sm:$0xf]  ;;  %v12508_v55 = vpop.permute.xlu0 %5371  ;;  %v12516_v30 = vpop.permute.xlu1 %4178 }
 0x18f   : > { %v5757_v0 = vrot.slane %v5755_v27, 4  ;;  %v3399_v50 = vsel %vm10128_vm1, %v12495_v23, 0  ;;  %v9428_v5 = vcombine.low %v3396_v45, %v3397_v61  ;;  %v3332_v59 = vsel %vm12431_vm12, %v12388_v35, 0 }
 0x190   : > { %v9429_v36 = vcombine.low %v3398_v25, %v3399_v50  ;;  %vm16215_vm7 = vsmask.f32 4352  ;;  %v1437_v17 = vsel %vm10128_vm1, %v12359_v57, 0  ;;  %vm16216_vm6 = vcmask 588800  }
 0x191   : > { %v5751_v54 = vsel %vm16215_vm7, %v12183_v51, %v5750_v3  ;;  %v12510_v14 = vor.u32 %v5757_v0, %v5754_v11  ;;  %v5181_v56 = vshrl.u32 %v9428_v5, 16  ;;  %v5184_v27 = vshll.u32 %v9428_v5, 16  ;;  %4859 = vrot.lane.b32.xlu0 %v4826_v53, %s10030_s22  ;;  %4978 = vrot.lane.b32.xlu1 %v9412_v60, %s10031_s23  ;;  %vm16217_vm14 = vmmov %vm16215_vm7 }
 0x192   : > { %9775 = vmatprep.mubr.msk.bf16.mxu0 %vm16216_vm6, %v5751_v54  ;;  %v1438_v61 = vsel %vm10128_vm1, %v12491_v26, 0  ;;  %v9305_v45 = vcombine.low %v1356_v6, %v1357_v41  ;;  %v5190_v25 = vshrl.u32 %v9429_v36, 16  ;;  %v5193_v50 = vshll.u32 %v9429_v36, 16  ;;  %vm16218_vm7 = vmmov %vm16216_vm6 }
 0x193   : > { %v9330_v51 = vcombine.low %v1437_v17, %v1438_v61  ;;  %v9411_v11 = vcombine.low %v3331_v42, %v3332_v59  ;;  %v5183_v0 = vrot.slane %v5181_v56, 4  ;;  %v5186_v39 = vrot.slane %v5184_v27, 5  ;;  %v12533_v17 = vpop.permute.xlu0 %5373  ;;  %v16224_v56 = vld [vmem:[#allocation70_spill] sm:$0xff] }
 0x194   : > { %v5759_v54 = vsel %vm16217_vm14, %v5750_v3, %v12510_v14  ;;  %v5192_v5 = vrot.slane %v5190_v25, 4  ;;  %v5195_v21 = vrot.slane %v5193_v50, 5  ;;  %vm16219_vm6 = vcmask 64512  }
 0x195   : > { %v4150_v1 = vshrl.u32 %v9330_v51, 16  ;;  %v4153_v40 = vshll.u32 %v9330_v51, 16  ;;  %9776 = vmatmul.mubr.msk.bf16.gmra.mxu0 %vm16218_vm7, %v5759_v54  ;;  %v5418_v6 = vsel %vm16219_vm6, %v9306_v18, %v12195_v7  ;;  %v5187_v36 = vor.u32 %v5186_v39, %v5183_v0  ;;  %4976 = vrot.lane.b32.xlu0 %v9411_v11, %s10031_s23  ;;  %v12548_v18 = vpop.permute.xlu1 %4329 }
 0x196   : > { %vm16220_vm8 = vcmp.ne.s16.totalorder %v12260_v49, 0  ;;  %v3846_v41 = vsel %vm12329_vm5, %v12400_v32, 0  ;;  %v12531_v42 = vor.u32 %v5195_v21, %v5192_v5  ;;  %vm16221_vm14 = vsmask.f32 3328 }
 0x197   : > { %v3845_v53 = vsel %vm16220_vm8, %v12388_v35, 0  ;;  %v4152_v3 = vrot.slane %v4150_v1, 4  ;;  %v4155_v60 = vrot.slane %v4153_v40, 5  ;;  %v5188_v7 = vsel %vm16221_vm14, %v12220_v13, %v5187_v36  ;;  %vm16223_vm8 = vmmov %vm16221_vm14 }
 0x198   : > { %v9444_v59 = vcombine.low %v3845_v53, %v3846_v41  ;;  %vm16222_vm7 = vcmp.ne.s16.totalorder %v12322_v44, 0  ;;  %v3848_v32 = vsel %vm12334_vm0, %v12495_v23, 0  ;;  %v5197_v1 = vsel %vm16223_vm8, %v5187_v36, %v12531_v42  ;;  %v12582_v53 = vpop.permute.xlu0 %4327  ;;  %v16237_v41 = vld [vmem:[#allocation24_spill] sm:$0xff] }
 0x199   : > { %v3847_v35 = vsel %vm16222_vm7, %v12469_v38, 0  ;;  %v4156_v40 = vor.u32 %v4155_v60, %v4152_v3  ;;  %v5415_v13 = vsel %vm16219_vm6, %v9305_v45, %v16224_v56  ;;  %vm16225_vm14 = vcmask 130048   ;;  %5235 = vrot.lane.b32.xlu1 %v5197_v1, %s10032_s29  ;;  %5233 = vrot.lane.b32.xlu0 %v5188_v7, %s10032_s29  ;;  %v16244_v56 = vld [vmem:[#allocation9_spill] sm:$0xff] }
 0x19a   : > { %v5349_v21 = vrot.slane %v9444_v59, 5  ;;  %v12546_v39 = vcombine.low %v3847_v35, %v3848_v32  ;;  %v5461_v27 = vsel %vm16225_vm14, %v5418_v6, %v12225_v20  ;;  %v409_v61 = vadd.s32 248, %v10133_v2  ;;  %vm16226_vm7 = vmmov %vm16225_vm14  ;;  %v16235_v6 = vld [vmem:[#allocation52_spill] sm:$0xff]  ;;  %v12599_v32 = vpop.permute.xlu1 %4446 }
 0x19b   : > { %v15681_v25 = vrot.slane %v12309_v37, 4  ;;  %v5459_v50 = vsel %vm16226_vm7, %v5415_v13, %v12241_v63  ;;  %vm16227_vm8 = vcmask 195584   ;;  %vm16228_vm0 = vsmask.f32 3328  ;;  %v1926_v63 = vld [vmem:[#allocation2 + $0xfc] sm:$0xf] }
 0x19c   : > { %v5496_v51 = vsel %vm16227_vm8, %v5461_v27, %v12253_v9  ;;  %v4157_v11 = vsel %vm16228_vm0, %v12268_v31, %v4156_v40  ;;  %vm16229_vm6 = vmmov %vm16227_vm8  ;;  %v631_v45 = vand.u32 15, %v409_v61  ;;  %vm16231_vm7 = vcmask 261120   ;;  %v16232_v31 = vld [vmem:[#allocation72_spill] sm:$0xff]  ;;  %v16245_v13 = vld [vmem:[#allocation10_spill] sm:$0xff] }
 0x19d   : > { %v5494_v20 = vsel %vm16229_vm6, %v5459_v50, %v12288_v46  ;;  %v12571_v0 = vsel %vm10224_vm11, %v15681_v25, %v10398_v10  ;;  %v5531_v9 = vsel %vm16231_vm7, %v5496_v51, %v12302_v22  ;;  %v16233_v54 = vrot.slane %v16232_v31, 5  ;;  %vm16236_vm8 = vmmov %vm16231_vm7  ;;  %4188 = vrot.lane.b32.xlu1 %v4157_v11, %s10029_s21  ;;  %v16252_v31 = vld [vmem:[#allocation71_spill] sm:$0xff] }
 0x19e   : > { %16230 = vst [vmem:[#allocation78_spill] sm:$0xff] %v12571_v0  ;;  %vm16234_vm0 = vcmask 1042432   ;;  %v5529_v46 = vsel %vm16236_vm8, %v5494_v20, %v16235_v6  ;;  %v15680_v36 = vrot.slane %v12546_v39, 5  ;;  %vm16238_vm6 = vcmask 326656  }
 0x19f   : > { %v5350_v5 = vsel %vm16234_vm0, %v16233_v54, %v5349_v21  ;;  %v5566_v3 = vsel %vm16238_vm6, %v5531_v9, %v16237_v41  ;;  %vm1471_vm14 = vcmp.lt.s32.totalorder %v631_v45, 15  ;;  %vm16239_vm5 = vmmov %vm16238_vm6  ;;  %v408_v60 = vadd.s32 240, %v10133_v2  ;;  %v9941_v9 = vld [vmem:[#allocation2 + $0xc0] sm:$0xf] }
 0x1a0   : > { %v5564_v22 = vsel %vm16239_vm5, %v5529_v46, %v12356_v33  ;;  %vm1535_vm7 = vmpackc.low %vm1471_vm14, %vm1471_vm14  ;;  %vm15688_vm0 = vcmp.ne.s16.totalorder %v12571_v0, 0  ;;  %vm16240_vm8 = vcmask 392192   ;;  %vm16241_vm4 = vcmp.ne.s16.totalorder %v10251_v62, 0  ;;  %5383 = vrot.lane.b32.xlu0 %v5350_v5, %s10033_s8  ;;  %v12627_v5 = vpop.permute.xlu0 %4444 }
 0x1a1   : > { %v5601_v59 = vsel %vm16240_vm8, %v5566_v3, %v12364_v24  ;;  %v12595_v7 = vsel %vm16241_vm4, %v1926_v63, 0  ;;  %vm16242_vm9 = vmmov %vm16240_vm8  ;;  %v16243_v33 = vmov 0   ;;  %v624_v2 = vand.u32 15, %v408_v60  ;;  %4190 = vrot.lane.b32.xlu1 %v4156_v40, %s10029_s21  ;;  %v12620_v63 = vld [vmem:[#allocation2 + $0xbc] sm:$0xf] }
 0x1a2   : > { %v5599_v35 = vsel %vm16242_vm9, %v5564_v22, %v12406_v58  ;;  %v1567_v1 = vsel %vm1535_vm7, 65537, %v16243_v33  ;;  %v9380_v27 = vcombine.low %v16245_v13, %v16244_v56  ;;  %vm16246_vm5 = vcmask 457728   ;;  %v9942_v13 = vld [vmem:[#allocation2 + $0xc4] sm:$0xf] }
 0x1a3   : > { %v5634_v24 = vsel %vm16246_vm5, %v5599_v35, %v12453_v15  ;;  %vm16247_vm4 = vcmask 1042432   ;;  %v1850_v50 = vshrl.u32 %v1567_v1, 16  ;;  %v1853_v51 = vshll.u32 %v1567_v1, 16  ;;  %vm16249_vm14 = vmmov %vm16246_vm5  ;;  %v2406_v35 = vld [vmem:[#allocation2 + $0x80] sm:$0x1]  ;;  %v12634_v1 = vpop.permute.xlu1 %4703 }
 0x1a4   : > { %v5352_v61 = vsel %vm16247_vm4, %v5349_v21, %v15680_v36  ;;  %vm16248_vm9 = vcmask 523264   ;;  %v5636_v20 = vsel %vm16249_vm14, %v5601_v59, %v12428_v43  ;;  %vm889_vm6 = vcmp.ge.s32.totalorder %v624_v2, 1  ;;  %v1439_v43 = vld [vmem:[#allocation2 + $0xf8] sm:$0x1] }
 0x1a5   : > { %v5669_v58 = vsel %vm16248_vm9, %v5634_v24, %v12508_v55  ;;  %v1852_v15 = vrot.slane %v1850_v50, 7  ;;  %v1921_v21 = vsel %vm15688_vm0, %v12359_v57, 0  ;;  %vm953_vm7 = vmpackc.low %vm889_vm6, %vm889_vm6  ;;  %v16250_v55 = vld [vmem:[#allocation69_spill] sm:$0xff]  ;;  %vm16253_vm5 = vnez %v16252_v31  ;;  %5385 = vrot.lane.b32.xlu0 %v5352_v61, %s10033_s8  ;;  %v9943_v50 = vld [vmem:[#allocation2 + $0xc8] sm:$0xf] }
 0x1a6   : > { %v5760_v45 = vshrl.u32 %v5669_v58, 16  ;;  %vm16251_vm8 = vnez %v16250_v55  ;;  %v1361_v54 = vsel %vm16253_vm5, %v9941_v9, 0  ;;  %v985_v6 = vsel %vm953_vm7, 65537, %v16243_v33  ;;  %v16254_v24 = vld [vmem:[#allocation33_spill] sm:$0xff]  ;;  %v16258_v36 = vld [vmem:[#allocation22_spill] sm:$0xff] }
 0x1a7   : > { %v1360_v40 = vsel %vm16251_vm8, %v12620_v63, 0  ;;  %v4675_v46 = vshrl.u32 %v9380_v27, 16  ;;  %v2821_v57 = vsel %vm15688_vm0, %v12469_v38, 0  ;;  %v5763_v41 = vshll.u32 %v5669_v58, 16  ;;  %v16256_v63 = vld [vmem:[#allocation68_spill] sm:$0xff] }
 0x1a8   : > { %v1855_v3 = vor.u32 %v1853_v51, %v1852_v15  ;;  %v1857_v22 = vrot.slane %v1852_v15, 4  ;;  %v1290_v60 = vshll.u32 %v985_v6, 16  ;;  %v1294_v59 = vshrl.u32 %v985_v6, 16 }
 0x1a9   : > { %v4678_v2 = vshll.u32 %v9380_v27, 16  ;;  %v5762_v56 = vrot.slane %v5760_v45, 3  ;;  %vm16255_vm4 = vnez %v16254_v24  ;;  %vm16257_vm9 = vnez %v16256_v63  ;;  %v12647_v27 = vpop.permute.xlu0 %4701 }
 0x1aa   : > { %v1362_v61 = vsel %vm16255_vm4, %v9942_v13, 0  ;;  %v1363_v9 = vsel %vm16257_vm9, %v9943_v50, 0  ;;  %v1856_v38 = vsel %vm10224_vm11, %v16258_v36, %v1855_v3  ;;  %vm12643_vm14 = vcmp.ne.s16.totalorder %v1857_v22, 0 }
 0x1ab   : > { %v16259_v51 = vmov 0  ;;  %v1292_v58 = vrot.slane %v1290_v60, 5  ;;  %v1296_v15 = vrot.slane %v1294_v59, 4  ;;  %vm12649_vm6 = vcmp.ne.s16.totalorder %v1856_v38, 0 }
 0x1ac   : > { %v16260_v51 = vsel %vm12643_vm14, 4294967295, %v16259_v51  ;;  %v16262_v45 = vmov 0  ;;  %v1923_v6 = vsel %vm12643_vm14, %v1439_v43, 0  ;;  %v2823_v13 = vsel %vm12643_vm14, %v2406_v35, 0 }
 0x1ad   : > { %16261 = vst [vmem:[#allocation79_spill] sm:$0xff] %v16260_v51  ;;  %v16263_v45 = vsel %vm12649_vm6, 4294967295, %v16262_v45  ;;  %v5765_v50 = vrot.slane %v5763_v41, 4  ;;  %v1922_v36 = vsel %vm12649_vm6, %v12491_v26, 0  ;;  %v9347_v3 = vcombine.low %v1923_v6, %v1923_v6  ;;  %v12670_v6 = vpop.permute.xlu1 %4853  ;;  %v12672_v0 = vpop.permute.xlu0 %4851 }
 0x1ae   : > { %16264 = vst [vmem:[#allocation70_spill] sm:$0xff] %v16263_v45  ;;  %v1293_v22 = vsel %vm10273_vm15, %v10251_v62, %v1292_v58  ;;  %v1297_v60 = vor.u32 %v1296_v15, %v1292_v58  ;;  %v9346_v59 = vcombine.low %v1921_v21, %v1922_v36  ;;  %v16265_v38 = vmov 0  ;;  %v1925_v58 = vld [vmem:[#allocation2 + $0xf8] sm:$0xf]  ;;  %v16268_v36 = vld [vmem:[#allocation61_spill] sm:$0xff] }
 0x1af   : > { %vm12663_vm7 = vcmp.ne.s16.totalorder %v1293_v22, 0  ;;  %v4677_v43 = vrot.slane %v4675_v46, 4  ;;  %v2822_v41 = vsel %vm12649_vm6, %v12495_v23, 0  ;;  %v4307_v35 = vrot.slane %v9347_v3, 5 }
 0x1b0   : > { %v16266_v38 = vsel %vm12663_vm7, 4294967295, %v16265_v38  ;;  %v1298_v25 = vrot.slane %v1297_v60, 4  ;;  %v4680_v11 = vrot.slane %v4678_v2, 5  ;;  %v9397_v51 = vcombine.low %v2823_v13, %v2823_v13 }
 0x1b1   : > { %16267 = vst [vmem:[#allocation72_spill] sm:$0xff] %v16266_v38  ;;  %v4305_v44 = vrot.slane %v9346_v59, 5  ;;  %v9396_v21 = vcombine.low %v2821_v57, %v2822_v41  ;;  %v9308_v15 = vcombine.low %v1362_v61, %v1363_v9  ;;  %vm15693_vm0 = vcmp.ne.s16.totalorder %v16268_v36, 0 }
 0x1b2   : > { %v1303_v46 = vsel %vm10273_vm15, %v1298_v25, %v10164_v12  ;;  %v2373_v3 = vsel %vm12663_vm7, %v12491_v26, 0  ;;  %v5766_v2 = vor.u32 %v5765_v50, %v5762_v56  ;;  %vm16269_vm14 = vcmask 523264   ;;  %v4969_v56 = vpop.permute.xlu0 %4968 }
 0x1b3   : > { %v5671_v13 = vsel %vm16269_vm14, %v5636_v20, %v12533_v17  ;;  %vm16270_vm6 = vcmask 1042432   ;;  %v16271_v60 = vrot.slane %v12350_v28, 5  ;;  %vm12687_vm4 = vcmp.ne.s16.totalorder %v1303_v46, 0  ;;  %v9944_v46 = vld [vmem:[#allocation2 + $0x84] sm:$0xf] }
 0x1b4   : > { %v4308_v22 = vsel %vm16270_vm6, %v4305_v44, %v4307_v35  ;;  %vm16272_vm9 = vmmov %vm16270_vm6  ;;  %v16273_v61 = vmov 0  ;;  %v5768_v9 = vshrl.u32 %v5671_v13, 16  ;;  %v2374_v12 = vsel %vm12687_vm4, %v1925_v58, 0  ;;  %v9945_v58 = vld [vmem:[#allocation2 + $0x80] sm:$0xf] }
 0x1b5   : > { %v4306_v57 = vsel %vm16272_vm9, %v16271_v60, %v4305_v44  ;;  %v16274_v61 = vsel %vm12687_vm4, 4294967295, %v16273_v61  ;;  %4341 = vrot.lane.b32.xlu1 %v4308_v22, %s10027_s19  ;;  %v9307_v25 = vcombine.low %v1360_v40, %v1361_v54  ;;  %v4831_v17 = vrot.slane %v9397_v51, 5  ;;  %v16276_v44 = vld [vmem:[#allocation11_spill] sm:$0xff]  ;;  %v16277_v40 = vld [vmem:[#allocation8_spill] sm:$0xff]  ;;  %v4971_v51 = vpop.permute.xlu1 %4970 }
 0x1b6   : > { %16275 = vst [vmem:[#allocation52_spill] sm:$0xff] %v16274_v61  ;;  %4339 = vrot.lane.b32.xlu0 %v4306_v57, %s10027_s19  ;;  %v5771_v20 = vshll.u32 %v5671_v13, 16  ;;  %v9363_v50 = vcombine.low %v2373_v3, %v2374_v12  ;;  %v4829_v28 = vrot.slane %v9396_v21, 5  ;;  %v5770_v59 = vrot.slane %v5768_v9, 3  ;;  %v5226_v57 = vpop.permute.xlu0 %5225 }
 0x1b7   : > { %v3256_v41 = vsel %vm10273_vm15, %v10251_v62, %v16276_v44  ;;  %v4681_v35 = vor.u32 %v4680_v11, %v4677_v43  ;;  %v12701_v22 = vsel %vm15693_vm0, %v9944_v46, 0  ;;  %vm16278_vm9 = vnez %v16277_v40  ;;  %v16379_v44 = vld [vmem:[#allocation18_spill] sm:$0xff] }
 0x1b8   : > { %v5773_v60 = vrot.slane %v5771_v20, 4  ;;  %v3400_v54 = vsel %vm16278_vm9, %v9945_v58, 0  ;;  %vm16279_vm14 = vcmask 64512   ;;  %vm12707_vm6 = vcmp.ne.s16.totalorder %v3256_v41, 0  ;;  %v16294_v41 = vld [vmem:[#allocation13_spill] sm:$0xff] }
 0x1b9   : > { %v5424_v21 = vsel %vm16279_vm14, %v9308_v15, %v12516_v30  ;;  %v16280_v3 = vmov 0  ;;  %v3401_v19 = vsel %vm16278_vm9, %v9944_v46, 0  ;;  %vm16283_vm15 = vsmask.f32 4352  ;;  %vm16285_vm0 = vmmov %vm16279_vm14 }
 0x1ba   : > { %v16281_v3 = vsel %vm12707_vm6, 4294967295, %v16280_v3  ;;  %v5767_v11 = vsel %vm16283_vm15, %v12510_v14, %v5766_v2  ;;  %v16284_v43 = vcombine.low %v12595_v7, %v12595_v7  ;;  %4456 = vrot.lane.b32.xlu0 %v9363_v50, %s10028_s20  ;;  %v5421_v30 = vsel %vm16285_vm0, %v9307_v25, %v12474_v16  ;;  %v16289_v7 = vld [vmem:[#allocation12_spill] sm:$0xff] }
 0x1bb   : > { %16282 = vst [vmem:[#allocation24_spill] sm:$0xff] %v16281_v3  ;;  %v12722_v15 = vor.u32 %v5773_v60, %v5770_v59  ;;  %v9430_v13 = vcombine.low %v3400_v54, %v3401_v19  ;;  %vm16286_vm14 = vsmask.f32 3328  ;;  %vm16287_vm5 = vcmask 1042432   ;;  %v3402_v59 = vld [vmem:[#allocation2 + $0x88] sm:$0x1]  ;;  %v5376_v19 = vpop.permute.xlu0 %5375 }
 0x1bc   : > { %4458 = vrot.lane.b32.xlu1 %v16284_v43, %s10028_s20  ;;  %v4682_v9 = vsel %vm16286_vm14, %v12398_v4, %v4681_v35  ;;  %v4832_v12 = vsel %vm16287_vm5, %v4829_v28, %v4831_v17  ;;  %v9414_v14 = vcombine.low %v12701_v22, %v12701_v22  ;;  %vm16288_vm15 = vcmask 588800   ;;  %v16292_v17 = vld [vmem:[#allocation62_spill] sm:$0xff] }
 0x1bd   : > { %9779 = vmatprep.mubr.msk.bf16.mxu0 %vm16288_vm15, %v5767_v11  ;;  %v16290_v20 = vrot.slane %v12309_v37, 4  ;;  %vm16291_vm0 = vcmask 130048   ;;  %v3335_v4 = vsel %vm12707_vm6, %v12495_v23, 0  ;;  %vm16293_vm5 = vnez %v16292_v17 }
 0x1be   : > { %v5465_v25 = vsel %vm16291_vm0, %v5424_v21, %v12548_v18  ;;  %v3336_v50 = vsel %vm16293_vm5, %v9945_v58, 0  ;;  %v5199_v22 = vshrl.u32 %v9430_v13, 16  ;;  %v5202_v60 = vshll.u32 %v9430_v13, 16  ;;  %4713 = vrot.lane.b32.xlu0 %v4682_v9, %s10026_s18  ;;  %v5228_v21 = vpop.permute.xlu1 %5227 }
 0x1bf   : > { %v12735_v16 = vsel %vm10224_vm11, %v16290_v20, %v16289_v7  ;;  %vm16295_vm11 = vsmask.f32 4352  ;;  %v16296_v37 = vrot.slane %v12437_v29, 5  ;;  %vm16297_vm0 = vcmask 1042432  }
 0x1c0   : > { %v5775_v48 = vsel %vm16295_vm11, %v5766_v2, %v12722_v15  ;;  %4715 = vrot.lane.b32.xlu1 %v4681_v35, %s10026_s18  ;;  %vm16298_vm6 = vcmask 130048   ;;  %vm16299_vm14 = vcmask 195584   ;;  %v9413_v11 = vcombine.low %v3335_v4, %v3336_v50 }
 0x1c1   : > { %v4830_v23 = vsel %vm16297_vm0, %v16296_v37, %v4829_v28  ;;  %v5463_v18 = vsel %vm16298_vm6, %v5421_v30, %v12582_v53  ;;  %v5500_v54 = vsel %vm16299_vm14, %v5465_v25, %v12599_v32  ;;  %vm16300_vm15 = vcmp.ne.s16.totalorder %v16294_v41, 0  ;;  %vm16301_vm11 = vmmov %vm16299_vm14  ;;  %v16305_v28 = vld [vmem:[#allocation16_spill] sm:$0xff] }
 0x1c2   : > { %v3851_v2 = vsel %vm16300_vm15, %v3402_v59, 0  ;;  %v5498_v35 = vsel %vm16301_vm11, %v5463_v18, %v12627_v5  ;;  %vm16302_vm5 = vcmask 588800   ;;  %vm16303_vm8 = vcmask 261120   ;;  %4863 = vrot.lane.b32.xlu0 %v4830_v23, %s10030_s22  ;;  %v4181_v50 = vpop.permute.xlu1 %4180 }
 0x1c3   : > { %9780 = vmatmul.mubr.msk.bf16.gmra.mxu0 %vm16302_vm5, %v5775_v48  ;;  %v5535_v29 = vsel %vm16303_vm8, %v5500_v54, %v12634_v1  ;;  %vm16304_vm0 = vcmp.ne.s16.totalorder %v12735_v16, 0  ;;  %vm16306_vm6 = vnez %v16305_v28  ;;  %vm16307_vm14 = vmmov %vm16303_vm8  ;;  %vm16308_vm4 = vcmask 326656  }
 0x1c4   : > { %v3849_v53 = vsel %vm16304_vm0, %v9945_v58, 0  ;;  %v3850_v32 = vsel %vm16306_vm6, %v9944_v46, 0  ;;  %v5533_v43 = vsel %vm16307_vm14, %v5498_v35, %v12647_v27  ;;  %v5570_v30 = vsel %vm16308_vm4, %v5535_v29, %v12670_v6  ;;  %vm16309_vm15 = vmmov %vm16308_vm4  ;;  %4865 = vrot.lane.b32.xlu1 %v4832_v12, %s10030_s22  ;;  %v5378_v27 = vpop.permute.xlu0 %5377 }
 0x1c5   : > { %v5201_v13 = vrot.slane %v5199_v22, 4  ;;  %v5204_v9 = vrot.slane %v5202_v60, 5  ;;  %v5568_v5 = vsel %vm16309_vm15, %v5533_v43, %v12672_v0  ;;  %vm16310_vm5 = vcmask 392192  }
 0x1c6   : > { %v5605_v20 = vsel %vm16310_vm5, %v5570_v30, %v4971_v51  ;;  %v9447_v1 = vcombine.low %v3851_v2, %v3851_v2  ;;  %vm16311_vm8 = vmmov %vm16310_vm5  ;;  %vm16312_vm11 = vcmask 457728   ;;  %v9446_v25 = vcombine.low %v3849_v53, %v3850_v32  ;;  %4980 = vrot.lane.b32.xlu0 %v9413_v11, %s10031_s23  ;;  %v4183_v2 = vpop.permute.xlu1 %4182 }
 0x1c7   : > { %v5603_v46 = vsel %vm16311_vm8, %v5568_v5, %v4969_v56  ;;  %v5640_v58 = vsel %vm16312_vm11, %v5605_v20, %v5228_v21  ;;  %vm16313_vm0 = vmmov %vm16312_vm11  ;;  %vm16314_vm4 = vcmask 523264   ;;  %v5205_v22 = vor.u32 %v5204_v9, %v5201_v13  ;;  %v9946_v9 = vld [vmem:[#allocation2 + $0xcc] sm:$0xf]  ;;  %v9947_v20 = vld [vmem:[#allocation2 + $0xd0] sm:$0xf] }
 0x1c8   : > { %v5638_v6 = vsel %vm16313_vm0, %v5603_v46, %v5226_v57  ;;  %v5675_v4 = vsel %vm16314_vm4, %v5640_v58, %v5378_v27  ;;  %vm16315_vm14 = vmmov %vm16314_vm4  ;;  %4982 = vrot.lane.b32.xlu1 %v9414_v14, %s10031_s23  ;;  %v5355_v56 = vrot.slane %v9447_v1, 5  ;;  %vm16316_vm15 = vsmask.f32 3328  ;;  %v4332_v32 = vpop.permute.xlu0 %4331  ;;  %v16325_v1 = vld [vmem:[#allocation73_spill] sm:$0xff] }
 0x1c9   : > { %v5673_v0 = vsel %vm16315_vm14, %v5638_v6, %v5376_v19  ;;  %v5784_v59 = vshrl.u32 %v5675_v4, 16  ;;  %v5787_v51 = vshll.u32 %v5675_v4, 16  ;;  %v5206_v57 = vsel %vm16316_vm15, %v12531_v42, %v5205_v22  ;;  %v9948_v27 = vld [vmem:[#allocation2 + $0xd4] sm:$0xf]  ;;  %v9949_v4 = vld [vmem:[#allocation2 + $0xd8] sm:$0xf] }
 0x1ca   : > { %v5776_v12 = vshrl.u32 %v5673_v0, 16  ;;  %v5779_v60 = vshll.u32 %v5673_v0, 16  ;;  %v5353_v23 = vrot.slane %v9446_v25, 5  ;;  %5237 = vrot.lane.b32.xlu0 %v5206_v57, %s10032_s29  ;;  %vm16317_vm5 = vcmask 1042432   ;;  %v4334_v53 = vpop.permute.xlu1 %4333  ;;  %v16327_v25 = vld [vmem:[#allocation76_spill] sm:$0xff]  ;;  %v16329_v0 = vld [vmem:[#allocation30_spill] sm:$0xff] }
 0x1cb   : > { %v5786_v48 = vrot.slane %v5784_v59, 3  ;;  %v5789_v37 = vrot.slane %v5787_v51, 4  ;;  %v16318_v11 = vrot.slane %v12546_v39, 5  ;;  %vm16319_vm8 = vmmov %vm16317_vm5  ;;  %vm16320_vm11 = vsmask.f32 4352 }
 0x1cc   : > { %v5778_v18 = vrot.slane %v5776_v12, 3  ;;  %v5781_v54 = vrot.slane %v5779_v60, 4  ;;  %5239 = vrot.lane.b32.xlu1 %v5205_v22, %s10032_s29  ;;  %v5356_v14 = vsel %vm16317_vm5, %v5353_v23, %v5355_v56  ;;  %vm16321_vm0 = vmmov %vm16320_vm11  ;;  %vm16322_vm4 = vcmask 588800   ;;  %v4449_v39 = vpop.permute.xlu0 %4448  ;;  %s10034_s29 = smov 80  }
 0x1cd   : > { %v12786_v21 = vor.u32 %v5789_v37, %v5786_v48  ;;  %v5354_v35 = vsel %vm16319_vm8, %v16318_v11, %v5353_v23  ;;  %vm16323_vm14 = vmmov %vm16322_vm4  ;;  %vm16326_vm15 = vnez %v16325_v1  ;;  %vm16328_vm5 = vnez %v16327_v25 }
 0x1ce   : > { %v5782_v19 = vor.u32 %v5781_v54, %v5778_v18  ;;  %5387 = vrot.lane.b32.xlu0 %v5354_v35, %s10033_s8  ;;  %v4451_v43 = vpop.permute.xlu1 %4450  ;;  %v1365_v46 = vsel %vm16326_vm15, %v9947_v20, 0  ;;  %v1366_v6 = vsel %vm16328_vm5, %v9948_v27, 0  ;;  %vm16330_vm8 = vnez %v16329_v0 }
 0x1cf   : > { %v1367_v59 = vsel %vm16330_vm8, %v9949_v4, 0  ;;  %vm16335_vm15 = vcmask 261120   ;;  %vm16336_vm5 = vcmask 326656   ;;  %vm16338_vm8 = vcmask 392192  }
 0x1d0   : > { %v5783_v42 = vsel %vm16320_vm11, %v12722_v15, %v5782_v19  ;;  %v5791_v29 = vsel %vm16321_vm0, %v5782_v19, %v12786_v21  ;;  %5389 = vrot.lane.b32.xlu1 %v5356_v14, %s10033_s8  ;;  %v4706_v13 = vpop.permute.xlu0 %4705  ;;  %v1364_v15 = vsel %vm12054_vm10, %v9946_v9, 0  ;;  %v9310_v12 = vcombine.low %v1366_v6, %v1367_v59 }
 0x1d1   : > { %9783 = vmatprep.mubr.msk.bf16.mxu0 %vm16322_vm4, %v5783_v42  ;;  %v9309_v22 = vcombine.low %v1364_v15, %v1365_v46  ;;  %vm16331_vm11 = vcmask 64512   ;;  %vm16332_vm0 = vcmask 130048   ;;  %vm16340_vm6 = vcmask 457728  }
 0x1d2   : > { %9784 = vmatmul.mubr.msk.bf16.gmra.mxu0 %vm16323_vm14, %v5791_v29  ;;  %v4708_v30 = vpop.permute.xlu1 %4707  ;;  %vm16333_vm4 = vmmov %vm16331_vm11  ;;  %vm16334_vm14 = vcmask 195584  }
 0x1d3   : > { %v5427_v56 = vsel %vm16331_vm11, %v9309_v22, %v4181_v50  ;;  %v5430_v57 = vsel %vm16333_vm4, %v9310_v12, %v4183_v2  ;;  %vm16337_vm10 = vmmov %vm16332_vm0 }
 0x1d4   : > { %v4856_v58 = vpop.permute.xlu0 %4855  ;;  %v5467_v48 = vsel %vm16332_vm0, %v5427_v56, %v4332_v32  ;;  %v5469_v14 = vsel %vm16337_vm10, %v5430_v57, %v4334_v53  ;;  %vm16339_vm7 = vmmov %vm16334_vm14  ;;  %vm16342_vm0 = vcmask 523264  }
 0x1d5   : > { %v5502_v23 = vsel %vm16334_vm14, %v5467_v48, %v4449_v39  ;;  %v5504_v35 = vsel %vm16339_vm7, %v5469_v14, %v4451_v43  ;;  %vm16341_vm11 = vmmov %vm16335_vm15  ;;  %vm16347_vm7 = vsmask.f32 4352 }
 0x1d6   : > { %v4858_v51 = vpop.permute.xlu1 %4857  ;;  %v5537_v54 = vsel %vm16335_vm15, %v5502_v23, %v4706_v13  ;;  %v5539_v29 = vsel %vm16341_vm11, %v5504_v35, %v4708_v30  ;;  %vm16343_vm4 = vmmov %vm16336_vm5  ;;  %v12837_v23 = vld [vmem:[%s15399_s2] ss:$0 sm:$0xff]  ;;  %vm15709_vm11 = vcmask 125952  }
 0x1d7   : > { %v5572_v19 = vsel %vm16336_vm5, %v5537_v54, %v4856_v58  ;;  %v5574_v39 = vsel %vm16343_vm4, %v5539_v29, %v4858_v51  ;;  %vm16344_vm15 = vmmov %vm16338_vm8  ;;  %v9951_v29 = vld [vmem:[#allocation2 + $0xe0] sm:$0xf] }
 0x1d8   : > { %v4973_v60 = vpop.permute.xlu0 %4972  ;;  %vm16345_vm5 = vmmov %vm16340_vm6 }
 0x1d9   : > { %v5607_v11 = vsel %vm16338_vm8, %v5572_v19, %v4973_v60  ;;  %vm16346_vm10 = vmmov %vm16342_vm0 }
 0x1da   : > { %v4975_v37 = vpop.permute.xlu1 %4974  ;;  %vm16349_vm8 = vmmov %vm16347_vm7 }
 0x1db   : > { %v5609_v15 = vsel %vm16344_vm15, %v5574_v39, %v4975_v37  ;;  %vm16355_vm15 = vcmask 130048  }
 0x1dc   : > { %v5230_v18 = vpop.permute.xlu0 %5229 }
 0x1dd   : > { %v5642_v50 = vsel %vm16340_vm6, %v5607_v11, %v5230_v18  ;;  %vm16348_vm6 = vcmask 588800  }
 0x1de   : > { %v5232_v32 = vpop.permute.xlu1 %5231  ;;  %vm16350_vm14 = vmmov %vm16348_vm6 }
 0x1df   : > { %v5644_v53 = vsel %vm16345_vm5, %v5609_v15, %v5232_v32  ;;  %v1369_v32 = vsel %vm12431_vm12, %v9951_v29, 0  ;;  %vm16356_vm5 = vmmov %vm16355_vm15 }
 0x1e0   : > { %v5380_v42 = vpop.permute.xlu0 %5379 }
 0x1e1   : > { %v5677_v2 = vsel %vm16342_vm0, %v5642_v50, %v5380_v42  ;;  %v9950_v50 = vld [vmem:[#allocation2 + $0xdc] sm:$0xf]  ;;  %vm16353_vm0 = vcmask 64512  }
 0x1e2   : > { %v5792_v9 = vshrl.u32 %v5677_v2, 16  ;;  %v5795_v13 = vshll.u32 %v5677_v2, 16  ;;  %v4185_v30 = vpop.permute.xlu1 %4184  ;;  %v1368_v42 = vsel %vm12394_vm3, %v9950_v50, 0  ;;  %vm16354_vm4 = vmmov %vm16353_vm0 }
 0x1e4   : > { %v5794_v20 = vrot.slane %v5792_v9, 3  ;;  %v5797_v46 = vrot.slane %v5795_v13, 4  ;;  %v5382_v58 = vpop.permute.xlu0 %5381  ;;  %v9952_v9 = vld [vmem:[#allocation2 + $0xe4] sm:$0xf] }
 0x1e5   : > { %v5679_v43 = vsel %vm16346_vm10, %v5644_v53, %v5382_v58  ;;  %v1370_v15 = vsel %vm12352_vm2, %v9952_v9, 0  ;;  %v9953_v53 = vld [vmem:[#allocation2 + $0xe8] sm:$0xf]  ;;  %vm16357_vm10 = vcmask 195584   ;;  %vm16425_vm2 = vcmask 392192  }
 0x1e6   : > { %v5798_v27 = vor.u32 %v5797_v46, %v5794_v20  ;;  %v5800_v6 = vshrl.u32 %v5679_v43, 16  ;;  %v5803_v4 = vshll.u32 %v5679_v43, 16  ;;  %v4187_v56 = vpop.permute.xlu1 %4186  ;;  %v1371_v46 = vsel %vm12384_vm13, %v9953_v53, 0 }
 0x1e7   : > { %v9769_v18 = vpop.f32.mrf.mxu0 }
 0x1e8   : > { %v5802_v59 = vrot.slane %v5800_v6, 3  ;;  %v5805_v22 = vrot.slane %v5803_v4, 4  ;;  %v5799_v51 = vsel %vm16347_vm7, %v12786_v21, %v5798_v27  ;;  %v5963_v21 = vadd.f32 %v9769_v18, %v12837_v23  ;;  %vm16358_vm7 = vmmov %vm16357_vm10 }
 0x1e9   : > { %9787 = vmatprep.mubr.msk.bf16.mxu0 %vm16348_vm6, %v5799_v51  ;;  %v5954_v11 = vpop.f32.mrf.mxu0  ;;  %v9312_v18 = vcombine.low %v1370_v15, %v1371_v46  ;;  %vm16359_vm6 = vcmask 261120  }
 0x1ea   : > { %v12829_v12 = vor.u32 %v5805_v22, %v5802_v59  ;;  %v6083_v14 = vmax.f32 %v5963_v21, 0.0  ;;  %v5955_v35 = vadd.f32 %v12837_v23, %v5954_v11 }
 0x1eb   : > { %v9770_v39 = vpop.f32.mrf.mxu0 }
 0x1ec   : > { %v5807_v60 = vsel %vm16349_vm8, %v5798_v27, %v12829_v12  ;;  %v9688_v2 = vpack.c.bf16 %v6083_v14, %v6083_v14  ;;  %v6081_v43 = vmax.f32 %v5955_v35, 0.0  ;;  %v5966_v27 = vadd.f32 %v9770_v39, %v12837_v23  ;;  %vm16360_vm8 = vmmov %vm16359_vm6 }
 0x1ed   : > { %9788 = vmatmul.mubr.msk.bf16.gmra.mxu0 %vm16350_vm14, %v5807_v60  ;;  %v5957_v4 = vpop.f32.mrf.mxu0  ;;  %v9311_v60 = vcombine.low %v1368_v42, %v1369_v32  ;;  %v5436_v42 = vsel %vm16354_vm4, %v9312_v18, %v4187_v56  ;;  %vm16361_vm14 = vcmask 326656   ;;  %vm16364_vm4 = vcmask 392192  }
 0x1ee   : > { %6244 = vst.msk [vmem:[#allocation3 + $0x8] sm:$0xf] %vm15709_vm11, %v9688_v2  ;;  %6276 = vst.msk [vmem:[#allocation3 + $0x88] sm:$0xf] %vm15709_vm11, %v9688_v2  ;;  %v9686_v59 = vpack.c.bf16 %v6081_v43, %v6081_v43  ;;  %v6084_v22 = vmax.f32 %v5966_v27, 0.0  ;;  %v5958_v51 = vadd.f32 %v12837_v23, %v5957_v4 }
 0x1ef   : > { %v5433_v53 = vsel %vm16353_vm0, %v9311_v60, %v4185_v30  ;;  %vm16363_vm0 = vmmov %vm16361_vm14 }
 0x1f0   : > { %v4336_v37 = vpop.permute.xlu0 %4335  ;;  %6242 = vst.msk [vmem:[#allocation3] sm:$0xf] %vm15709_vm11, %v9686_v59  ;;  %6274 = vst.msk [vmem:[#allocation3 + $0x80] sm:$0xf] %vm15709_vm11, %v9686_v59  ;;  %v6114_v11 = vpack.c.bf16 %v6084_v22, %v6083_v14  ;;  %v9689_v35 = vpack.c.bf16 %v6084_v22, %v6084_v22  ;;  %v6082_v50 = vmax.f32 %v5958_v51, 0.0 }
 0x1f1   : > { %v4338_v48 = vpop.permute.xlu1 %4337  ;;  %v5471_v59 = vsel %vm16355_vm15, %v5433_v53, %v4336_v37 }
 0x1f2   : > { %6245 = vst.msk [vmem:[#allocation3 + $0xc] sm:$0xf] %vm15709_vm11, %v9689_v35  ;;  %6277 = vst.msk [vmem:[#allocation3 + $0x8c] sm:$0xf] %vm15709_vm11, %v9689_v35  ;;  %v7254_v29 = vshrl.u32 %v6114_v11, 16  ;;  %v7257_v2 = vshll.u32 %v6114_v11, 16  ;;  %v6113_v39 = vpack.c.bf16 %v6082_v50, %v6081_v43  ;;  %v9687_v9 = vpack.c.bf16 %v6082_v50, %v6082_v50 }
 0x1f3   : > { %v5473_v22 = vsel %vm16356_vm5, %v5436_v42, %v4338_v48  ;;  %vm16367_vm5 = vsmask.f32 3328  ;;  %v16368_v42 = vld [vmem:[#allocation27_spill] sm:$0xff] }
 0x1f4   : > { %v7256_v46 = vrot.slane %v7254_v29, 4  ;;  %v7259_v27 = vrot.slane %v7257_v2, 5  ;;  %6243 = vst.msk [vmem:[#allocation3 + $0x4] sm:$0xf] %vm15709_vm11, %v9687_v9  ;;  %6275 = vst.msk [vmem:[#allocation3 + $0x84] sm:$0xf] %vm15709_vm11, %v9687_v9 }
 0x1f5   : > { %v4455_v57 = vpop.permute.xlu1 %4454  ;;  %v7246_v14 = vshrl.u32 %v6113_v39, 16  ;;  %v7249_v4 = vshll.u32 %v6113_v39, 16  ;;  %v12864_v60 = vld [vmem:[#allocation3 + $0x88] sm:$0xf]  ;;  %vm16402_vm11 = vcmp.ne.s16.totalorder %v10251_v62, 0 }
 0x1f6   : > { %v5508_v56 = vsel %vm16358_vm7, %v5473_v22, %v4455_v57  ;;  %v12870_v29 = vor.u32 %v7259_v27, %v7256_v46 }
 0x1f7   : > { %v7248_v51 = vrot.slane %v7246_v14, 4  ;;  %v7251_v30 = vrot.slane %v7249_v4, 5  ;;  %v12874_v48 = vld [vmem:[#allocation3 + $0x80] sm:$0xf]  ;;  %v16372_v14 = vld [vmem:[#allocation28_spill] sm:$0xff] }
 0x1f8   : > { %v6474_v27 = vld [vmem:[#allocation3] sm:$0xf] }
 0x1f9   : > { %v4712_v19 = vpop.permute.xlu1 %4711  ;;  %v12872_v37 = vor.u32 %v7251_v30, %v7248_v51  ;;  %v12883_v9 = vld [vmem:[#allocation3 + $0x8c] sm:$0xf] }
 0x1fa   : > { %v5543_v11 = vsel %vm16360_vm8, %v5508_v56, %v4712_v19  ;;  %vm16374_vm8 = vcmask 457728  }
 0x1fb   : > { %v4453_v54 = vpop.permute.xlu0 %4452  ;;  %16362 = vst [vmem:[#allocation9_spill] sm:$0xff] %v12872_v37  ;;  %v7261_v53 = vsel %vm16367_vm5, %v12872_v37, %v12870_v29  ;;  %v12901_v22 = vld [vmem:[#allocation3 + $0x84] sm:$0xf] }
 0x1fc   : > { %v5506_v43 = vsel %vm16357_vm10, %v5471_v59, %v4453_v54  ;;  %v12876_v54 = vld [vmem:[#allocation3 + $0x8] sm:$0xf]  ;;  %vm16369_vm10 = vcmp.ne.s16.totalorder %v16368_v42, 0  ;;  %7390 = vrot.lane.b32.xlu0 %v7261_v53, %s10033_s8  ;;  %v6475_v56 = vld [vmem:[#allocation3 + $0x4] sm:$0xf]  ;;  %v16381_v53 = vld [vmem:[#allocation25_spill] sm:$0xff] }
 0x1fd   : > { %v6409_v46 = vsel %vm16369_vm10, %v12864_v60, 0  ;;  %vm16382_vm5 = vnez %v16381_v53  ;;  %vm16383_vm10 = vcmask 523264  }
 0x1ff   : > { %v4710_v58 = vpop.permute.xlu0 %4709  ;;  %v4862_v6 = vpop.permute.xlu1 %4861 }
 0x200   : > { %v5541_v18 = vsel %vm16359_vm6, %v5506_v43, %v4710_v58  ;;  %v5578_v2 = vsel %vm16363_vm0, %v5543_v11, %v4862_v6  ;;  %v16365_v58 = vld [vmem:[#allocation20_spill] sm:$0xff]  ;;  %v16370_v6 = vld [vmem:[#allocation29_spill] sm:$0xff]  ;;  %vm16373_vm6 = vnez %v16372_v14  ;;  %v16375_v43 = vld [vmem:[#allocation23_spill] sm:$0xff] }
 0x201   : > { %vm16366_vm15 = vnez %v16365_v58  ;;  %vm16371_vm7 = vnez %v16370_v6 }
 0x202   : > { %v6444_v19 = vsel %vm16366_vm15, %v12864_v60, 0 }
 0x203   : > { %v4860_v21 = vpop.permute.xlu0 %4859  ;;  %v4979_v32 = vpop.permute.xlu1 %4978 }
 0x204   : > { %v5576_v35 = vsel %vm16361_vm14, %v5541_v18, %v4860_v21  ;;  %v12885_v21 = vld [vmem:[#allocation3 + $0xc] sm:$0xf]  ;;  %vm16376_vm14 = vnez %v16375_v43  ;;  %v16377_v18 = vld [vmem:[#allocation26_spill] sm:$0xff]  ;;  %v6506_v43 = vsel %vm16382_vm5, %v6475_v56, 0 }
 0x205   : > { %v6508_v4 = vsel %vm16373_vm6, %v12885_v21, 0  ;;  %v6407_v51 = vsel %vm16376_vm14, %v12874_v48, 0  ;;  %vm16378_vm0 = vcmp.ne.s16.totalorder %v16377_v18, 0  ;;  %vm16386_vm14 = vcmask 392192  }
 0x206   : > { %v6507_v11 = vsel %vm16378_vm0, %v12876_v54, 0  ;;  %v5613_v45 = vsel %vm16386_vm14, %v5578_v2, %v4979_v32  ;;  %vm16388_vm0 = vcmask 457728  }
 0x207   : > { %v4977_v15 = vpop.permute.xlu0 %4976  ;;  %v12919_v36 = vcombine.low %v6507_v11, %v6508_v4 }
 0x208   : > { %v5611_v39 = vsel %vm16364_vm4, %v5576_v35, %v4977_v15  ;;  %v6410_v15 = vsel %vm16371_vm7, %v12883_v9, 0  ;;  %vm16380_vm4 = vnez %v16379_v44 }
 0x209   : > { %v12906_v30 = vcombine.low %v6409_v46, %v6410_v15  ;;  %v15714_v32 = vrot.slane %v12919_v36, 5 }
 0x20b   : > { %v5234_v50 = vpop.permute.xlu0 %5233  ;;  %v5236_v57 = vpop.permute.xlu1 %5235 }
 0x20c   : > { %v5646_v59 = vsel %vm16374_vm8, %v5611_v39, %v5234_v50  ;;  %v6443_v50 = vsel %vm16380_vm4, %v12901_v22, 0  ;;  %v6408_v39 = vsel %vm16373_vm6, %v12901_v22, 0  ;;  %vm16385_vm8 = vcmp.ne.s16.totalorder %v10398_v10, 0 }
 0x20d   : > { %v9553_v15 = vcombine.low %v6443_v50, %v6444_v19  ;;  %v12922_v37 = vcombine.low %v6407_v51, %v6408_v39  ;;  %v6505_v3 = vsel %vm16385_vm8, %v6474_v27, 0  ;;  %v5648_v20 = vsel %vm16388_vm0, %v5613_v45, %v5236_v57 }
 0x20e   : > { %v12927_v33 = vcombine.low %v6505_v3, %v6506_v43  ;;  %v15712_v19 = vrot.slane %v12906_v30, 5  ;;  %vm16389_vm8 = vcmask 1042432   ;;  %vm16391_vm0 = vsmask.f32 4352 }
 0x20f   : > { %16384 = vst [vmem:[#allocation10_spill] sm:$0xff] %v12922_v37  ;;  %v12930_v13 = vpop.permute.xlu1 %4188  ;;  %7213 = vrot.lane.b32.xlu0 %v9553_v15, %s10031_s23  ;;  %v15711_v4 = vrot.slane %v12922_v37, 5  ;;  %vm16390_vm14 = vmmov %vm16389_vm8  ;;  %v6572_v43 = vsel %vm10128_vm1, %v12876_v54, 0  ;;  %v6573_v15 = vsel %vm10128_vm1, %v12885_v21, 0 }
 0x210   : > { %16387 = vst [vmem:[#allocation69_spill] sm:$0xff] %v12927_v33  ;;  %v15710_v27 = vrot.slane %v12927_v33, 5 }
 0x211   : > { %v7065_v45 = vsel %vm16389_vm8, %v15711_v4, %v15712_v19  ;;  %v6377_v4 = vsel %vm10128_vm1, %v12883_v9, 0  ;;  %v9954_v19 = vld [vmem:[#allocation2 + $0xec] sm:$0xf] }
 0x212   : > { %v5384_v35 = vpop.permute.xlu0 %5383  ;;  %7098 = vrot.lane.b32.xlu1 %v7065_v45, %s10026_s18 }
 0x213   : > { %v5681_v46 = vsel %vm16383_vm10, %v5646_v59, %v5384_v35  ;;  %v4191_v50 = vpop.permute.xlu1 %4190 }
 0x214   : > { %v5808_v7 = vshrl.u32 %v5681_v46, 16  ;;  %v5811_v8 = vshll.u32 %v5681_v46, 16 }
 0x216   : > { %v5810_v59 = vrot.slane %v5808_v7, 3  ;;  %v5813_v51 = vrot.slane %v5811_v8, 4  ;;  %v7507_v8 = vsel %vm16390_vm14, %v15710_v27, %v15714_v32 }
 0x217   : > { %v5386_v56 = vpop.permute.xlu0 %5385  ;;  %7540 = vrot.lane.b32.xlu0 %v7507_v8, %s10034_s29  ;;  %v6603_v8 = vsel %vm16278_vm9, %v12901_v22, 0 }
 0x218   : > { %v5683_v3 = vsel %vm16383_vm10, %v5648_v20, %v5386_v56  ;;  %v5814_v2 = vor.u32 %v5813_v51, %v5810_v59  ;;  %vm16392_vm10 = vcmask 588800   ;;  %v16394_v59 = vld [vmem:[#allocation19_spill] sm:$0xff]  ;;  %v16396_v56 = vld [vmem:[#allocation21_spill] sm:$0xff] }
 0x219   : > { %v5816_v57 = vshrl.u32 %v5683_v3, 16  ;;  %v5819_v11 = vshll.u32 %v5683_v3, 16  ;;  %vm16395_vm8 = vnez %v16394_v59  ;;  %vm16397_vm14 = vnez %v16396_v56 }
 0x21a   : > { %v5815_v35 = vsel %vm16391_vm0, %v12829_v12, %v5814_v2  ;;  %v6343_v51 = vsel %vm16395_vm8, %v12901_v22, 0  ;;  %v6344_v12 = vsel %vm16397_vm14, %v12864_v60, 0  ;;  %v12967_v3 = vcombine.low %v6572_v43, %v6573_v15 }
 0x21b   : > { %v5818_v7 = vrot.slane %v5816_v57, 3  ;;  %v5821_v20 = vrot.slane %v5819_v11, 4  ;;  %9791 = vmatprep.mubr.msk.bf16.mxu0 %vm16392_vm10, %v5815_v35  ;;  %v12969_v45 = vcombine.low %v6343_v51, %v6344_v12  ;;  %v6602_v11 = vsel %vm16278_vm9, %v12874_v48, 0 }
 0x21c   : > { %v12980_v35 = vcombine.low %v6602_v11, %v6603_v8  ;;  %v6375_v43 = vsel %vm10128_vm1, %v12901_v22, 0  ;;  %v6374_v51 = vsel %vm10128_vm1, %v12874_v48, 0  ;;  %v1374_v11 = vsel %vm16402_vm11, %v12491_v26, 0 }
 0x21d   : > { %v12956_v46 = vor.u32 %v5821_v20, %v5818_v7  ;;  %16398 = vst [vmem:[#allocation71_spill] sm:$0xff] %v12969_v45  ;;  %v9520_v8 = vcombine.low %v6374_v51, %v6375_v43  ;;  %vm16404_vm9 = vnez %v16266_v38  ;;  %v9314_v33 = vcombine.low %v1374_v11, %v1374_v11  ;;  %v16445_v45 = vld [vmem:[#allocation36_spill] sm:$0xff] }
 0x21e   : > { %16399 = vst [vmem:[#allocation33_spill] sm:$0xff] %v12980_v35  ;;  %v6376_v43 = vsel %vm10128_vm1, %v12864_v60, 0  ;;  %v6606_v51 = vsel %vm16382_vm5, %v12885_v21, 0  ;;  %vm16406_vm11 = vcmp.ne.s16.totalorder %v10398_v10, 0  ;;  %v16464_v56 = vrot.slane %v12919_v36, 5  ;;  %v16469_v36 = vld [vmem:[#allocation41_spill] sm:$0xff] }
 0x21f   : > { %v5823_v57 = vsel %vm16391_vm0, %v5814_v2, %v12956_v46  ;;  %vm16400_vm0 = vcmp.ne.s16.totalorder %v12735_v16, 0  ;;  %v1372_v16 = vsel %vm16404_vm9, %v9954_v19, 0  ;;  %v9521_v19 = vcombine.low %v6376_v43, %v6377_v4 }
 0x220   : > { %9792 = vmatmul.mubr.msk.bf16.gmra.mxu0 %vm16392_vm10, %v5823_v57  ;;  %v6635_v12 = vsel %vm16400_vm0, %v12874_v48, 0  ;;  %vm16401_vm10 = vnez %v16305_v28  ;;  %v9955_v48 = vld [vmem:[#allocation2 + $0xf0] sm:$0xf]  ;;  %vm16405_vm0 = vnez %v16274_v61  ;;  %v6813_v40 = vshll.u32 %v9520_v8, 16 }
 0x221   : > { %v6636_v57 = vsel %vm16401_vm10, %v12901_v22, 0  ;;  %v1373_v32 = vsel %vm16405_vm0, %v9955_v48, 0  ;;  %v9773_v22 = vpop.f32.mrf.mxu0  ;;  %vm16407_vm0 = vcmask 64512   ;;  %vm16411_vm10 = vcmask 130048  }
 0x222   : > { %v12997_v27 = vcombine.low %v6635_v12, %v6636_v57  ;;  %v5979_v26 = vadd.f32 %v9773_v22, %v12837_v23  ;;  %v6810_v57 = vshrl.u32 %v9520_v8, 16  ;;  %v9313_v61 = vcombine.low %v1372_v16, %v1373_v32  ;;  %vm16408_vm5 = vmmov %vm16407_vm0 }
 0x223   : > { %v5970_v12 = vpop.f32.mrf.mxu0  ;;  %v6605_v22 = vsel %vm16406_vm11, %v12876_v54, 0  ;;  %v5442_v60 = vsel %vm16407_vm0, %v9314_v33, %v4191_v50  ;;  %v6541_v32 = vsel %vm16380_vm4, %v12885_v21, 0  ;;  %v6815_v16 = vrot.slane %v6813_v40, 5  ;;  %vm16412_vm9 = vmmov %vm16411_vm10 }
 0x224   : > { %16403 = vst [vmem:[#allocation68_spill] sm:$0xff] %v12997_v27  ;;  %v6087_v48 = vmax.f32 %v5979_v26, 0.0  ;;  %v5971_v11 = vadd.f32 %v12837_v23, %v5970_v12  ;;  %v9619_v38 = vcombine.low %v6605_v22, %v6606_v51  ;;  %v6812_v8 = vrot.slane %v6810_v57, 4 }
 0x225   : > { %v9774_v28 = vpop.f32.mrf.mxu0  ;;  %v6819_v26 = vshrl.u32 %v9521_v19, 16  ;;  %v5439_v10 = vsel %vm16408_vm5, %v9313_v61, %v12930_v13  ;;  %vm16409_vm11 = vcmask 125952   ;;  %v6445_v51 = vsel %vm16395_vm8, %v12883_v9, 0 }
 0x226   : > { %v9692_v53 = vpack.c.bf16 %v6087_v48, %v6087_v48  ;;  %v6085_v52 = vmax.f32 %v5971_v11, 0.0  ;;  %v5982_v4 = vadd.f32 %v9774_v28, %v12837_v23  ;;  %vm16410_vm0 = vmmov %vm16409_vm11  ;;  %v6822_v12 = vshll.u32 %v9521_v19, 16 }
 0x227   : > { %v4342_v7 = vpop.permute.xlu1 %4341  ;;  %v5973_v43 = vpop.f32.mrf.mxu0  ;;  %v13031_v40 = vrot.slane %v9619_v38, 5  ;;  %vm16413_vm5 = vmmov %vm16410_vm0  ;;  %v13040_v19 = vrot.slane %v6819_v26, 4  ;;  %vm16439_vm4 = vcmp.ne.s16.totalorder %v16368_v42, 0 }
 0x228   : > { %v4340_v20 = vpop.permute.xlu0 %4339  ;;  %6248 = vst.msk [vmem:[#allocation3 + $0x18] sm:$0xf] %vm16409_vm11, %v9692_v53  ;;  %v9690_v33 = vpack.c.bf16 %v6085_v52, %v6085_v52  ;;  %v6088_v54 = vmax.f32 %v5982_v4, 0.0  ;;  %v5974_v50 = vadd.f32 %v12837_v23, %v5973_v43  ;;  %v5477_v28 = vsel %vm16411_vm10, %v5442_v60, %v4342_v7  ;;  %vm16414_vm11 = vmmov %vm16410_vm0 }
 0x229   : > { %6280 = vst.msk [vmem:[#allocation3 + $0x98] sm:$0xf] %vm16410_vm0, %v9692_v53  ;;  %v5475_v57 = vsel %vm16412_vm9, %v5439_v10, %v4340_v20  ;;  %vm16415_vm0 = vcmask 195584   ;;  %v13038_v4 = vor.u32 %v6815_v16, %v6812_v8  ;;  %vm16418_vm13 = vmmov %vm16413_vm5 }
 0x22a   : > { %6246 = vst.msk [vmem:[#allocation3 + $0x10] sm:$0xf] %vm16413_vm5, %v9690_v33  ;;  %v6116_v11 = vpack.c.bf16 %v6088_v54, %v6087_v48  ;;  %v9693_v22 = vpack.c.bf16 %v6088_v54, %v6088_v54  ;;  %v6086_v53 = vmax.f32 %v5974_v50, 0.0  ;;  %vm16416_vm10 = vmmov %vm16415_vm0  ;;  %v13046_v54 = vrot.slane %v6822_v12, 5 }
 0x22b   : > { %6278 = vst.msk [vmem:[#allocation3 + $0x90] sm:$0xf] %vm16414_vm11, %v9690_v33  ;;  %16417 = vst [vmem:[#allocation22_spill] sm:$0xff] %v13038_v4 }
 0x22c   : > { %v4457_v2 = vpop.permute.xlu0 %4456  ;;  %6249 = vst.msk [vmem:[#allocation3 + $0x1c] sm:$0xf] %vm16418_vm13, %v9693_v22  ;;  %vm16419_vm9 = vmmov %vm16413_vm5  ;;  %v7272_v38 = vshrl.u32 %v6116_v11, 16  ;;  %v7275_v20 = vshll.u32 %v6116_v11, 16  ;;  %v6115_v43 = vpack.c.bf16 %v6086_v53, %v6085_v52  ;;  %v9691_v10 = vpack.c.bf16 %v6086_v53, %v6086_v53  ;;  %v16427_v53 = vld [vmem:[#allocation42_spill] sm:$0xff] }
 0x22d   : > { %v5510_v60 = vsel %vm16416_vm10, %v5475_v57, %v4457_v2  ;;  %6281 = vst.msk [vmem:[#allocation3 + $0x9c] sm:$0xf] %vm16419_vm9, %v9693_v22  ;;  %vm16420_vm5 = vcmask 261120   ;;  %vm16424_vm13 = vmmov %vm16419_vm9 }
 0x22e   : > { %v4459_v15 = vpop.permute.xlu1 %4458  ;;  %vm16421_vm11 = vmmov %vm16420_vm5  ;;  %6247 = vst.msk [vmem:[#allocation3 + $0x14] sm:$0xf] %vm16424_vm13, %v9691_v10  ;;  %v7263_v52 = vshrl.u32 %v6115_v43, 16  ;;  %v7266_v50 = vshll.u32 %v6115_v43, 16 }
 0x22f   : > { %v5512_v7 = vsel %vm16415_vm0, %v5477_v28, %v4459_v15  ;;  %vm16422_vm0 = vcmask 326656   ;;  %6279 = vst.msk [vmem:[#allocation3 + $0x94] sm:$0xf] %vm16419_vm9, %v9691_v10  ;;  %v7274_v28 = vrot.slane %v7272_v38, 4  ;;  %v13057_v57 = vld [vmem:[#allocation3 + $0x18] sm:$0xf] }
 0x230   : > { %v4714_v62 = vpop.permute.xlu0 %4713  ;;  %vm16423_vm10 = vmmov %vm16422_vm0  ;;  %v13055_v12 = vld [vmem:[#allocation3 + $0x98] sm:$0xf]  ;;  %v7265_v11 = vrot.slane %v7263_v52, 4  ;;  %v7268_v22 = vrot.slane %v7266_v50, 5  ;;  %v16431_v38 = vld [vmem:[#allocation32_spill] sm:$0xff]  ;;  %vm16435_vm9 = vcmp.ne.s16.totalorder %v16377_v18, 0 }
 0x231   : > { %v5545_v33 = vsel %vm16421_vm11, %v5510_v60, %v4714_v62  ;;  %vm16428_vm11 = vnez %v16427_v53  ;;  %v13065_v43 = vld [vmem:[#allocation3 + $0x10] sm:$0xf] }
 0x232   : > { %v4716_v37 = vpop.permute.xlu1 %4715 }
 0x233   : > { %v5547_v48 = vsel %vm16420_vm5, %v5512_v7, %v4716_v37  ;;  %vm16426_vm5 = vmmov %vm16425_vm2  ;;  %v6448_v7 = vsel %vm16428_vm11, %v13055_v12, 0 }
 0x234   : > { %v4864_v49 = vpop.permute.xlu0 %4863 }
 0x235   : > { %v5580_v8 = vsel %vm16423_vm10, %v5545_v33, %v4864_v49  ;;  %v7277_v49 = vrot.slane %v7275_v20, 5  ;;  %v16433_v20 = vld [vmem:[#allocation34_spill] sm:$0xff]  ;;  %v13100_v21 = vld [vmem:[#allocation3 + $0x14] sm:$0xf] }
 0x236   : > { %v4866_v34 = vpop.permute.xlu1 %4865  ;;  %vm16434_vm13 = vcmp.ne.s16.totalorder %v16433_v20, 0 }
 0x237   : > { %v5582_v2 = vsel %vm16422_vm0, %v5547_v48, %v4866_v34  ;;  %vm16429_vm0 = vcmask 457728   ;;  %v6413_v48 = vsel %vm16434_vm13, %v13055_v12, 0  ;;  %v13092_v27 = vor.u32 %v7277_v49, %v7274_v28 }
 0x238   : > { %v4981_v13 = vpop.permute.xlu0 %4980  ;;  %vm16430_vm10 = vmmov %vm16429_vm0 }
 0x239   : > { %v5615_v62 = vsel %vm16426_vm5, %v5580_v8, %v4981_v13  ;;  %v13067_v13 = vld [vmem:[#allocation3 + $0x90] sm:$0xf]  ;;  %v7269_v8 = vor.u32 %v7268_v22, %v7265_v11  ;;  %vm16436_vm5 = vcmask 523264   ;;  %v13090_v22 = vld [vmem:[#allocation3 + $0x1c] sm:$0xf] }
 0x23a   : > { %v4983_v61 = vpop.permute.xlu1 %4982  ;;  %v6446_v52 = vsel %vm16397_vm14, %v13067_v13, 0  ;;  %v6610_v14 = vsel %vm16371_vm7, %v13090_v22, 0 }
 0x23b   : > { %v5617_v37 = vsel %vm16425_vm2, %v5582_v2, %v4983_v61  ;;  %vm16432_vm2 = vcmp.ne.s16.totalorder %v16431_v38, 0  ;;  %v9554_v11 = vcombine.low %v6445_v51, %v6446_v52  ;;  %v16440_v51 = vld [vmem:[#allocation35_spill] sm:$0xff] }
 0x23c   : > { %v5238_v26 = vpop.permute.xlu0 %5237  ;;  %v6511_v10 = vsel %vm16432_vm2, %v13057_v57, 0  ;;  %vm16441_vm2 = vnez %v16440_v51  ;;  %v16442_v52 = vld [vmem:[#allocation39_spill] sm:$0xff] }
 0x23d   : > { %v5650_v61 = vsel %vm16430_vm10, %v5615_v62, %v5238_v26  ;;  %v6607_v26 = vsel %vm16435_vm9, %v13065_v43, 0  ;;  %7215 = vrot.lane.b32.xlu1 %v9554_v11, %s10031_s23  ;;  %vm16438_vm10 = vsmask.f32 3328  ;;  %v6512_v28 = vsel %vm16441_vm2, %v13090_v22, 0 }
 0x23e   : > { %v5240_v16 = vpop.permute.xlu1 %5239  ;;  %v7270_v44 = vsel %vm16438_vm10, %v12870_v29, %v7269_v8  ;;  %vm16443_vm13 = vnez %v16442_v52  ;;  %vm16444_vm9 = vcmp.ne.s16.totalorder %v16431_v38, 0 }
 0x23f   : > { %v5652_v60 = vsel %vm16429_vm0, %v5617_v37, %v5240_v16  ;;  %v6542_v16 = vsel %vm16366_vm15, %v13065_v43, 0  ;;  %vm16437_vm0 = vmmov %vm16436_vm5 }
 0x240   : > { %v5388_v2 = vpop.permute.xlu0 %5387  ;;  %v9587_v62 = vcombine.low %v6541_v32, %v6542_v16  ;;  %v6509_v32 = vsel %vm16439_vm4, %v13065_v43, 0  ;;  %v13108_v16 = vld [vmem:[#allocation3 + $0x9c] sm:$0xf]  ;;  %vm16449_vm4 = vcmask 588800  }
 0x241   : > { %v5685_v37 = vsel %vm16437_vm0, %v5650_v61, %v5388_v2  ;;  %7392 = vrot.lane.b32.xlu1 %v7270_v44, %s10033_s8  ;;  %vm16447_vm0 = vsmask.f32 4352 }
 0x242   : > { %v5390_v33 = vpop.permute.xlu1 %5389  ;;  %v5824_v18 = vshrl.u32 %v5685_v37, 16  ;;  %v5827_v47 = vshll.u32 %v5685_v37, 16  ;;  %7657 = vrot.lane.b32.xlu0 %v9587_v62, %s10035_s16  ;;  %v13116_v37 = vcombine.low %v6511_v10, %v6512_v28  ;;  %v6411_v62 = vsel %vm16444_vm9, %v13067_v13, 0  ;;  %vm16448_vm10 = vmmov %vm16447_vm0 }
 0x243   : > { %v5687_v50 = vsel %vm16436_vm5, %v5652_v60, %v5390_v33  ;;  %v13096_v60 = vld [vmem:[#allocation3 + $0x94] sm:$0xf]  ;;  %vm16446_vm5 = vnez %v16445_v45  ;;  %v6608_v28 = vsel %vm16373_vm6, %v13100_v21, 0  ;;  %vm16450_vm9 = vcmp.ne.s16.totalorder %v16368_v42, 0  ;;  %vm16451_vm6 = vmmov %vm16449_vm4 }
 0x244   : > { %v5832_v34 = vshrl.u32 %v5687_v50, 16  ;;  %v5835_v15 = vshll.u32 %v5687_v50, 16  ;;  %v5826_v33 = vrot.slane %v5824_v18, 3  ;;  %v5829_v2 = vrot.slane %v5827_v47, 4 }
 0x245   : > { %v6447_v29 = vsel %vm16443_vm13, %v13096_v60, 0  ;;  %v6510_v50 = vsel %vm16371_vm7, %v13100_v21, 0  ;;  %v7510_v18 = vrot.slane %v13116_v37, 5  ;;  %v6412_v41 = vsel %vm16441_vm2, %v13096_v60, 0 }
 0x246   : > { %v5834_v49 = vrot.slane %v5832_v34, 3  ;;  %v5837_v61 = vrot.slane %v5835_v15, 4  ;;  %v5830_v15 = vor.u32 %v5829_v2, %v5826_v33  ;;  %v9555_v11 = vcombine.low %v6447_v29, %v6448_v7 }
 0x247   : > { %v9571_v47 = vcombine.low %v6509_v32, %v6510_v50  ;;  %v6414_v10 = vsel %vm16446_vm5, %v13108_v16, 0  ;;  %v9620_v33 = vcombine.low %v6607_v26, %v6608_v28  ;;  %v6609_v2 = vsel %vm16450_vm9, %v13057_v57, 0 }
 0x248   : > { %v5838_v34 = vor.u32 %v5837_v61, %v5834_v49  ;;  %v5831_v7 = vsel %vm16447_vm0, %v12956_v46, %v5830_v15  ;;  %7217 = vrot.lane.b32.xlu0 %v9555_v11, %s10031_s23  ;;  %v9538_v49 = vcombine.low %v6411_v62, %v6412_v41  ;;  %v13137_v61 = vcombine.low %v6413_v48, %v6414_v10 }
 0x249   : > { %v7508_v44 = vrot.slane %v9571_v47, 5  ;;  %9795 = vmatprep.mubr.msk.bf16.mxu0 %vm16449_vm4, %v5831_v7  ;;  %vm16452_vm0 = vcmask 1042432   ;;  %v13153_v48 = vor.u32 %v13046_v54, %v13040_v19  ;;  %v13155_v26 = vcombine.low %v6609_v2, %v6610_v14 }
 0x24a   : > { %v5839_v32 = vsel %vm16448_vm10, %v5830_v15, %v5838_v34  ;;  %vm16453_vm10 = vsmask.f32 3328  ;;  %v7066_v42 = vrot.slane %v9538_v49, 5  ;;  %v8030_v6 = vrot.slane %v9620_v33, 5  ;;  %vm16455_vm4 = vmmov %vm16452_vm0 }
 0x24b   : > { %9796 = vmatmul.mubr.msk.bf16.gmra.mxu0 %vm16451_vm6, %v5839_v32  ;;  %v7511_v46 = vsel %vm16452_vm0, %v7508_v44, %v7510_v18  ;;  %v7279_v41 = vsel %vm16453_vm10, %v7269_v8, %v13092_v27  ;;  %vm16454_vm7 = vmmov %vm16453_vm10  ;;  %v15739_v50 = vrot.slane %v13155_v26, 5  ;;  %v15740_v8 = vrot.slane %v13137_v61, 5 }
 0x24c   : > { %7394 = vrot.lane.b32.xlu1 %v7279_v41, %s10033_s8  ;;  %7544 = vrot.lane.b32.xlu0 %v7511_v46, %s10034_s29  ;;  %v6826_v29 = vsel %vm16454_vm7, %v13038_v4, %v13153_v48  ;;  %v8031_v19 = vsel %vm16455_vm4, %v13031_v40, %v8030_v6  ;;  %v16456_v54 = vshrl.u32 %v13031_v40, 16  ;;  %v16457_v34 = vshll.u32 %v13031_v40, 16  ;;  %vm16458_vm9 = vmmov %vm16452_vm0 }
 0x24d   : > { %v8369_v11 = vshrl.u32 %v8031_v19, 16  ;;  %v8372_v47 = vshll.u32 %v8031_v19, 16  ;;  %v8033_v10 = vsel %vm16458_vm9, %v8030_v6, %v15739_v50  ;;  %v6543_v28 = vsel %vm16395_vm8, %v13100_v21, 0  ;;  %vm16459_vm6 = vmmov %vm16452_vm0 }
 0x24e   : > { %v8363_v62 = vrot.slane %v16456_v54, 3  ;;  %v8366_v15 = vrot.slane %v16457_v34, 4  ;;  %v7069_v7 = vsel %vm16459_vm6, %v7066_v42, %v15740_v8  ;;  %v8386_v32 = vshrl.u32 %v8033_v10, 16 }
 0x24f   : > { %v8389_v49 = vshll.u32 %v8033_v10, 16  ;;  %v8371_v40 = vrot.slane %v8369_v11, 3  ;;  %v8374_v33 = vrot.slane %v8372_v47, 4  ;;  %v6544_v2 = vsel %vm16397_vm14, %v13057_v57, 0  ;;  %vm16465_vm14 = vmmov %vm16455_vm4  ;;  %v16467_v47 = vld [vmem:[#allocation37_spill] sm:$0xff] }
 0x250   : > { %6948 = vrot.lane.b32.xlu1 %v6826_v29, %s10027_s19  ;;  %7102 = vrot.lane.b32.xlu0 %v7069_v7, %s10026_s18  ;;  %v8388_v14 = vrot.slane %v8386_v32, 3  ;;  %v9588_v59 = vcombine.low %v6543_v28, %v6544_v2  ;;  %v8367_v41 = vor.u32 %v8366_v15, %v8363_v62  ;;  %vm16460_vm8 = vsmask.f32 4352 }
 0x251   : > { %v8391_v46 = vrot.slane %v8389_v49, 4  ;;  %v8375_v6 = vor.u32 %v8374_v33, %v8371_v40  ;;  %vm16461_vm0 = vcmask 130048   ;;  %vm16462_vm10 = vmmov %vm16460_vm8  ;;  %v7509_v34 = vsel %vm16465_vm14, %v16464_v56, %v7508_v44 }
 0x252   : > { %vm16463_vm7 = vmmov %vm16461_vm0  ;;  %v6346_v62 = vsel %vm16428_vm11, %v13067_v13, 0  ;;  %v6345_v15 = vsel %vm16443_vm13, %v12883_v9, 0  ;;  %vm16468_vm4 = vnez %v16467_v47  ;;  %vm16470_vm9 = vnez %v16469_v36 }
 0x253   : > { %v13184_v19 = vor.u32 %v8391_v46, %v8388_v14  ;;  %v8376_v29 = vsel %vm16460_vm8, %v8367_v41, %v8375_v6  ;;  %v13202_v11 = vcombine.low %v6345_v15, %v6346_v62  ;;  %v6347_v10 = vsel %vm16468_vm4, %v13096_v60, 0 }
 0x254   : > { %7659 = vrot.lane.b32.xlu1 %v9588_v59, %s10035_s16  ;;  %9646 = vmatprep.mubr.msk.bf16.mxu0 %vm16461_vm0, %v8376_v29  ;;  %v6348_v44 = vsel %vm16470_vm9, %v13055_v12, 0  ;;  %v16471_v28 = vrot.slane %v12906_v30, 5  ;;  %v6575_v14 = vsel %vm10128_vm1, %v13100_v21, 0  ;;  %v6574_v41 = vsel %vm10128_vm1, %v13065_v43, 0 }
 0x255   : > { %v8393_v54 = vsel %vm16462_vm10, %v8375_v6, %v13184_v19  ;;  %16466 = vst [vmem:[#allocation27_spill] sm:$0xff] %v13202_v11  ;;  %v13213_v32 = vcombine.low %v6347_v10, %v6348_v44  ;;  %v9777_v49 = vpop.f32.mrf.mxu0  ;;  %v9604_v29 = vcombine.low %v6574_v41, %v6575_v14  ;;  %vm16473_vm8 = vcmask 125952  }
 0x256   : > { %9647 = vmatprep.mubr.msk.bf16.mxu1 %vm16463_vm7, %v8393_v54  ;;  %v7067_v7 = vsel %vm16459_vm6, %v16471_v28, %v7066_v42  ;;  %v5995_v9 = vadd.f32 %v9777_v49, %v12837_v23  ;;  %vm16474_vm0 = vmmov %vm16473_vm8  ;;  %v6379_v21 = vsel %vm10128_vm1, %v13096_v60, 0  ;;  %v7770_v62 = vshrl.u32 %v12967_v3, 16 }
 0x257   : > { %16472 = vst [vmem:[#allocation29_spill] sm:$0xff] %v13213_v32  ;;  %v5986_v40 = vpop.f32.mrf.mxu0  ;;  %v7773_v15 = vshll.u32 %v12967_v3, 16  ;;  %v6577_v43 = vsel %vm10128_vm1, %v13090_v22, 0  ;;  %vm16475_vm10 = vmmov %vm16474_vm0  ;;  %v6378_v28 = vsel %vm10128_vm1, %v13067_v13, 0  ;;  %v6381_v60 = vsel %vm10128_vm1, %v13108_v16, 0 }
 0x258   : > { %7542 = vrot.lane.b32.xlu1 %v7509_v34, %s10034_s29  ;;  %v6091_v33 = vmax.f32 %v5995_v9, 0.0  ;;  %v5987_v2 = vadd.f32 %v12837_v23, %v5986_v40  ;;  %vm16476_vm7 = vmmov %vm16474_vm0  ;;  %v7781_v3 = vshll.u32 %v9604_v29, 16  ;;  %v9522_v49 = vcombine.low %v6378_v28, %v6379_v21 }
 0x259   : > { %v9778_v46 = vpop.f32.mrf.mxu0  ;;  %v6576_v9 = vsel %vm10128_vm1, %v13057_v57, 0  ;;  %vm16477_vm14 = vmmov %vm16474_vm0  ;;  %v6380_v13 = vsel %vm10128_vm1, %v13055_v12, 0  ;;  %v6449_v53 = vsel %vm16468_vm4, %v13108_v16, 0 }
 0x25a   : > { %v9696_v59 = vpack.c.bf16 %v6091_v33, %v6091_v33  ;;  %v6089_v30 = vmax.f32 %v5987_v2, 0.0  ;;  %v5998_v42 = vadd.f32 %v9778_v46, %v12837_v23  ;;  %vm16478_vm6 = vmmov %vm16474_vm0  ;;  %v9605_v14 = vcombine.low %v6576_v9, %v6577_v43 }
 0x25b   : > { %v5989_v6 = vpop.f32.mrf.mxu0  ;;  %v7772_v46 = vrot.slane %v7770_v62, 4  ;;  %v6831_v21 = vshll.u32 %v9522_v49, 16 }
 0x25c   : > { %7100 = vrot.lane.b32.xlu1 %v7067_v7, %s10026_s18  ;;  %6252 = vst.msk [vmem:[#allocation3 + $0x28] sm:$0xf] %vm16473_vm8, %v9696_v59  ;;  %v9694_v54 = vpack.c.bf16 %v6089_v30, %v6089_v30  ;;  %v6092_v56 = vmax.f32 %v5998_v42, 0.0  ;;  %v5990_v34 = vadd.f32 %v12837_v23, %v5989_v6  ;;  %v7778_v7 = vshrl.u32 %v9604_v29, 16  ;;  %vm16479_vm8 = vmmov %vm16474_vm0 }
 0x25d   : > { %6284 = vst.msk [vmem:[#allocation3 + $0xa8] sm:$0xf] %vm16474_vm0, %v9696_v59  ;;  %v7775_v59 = vrot.slane %v7773_v15, 5  ;;  %v9523_v42 = vcombine.low %v6380_v13, %v6381_v60  ;;  %v7787_v62 = vshrl.u32 %v9605_v14, 16  ;;  %v7790_v15 = vshll.u32 %v9605_v14, 16 }
 0x25e   : > { %6250 = vst.msk [vmem:[#allocation3 + $0x20] sm:$0xf] %vm16475_vm10, %v9694_v54  ;;  %v9697_v10 = vpack.c.bf16 %v6092_v56, %v6092_v56  ;;  %v6090_v44 = vmax.f32 %v5990_v34, 0.0  ;;  %v6118_v41 = vpack.c.bf16 %v6092_v56, %v6091_v33  ;;  %v7780_v29 = vrot.slane %v7778_v7, 4 }
 0x25f   : > { %6282 = vst.msk [vmem:[#allocation3 + $0xa0] sm:$0xf] %vm16476_vm7, %v9694_v54  ;;  %v7783_v54 = vrot.slane %v7781_v3, 5  ;;  %v6828_v34 = vshrl.u32 %v9522_v49, 16  ;;  %v6837_v56 = vshrl.u32 %v9523_v42, 16  ;;  %v6833_v3 = vrot.slane %v6831_v21, 5 }
 0x260   : > { %6253 = vst.msk [vmem:[#allocation3 + $0x2c] sm:$0xf] %vm16477_vm14, %v9697_v10  ;;  %v6117_v40 = vpack.c.bf16 %v6090_v44, %v6089_v30  ;;  %v9695_v2 = vpack.c.bf16 %v6090_v44, %v6090_v44  ;;  %v6545_v30 = vsel %vm16443_vm13, %v13090_v22, 0  ;;  %v6840_v44 = vshll.u32 %v9523_v42, 16 }
 0x261   : > { %6285 = vst.msk [vmem:[#allocation3 + $0xac] sm:$0xf] %vm16478_vm6, %v9697_v10  ;;  %v7290_v28 = vshrl.u32 %v6118_v41, 16  ;;  %v7293_v60 = vshll.u32 %v6118_v41, 16  ;;  %v6830_v7 = vrot.slane %v6828_v34, 4  ;;  %v13271_v14 = vor.u32 %v7775_v59, %v7772_v46 }
 0x262   : > { %6251 = vst.msk [vmem:[#allocation3 + $0x24] sm:$0xf] %vm16479_vm8, %v9695_v2  ;;  %v7281_v57 = vshrl.u32 %v6117_v40, 16  ;;  %v7284_v6 = vshll.u32 %v6117_v40, 16  ;;  %vm16480_vm13 = vsmask.f32 3328  ;;  %v7784_v40 = vor.u32 %v7783_v54, %v7780_v29 }
 0x263   : > { %6283 = vst.msk [vmem:[#allocation3 + $0xa4] sm:$0xf] %vm16474_vm0, %v9695_v2  ;;  %16481 = vst [vmem:[#allocation28_spill] sm:$0xff] %v13271_v14  ;;  %v7789_v13 = vrot.slane %v7787_v62, 4  ;;  %v7792_v42 = vrot.slane %v7790_v15, 5  ;;  %v7292_v41 = vrot.slane %v7290_v28, 4  ;;  %v6834_v29 = vor.u32 %v6833_v3, %v6830_v7 }
 0x264   : > { %v7283_v43 = vrot.slane %v7281_v57, 4  ;;  %v7286_v12 = vrot.slane %v7284_v6, 5  ;;  %v7295_v57 = vrot.slane %v7293_v60, 5  ;;  %v6842_v6 = vrot.slane %v6840_v44, 5  ;;  %v13284_v59 = vld [vmem:[#allocation3 + $0x28] sm:$0xf] }
 0x265   : > { %v13257_v10 = vld [vmem:[#allocation3 + $0x20] sm:$0xf]  ;;  %v16484_v28 = vld [vmem:[#allocation45_spill] sm:$0xff] }
 0x266   : > { %v13259_v33 = vld [vmem:[#allocation3 + $0xa0] sm:$0xf]  ;;  %v7287_v9 = vor.u32 %v7286_v12, %v7283_v43  ;;  %v6546_v22 = vsel %vm16428_vm11, %v13257_v10, 0  ;;  %vm16482_vm11 = vmmov %vm16480_vm13  ;;  %v13282_v46 = vor.u32 %v7295_v57, %v7292_v41  ;;  %v13286_v43 = vor.u32 %v7792_v42, %v7789_v13 }
 0x267   : > { %v9589_v52 = vcombine.low %v6545_v30, %v6546_v22  ;;  %v6450_v2 = vsel %vm16470_vm9, %v13259_v33, 0  ;;  %v7785_v54 = vsel %vm16482_vm11, %v13271_v14, %v7784_v40  ;;  %v13278_v21 = vld [vmem:[#allocation3 + $0x2c] sm:$0xf]  ;;  %vm16483_vm10 = vmmov %vm16482_vm11  ;;  %vm16485_vm7 = vnez %v16484_v28 }
 0x268   : > { %v7288_v49 = vsel %vm16480_vm13, %v13092_v27, %v7287_v9  ;;  %v6839_v27 = vrot.slane %v6837_v56, 4  ;;  %v9556_v30 = vcombine.low %v6449_v53, %v6450_v2  ;;  %v13290_v62 = vld [vmem:[#allocation3 + $0xac] sm:$0xf]  ;;  %v6835_v15 = vsel %vm16483_vm10, %v13153_v48, %v6834_v29  ;;  %vm16488_vm6 = vmmov %vm16483_vm10  ;;  %v16494_v53 = vld [vmem:[#allocation46_spill] sm:$0xff] }
 0x269   : > { %7396 = vrot.lane.b32.xlu0 %v7288_v49, %s10033_s8  ;;  %7661 = vrot.lane.b32.xlu1 %v9589_v52, %s10035_s16  ;;  %v6483_v34 = vld [vmem:[#allocation3 + $0x24] sm:$0xf]  ;;  %v6516_v60 = vsel %vm16485_vm7, %v13278_v21, 0  ;;  %v16486_v22 = vld [vmem:[#allocation48_spill] sm:$0xff]  ;;  %v7297_v7 = vsel %vm16488_vm6, %v7287_v9, %v13282_v46  ;;  %vm16489_vm8 = vmmov %vm16488_vm6  ;;  %vm16491_vm13 = vcmp.ne.s16.totalorder %v16433_v20, 0  ;;  %vm16495_vm11 = vnez %v16494_v53 }
 0x26a   : > { %v13288_v12 = vor.u32 %v6842_v6, %v6839_v27  ;;  %v6318_v56 = vld [vmem:[#allocation3 + $0xa4] sm:$0xf]  ;;  %v6514_v44 = vsel %vm16446_vm5, %v6483_v34, 0  ;;  %vm16487_vm14 = vnez %v16486_v22  ;;  %v6547_v3 = vsel %vm16468_vm4, %v6483_v34, 0  ;;  %v13308_v49 = vld [vmem:[#allocation3 + $0xa8] sm:$0xf]  ;;  %vm16490_vm0 = vmmov %vm16488_vm6 }
 0x26b   : > { %v6349_v52 = vsel %vm16487_vm14, %v13108_v16, 0  ;;  %v7794_v48 = vsel %vm16489_vm8, %v7784_v40, %v13286_v43  ;;  %v6548_v16 = vsel %vm16470_vm9, %v13284_v59, 0  ;;  %v6513_v47 = vsel %vm16491_vm13, %v13257_v10, 0  ;;  %v16492_v9 = vld [vmem:[#allocation43_spill] sm:$0xff]  ;;  %vm16496_vm10 = vmmov %vm16491_vm13 }
 0x26c   : > { %v6844_v2 = vsel %vm16490_vm0, %v6834_v29, %v13288_v12  ;;  %vm16493_vm4 = vcmp.ne.s16.totalorder %v16492_v9, 0  ;;  %v6418_v13 = vsel %vm16495_vm11, %v13290_v62, 0  ;;  %v6613_v42 = vsel %vm16496_vm10, %v13284_v59, 0 }
 0x26d   : > { %7914 = vrot.lane.b32.xlu0 %v7785_v54, %s10036_s17  ;;  %7219 = vrot.lane.b32.xlu1 %v9556_v30, %s10031_s23  ;;  %v6515_v40 = vsel %vm16493_vm4, %v13284_v59, 0  ;;  %v9573_v41 = vcombine.low %v6513_v47, %v6514_v44  ;;  %v6416_v36 = vsel %vm16485_vm7, %v6318_v56, 0  ;;  %v9590_v27 = vcombine.low %v6547_v3, %v6548_v16  ;;  %v16497_v30 = vld [vmem:[#allocation50_spill] sm:$0xff]  ;;  %v16499_v54 = vld [vmem:[#allocation44_spill] sm:$0xff]  ;;  %vm16502_vm0 = vmmov %vm16493_vm4 }
 0x26e   : > { %v13329_v57 = vcombine.low %v6515_v40, %v6516_v60  ;;  %v6451_v6 = vsel %vm16487_vm14, %v6318_v56, 0  ;;  %vm16498_vm9 = vnez %v16497_v30  ;;  %vm16500_vm6 = vcmp.ne.s16.totalorder %v16499_v54, 0  ;;  %v16503_v47 = vld [vmem:[#allocation47_spill] sm:$0xff] }
 0x26f   : > { %v6452_v29 = vsel %vm16498_vm9, %v13308_v49, 0  ;;  %vm16501_vm8 = vcmp.ne.s16.totalorder %v16431_v38, 0  ;;  %v6415_v44 = vsel %vm16502_vm0, %v13259_v33, 0  ;;  %v6612_v3 = vsel %vm16441_vm2, %v6483_v34, 0 }
 0x270   : > { %v6611_v20 = vsel %vm16501_vm8, %v13257_v10, 0  ;;  %v9540_v16 = vcombine.low %v6415_v44, %v6416_v36  ;;  %v6350_v38 = vsel %vm16498_vm9, %v13259_v33, 0  ;;  %vm16504_vm13 = vnez %v16503_v47 }
 0x271   : > { %6950 = vrot.lane.b32.xlu0 %v6835_v15, %s10027_s19  ;;  %7398 = vrot.lane.b32.xlu1 %v7297_v7, %s10033_s8  ;;  %v6417_v15 = vsel %vm16500_vm6, %v13308_v49, 0  ;;  %v6579_v7 = vsel %vm10128_vm1, %v6483_v34, 0  ;;  %v6351_v40 = vsel %vm16504_vm13, %v6318_v56, 0  ;;  %v15743_v50 = vrot.slane %v13329_v57, 5 }
 0x272   : > { %v13347_v60 = vcombine.low %v6417_v15, %v6418_v13  ;;  %v9557_v13 = vcombine.low %v6451_v6, %v6452_v29  ;;  %v7512_v15 = vrot.slane %v9573_v41, 5  ;;  %v6578_v51 = vsel %vm10128_vm1, %v13257_v10, 0 }
 0x273   : > { %v13364_v34 = vcombine.low %v6578_v51, %v6579_v7  ;;  %v13368_v36 = vcombine.low %v6349_v52, %v6350_v38  ;;  %v6382_v10 = vsel %vm10128_vm1, %v13259_v33, 0  ;;  %v7070_v52 = vrot.slane %v9540_v16, 5 }
 0x274   : > { %v15741_v41 = vrot.slane %v13347_v60, 5  ;;  %v9622_v7 = vcombine.low %v6611_v20, %v6612_v3  ;;  %v6614_v38 = vsel %vm16446_vm5, %v13278_v21, 0  ;;  %vm16509_vm4 = vcmask 1042432  }
 0x275   : > { %7663 = vrot.lane.b32.xlu0 %v9590_v27, %s10035_s16  ;;  %7916 = vrot.lane.b32.xlu1 %v7794_v48, %s10036_s17  ;;  %v6383_v48 = vsel %vm10128_vm1, %v6318_v56, 0  ;;  %16505 = vst [vmem:[#allocation23_spill] sm:$0xff] %v13368_v36  ;;  %v16506_v27 = vld [vmem:[#allocation49_spill] sm:$0xff]  ;;  %v7515_v6 = vsel %vm16509_vm4, %v7512_v15, %v15743_v50  ;;  %vm16510_vm10 = vmmov %vm16509_vm4  ;;  %v7796_v3 = vshrl.u32 %v13364_v34, 16  ;;  %v6581_v37 = vsel %vm10128_vm1, %v13278_v21, 0 }
 0x276   : > { %vm16507_vm2 = vnez %v16506_v27  ;;  %v7513_v33 = vsel %vm16510_vm10, %v7510_v18, %v7512_v15  ;;  %v8034_v45 = vrot.slane %v9622_v7, 5  ;;  %vm16511_vm5 = vmmov %vm16509_vm4 }
 0x277   : > { %v6352_v44 = vsel %vm16507_vm2, %v13308_v49, 0  ;;  %vm16513_vm6 = vmmov %vm16509_vm4 }
 0x278   : > { %v13380_v29 = vcombine.low %v6351_v40, %v6352_v44  ;;  %v13396_v40 = vcombine.low %v6613_v42, %v6614_v38  ;;  %v6580_v44 = vsel %vm10128_vm1, %v13284_v59, 0  ;;  %v16512_v59 = vrot.slane %v13137_v61, 5  ;;  %vm16515_vm8 = vmmov %vm16509_vm4 }
 0x279   : > { %7221 = vrot.lane.b32.xlu0 %v9557_v13, %s10031_s23  ;;  %6952 = vrot.lane.b32.xlu1 %v6844_v2, %s10027_s19  ;;  %v7799_v13 = vshll.u32 %v13364_v34, 16  ;;  %v7073_v34 = vsel %vm16511_vm5, %v7070_v52, %v15741_v41  ;;  %v16514_v38 = vrot.slane %v13155_v26, 5  ;;  %vm16516_vm0 = vmmov %vm16509_vm4  ;;  %vm16517_vm4 = vcmask 125952  }
 0x27a   : > { %16508 = vst [vmem:[#allocation26_spill] sm:$0xff] %v13380_v29  ;;  %v15742_v18 = vrot.slane %v13396_v40, 5  ;;  %vm16518_vm10 = vmmov %vm16517_vm4  ;;  %v16561_v29 = vld [vmem:[#allocation56_spill] sm:$0xff] }
 0x27b   : > { %vm16519_vm5 = vmmov %vm16517_vm4 }
 0x27d   : > { %7548 = vrot.lane.b32.xlu0 %v7515_v6, %s10034_s29  ;;  %7546 = vrot.lane.b32.xlu1 %v7513_v33, %s10034_s29  ;;  %v8037_v6 = vsel %vm16516_vm0, %v8034_v45, %v15742_v18  ;;  %vm16522_vm0 = vmmov %vm16517_vm4 }
 0x27e   : > { %v8420_v41 = vshrl.u32 %v8037_v6, 16  ;;  %v8423_v26 = vshll.u32 %v8037_v6, 16 }
 0x281   : > { %7106 = vrot.lane.b32.xlu0 %v7073_v34, %s10026_s18  ;;  %v6384_v34 = vsel %vm10128_vm1, %v13308_v49, 0 }
 0x283   : > { %v9781_v8 = vpop.f32.mrf.mxu0 }
 0x284   : > { %v6011_v56 = vadd.f32 %v9781_v8, %v12837_v23  ;;  %v13394_v8 = vcombine.low %v6382_v10, %v6383_v48 }
 0x285   : > { %v6002_v51 = vpop.f32.mrf.mxu0 }
 0x286   : > { %v6095_v2 = vmax.f32 %v6011_v56, 0.0  ;;  %v6003_v20 = vadd.f32 %v12837_v23, %v6002_v51  ;;  %v7071_v56 = vsel %vm16513_vm6, %v16512_v59, %v7070_v52  ;;  %v6846_v7 = vshrl.u32 %v13394_v8, 16  ;;  %vm16520_vm6 = vmmov %vm16517_vm4 }
 0x287   : > { %v9782_v16 = vpop.f32.mrf.mxu0  ;;  %v8035_v51 = vsel %vm16515_vm8, %v16514_v38, %v8034_v45  ;;  %v6849_v52 = vshll.u32 %v13394_v8, 16  ;;  %7104 = vrot.lane.b32.xlu1 %v7071_v56, %s10026_s18  ;;  %vm16521_vm8 = vmmov %vm16517_vm4  ;;  %v7801_v56 = vrot.slane %v7799_v13, 5 }
 0x288   : > { %v9700_v42 = vpack.c.bf16 %v6095_v2, %v6095_v2  ;;  %v6093_v15 = vmax.f32 %v6003_v20, 0.0  ;;  %v6014_v48 = vadd.f32 %v9782_v16, %v12837_v23  ;;  %v8403_v16 = vshrl.u32 %v8035_v51, 16 }
 0x289   : > { %v6005_v10 = vpop.f32.mrf.mxu0  ;;  %v8406_v59 = vshll.u32 %v8035_v51, 16  ;;  %v8425_v51 = vrot.slane %v8423_v26, 4  ;;  %v6851_v26 = vrot.slane %v6849_v52, 5 }
 0x28a   : > { %6256 = vst.msk [vmem:[#allocation3 + $0x38] sm:$0xf] %vm16517_vm4, %v9700_v42  ;;  %v9698_v33 = vpack.c.bf16 %v6093_v15, %v6093_v15  ;;  %v6096_v20 = vmax.f32 %v6014_v48, 0.0  ;;  %v6006_v61 = vadd.f32 %v12837_v23, %v6005_v10  ;;  %v6385_v23 = vsel %vm10128_vm1, %v13290_v62, 0  ;;  %vm16524_vm4 = vmmov %vm16522_vm0 }
 0x28b   : > { %6288 = vst.msk [vmem:[#allocation3 + $0xb8] sm:$0xf] %vm16518_vm10, %v9700_v42  ;;  %v8405_v42 = vrot.slane %v8403_v16, 3  ;;  %v9607_v48 = vcombine.low %v6580_v44, %v6581_v37  ;;  %v8408_v8 = vrot.slane %v8406_v59, 4  ;;  %v8422_v10 = vrot.slane %v8420_v41, 3  ;;  %vm16525_vm10 = vmmov %vm16522_vm0 }
 0x28c   : > { %6254 = vst.msk [vmem:[#allocation3 + $0x30] sm:$0xf] %vm16519_vm5, %v9698_v33  ;;  %v9701_v38 = vpack.c.bf16 %v6096_v20, %v6096_v20  ;;  %v6094_v45 = vmax.f32 %v6006_v61, 0.0  ;;  %v7798_v61 = vrot.slane %v7796_v3, 4  ;;  %v9525_v18 = vcombine.low %v6384_v34, %v6385_v23 }
 0x28d   : > { %6286 = vst.msk [vmem:[#allocation3 + $0xb0] sm:$0xf] %vm16520_vm6, %v9698_v33  ;;  %v8409_v50 = vor.u32 %v8408_v8, %v8405_v42  ;;  %v13440_v14 = vor.u32 %v8425_v51, %v8422_v10  ;;  %v6120_v44 = vpack.c.bf16 %v6096_v20, %v6095_v2  ;;  %v6453_v3 = vsel %vm16504_vm13, %v13290_v62, 0 }
 0x28e   : > { %6257 = vst.msk [vmem:[#allocation3 + $0x3c] sm:$0xf] %vm16521_vm8, %v9701_v38  ;;  %v6119_v6 = vpack.c.bf16 %v6094_v45, %v6093_v15  ;;  %v9699_v33 = vpack.c.bf16 %v6094_v45, %v6094_v45  ;;  %v6848_v15 = vrot.slane %v6846_v7, 4  ;;  %v7805_v16 = vshrl.u32 %v9607_v48, 16  ;;  %v13462_v7 = vld [vmem:[%s15399_s2] ss:$0 sm:$0xff] }
 0x28f   : > { %6289 = vst.msk [vmem:[#allocation3 + $0xbc] sm:$0xf] %vm16522_vm0, %v9701_v38  ;;  %16523 = vst [vmem:[#allocation18_spill] sm:$0xff] %v13440_v14  ;;  %vm16526_vm5 = vsmask.f32 4352  ;;  %v7808_v38 = vshll.u32 %v9607_v48, 16  ;;  %v7802_v23 = vor.u32 %v7801_v56, %v7798_v61 }
 0x290   : > { %6255 = vst.msk [vmem:[#allocation3 + $0x34] sm:$0xf] %vm16524_vm4, %v9699_v33  ;;  %v7299_v41 = vshrl.u32 %v6119_v6, 16  ;;  %v7302_v37 = vshll.u32 %v6119_v6, 16  ;;  %v13449_v49 = vsel %vm16526_vm5, %v13184_v19, %v8409_v50  ;;  %vm16528_vm6 = vmmov %vm16526_vm5  ;;  %v6855_v10 = vshrl.u32 %v9525_v18, 16 }
 0x291   : > { %6287 = vst.msk [vmem:[#allocation3 + $0xb4] sm:$0xf] %vm16525_vm10, %v9699_v33  ;;  %16527 = vst [vmem:[#allocation25_spill] sm:$0xff] %v13449_v49  ;;  %v13453_v2 = vsel %vm16528_vm6, %v8409_v50, %v13440_v14  ;;  %v6858_v50 = vshll.u32 %v9525_v18, 16  ;;  %v7308_v51 = vshrl.u32 %v6120_v44, 16  ;;  %v7311_v6 = vshll.u32 %v6120_v44, 16 }
 0x292   : > { %v9785_v59 = vpop.f32.mrf.mxu0  ;;  %16529 = vst [vmem:[#allocation7_spill] sm:$0xff] %v13453_v2  ;;  %v7301_v13 = vrot.slane %v7299_v41, 4  ;;  %v7304_v20 = vrot.slane %v7302_v37, 5  ;;  %v16530_v48 = vsel %vm16487_vm14, %v13278_v21, 0  ;;  %v7807_v34 = vrot.slane %v7805_v16, 4  ;;  %vm16532_vm14 = vmmov %vm16522_vm0 }
 0x293   : > { %v13455_v45 = vld [vmem:[#allocation3 + $0x30] sm:$0xf]  ;;  %v6027_v19 = vadd.f32 %v13462_v7, %v9785_v59  ;;  %vm16531_vm8 = vsmask.f32 3328  ;;  %v7810_v30 = vrot.slane %v7808_v38, 5  ;;  %v13483_v21 = vor.u32 %v6851_v26, %v6848_v15  ;;  %vm16535_vm10 = vmmov %vm16524_vm4 }
 0x294   : > { %v13457_v42 = vld [vmem:[#allocation3 + $0xb0] sm:$0xf]  ;;  %v6018_v8 = vpop.f32.mrf.mxu0  ;;  %v7305_v33 = vor.u32 %v7304_v20, %v7301_v13  ;;  %v6550_v52 = vsel %vm16498_vm9, %v13455_v45, 0  ;;  %v6857_v13 = vrot.slane %v6855_v10, 4  ;;  %v6538_v38 = vld [vmem:[#allocation3 + $0x4] sm:$0x8]  ;;  %vm16533_vm9 = vmmov %vm16522_vm0 }
 0x295   : > { %v9591_v61 = vcombine.low %v16530_v48, %v6550_v52  ;;  %v13472_v56 = vmax.f32 %v6027_v19, 0.0  ;;  %v6019_v41 = vadd.f32 %v13462_v7, %v6018_v8  ;;  %v6454_v44 = vsel %vm16507_vm2, %v13457_v42, 0  ;;  %vm16534_vm0 = vmmov %vm16531_vm8  ;;  %v13496_v10 = vld [vmem:[#allocation3 + $0x38] sm:$0xf] }
 0x296   : > { %v9786_v37 = vpop.f32.mrf.mxu0  ;;  %v7306_v18 = vsel %vm16531_vm8, %v13282_v46, %v7305_v33  ;;  %v7310_v46 = vrot.slane %v7308_v51, 4  ;;  %v7313_v19 = vrot.slane %v7311_v6, 5  ;;  %v6860_v8 = vrot.slane %v6858_v50, 5  ;;  %vm16543_vm8 = vmmov %vm16534_vm0 }
 0x297   : > { %v6030_v59 = vadd.f32 %v13462_v7, %v9786_v37  ;;  %7665 = vrot.lane.b32.xlu1 %v9591_v61, %s10035_s16  ;;  %7400 = vrot.lane.b32.xlu0 %v7306_v18, %s10033_s8  ;;  %v9704_v22 = vpack.c.bf16 %v13472_v56, %v13472_v56  ;;  %v6097_v16 = vmax.f32 %v6019_v41, 0.0  ;;  %v9558_v48 = vcombine.low %v6453_v3, %v6454_v44  ;;  %v13494_v41 = vld [vmem:[#allocation3 + $0x34] sm:$0xf]  ;;  %v13502_v3 = vld [vmem:[#allocation3 + $0x3c] sm:$0xf] }
 0x298   : > { %v6021_v20 = vpop.f32.mrf.mxu0  ;;  %v7803_v26 = vsel %vm16534_vm0, %v13286_v43, %v7802_v23  ;;  %v13498_v51 = vor.u32 %v7810_v30, %v7807_v34  ;;  %v13508_v43 = vld [vmem:[#allocation3 + $0xb4] sm:$0xf]  ;;  %v13510_v37 = vld [vmem:[#allocation3 + $0x80] sm:$0xf]  ;;  %v16539_v44 = vld [vmem:[#allocation14_spill] sm:$0xff] }
 0x299   : > { %v13487_v52 = vmax.f32 %v6030_v59, 0.0  ;;  %6260 = vst.msk [vmem:[#allocation3 + $0x48] sm:$0xf] %vm16532_vm14, %v9704_v22  ;;  %v9702_v61 = vpack.c.bf16 %v6097_v16, %v6097_v16  ;;  %v6022_v15 = vadd.f32 %v13462_v7, %v6021_v20  ;;  %16536 = vst [vmem:[#allocation19_spill] sm:$0xff] %v13510_v37  ;;  %v16537_v34 = vld [vmem:[#allocation17_spill] sm:$0xff]  ;;  %vm16540_vm6 = vcmp.ne.s16.totalorder %v16539_v44, 0 }
 0x29a   : > { %6292 = vst.msk [vmem:[#allocation3 + $0xc8] sm:$0xf] %vm16533_vm9, %v9704_v22  ;;  %vm16538_vm5 = vnez %v16537_v34  ;;  %v13517_v30 = vsel %vm16540_vm6, %v6538_v38, 0  ;;  %v13519_v59 = vld [vmem:[#allocation3 + $0x8] sm:$0xf]  ;;  %v13524_v20 = vor.u32 %v7313_v19, %v7310_v46  ;;  %vm16544_vm14 = vmmov %vm16534_vm0  ;;  %v6552_v46 = vsel %vm16507_vm2, %v13496_v10, 0 }
 0x29b   : > { %v9705_v50 = vpack.c.bf16 %v13487_v52, %v13487_v52  ;;  %7918 = vrot.lane.b32.xlu0 %v7803_v26, %s10036_s17  ;;  %7223 = vrot.lane.b32.xlu1 %v9558_v48, %s10031_s23  ;;  %6258 = vst.msk [vmem:[#allocation3 + $0x40] sm:$0xf] %vm16524_vm4, %v9702_v61  ;;  %v6098_v6 = vmax.f32 %v6022_v15, 0.0  ;;  %16541 = vst [vmem:[#allocation21_spill] sm:$0xff] %v13517_v30  ;;  %v6853_v48 = vsel %vm16543_vm8, %v13288_v12, %v13483_v21  ;;  %v13531_v15 = vld [vmem:[#allocation3 + $0xb8] sm:$0xf] }
 0x29c   : > { %6290 = vst.msk [vmem:[#allocation3 + $0xc0] sm:$0xf] %vm16535_vm10, %v9702_v61  ;;  %16542 = vst [vmem:[#allocation42_spill] sm:$0xff] %v13519_v59  ;;  %v7812_v61 = vsel %vm16544_vm14, %v7802_v23, %v13498_v51  ;;  %v13533_v26 = vor.u32 %v6860_v8, %v6857_v13  ;;  %v6518_v12 = vsel %vm16495_vm11, %v13494_v41, 0  ;;  %v16547_v38 = vld [vmem:[#allocation55_spill] sm:$0xff]  ;;  %v6551_v8 = vsel %vm16504_vm13, %v13494_v41, 0 }
 0x29d   : > { %vm16545_vm9 = vmmov %vm16524_vm4  ;;  %v9703_v19 = vpack.c.bf16 %v6098_v6, %v6098_v6  ;;  %v13551_v18 = vld [vmem:[#allocation3 + $0xbc] sm:$0xf]  ;;  %v6616_v22 = vsel %vm16485_vm7, %v13494_v41, 0  ;;  %v9592_v44 = vcombine.low %v6551_v8, %v6552_v46 }
 0x29e   : > { %6261 = vst.msk [vmem:[#allocation3 + $0x4c] sm:$0xf] %vm16545_vm9, %v9705_v50  ;;  %vm16546_vm0 = vmmov %vm16524_vm4  ;;  %vm16548_vm4 = vnez %v16547_v38  ;;  %v16564_v8 = vld [vmem:[#allocation54_spill] sm:$0xff] }
 0x29f   : > { %6293 = vst.msk [vmem:[#allocation3 + $0xcc] sm:$0xf] %vm16546_vm0, %v9705_v50  ;;  %v6520_v23 = vsel %vm16548_vm4, %v13502_v3, 0  ;;  %vm16549_vm10 = vmmov %vm16543_vm8  ;;  %v6121_v50 = vpack.c.bf16 %v6098_v6, %v6097_v16  ;;  %v6420_v27 = vsel %vm16548_vm4, %v13508_v43, 0  ;;  %6954 = vrot.lane.b32.xlu0 %v6853_v48, %s10027_s19  ;;  %vm16554_vm8 = vcmp.ne.s16.totalorder %v16499_v54, 0  ;;  %v16555_v6 = vld [vmem:[#allocation53_spill] sm:$0xff] }
 0x2a0   : > { %v7315_v13 = vsel %vm16549_vm10, %v7305_v33, %v13524_v20  ;;  %v16550_v33 = vld [vmem:[#allocation60_spill] sm:$0xff]  ;;  %vm16552_vm13 = vmmov %vm16546_vm0  ;;  %v6517_v16 = vsel %vm16554_vm8, %v13455_v45, 0  ;;  %vm16556_vm14 = vcmp.ne.s16.totalorder %v16555_v6, 0  ;;  %vm16562_vm10 = vnez %v16561_v29 }
 0x2a1   : > { %7402 = vrot.lane.b32.xlu1 %v7315_v13, %s10033_s8  ;;  %vm16551_vm2 = vnez %v16550_v33  ;;  %6259 = vst.msk [vmem:[#allocation3 + $0x44] sm:$0xf] %vm16552_vm13, %v9703_v19  ;;  %vm16553_vm6 = vmmov %vm16546_vm0  ;;  %v6519_v48 = vsel %vm16556_vm14, %v13496_v10, 0  ;;  %v16557_v13 = vld [vmem:[#allocation58_spill] sm:$0xff]  ;;  %v9575_v2 = vcombine.low %v6517_v16, %v6518_v12  ;;  %vm16560_vm0 = vcmp.ne.s16.totalorder %v16492_v9, 0 }
 0x2a2   : > { %v6456_v47 = vsel %vm16551_vm2, %v13531_v15, 0  ;;  %6291 = vst.msk [vmem:[#allocation3 + $0xc4] sm:$0xf] %vm16553_vm6, %v9703_v19  ;;  %vm16558_vm9 = vnez %v16557_v13  ;;  %v13575_v49 = vcombine.low %v6519_v48, %v6520_v23  ;;  %vm16559_vm7 = vmmov %vm16556_vm14  ;;  %v6615_v19 = vsel %vm16560_vm0, %v13455_v45, 0 }
 0x2a3   : > { %v6455_v28 = vsel %vm16558_vm9, %v13508_v43, 0  ;;  %v6419_v4 = vsel %vm16559_vm7, %v13457_v42, 0  ;;  %v6422_v36 = vsel %vm16562_vm10, %v13551_v18, 0  ;;  %v7317_v59 = vshrl.u32 %v6121_v50, 16  ;;  %7667 = vrot.lane.b32.xlu0 %v9592_v44, %s10035_s16 }
 0x2a4   : > { %v9542_v30 = vcombine.low %v6419_v4, %v6420_v27  ;;  %v7320_v34 = vshll.u32 %v6121_v50, 16  ;;  %v6583_v12 = vsel %vm10128_vm1, %v13494_v41, 0  ;;  %v13589_v23 = vcombine.low %v6615_v19, %v6616_v22 }
 0x2a5   : > { %7920 = vrot.lane.b32.xlu1 %v7812_v61, %s10036_s17  ;;  %v9559_v9 = vcombine.low %v6455_v28, %v6456_v47  ;;  %vm16563_vm13 = vsmask.f32 3328  ;;  %vm16565_vm6 = vcmp.ne.s16.totalorder %v16564_v8, 0  ;;  %v7516_v27 = vrot.slane %v9575_v2, 5 }
 0x2a6   : > { %v6862_v46 = vsel %vm16563_vm13, %v13483_v21, %v13533_v26  ;;  %v6421_v4 = vsel %vm16565_vm6, %v13531_v15, 0  ;;  %v15748_v41 = vrot.slane %v13575_v49, 5  ;;  %v6582_v44 = vsel %vm10128_vm1, %v13455_v45, 0 }
 0x2a7   : > { %v13601_v22 = vcombine.low %v6421_v4, %v6422_v36  ;;  %v7074_v61 = vrot.slane %v9542_v30, 5  ;;  %v9608_v47 = vcombine.low %v6582_v44, %v6583_v12  ;;  %v6386_v21 = vsel %vm10128_vm1, %v13457_v42, 0  ;;  %7225 = vrot.lane.b32.xlu0 %v9559_v9, %s10031_s23  ;;  %v13638_v9 = vld [vmem:[#allocation3 + $0x40] sm:$0xf] }
 0x2a8   : > { %v6387_v16 = vsel %vm10128_vm1, %v13508_v43, 0  ;;  %v7319_v48 = vrot.slane %v7317_v59, 4  ;;  %v7322_v2 = vrot.slane %v7320_v34, 5  ;;  %v6585_v36 = vsel %vm10128_vm1, %v13502_v3, 0 }
 0x2a9   : > { %v9526_v28 = vcombine.low %v6386_v21, %v6387_v16  ;;  %v13618_v45 = vsel %vm16554_vm8, %v13496_v10, 0  ;;  %6956 = vrot.lane.b32.xlu1 %v6862_v46, %s10027_s19  ;;  %v13624_v30 = vpack.c.bf16 %v13487_v52, %v13472_v56  ;;  %v6553_v34 = vsel %vm16558_vm9, %v13502_v3, 0  ;;  %v13640_v56 = vld [vmem:[#allocation3 + $0xc0] sm:$0xf]  ;;  %v16569_v52 = vld [vmem:[#allocation57_spill] sm:$0xff] }
 0x2aa   : > { %vm16566_vm14 = vcmask 1042432   ;;  %v16567_v19 = vrot.slane %v13329_v57, 5  ;;  %vm16570_vm0 = vnez %v16569_v52  ;;  %v6584_v4 = vsel %vm10128_vm1, %v13496_v10, 0  ;;  %v13649_v57 = vld [vmem:[#allocation3 + $0x44] sm:$0xf] }
 0x2ab   : > { %v7519_v54 = vsel %vm16566_vm14, %v7516_v27, %v15748_v41  ;;  %vm16568_vm7 = vmmov %vm16566_vm14  ;;  %v6457_v46 = vsel %vm16570_vm0, %v13551_v18, 0  ;;  %v15750_v44 = vrot.slane %v13601_v22, 5  ;;  %v7814_v21 = vshrl.u32 %v9608_v47, 16 }
 0x2ac   : > { %v7517_v12 = vsel %vm16568_vm7, %v16567_v19, %v7516_v27  ;;  %v7817_v16 = vshll.u32 %v9608_v47, 16  ;;  %v9609_v50 = vcombine.low %v6584_v4, %v6585_v36  ;;  %v13651_v27 = vor.u32 %v7322_v2, %v7319_v48  ;;  %vm16573_vm13 = vmmov %vm16568_vm7  ;;  %7552 = vrot.lane.b32.xlu0 %v7519_v54, %s10034_s29  ;;  %v16574_v47 = vld [vmem:[#allocation59_spill] sm:$0xff] }
 0x2ad   : > { %v16572_v19 = vrot.slane %v13347_v60, 5  ;;  %v6864_v41 = vshrl.u32 %v9526_v28, 16  ;;  %v6867_v32 = vshll.u32 %v9526_v28, 16  ;;  %7550 = vrot.lane.b32.xlu1 %v7517_v12, %s10034_s29  ;;  %v6554_v10 = vsel %vm16551_vm2, %v13638_v9, 0  ;;  %vm16576_vm8 = vmmov %vm16568_vm7 }
 0x2ae   : > { %16571 = vst [vmem:[#allocation32_spill] sm:$0xff] %v13651_v27  ;;  %vm16575_vm6 = vnez %v16574_v47  ;;  %v6388_v60 = vsel %vm10128_vm1, %v13531_v15, 0  ;;  %v6389_v48 = vsel %vm10128_vm1, %v13551_v18, 0  ;;  %v7077_v2 = vsel %vm16576_vm8, %v7074_v61, %v15750_v44  ;;  %v13700_v44 = vld [vmem:[#allocation3 + $0x48] sm:$0xf]  ;;  %v13800_v47 = vpop.permute.xlu0 %7390 }
 0x2af   : > { %v7075_v59 = vsel %vm16573_vm13, %v16572_v19, %v7074_v61  ;;  %v6458_v36 = vsel %vm16575_vm6, %v13640_v56, 0  ;;  %v9527_v28 = vcombine.low %v6388_v60, %v6389_v48  ;;  %v6586_v54 = vsel %vm10128_vm1, %v13638_v9, 0  ;;  %v13693_v60 = vld [vmem:[#allocation3 + $0x4c] sm:$0xf]  ;;  %16593 = vst [vmem:[#allocation39_spill] sm:$0xff] %v13800_v47 }
 0x2b0   : > { %v6587_v12 = vsel %vm10128_vm1, %v13649_v57, 0  ;;  %v7816_v4 = vrot.slane %v7814_v21, 4  ;;  %v7819_v19 = vrot.slane %v7817_v16, 5  ;;  %v7823_v11 = vshrl.u32 %v9609_v50, 16  ;;  %7110 = vrot.lane.b32.xlu0 %v7077_v2, %s10026_s18 }
 0x2b1   : > { %v9610_v0 = vcombine.low %v6586_v54, %v6587_v12  ;;  %v6866_v25 = vrot.slane %v6864_v41, 4  ;;  %v6869_v14 = vrot.slane %v6867_v32, 5  ;;  %v7826_v1 = vshll.u32 %v9609_v50, 16  ;;  %7108 = vrot.lane.b32.xlu1 %v7075_v59, %s10026_s18  ;;  %v13688_v54 = vld [vmem:[#allocation3 + $0xc4] sm:$0xf] }
 0x2b2   : > { %v6522_v61 = vsel %vm16562_vm10, %v13649_v57, 0  ;;  %v9593_v48 = vcombine.low %v6553_v34, %v6554_v10  ;;  %vm16577_vm14 = vsmask.f32 3328  ;;  %v9560_v16 = vcombine.low %v6457_v46, %v6458_v36 }
 0x2b3   : > { %v7324_v21 = vsel %vm16577_vm14, %v13524_v20, %v13651_v27  ;;  %v6873_v32 = vshrl.u32 %v9527_v28, 16  ;;  %v7832_v50 = vshrl.u32 %v9610_v0, 16  ;;  %v7835_v41 = vshll.u32 %v9610_v0, 16  ;;  %v16579_v0 = vld [vmem:[#allocation67_spill] sm:$0xff] }
 0x2b4   : > { %vm16578_vm7 = vcmp.ne.s16.totalorder %v16564_v8, 0  ;;  %v7820_v2 = vor.u32 %v7819_v19, %v7816_v4  ;;  %v6555_v34 = vsel %vm16570_vm0, %v13649_v57, 0  ;;  %v6876_v59 = vshll.u32 %v9527_v28, 16  ;;  %7404 = vrot.lane.b32.xlu0 %v7324_v21, %s10033_s8  ;;  %v16581_v4 = vld [vmem:[#allocation65_spill] sm:$0xff] }
 0x2b5   : > { %v6521_v12 = vsel %vm16578_vm7, %v13638_v9, 0  ;;  %v6870_v20 = vor.u32 %v6869_v14, %v6866_v25  ;;  %v7825_v46 = vrot.slane %v7823_v11, 4  ;;  %v7828_v36 = vrot.slane %v7826_v1, 5  ;;  %7669 = vrot.lane.b32.xlu1 %v9593_v48, %s10035_s16 }
 0x2b6   : > { %v13698_v10 = vcombine.low %v6521_v12, %v6522_v61  ;;  %vm16580_vm13 = vnez %v16579_v0  ;;  %vm16582_vm8 = vcmp.ne.s16.totalorder %v16581_v4, 0  ;;  %v6589_v25 = vsel %vm10128_vm1, %v13693_v60, 0  ;;  %v16674_v0 = vld [vmem:[#allocation71_spill] sm:$0xff] }
 0x2b7   : > { %v6424_v29 = vsel %vm16580_vm13, %v13688_v54, 0  ;;  %v6423_v19 = vsel %vm16582_vm8, %v13640_v56, 0  ;;  %v6390_v1 = vsel %vm10128_vm1, %v13640_v56, 0  ;;  %v6391_v11 = vsel %vm10128_vm1, %v13688_v54, 0  ;;  %vm16584_vm8 = vmmov %vm16577_vm14 }
 0x2b8   : > { %v6875_v14 = vrot.slane %v6873_v32, 4  ;;  %v7834_v28 = vrot.slane %v7832_v50, 4  ;;  %v7837_v61 = vrot.slane %v7835_v41, 5  ;;  %v9528_v48 = vcombine.low %v6390_v1, %v6391_v11  ;;  %v13728_v32 = vld [vmem:[#allocation3 + $0xc8] sm:$0xf] }
 0x2b9   : > { %v6878_v21 = vrot.slane %v6876_v59, 5  ;;  %v7520_v12 = vrot.slane %v13698_v10, 5  ;;  %v13720_v5 = vcombine.low %v6423_v19, %v6424_v29  ;;  %v6588_v27 = vsel %vm10128_vm1, %v13700_v44, 0  ;;  %7227 = vrot.lane.b32.xlu1 %v9560_v16, %s10031_s23 }
 0x2ba   : > { %v7329_v8 = vshll.u32 %v13624_v30, 16  ;;  %v7821_v58 = vsel %vm16577_vm14, %v13498_v51, %v7820_v2  ;;  %v9611_v4 = vcombine.low %v6588_v27, %v6589_v25  ;;  %v6882_v17 = vshrl.u32 %v9528_v48, 16  ;;  %v13740_v51 = vld [vmem:[#allocation3 + $0xcc] sm:$0xf]  ;;  %vm16585_vm14 = vmmov %vm16584_vm8 }
 0x2bb   : > { %vm16583_vm7 = vcmp.ne.s16.totalorder %v16555_v6, 0  ;;  %7922 = vrot.lane.b32.xlu0 %v7821_v58, %s10036_s17  ;;  %v7829_v29 = vor.u32 %v7828_v36, %v7825_v46  ;;  %v6556_v41 = vsel %vm16575_vm6, %v13700_v44, 0  ;;  %v6885_v59 = vshll.u32 %v9528_v48, 16 }
 0x2bc   : > { %v13733_v50 = vsel %vm16583_vm7, %v13638_v9, 0  ;;  %v6871_v27 = vsel %vm16584_vm8, %v13533_v26, %v6870_v20  ;;  %v6620_v6 = vsel %vm16548_vm4, %v13649_v57, 0  ;;  %v9594_v9 = vcombine.low %v6555_v34, %v6556_v41  ;;  %v13758_v26 = vpop.permute.xlu1 %7098  ;;  %v16612_v57 = vld [vmem:[#allocation62_spill] sm:$0xff] }
 0x2bd   : > { %v13747_v19 = vor.u32 %v7837_v61, %v7834_v28  ;;  %v7830_v58 = vsel %vm16585_vm14, %v7820_v2, %v7829_v29  ;;  %v13750_v16 = vor.u32 %v6878_v21, %v6875_v14  ;;  %v16586_v46 = vrot.slane %v13575_v49, 5  ;;  %v9789_v49 = vpop.f32.mrf.mxu0  ;;  %vm16588_vm14 = vmmov %vm16584_vm8 }
 0x2be   : > { %vm16587_vm7 = vcmask 1042432   ;;  %v15757_v25 = vrot.slane %v13720_v5, 5  ;;  %v7841_v1 = vshrl.u32 %v9611_v4, 16  ;;  %v6884_v11 = vrot.slane %v6882_v17, 4  ;;  %7924 = vrot.lane.b32.xlu1 %v7830_v58, %s10036_s17 }
 0x2bf   : > { %v7521_v36 = vsel %vm16587_vm7, %v16586_v46, %v7520_v12  ;;  %v6392_v34 = vsel %vm10128_vm1, %v13728_v32, 0  ;;  %v6393_v2 = vsel %vm10128_vm1, %v13740_v51, 0  ;;  %6958 = vrot.lane.b32.xlu0 %v6871_v27, %s10027_s19  ;;  %v6887_v14 = vrot.slane %v6885_v59, 5  ;;  %v6034_v58 = vpop.f32.mrf.mxu0 }
 0x2c0   : > { %v9529_v28 = vcombine.low %v6392_v34, %v6393_v2  ;;  %v6354_v61 = vsel %vm16551_vm2, %v13457_v42, 0  ;;  %v6355_v17 = vsel %vm16570_vm0, %v13508_v43, 0  ;;  %v6880_v48 = vsel %vm16584_vm8, %v6870_v20, %v13750_v16  ;;  %v13789_v34 = vpop.permute.xlu1 %7215 }
 0x2c1   : > { %v6043_v21 = vadd.f32 %v13462_v7, %v9789_v49  ;;  %v7839_v41 = vsel %vm16588_vm14, %v7829_v29, %v13747_v19  ;;  %v7844_v27 = vshll.u32 %v9611_v4, 16  ;;  %v16589_v42 = vsel %vm16558_vm9, %v13290_v62, 0  ;;  %v9790_v13 = vpop.f32.mrf.mxu0 }
 0x2c2   : > { %v6891_v59 = vshrl.u32 %v9529_v28, 16  ;;  %v6894_v46 = vshll.u32 %v9529_v28, 16  ;;  %v13783_v33 = vcombine.low %v16589_v42, %v6354_v61  ;;  %v6356_v43 = vsel %vm16575_vm6, %v13531_v15, 0  ;;  %6960 = vrot.lane.b32.xlu1 %v6880_v48, %s10027_s19 }
 0x2c3   : > { %v6103_v52 = vmax.f32 %v6043_v21, 0.0  ;;  %v6035_v20 = vadd.f32 %v13462_v7, %v6034_v58  ;;  %v7843_v29 = vrot.slane %v7841_v1, 4  ;;  %v13791_v4 = vcombine.low %v6355_v17, %v6356_v43  ;;  %7671 = vrot.lane.b32.xlu0 %v9594_v9, %s10035_s16  ;;  %v6037_v17 = vpop.f32.mrf.mxu0 }
 0x2c4   : > { %16590 = vst [vmem:[#allocation34_spill] sm:$0xff] %v13783_v33  ;;  %v13795_v62 = vor.u32 %v6887_v14, %v6884_v11  ;;  %v6893_v2 = vrot.slane %v6891_v59, 4  ;;  %v6896_v49 = vrot.slane %v6894_v46, 5  ;;  %vm16592_vm2 = vnez %v16250_v55 }
 0x2c5   : > { %16591 = vst [vmem:[#allocation35_spill] sm:$0xff] %v13791_v4  ;;  %v6357_v15 = vsel %vm16592_vm2, %v13551_v18, 0  ;;  %v9708_v28 = vpack.c.bf16 %v6103_v52, %v6103_v52  ;;  %v6101_v61 = vmax.f32 %v6035_v20, 0.0  ;;  %v6046_v1 = vadd.f32 %v13462_v7, %v9790_v13  ;;  %v13834_v13 = vpop.permute.xlu1 %7392 }
 0x2c6   : > { %vm16594_vm9 = vnez %v16252_v31  ;;  %v7846_v48 = vrot.slane %v7844_v27, 5  ;;  %v13806_v11 = vor.u32 %v6896_v49, %v6893_v2  ;;  %vm16597_vm0 = vnez %v16254_v24  ;;  %7554 = vrot.lane.b32.xlu1 %v7521_v36, %s10034_s29  ;;  %v16604_v49 = vld [vmem:[#allocation31_spill] sm:$0xff] }
 0x2c7   : > { %v6358_v9 = vsel %vm16594_vm9, %v13640_v56, 0  ;;  %v6359_v18 = vsel %vm16597_vm0, %v13688_v54, 0  ;;  %vm16598_vm6 = vcmask 125952   ;;  %v9706_v21 = vpack.c.bf16 %v6101_v61, %v6101_v61  ;;  %7926 = vrot.lane.b32.xlu0 %v7839_v41, %s10036_s17 }
 0x2c8   : > { %16595 = vst [vmem:[#allocation36_spill] sm:$0xff] %v13806_v11  ;;  %v13808_v14 = vcombine.low %v6357_v15, %v6358_v9  ;;  %6264 = vst.msk [vmem:[#allocation3 + $0x58] sm:$0xf] %vm16598_vm6, %v9708_v28  ;;  %v6104_v58 = vmax.f32 %v6046_v1, 0.0  ;;  %v6038_v59 = vadd.f32 %v13462_v7, %v6037_v17  ;;  %vm16600_vm8 = vnez %v16256_v63  ;;  %v16616_v17 = vld [vmem:[#allocation66_spill] sm:$0xff] }
 0x2c9   : > { %vm16599_vm7 = vmmov %vm16598_vm6  ;;  %v6360_v56 = vsel %vm16600_vm8, %v13728_v32, 0  ;;  %v13824_v27 = vsel %vm16588_vm14, %v13795_v62, %v13806_v11  ;;  %v8038_v42 = vrot.slane %v13589_v23, 5  ;;  %v6618_v43 = vsel %vm16495_vm11, %v13502_v3, 0  ;;  %6262 = vst.msk [vmem:[#allocation3 + $0x50] sm:$0xf] %vm16598_vm6, %v9706_v21 }
 0x2ca   : > { %16596 = vst [vmem:[#allocation37_spill] sm:$0xff] %v13808_v14  ;;  %6296 = vst.msk [vmem:[#allocation3 + $0xd8] sm:$0xf] %vm16599_vm7, %v9708_v28  ;;  %v13826_v46 = vcombine.low %v6359_v18, %v6360_v56  ;;  %v6124_v41 = vpack.c.bf16 %v6104_v58, %v6103_v52  ;;  %v9709_v20 = vpack.c.bf16 %v6104_v58, %v6104_v58  ;;  %v6102_v36 = vmax.f32 %v6038_v59, 0.0 }
 0x2cb   : > { %16601 = vst [vmem:[#allocation41_spill] sm:$0xff] %v13824_v27  ;;  %vm16603_vm7 = vmmov %vm16598_vm6  ;;  %v13837_v2 = vcombine.low %v13618_v45, %v6618_v43  ;;  %v6524_v23 = vsel %vm16580_vm13, %v13693_v60, 0  ;;  %vm16605_vm14 = vnez %v16604_v49  ;;  %v16606_v3 = vrot.slane %v13396_v40, 5  ;;  %v13855_v45 = vpop.permute.xlu0 %7213 }
 0x2cc   : > { %16602 = vst [vmem:[#allocation45_spill] sm:$0xff] %v13826_v46  ;;  %6294 = vst.msk [vmem:[#allocation3 + $0xd0] sm:$0xf] %vm16603_vm7, %v9706_v21  ;;  %v6426_v53 = vsel %vm16605_vm14, %v13740_v51, 0  ;;  %vm16607_vm11 = vcmask 1042432   ;;  %v13853_v52 = vcombine.low %v13733_v50, %v6620_v6  ;;  %v9707_v28 = vpack.c.bf16 %v6102_v36, %v6102_v36  ;;  %v16614_v6 = vld [vmem:[#allocation65_spill] sm:$0xff] }
 0x2cd   : > { %v8039_v15 = vsel %vm16607_vm11, %v16606_v3, %v8038_v42  ;;  %16608 = vst [vmem:[#allocation48_spill] sm:$0xff] %v13855_v45  ;;  %6265 = vst.msk [vmem:[#allocation3 + $0x5c] sm:$0xf] %vm16598_vm6, %v9709_v20  ;;  %v16610_v40 = vrot.slane %v13601_v22, 5  ;;  %vm16613_vm4 = vnez %v16612_v57  ;;  %v15758_v58 = vrot.slane %v13837_v2, 5 }
 0x2ce   : > { %vm16609_vm7 = vmmov %vm16598_vm6  ;;  %vm16617_vm6 = vcmp.ne.s16.totalorder %v16616_v17, 0  ;;  %v6123_v59 = vpack.c.bf16 %v6102_v36, %v6101_v61  ;;  %v13881_v56 = vor.u32 %v7846_v48, %v7843_v29  ;;  %v16620_v3 = vshrl.u32 %v13624_v30, 16 }
 0x2cf   : > { %6297 = vst.msk [vmem:[#allocation3 + $0xdc] sm:$0xf] %vm16609_vm7, %v9709_v20  ;;  %vm16611_vm12 = vmmov %vm16607_vm11  ;;  %vm16615_vm11 = vcmp.ne.s16.totalorder %v16614_v6, 0  ;;  %v6425_v18 = vsel %vm16617_vm6, %v13728_v32, 0  ;;  %v6459_v61 = vsel %vm16592_vm2, %v13688_v54, 0  ;;  %v7344_v29 = vshrl.u32 %v6124_v41, 16 }
 0x2d0   : > { %v7079_v1 = vsel %vm16611_vm12, %v16610_v40, %v15757_v25  ;;  %v6523_v9 = vsel %vm16615_vm11, %v13700_v44, 0  ;;  %vm16619_vm12 = vmmov %vm16609_vm7  ;;  %6295 = vst.msk [vmem:[#allocation3 + $0xd4] sm:$0xf] %vm16609_vm7, %v9707_v28  ;;  %v13885_v20 = vcombine.low %v6425_v18, %v6426_v53  ;;  %v7328_v40 = vrot.slane %v16620_v3, 4  ;;  %v13902_v53 = vpop.permute.xlu1 %7394  ;;  %v13928_v21 = vld [vmem:[#allocation3 + $0x50] sm:$0xf] }
 0x2d1   : > { %7112 = vrot.lane.b32.xlu1 %v7079_v1, %s10026_s18  ;;  %6263 = vst.msk [vmem:[#allocation3 + $0x54] sm:$0xf] %vm16619_vm12, %v9707_v28  ;;  %v13883_v43 = vcombine.low %v6523_v9, %v6524_v23  ;;  %v7331_v1 = vrot.slane %v7329_v8, 5  ;;  %vm16621_vm11 = vcmask 1042432   ;;  %v7347_v48 = vshll.u32 %v6124_v41, 16  ;;  %16623 = vst [vmem:[#allocation43_spill] sm:$0xff] %v13902_v53 }
 0x2d2   : > { %v13897_v36 = vsel %vm16621_vm11, %v8038_v42, %v15758_v58  ;;  %vm16622_vm6 = vsmask.f32 3328  ;;  %v8437_v28 = vshrl.u32 %v8039_v15, 16  ;;  %v16624_v8 = vld [vmem:[#allocation54_spill] sm:$0xff]  ;;  %v6460_v54 = vsel %vm16594_vm9, %v13728_v32, 0 }
 0x2d3   : > { %v7848_v23 = vsel %vm16622_vm6, %v13747_v19, %v13881_v56  ;;  %vm16625_vm12 = vcmp.ne.s16.totalorder %v16624_v8, 0  ;;  %v8440_v41 = vshll.u32 %v8039_v15, 16  ;;  %v13916_v19 = vpop.permute.xlu0 %7540  ;;  %v7335_v9 = vshrl.u32 %v6123_v59, 16  ;;  %vm16627_vm7 = vmmov %vm16622_vm6  ;;  %v13930_v15 = vld [vmem:[#allocation3 + $0xd0] sm:$0xf] }
 0x2d4   : > { %v13907_v30 = vsel %vm16625_vm12, %v13700_v44, 0  ;;  %16626 = vst [vmem:[#allocation46_spill] sm:$0xff] %v13916_v19  ;;  %v15759_v18 = vrot.slane %v13883_v43, 5  ;;  %v6889_v32 = vsel %vm16627_vm7, %v13750_v16, %v13795_v62  ;;  %v9561_v8 = vcombine.low %v6459_v61, %v6460_v54  ;;  %v13932_v50 = vld [vmem:[#allocation3 + $0x5c] sm:$0xf]  ;;  %vm16629_vm11 = vmmov %vm16622_vm6 }
 0x2d5   : > { %7928 = vrot.lane.b32.xlu1 %v7848_v23, %s10036_s17  ;;  %v13923_v23 = vor.u32 %v7331_v1, %v7328_v40  ;;  %v7346_v38 = vrot.slane %v7344_v29, 4  ;;  %v7349_v25 = vrot.slane %v7347_v48, 5  ;;  %v7338_v58 = vshll.u32 %v6123_v59, 16  ;;  %v13934_v42 = vld [vmem:[#allocation3 + $0x58] sm:$0xf]  ;;  %v16628_v40 = vld [vmem:[#allocation32_spill] sm:$0xff] }
 0x2d6   : > { %v8439_v3 = vrot.slane %v8437_v28, 3  ;;  %vm16630_vm6 = vcmask 1042432   ;;  %v6593_v59 = vsel %vm10128_vm1, %v13932_v50, 0  ;;  %v8442_v29 = vrot.slane %v8440_v41, 4  ;;  %v13954_v28 = vpop.permute.xlu1 %6948  ;;  %v13983_v4 = vld [vmem:[#allocation3 + $0xd8] sm:$0xf] }
 0x2d7   : > { %v7333_v1 = vsel %vm16629_vm11, %v16628_v40, %v13923_v23  ;;  %v7523_v16 = vsel %vm16630_vm6, %v7520_v12, %v15759_v18  ;;  %v13947_v61 = vld [vmem:[#allocation3 + $0xd4] sm:$0xf]  ;;  %v13952_v48 = vpop.permute.xlu0 %7657  ;;  %v6590_v54 = vsel %vm10128_vm1, %v13928_v21, 0  ;;  %v6394_v12 = vsel %vm10128_vm1, %v13930_v15, 0 }
 0x2d8   : > { %v13945_v62 = vld [vmem:[#allocation3 + $0x54] sm:$0xf]  ;;  %16631 = vst [vmem:[#allocation50_spill] sm:$0xff] %v13952_v48  ;;  %v6395_v41 = vsel %vm10128_vm1, %v13947_v61, 0  ;;  %v6592_v18 = vsel %vm10128_vm1, %v13934_v42, 0  ;;  %v7340_v46 = vrot.slane %v7338_v58, 5  ;;  %v14001_v53 = vor.u32 %v7349_v25, %v7346_v38 }
 0x2d9   : > { %6962 = vrot.lane.b32.xlu1 %v6889_v32, %s10027_s19  ;;  %v6591_v10 = vsel %vm10128_vm1, %v13945_v62, 0  ;;  %v7337_v32 = vrot.slane %v7335_v9, 4  ;;  %v9530_v44 = vcombine.low %v6394_v12, %v6395_v41  ;;  %vm16632_vm12 = vcmp.ne.s16.totalorder %v16616_v17, 0  ;;  %v16633_v58 = vld [vmem:[#allocation38_spill] sm:$0xff] }
 0x2da   : > { %v9612_v40 = vcombine.low %v6590_v54, %v6591_v10  ;;  %v6525_v48 = vsel %vm16632_vm12, %v13928_v21, 0  ;;  %v6526_v19 = vsel %vm16605_vm14, %v13945_v62, 0  ;;  %v9613_v47 = vcombine.low %v6592_v18, %v6593_v59  ;;  %v16635_v18 = vld [vmem:[#allocation77_spill] sm:$0xff] }
 0x2db   : > { %v6900_v54 = vshrl.u32 %v9530_v44, 16  ;;  %v6903_v10 = vshll.u32 %v9530_v44, 16  ;;  %v13978_v12 = vcombine.low %v6525_v48, %v6526_v19  ;;  %vm16634_vm7 = vnez %v16633_v58  ;;  %v13991_v19 = vpop.permute.xlu0 %7217  ;;  %v13993_v48 = vpop.permute.xlu1 %7659 }
 0x2dc   : > { %v7850_v45 = vshrl.u32 %v9612_v40, 16  ;;  %v7853_v9 = vshll.u32 %v9612_v40, 16  ;;  %v7859_v41 = vshrl.u32 %v9613_v47, 16  ;;  %v7862_v14 = vshll.u32 %v9613_v47, 16  ;;  %16638 = vst [vmem:[#allocation44_spill] sm:$0xff] %v13991_v19  ;;  %16639 = vst [vmem:[#allocation47_spill] sm:$0xff] %v13993_v48 }
 0x2dd   : > { %7229 = vrot.lane.b32.xlu1 %v9561_v8, %s10031_s23  ;;  %v6428_v27 = vsel %vm16634_vm7, %v13947_v61, 0  ;;  %vm16636_vm11 = vnez %v16635_v18  ;;  %v6622_v44 = vsel %vm16562_vm10, %v13693_v60, 0  ;;  %v14003_v35 = vor.u32 %v7340_v46, %v7337_v32  ;;  %vm16642_vm10 = vmmov %vm16632_vm12 }
 0x2de   : > { %v7852_v22 = vrot.slane %v7850_v45, 4  ;;  %v7855_v57 = vrot.slane %v7853_v9, 5  ;;  %v6361_v8 = vsel %vm16636_vm11, %v13740_v51, 0  ;;  %v7861_v40 = vrot.slane %v7859_v41, 4  ;;  %v13996_v45 = vld [vmem:[#allocation3 + $0xdc] sm:$0xf] }
 0x2df   : > { %v7864_v33 = vrot.slane %v7862_v14, 5  ;;  %v16640_v9 = vld [vmem:[#allocation74_spill] sm:$0xff]  ;;  %v6558_v41 = vsel %vm16594_vm9, %v13928_v21, 0  ;;  %v6902_v14 = vrot.slane %v6900_v54, 4  ;;  %v6905_v47 = vrot.slane %v6903_v10, 5 }
 0x2e0   : > { %vm16641_vm6 = vcmp.ne.s16.totalorder %v16640_v9, 0  ;;  %v7856_v59 = vor.u32 %v7855_v57, %v7852_v22  ;;  %v8443_v48 = vor.u32 %v8442_v29, %v8439_v3  ;;  %v6396_v25 = vsel %vm10128_vm1, %v13983_v4, 0  ;;  %v14056_v29 = vpop.permute.xlu0 %7544 }
 0x2e1   : > { %v6427_v37 = vsel %vm16641_vm6, %v13930_v15, 0  ;;  %7406 = vrot.lane.b32.xlu1 %v7333_v1, %s10033_s8  ;;  %v14011_v11 = vor.u32 %v7864_v33, %v7861_v40  ;;  %v6625_v31 = vsel %vm16642_vm10, %v13934_v42, 0  ;;  %v6462_v33 = vsel %vm16600_vm8, %v13930_v15, 0 }
 0x2e2   : > { %v14006_v19 = vcombine.low %v6427_v37, %v6428_v27  ;;  %v6397_v37 = vsel %vm10128_vm1, %v13996_v45, 0  ;;  %v16643_v46 = vrot.slane %v13978_v12, 5  ;;  %v16644_v38 = vrot.slane %v13883_v43, 5 }
 0x2e3   : > { %v9531_v27 = vcombine.low %v6396_v25, %v6397_v37  ;;  %vm16645_vm9 = vcmask 1042432   ;;  %v16647_v22 = vsel %vm16597_vm0, %v13740_v51, 0  ;;  %vm16649_vm12 = vsmask.f32 3328  ;;  %v14058_v51 = vpop.permute.xlu1 %7542 }
 0x2e4   : > { %v15765_v9 = vrot.slane %v14006_v19, 5  ;;  %v14031_v57 = vsel %vm16645_vm9, %v16644_v38, %v16643_v46  ;;  %v14038_v17 = vcombine.low %v16647_v22, %v6462_v33  ;;  %v14042_v3 = vsel %vm16649_vm12, %v7856_v59, %v14011_v11  ;;  %vm16652_vm6 = vmmov %vm16645_vm9  ;;  %v16659_v46 = vld [vmem:[#allocation73_spill] sm:$0xff]  ;;  %v16661_v22 = vld [vmem:[#allocation18_spill] sm:$0xff] }
 0x2e5   : > { %16646 = vst [vmem:[#allocation49_spill] sm:$0xff] %v14031_v57  ;;  %7556 = vrot.lane.b32.xlu1 %v7523_v16, %s10034_s29  ;;  %16650 = vst [vmem:[#allocation60_spill] sm:$0xff] %v14042_v3  ;;  %v16651_v1 = vrot.slane %v13885_v20, 5  ;;  %vm16656_vm9 = vcmp.ne.s16.totalorder %v16614_v6, 0  ;;  %v16657_v54 = vsel %vm16592_vm2, %v13693_v60, 0  ;;  %v6909_v40 = vshrl.u32 %v9531_v27, 16 }
 0x2e6   : > { %16648 = vst [vmem:[#allocation55_spill] sm:$0xff] %v14038_v17  ;;  %vm16654_vm10 = vmmov %vm16649_vm12  ;;  %v6623_v32 = vsel %vm16656_vm9, %v13928_v21, 0  ;;  %v9595_v10 = vcombine.low %v16657_v54, %v6558_v41  ;;  %v6912_v25 = vshll.u32 %v9531_v27, 16  ;;  %v14069_v33 = vor.u32 %v6905_v47, %v6902_v14  ;;  %v16667_v41 = vld [vmem:[#allocation30_spill] sm:$0xff] }
 0x2e7   : > { %v14049_v43 = vsel %vm16652_vm6, %v16651_v1, %v15765_v9  ;;  %v14054_v16 = vsel %vm16654_vm10, %v14003_v35, %v14001_v53  ;;  %vm16658_vm12 = vmmov %vm16654_vm10  ;;  %vm16660_vm6 = vnez %v16659_v46  ;;  %vm16662_vm10 = vsmask.f32 4352 }
 0x2e8   : > { %16653 = vst [vmem:[#allocation53_spill] sm:$0xff] %v14049_v43  ;;  %16655 = vst [vmem:[#allocation58_spill] sm:$0xff] %v14054_v16  ;;  %v7857_v37 = vsel %vm16658_vm12, %v13881_v56, %v7856_v59  ;;  %v6362_v38 = vsel %vm16660_vm6, %v13930_v15, 0  ;;  %v14076_v6 = vsel %vm16662_vm10, %v16661_v22, %v8443_v48  ;;  %v6911_v21 = vrot.slane %v6909_v40, 4  ;;  %v16665_v59 = vld [vmem:[#allocation76_spill] sm:$0xff] }
 0x2e9   : > { %16663 = vst [vmem:[#allocation57_spill] sm:$0xff] %v14076_v6  ;;  %v6914_v55 = vrot.slane %v6912_v25, 5  ;;  %v14078_v1 = vcombine.low %v6361_v8, %v6362_v38  ;;  %v8454_v60 = vshrl.u32 %v13897_v36, 16  ;;  %7673 = vrot.lane.b32.xlu1 %v9595_v10, %s10035_s16  ;;  %v8457_v56 = vshll.u32 %v13897_v36, 16  ;;  %v6604_v22 = vld [vmem:[#allocation3 + $0x88] sm:$0x1] }
 0x2ea   : > { %v8042_v47 = vrot.slane %v13853_v52, 5  ;;  %vm16666_vm2 = vnez %v16665_v59  ;;  %vm16668_vm9 = vnez %v16667_v41  ;;  %v9627_v40 = vcombine.low %v13907_v30, %v6622_v44 }
 0x2eb   : > { %16664 = vst [vmem:[#allocation59_spill] sm:$0xff] %v14078_v1  ;;  %v6363_v15 = vsel %vm16666_vm2, %v13947_v61, 0  ;;  %v6364_v14 = vsel %vm16668_vm9, %v13983_v4, 0  ;;  %v14090_v27 = vor.u32 %v6914_v55, %v6911_v21  ;;  %v8456_v8 = vrot.slane %v8454_v60, 3  ;;  %v14104_v21 = vpop.permute.xlu0 %7102  ;;  %v14106_v55 = vpop.permute.xlu1 %7100  ;;  %v16677_v1 = vld [vmem:[#allocation13_spill] sm:$0xff] }
 0x2ec   : > { %v14092_v54 = vcombine.low %v6363_v15, %v6364_v14  ;;  %v8459_v10 = vrot.slane %v8457_v56, 4  ;;  %v16670_v36 = vrot.slane %v13837_v2, 5  ;;  %vm16671_vm12 = vcmask 1042432  }
 0x2ed   : > { %v6624_v25 = vsel %vm16580_vm13, %v13945_v62, 0  ;;  %v6626_v38 = vsel %vm16605_vm14, %v13932_v50, 0  ;;  %vm16672_vm10 = vsmask.f32 3328  ;;  %v8044_v60 = vrot.slane %v9627_v40, 5  ;;  %7930 = vrot.lane.b32.xlu1 %v7857_v37, %s10036_s17  ;;  %vm16676_vm14 = vmmov %vm16671_vm12 }
 0x2ee   : > { %16669 = vst [vmem:[#allocation67_spill] sm:$0xff] %v14092_v54  ;;  %v8043_v52 = vsel %vm16671_vm12, %v16670_v36, %v8042_v47  ;;  %v14111_v30 = vsel %vm16672_vm10, %v14069_v33, %v14090_v27  ;;  %vm16675_vm13 = vcmask 130048   ;;  %v8460_v49 = vor.u32 %v8459_v10, %v8456_v8 }
 0x2ef   : > { %16673 = vst [vmem:[#allocation31_spill] sm:$0xff] %v14111_v30  ;;  %v8471_v2 = vshrl.u32 %v8043_v52, 16  ;;  %v8474_v44 = vshll.u32 %v8043_v52, 16  ;;  %v8070_v56 = vsel %vm16675_vm13, %v16674_v0, %v13954_v28  ;;  %v9628_v15 = vcombine.low %v6623_v32, %v6624_v25  ;;  %v14129_v32 = vpop.permute.xlu0 %7396 }
 0x2f0   : > { %v14117_v14 = vcombine.low %v6625_v31, %v6626_v38  ;;  %v8045_v54 = vsel %vm16676_vm14, %v8042_v47, %v8044_v60  ;;  %vm16678_vm12 = vcmp.ne.s16.totalorder %v16677_v1, 0  ;;  %vm16679_vm10 = vsmask.f32 4352  ;;  %v14131_v31 = vpop.permute.xlu1 %7661 }
 0x2f1   : > { %v8473_v36 = vrot.slane %v8471_v2, 3  ;;  %v8476_v9 = vrot.slane %v8474_v44, 4  ;;  %v14122_v6 = vsel %vm16678_vm12, %v6604_v22, 0  ;;  %v14125_v40 = vsel %vm16679_vm10, %v8443_v48, %v8460_v49  ;;  %vm16684_vm12 = vmmov %vm16676_vm14 }
 0x2f2   : > { %16680 = vst [vmem:[#allocation65_spill] sm:$0xff] %v14125_v40  ;;  %v8488_v52 = vshrl.u32 %v8045_v54, 16  ;;  %v8491_v30 = vshll.u32 %v8045_v54, 16  ;;  %v8046_v28 = vrot.slane %v9628_v15, 5  ;;  %vm16681_vm13 = vcmask 261120  }
 0x2f3   : > { %v8118_v37 = vsel %vm16681_vm13, %v8070_v56, %v13758_v26  ;;  %v16682_v8 = vrot.slane %v13885_v20, 5  ;;  %v16683_v47 = vrot.slane %v13720_v5, 5  ;;  %v8477_v10 = vor.u32 %v8476_v9, %v8473_v36  ;;  %vm16686_vm13 = vmmov %vm16684_vm12  ;;  %v9793_v56 = vpop.f32.mrf.mxu0 }
 0x2f4   : > { %v15768_v48 = vrot.slane %v14117_v14, 5  ;;  %v8490_v54 = vrot.slane %v8488_v52, 3  ;;  %v8493_v25 = vrot.slane %v8491_v30, 4  ;;  %v8047_v38 = vsel %vm16684_vm12, %v8044_v60, %v8046_v28  ;;  %v14151_v60 = vpop.permute.xlu0 %7914 }
 0x2f5   : > { %v7081_v1 = vsel %vm16676_vm14, %v16683_v47, %v16682_v8  ;;  %v9635_v26 = vcombine.low %v14122_v6, %v14122_v6  ;;  %v14144_v22 = vsel %vm16679_vm10, %v8460_v49, %v8477_v10  ;;  %v8505_v20 = vshrl.u32 %v8047_v38, 16  ;;  %16688 = vst [vmem:[#allocation54_spill] sm:$0xff] %v14151_v60  ;;  %v6050_v47 = vpop.f32.mrf.mxu0 }
 0x2f6   : > { %7114 = vrot.lane.b32.xlu1 %v7081_v1, %s10026_s18  ;;  %16685 = vst [vmem:[#allocation66_spill] sm:$0xff] %v14144_v22  ;;  %v8508_v2 = vshll.u32 %v8047_v38, 16  ;;  %v8049_v5 = vsel %vm16686_vm13, %v8046_v28, %v15768_v48  ;;  %vm16687_vm14 = vcmask 392192   ;;  %v8494_v44 = vor.u32 %v8493_v25, %v8490_v54  ;;  %v14160_v28 = vpop.permute.xlu1 %7219  ;;  %v16751_v22 = vld [vmem:[#allocation63_spill] sm:$0xff] }
 0x2f7   : > { %v8152_v9 = vsel %vm16687_vm14, %v8118_v37, %v13789_v34  ;;  %v8522_v0 = vshrl.u32 %v8049_v5, 16  ;;  %v8525_v30 = vshll.u32 %v8049_v5, 16  ;;  %vm16689_vm12 = vsmask.f32 3328 }
 0x2f8   : > { %v7342_v6 = vsel %vm16689_vm12, %v13923_v23, %v14003_v35  ;;  %v6559_v49 = vsel %vm16597_vm0, %v13945_v62, 0  ;;  %v8507_v15 = vrot.slane %v8505_v20, 3  ;;  %v8510_v36 = vrot.slane %v8508_v2, 4  ;;  %v16691_v23 = vld [vmem:[#allocation68_spill] sm:$0xff]  ;;  %v9794_v20 = vpop.f32.mrf.mxu0  ;;  %v6951_v2 = vpop.permute.xlu0 %6950 }
 0x2f9   : > { %v6059_v52 = vadd.f32 %v13462_v7, %v9793_v56  ;;  %v14164_v34 = vsel %vm16679_vm10, %v8477_v10, %v8494_v44  ;;  %v8524_v37 = vrot.slane %v8522_v0, 3  ;;  %v8527_v8 = vrot.slane %v8525_v30, 4 }
 0x2fa   : > { %7408 = vrot.lane.b32.xlu1 %v7342_v6, %s10033_s8  ;;  %16690 = vst [vmem:[#allocation32_spill] sm:$0xff] %v14164_v34  ;;  %vm15766_vm13 = vcmask 654336   ;;  %v6560_v24 = vsel %vm16600_vm8, %v13934_v42, 0  ;;  %v8511_v35 = vor.u32 %v8510_v36, %v8507_v15  ;;  %v15767_v62 = vrot.slane %v16691_v23, 5  ;;  %v14179_v56 = vpop.permute.xlu1 %7398 }
 0x2fb   : > { %v6107_v1 = vmax.f32 %v6059_v52, 0.0  ;;  %v6051_v54 = vadd.f32 %v13462_v7, %v6050_v47  ;;  %v9596_v25 = vcombine.low %v6559_v49, %v6560_v24  ;;  %v14171_v38 = vor.u32 %v8527_v8, %v8524_v37  ;;  %v16694_v49 = vld [vmem:[#allocation74_spill] sm:$0xff]  ;;  %v16700_v8 = vld [vmem:[#allocation27_spill] sm:$0xff] }
 0x2fc   : > { %vm16692_vm0 = vcmask 523264   ;;  %v14176_v5 = vsel %vm16679_vm10, %v8494_v44, %v8511_v35  ;;  %v6062_v30 = vadd.f32 %v13462_v7, %v9794_v20  ;;  %v6528_v6 = vsel %vm16634_vm7, %v13932_v50, 0  ;;  %v14212_v20 = vpop.permute.xlu0 %7663 }
 0x2fd   : > { %v8186_v10 = vsel %vm16692_vm0, %v8152_v9, %v13834_v13  ;;  %16693 = vst [vmem:[#allocation38_spill] sm:$0xff] %v14176_v5  ;;  %v9712_v63 = vpack.c.bf16 %v6107_v1, %v6107_v1  ;;  %v6105_v0 = vmax.f32 %v6051_v54, 0.0  ;;  %v6053_v9 = vpop.f32.mrf.mxu0  ;;  %v6463_v44 = vsel %vm16636_vm11, %v13947_v61, 0  ;;  %vm16696_vm0 = vmmov %vm16679_vm10  ;;  %v16702_v61 = vld [vmem:[#allocation36_spill] sm:$0xff] }
 0x2fe   : > { %7675 = vrot.lane.b32.xlu1 %v9596_v25, %s10035_s16  ;;  %v8221_v13 = vsel %vm15766_vm13, %v8186_v10, %v14058_v51  ;;  %vm16695_vm8 = vcmp.ne.s16.totalorder %v16694_v49, 0  ;;  %v14195_v36 = vsel %vm16696_vm0, %v8511_v35, %v14171_v38  ;;  %vm16698_vm10 = vcmask 125952  }
 0x2ff   : > { %v6527_v15 = vsel %vm16695_vm8, %v13934_v42, 0  ;;  %16697 = vst [vmem:[#allocation77_spill] sm:$0xff] %v14195_v36  ;;  %6268 = vst.msk [vmem:[#allocation3 + $0x68] sm:$0xf] %vm16698_vm10, %v9712_v63  ;;  %v9710_v52 = vpack.c.bf16 %v6105_v0, %v6105_v0  ;;  %v6108_v37 = vmax.f32 %v6062_v30, 0.0  ;;  %v6054_v51 = vadd.f32 %v13462_v7, %v6053_v9  ;;  %v16710_v9 = vld [vmem:[#allocation75_spill] sm:$0xff] }
 0x300   : > { %vm16699_vm12 = vmmov %vm16698_vm10  ;;  %vm16701_vm13 = vcmask 130048   ;;  %vm16703_vm14 = vsmask.f32 3328  ;;  %v6464_v42 = vsel %vm16660_vm6, %v13983_v4, 0  ;;  %v14208_v35 = vcombine.low %v6527_v15, %v6528_v6 }
 0x301   : > { %6300 = vst.msk [vmem:[#allocation3 + $0xe8] sm:$0xf] %vm16699_vm12, %v9712_v63  ;;  %v8073_v47 = vsel %vm16701_vm13, %v16700_v8, %v6951_v2  ;;  %v6907_v24 = vsel %vm16703_vm14, %v16702_v61, %v14069_v33  ;;  %v8060_v54 = vrot.slane %v9635_v26, 5  ;;  %vm16704_vm8 = vmmov %vm16698_vm10  ;;  %v6126_v25 = vpack.c.bf16 %v6108_v37, %v6107_v1  ;;  %v16706_v2 = vld [vmem:[#allocation47_spill] sm:$0xff]  ;;  %v7917_v33 = vpop.permute.xlu1 %7916  ;;  %v16713_v8 = vld [vmem:[#allocation40_spill] sm:$0xff] }
 0x302   : > { %6266 = vst.msk [vmem:[#allocation3 + $0x60] sm:$0xf] %vm16704_vm8, %v9710_v52  ;;  %vm16705_vm12 = vmmov %vm16704_vm8  ;;  %v9713_v7 = vpack.c.bf16 %v6108_v37, %v6108_v37  ;;  %v6106_v10 = vmax.f32 %v6054_v51, 0.0  ;;  %vm16707_vm13 = vcmask 785408   ;;  %6966 = vrot.lane.b32.xlu1 %v6907_v24, %s10027_s19  ;;  %vm16708_vm14 = vcmask 261120  }
 0x303   : > { %6298 = vst.msk [vmem:[#allocation3 + $0xe0] sm:$0xf] %vm16705_vm12, %v9710_v52  ;;  %v8256_v63 = vsel %vm16707_vm13, %v8221_v13, %v16706_v2  ;;  %v8120_v30 = vsel %vm16708_vm14, %v8073_v47, %v14106_v55  ;;  %vm16709_vm0 = vcmask 916480   ;;  %v9563_v6 = vcombine.low %v6463_v44, %v6464_v42  ;;  %vm16712_vm12 = vmmov %vm16704_vm8  ;;  %v16715_v47 = vld [vmem:[#allocation33_spill] sm:$0xff] }
 0x304   : > { %v8291_v26 = vsel %vm16709_vm0, %v8256_v63, %v7917_v33  ;;  %vm16711_vm10 = vnez %v16710_v9  ;;  %6269 = vst.msk [vmem:[#allocation3 + $0x6c] sm:$0xf] %vm16704_vm8, %v9713_v7  ;;  %v7362_v15 = vshrl.u32 %v6126_v25, 16  ;;  %v7365_v52 = vshll.u32 %v6126_v25, 16  ;;  %vm16720_vm0 = vmmov %vm16704_vm8  ;;  %v16722_v25 = vld [vmem:[#allocation44_spill] sm:$0xff] }
 0x305   : > { %v6430_v1 = vsel %vm16711_vm10, %v13996_v45, 0  ;;  %6301 = vst.msk [vmem:[#allocation3 + $0xec] sm:$0xf] %vm16712_vm12, %v9713_v7  ;;  %v6125_v13 = vpack.c.bf16 %v6106_v10, %v6105_v0  ;;  %v9711_v37 = vpack.c.bf16 %v6106_v10, %v6106_v10  ;;  %vm16714_vm13 = vcmp.ne.s16.totalorder %v16713_v8, 0  ;;  %vm16721_vm8 = vmmov %vm16720_vm0  ;;  %v6953_v10 = vpop.permute.xlu1 %6952 }
 0x306   : > { %v6429_v55 = vsel %vm16714_vm13, %v13983_v4, 0  ;;  %v16716_v44 = vshrl.u32 %v16715_v47, 16  ;;  %vm16718_vm14 = vcmask 1042432   ;;  %vm16723_vm12 = vcmask 392192   ;;  %7233 = vrot.lane.b32.xlu1 %v9563_v6, %s10031_s23 }
 0x307   : > { %v14236_v24 = vsel %vm16718_vm14, %v15767_v62, %v8060_v54  ;;  %6267 = vst.msk [vmem:[#allocation3 + $0x64] sm:$0xf] %vm16720_vm0, %v9711_v37  ;;  %v7353_v0 = vshrl.u32 %v6125_v13, 16  ;;  %v7356_v42 = vshll.u32 %v6125_v13, 16  ;;  %v8154_v7 = vsel %vm16723_vm12, %v8120_v30, %v16722_v25  ;;  %vm16727_vm0 = vmmov %vm16723_vm12  ;;  %v16734_v25 = vld [vmem:[#allocation43_spill] sm:$0xff] }
 0x308   : > { %v14231_v61 = vrot.slane %v16716_v44, 4  ;;  %16719 = vst [vmem:[#allocation73_spill] sm:$0xff] %v14236_v24  ;;  %6299 = vst.msk [vmem:[#allocation3 + $0xe4] sm:$0xf] %vm16721_vm8, %v9711_v37  ;;  %v14243_v4 = vcombine.low %v6429_v55, %v6430_v1  ;;  %v7364_v2 = vrot.slane %v7362_v15, 4  ;;  %v7367_v63 = vrot.slane %v7365_v52, 5  ;;  %v14247_v37 = vpop.permute.xlu0 %7221 }
 0x309   : > { %v8377_v33 = vshrl.u32 %v8291_v26, 16  ;;  %v16724_v44 = vld [vmem:[#allocation29_spill] sm:$0xff]  ;;  %vm16725_vm13 = vcmask 130048   ;;  %v7355_v62 = vrot.slane %v7353_v0, 4  ;;  %v7358_v48 = vrot.slane %v7356_v42, 5  ;;  %v9917_v24 = vld [vmem:[%s15400_s3 + $0x8] sm:$0xff]  }
 0x30a   : > { %16717 = vst [vmem:[#allocation56_spill] sm:$0xff] %v14231_v61  ;;  %v8076_v54 = vsel %vm16725_vm13, %v16724_v44, %v6953_v10  ;;  %v8380_v51 = vshll.u32 %v8291_v26, 16  ;;  %vm16726_vm14 = vcmask 261120   ;;  %v16728_v6 = vrot.slane %v14208_v35, 5  ;;  %v14274_v44 = vld [vmem:[#allocation3 + $0x60] sm:$0xf] }
 0x30b   : > { %v8122_v13 = vsel %vm16726_vm14, %v8076_v54, %v14104_v21  ;;  %v16729_v1 = vrot.slane %v13978_v12, 5  ;;  %vm16730_vm8 = vcmask 1042432   ;;  %v16731_v52 = vshll.u32 %v16715_v47, 16  ;;  %v7547_v21 = vpop.permute.xlu1 %7546  ;;  %v14276_v54 = vld [vmem:[#allocation3 + $0xe0] sm:$0xf] }
 0x30c   : > { %v8156_v30 = vsel %vm16727_vm0, %v8122_v13, %v14160_v28  ;;  %v7359_v0 = vor.u32 %v7358_v48, %v7355_v62  ;;  %vm16733_vm12 = vcmask 523264   ;;  %v15769_v28 = vrot.slane %v14243_v4, 5  ;;  %v14278_v48 = vld [vmem:[#allocation3 + $0x6c] sm:$0xf]  ;;  %v16738_v62 = vld [vmem:[#allocation42_spill] sm:$0xff]  ;;  %vm16743_vm0 = vmmov %vm16730_vm8 }
 0x30d   : > { %v7527_v15 = vsel %vm16730_vm8, %v16729_v1, %v16728_v6  ;;  %v14260_v55 = vrot.slane %v16731_v52, 5  ;;  %v8190_v42 = vsel %vm16733_vm12, %v8156_v30, %v14129_v32  ;;  %vm16735_vm13 = vmmov %vm16733_vm12  ;;  %v14269_v10 = vor.u32 %v7367_v63, %v7364_v2  ;;  %v16740_v30 = vld [vmem:[#allocation21_spill] sm:$0xff]  ;;  %v9918_v32 = vld [vmem:[%s15400_s3] sm:$0xff]  }
 0x30e   : > { %7560 = vrot.lane.b32.xlu1 %v7527_v15, %s10034_s29  ;;  %v8188_v12 = vsel %vm16735_vm13, %v8154_v7, %v16734_v25  ;;  %vm16736_vm14 = vcmask 654336   ;;  %v16739_v13 = vsel %vm16538_vm5, %v16738_v62, 0  ;;  %v8379_v1 = vrot.slane %v8377_v33, 3  ;;  %v14294_v15 = vld [vmem:[#allocation3 + $0x68] sm:$0xf] }
 0x30f   : > { %16732 = vst [vmem:[#allocation18_spill] sm:$0xff] %v14260_v55  ;;  %v14272_v47 = vsel %vm16736_vm14, %v8190_v42, %v7547_v21  ;;  %v14285_v6 = vcombine.low %v16740_v30, %v16739_v13  ;;  %v8382_v7 = vrot.slane %v8380_v51, 4  ;;  %v16742_v2 = vrot.slane %v14006_v19, 5  ;;  %v14299_v42 = vld [vmem:[#allocation3 + $0x64] sm:$0xf]  ;;  %vm16744_vm8 = vmmov %vm16736_vm14  ;;  %v14366_v43 = vpop.permute.xlu1 %7104 }
 0x310   : > { %v6561_v52 = vsel %vm16636_vm11, %v13932_v50, 0  ;;  %v8223_v21 = vsel %vm16744_vm8, %v8188_v12, %v14056_v29  ;;  %v14303_v33 = vld [vmem:[#allocation3 + $0xe4] sm:$0xf]  ;;  %v6597_v19 = vsel %vm10128_vm1, %v14278_v48, 0  ;;  %v6465_v51 = vsel %vm16666_vm2, %v13996_v45, 0  ;;  %v14315_v50 = vpop.permute.xlu0 %7548 }
 0x311   : > { %16741 = vst [vmem:[#allocation76_spill] sm:$0xff] %v14285_v6  ;;  %v14292_v63 = vsel %vm16743_vm0, %v16742_v2, %v15769_v28  ;;  %vm16745_vm12 = vsmask.f32 3328  ;;  %v6594_v18 = vsel %vm10128_vm1, %v14274_v44, 0  ;;  %v6595_v29 = vsel %vm10128_vm1, %v14299_v42, 0 }
 0x312   : > { %v14313_v25 = vsel %vm16745_vm12, %v7359_v0, %v14269_v10  ;;  %v6398_v12 = vsel %vm10128_vm1, %v14276_v54, 0  ;;  %v6399_v62 = vsel %vm10128_vm1, %v14303_v33, 0  ;;  %v9614_v13 = vcombine.low %v6594_v18, %v6595_v29 }
 0x313   : > { %16746 = vst [vmem:[#allocation30_spill] sm:$0xff] %v14313_v25  ;;  %v9532_v30 = vcombine.low %v6398_v12, %v6399_v62  ;;  %v6596_v2 = vsel %vm10128_vm1, %v14294_v15, 0  ;;  %v6365_v28 = vsel %vm12394_vm3, %v13996_v45, 0  ;;  %v14335_v36 = vor.u32 %v8382_v7, %v8379_v1  ;;  %v14350_v7 = vld [vmem:[#allocation3 + $0xe8] sm:$0xf] }
 0x314   : > { %vm16749_vm11 = vcmask 785408   ;;  %v6530_v34 = vsel %vm16711_vm10, %v14299_v42, 0  ;;  %v9615_v18 = vcombine.low %v6596_v2, %v6597_v19  ;;  %v7868_v29 = vshrl.u32 %v9614_v13, 16  ;;  %v14362_v2 = vld [vmem:[#allocation3 + $0xec] sm:$0xf]  ;;  %v14364_v16 = vpop.permute.xlu0 %7106 }
 0x315   : > { %16748 = vst [vmem:[#allocation71_spill] sm:$0xff] %v14335_v36  ;;  %v14339_v5 = vsel %vm16749_vm11, %v8223_v21, %v14131_v31  ;;  %v7871_v12 = vshll.u32 %v9614_v13, 16  ;;  %vm16750_vm13 = vcmp.ne.s16.totalorder %v16713_v8, 0  ;;  %vm16752_vm14 = vnez %v16751_v22  ;;  %v16756_v8 = vld [vmem:[#allocation85_spill] sm:$0xff] }
 0x316   : > { %v6529_v62 = vsel %vm16750_vm13, %v14274_v44, 0  ;;  %v6432_v45 = vsel %vm16752_vm14, %v14303_v33, 0  ;;  %v6918_v1 = vshrl.u32 %v9532_v30, 16  ;;  %v7877_v21 = vshrl.u32 %v9615_v18, 16  ;;  %vm16753_vm0 = vmmov %vm16750_vm13 }
 0x317   : > { %v14352_v31 = vcombine.low %v6529_v62, %v6530_v34  ;;  %v7880_v40 = vshll.u32 %v9615_v18, 16  ;;  %v7870_v60 = vrot.slane %v7868_v29, 4  ;;  %v7873_v25 = vrot.slane %v7871_v12, 5  ;;  %v16754_v12 = vld [vmem:[#allocation80_spill] sm:$0xff] }
 0x318   : > { %v6564_v19 = vsel %vm16668_vm9, %v14294_v15, 0  ;;  %v14360_v13 = vsel %vm16753_vm0, %v14294_v15, 0  ;;  %v7879_v18 = vrot.slane %v7877_v21, 4  ;;  %vm16755_vm8 = vcmp.ne.s16.totalorder %v16754_v12, 0 }
 0x319   : > { %v15772_v34 = vrot.slane %v14352_v31, 5  ;;  %v7882_v29 = vrot.slane %v7880_v40, 5  ;;  %v6431_v62 = vsel %vm16755_vm8, %v14276_v54, 0  ;;  %v7874_v3 = vor.u32 %v7873_v25, %v7870_v60  ;;  %vm16759_vm13 = vmmov %vm16755_vm8 }
 0x31a   : > { %v6921_v57 = vshll.u32 %v9532_v30, 16  ;;  %vm16757_vm12 = vnez %v16756_v8  ;;  %v14375_v23 = vcombine.low %v6431_v62, %v6432_v45  ;;  %vm16758_vm11 = vsmask.f32 3328 }
 0x31b   : > { %v7360_v55 = vsel %vm16758_vm11, %v14001_v53, %v7359_v0  ;;  %v6920_v61 = vrot.slane %v6918_v1, 4  ;;  %v14382_v40 = vsel %vm16759_vm13, %v14294_v15, 0  ;;  %v6401_v60 = vsel %vm10128_vm1, %v14362_v2, 0  ;;  %vm16760_vm0 = vmmov %vm16758_vm11  ;;  %v14396_v0 = vpop.permute.xlu0 %7400  ;;  %v14398_v15 = vpop.permute.xlu1 %7665 }
 0x31c   : > { %v7875_v25 = vsel %vm16760_vm0, %v14011_v11, %v7874_v3  ;;  %v14389_v30 = vor.u32 %v7882_v29, %v7879_v18  ;;  %v15771_v45 = vrot.slane %v14375_v23, 5  ;;  %v6400_v53 = vsel %vm10128_vm1, %v14350_v7, 0  ;;  %vm16766_vm11 = vmmov %vm16760_vm0 }
 0x31d   : > { %7934 = vrot.lane.b32.xlu1 %v7875_v25, %s10036_s17  ;;  %v9533_v1 = vcombine.low %v6400_v53, %v6401_v60  ;;  %v6562_v21 = vsel %vm16660_vm6, %v14274_v44, 0  ;;  %v6466_v11 = vsel %vm16668_vm9, %v14276_v54, 0  ;;  %v16761_v18 = vrot.slane %v14208_v35, 5 }
 0x31e   : > { %vm16762_vm8 = vcmask 1042432   ;;  %v6923_v62 = vrot.slane %v6921_v57, 5  ;;  %v14413_v25 = vcombine.low %v6561_v52, %v6562_v21  ;;  %v14415_v17 = vcombine.low %v6465_v51, %v6466_v11 }
 0x31f   : > { %v14411_v29 = vsel %vm16762_vm8, %v16761_v18, %v15772_v34  ;;  %v14419_v46 = vsel %vm16766_vm11, %v7874_v3, %v14389_v30  ;;  %vm16768_vm6 = vcmask 785408   ;;  %v6927_v60 = vshrl.u32 %v9533_v1, 16  ;;  %vm16770_vm9 = vmmov %vm16762_vm8  ;;  %v16775_v18 = vld [vmem:[#allocation83_spill] sm:$0xff] }
 0x320   : > { %16763 = vst [vmem:[#allocation13_spill] sm:$0xff] %v14411_v29  ;;  %16764 = vst [vmem:[#allocation74_spill] sm:$0xff] %v14413_v25  ;;  %v14424_v41 = vsel %vm16768_vm6, %v14272_v47, %v14212_v20  ;;  %v6930_v53 = vshll.u32 %v9533_v1, 16  ;;  %v16769_v35 = vrot.slane %v14243_v4, 5  ;;  %v6563_v52 = vsel %vm16666_vm2, %v14299_v42, 0  ;;  %v16772_v47 = vld [vmem:[#allocation82_spill] sm:$0xff]  ;;  %v7919_v4 = vpop.permute.xlu0 %7918  ;;  %v14447_v1 = vpop.permute.xlu1 %7223 }
 0x321   : > { %16765 = vst [vmem:[#allocation27_spill] sm:$0xff] %v14415_v17  ;;  %16767 = vst [vmem:[#allocation36_spill] sm:$0xff] %v14419_v46  ;;  %v6532_v3 = vsel %vm16752_vm14, %v14278_v48, 0  ;;  %v6366_v20 = vsel %vm16757_vm12, %v14276_v54, 0  ;;  %vm16773_vm13 = vnez %v16772_v47  ;;  %7118 = vrot.lane.b32.xlu1 %v14292_v63, %s10026_s18  ;;  %v6929_v59 = vrot.slane %v6927_v60, 4  ;;  %v9911_v63 = vld [vmem:[%s15400_s3 + $0x38] sm:$0xff]  }
 0x322   : > { %v14431_v57 = vsel %vm16770_vm9, %v16769_v35, %v15771_v45  ;;  %v6367_v51 = vsel %vm16773_vm13, %v14303_v33, 0  ;;  %v6932_v21 = vrot.slane %v6930_v53, 5  ;;  %v14449_v11 = vcombine.low %v6365_v28, %v6366_v20  ;;  %v9797_v45 = vpop.f32.mrf.mxu0  ;;  %v9959_v60 = vld [vmem:[%s15399_s2] ss:$0 sm:$0xff]  ;;  %9842 = vmatpush1.bf16.msra.mxu1 %v9911_v63  ;;  %8751 = vmatpush1.bf16.msra.mxu0 %v9911_v63  ;;  %v16827_v17 = vld [vmem:[#allocation14_spill] sm:$0xff] }
 0x323   : > { %16771 = vst [vmem:[#allocation47_spill] sm:$0xff] %v14431_v57  ;;  %vm16776_vm2 = vnez %v16775_v18  ;;  %vm16777_vm0 = vcmask 916480   ;;  %v14456_v34 = vor.u32 %v6923_v62, %v6920_v61  ;;  %v6628_v28 = vsel %vm16634_vm7, %v14299_v42, 0 }
 0x324   : > { %16774 = vst [vmem:[#allocation75_spill] sm:$0xff] %v14449_v11  ;;  %v6368_v35 = vsel %vm16776_vm2, %v14350_v7, 0  ;;  %v8293_v54 = vsel %vm16777_vm0, %v14339_v5, %v7919_v4  ;;  %v6075_v53 = vadd.f32 %v9959_v60, %v9797_v45  ;;  %vm16779_vm8 = vcmp.ne.s16.totalorder %v16694_v49, 0  ;;  %v6066_v61 = vpop.f32.mrf.mxu0  ;;  %v6955_v49 = vpop.permute.xlu0 %6954 }
 0x325   : > { %v14461_v57 = vcombine.low %v6367_v51, %v6368_v35  ;;  %v8394_v20 = vshrl.u32 %v8293_v54, 16  ;;  %v8397_v11 = vshll.u32 %v8293_v54, 16  ;;  %v6627_v5 = vsel %vm16779_vm8, %v14274_v44, 0  ;;  %7412 = vrot.lane.b32.xlu1 %v7360_v55, %s10033_s8  ;;  %v14480_v44 = vpop.permute.xlu1 %7402  ;;  %v9912_v55 = vld [vmem:[%s15400_s3 + $0x30] sm:$0xff]  }
 0x326   : > { %v9598_v62 = vcombine.low %v6563_v52, %v6564_v19  ;;  %v14472_v4 = vor.u32 %v6932_v21, %v6929_v59  ;;  %v14474_v51 = vcombine.low %v6627_v5, %v6628_v28  ;;  %v6630_v58 = vsel %vm16711_vm10, %v14278_v48, 0  ;;  %v9798_v52 = vpop.f32.mrf.mxu0  ;;  %v16781_v59 = vld [vmem:[#allocation23_spill] sm:$0xff] }
 0x327   : > { %16778 = vst [vmem:[#allocation40_spill] sm:$0xff] %v14461_v57  ;;  %v6111_v42 = vmax.f32 %v6075_v53, 0.0  ;;  %v6067_v45 = vadd.f32 %v9959_v60, %v6066_v61  ;;  %v8396_v35 = vrot.slane %v8394_v20, 3  ;;  %v8399_v54 = vrot.slane %v8397_v11, 4  ;;  %v16786_v57 = vld [vmem:[#allocation81_spill] sm:$0xff] }
 0x328   : > { %v16780_v19 = vmov 0   ;;  %vm16782_vm7 = vcmask 130048   ;;  %v14488_v9 = vsel %vm16766_vm11, %v14456_v34, %v14472_v4  ;;  %v8050_v11 = vrot.slane %v14474_v51, 5  ;;  %v6069_v61 = vpop.f32.mrf.mxu0 }
 0x329   : > { %9834 = vmatprep.subr.bf16.mxu1 %v16780_v19  ;;  %v8079_v21 = vsel %vm16782_vm7, %v16781_v59, %v6955_v49  ;;  %16783 = vst [vmem:[#allocation33_spill] sm:$0xff] %v14488_v9  ;;  %8752 = vmatprep.subr.bf16.mxu0 %v16780_v19  ;;  %v14496_v63 = vcombine.low %v14360_v13, %v6630_v58  ;;  %v6109_v53 = vmax.f32 %v6067_v45, 0.0  ;;  %vm16785_vm10 = vcmask 261120  }
 0x32a   : > { %v9716_v28 = vpack.c.bf16 %v6111_v42, %v6111_v42  ;;  %v6078_v20 = vadd.f32 %v9959_v60, %v9798_v52  ;;  %v14498_v5 = vor.u32 %v8399_v54, %v8396_v35  ;;  %v8124_v49 = vsel %vm16785_vm10, %v8079_v21, %v14366_v43  ;;  %9843 = vmatpush1.bf16.msra.mxu1 %v9912_v55  ;;  %v14520_v35 = vpop.permute.xlu0 %7667  ;;  %v7921_v54 = vpop.permute.xlu1 %7920 }
 0x32b   : > { %16784 = vst [vmem:[#allocation44_spill] sm:$0xff] %v14496_v63  ;;  %v14503_v59 = vcombine.low %v14382_v40, %v6532_v3  ;;  %vm16787_vm6 = vnez %v16786_v57  ;;  %8753 = vmatpush1.bf16.msra.mxu0 %v9912_v55  ;;  %v16788_v13 = vrot.slane %v14117_v14, 5  ;;  %vm16789_vm0 = vcmask 125952   ;;  %7679 = vrot.lane.b32.xlu1 %v9598_v62, %s10035_s16  ;;  %v9913_v62 = vld [vmem:[%s15400_s3 + $0x28] sm:$0xff]  }
 0x32c   : > { %v6434_v9 = vsel %vm16787_vm6, %v14362_v2, 0  ;;  %6272 = vst.msk [vmem:[#allocation3 + $0x78] sm:$0xf] %vm16789_vm0, %v9716_v28  ;;  %vm16790_vm8 = vmmov %vm16789_vm0  ;;  %v9714_v43 = vpack.c.bf16 %v6109_v53, %v6109_v53  ;;  %v6112_v40 = vmax.f32 %v6078_v20, 0.0  ;;  %v6070_v3 = vadd.f32 %v9959_v60, %v6069_v61  ;;  %9835 = vmatprep.subr.bf16.mxu1 %v16780_v19  ;;  %8754 = vmatprep.subr.bf16.mxu0 %v16780_v19 }
 0x32d   : > { %v14513_v58 = vsel %vm16770_vm9, %v16788_v13, %v8050_v11  ;;  %6304 = vst.msk [vmem:[#allocation3 + $0xf8] sm:$0xf] %vm16790_vm8, %v9716_v28  ;;  %vm16791_vm7 = vcmask 392192   ;;  %vm16792_vm11 = vcmask 916480   ;;  %v6467_v52 = vsel %vm12394_vm3, %v14303_v33, 0  ;;  %vm16796_vm8 = vmmov %vm16789_vm0 }
 0x32e   : > { %v8158_v45 = vsel %vm16791_vm7, %v8124_v49, %v14247_v37  ;;  %v8295_v14 = vsel %vm16792_vm11, %v14424_v41, %v7921_v54  ;;  %vm16793_vm10 = vcmask 523264   ;;  %vm16794_vm9 = vsmask.f32 4352  ;;  %6270 = vst.msk [vmem:[#allocation3 + $0x70] sm:$0xf] %vm16789_vm0, %v9714_v43  ;;  %9844 = vmatpush1.bf16.msra.mxu1 %v9913_v62  ;;  %v16802_v54 = vld [vmem:[#allocation26_spill] sm:$0xff] }
 0x32f   : > { %v8192_v60 = vsel %vm16793_vm10, %v8158_v45, %v14179_v56  ;;  %v14537_v37 = vsel %vm16794_vm9, %v14335_v36, %v14498_v5  ;;  %6302 = vst.msk [vmem:[#allocation3 + $0xf0] sm:$0xf] %vm16796_vm8, %v9714_v43  ;;  %v9717_v41 = vpack.c.bf16 %v6112_v40, %v6112_v40  ;;  %v6110_v33 = vmax.f32 %v6070_v3, 0.0  ;;  %v16797_v56 = vld [vmem:[#allocation51_spill] sm:$0xff]  ;;  %8755 = vmatpush1.bf16.msra.mxu0 %v9913_v62  ;;  %vm16801_vm9 = vmmov %vm16789_vm0  ;;  %v14556_v45 = vpop.permute.xlu0 %7225 }
 0x330   : > { %16795 = vst [vmem:[#allocation29_spill] sm:$0xff] %v14537_v37  ;;  %v8411_v21 = vshrl.u32 %v8295_v14, 16  ;;  %vm16798_vm7 = vcmp.ne.s16.totalorder %v16797_v56, 0  ;;  %vm16799_vm11 = vsmask.f32 3328  ;;  %v8414_v20 = vshll.u32 %v8295_v14, 16  ;;  %9836 = vmatprep.subr.bf16.mxu1 %v16780_v19  ;;  %8756 = vmatprep.subr.bf16.mxu0 %v16780_v19 }
 0x331   : > { %v6433_v55 = vsel %vm16798_vm7, %v14350_v7, 0  ;;  %v6925_v28 = vsel %vm16799_vm11, %v14090_v27, %v14456_v34  ;;  %vm16800_vm10 = vcmask 654336   ;;  %v14551_v13 = vpack.c.bf16 %v6112_v40, %v6111_v42  ;;  %6273 = vst.msk [vmem:[#allocation3 + $0x7c] sm:$0xf] %vm16801_vm9, %v9717_v41  ;;  %v6957_v27 = vpop.permute.xlu1 %6956  ;;  %vm16805_vm11 = vmmov %vm16789_vm0 }
 0x332   : > { %v14547_v61 = vcombine.low %v6433_v55, %v6434_v9  ;;  %v8227_v49 = vsel %vm16800_vm10, %v8192_v60, %v14315_v50  ;;  %6305 = vst.msk [vmem:[#allocation3 + $0xfc] sm:$0xf] %vm16789_vm0, %v9717_v41  ;;  %v6127_v43 = vpack.c.bf16 %v6110_v33, %v6109_v53  ;;  %v9715_v3 = vpack.c.bf16 %v6110_v33, %v6110_v33  ;;  %v9914_v53 = vld [vmem:[%s15400_s3 + $0x20] sm:$0xff]   ;;  %vm16806_vm10 = vmmov %vm16789_vm0 }
 0x333   : > { %6970 = vrot.lane.b32.xlu1 %v6925_v28, %s10027_s19  ;;  %v15773_v34 = vrot.slane %v14496_v63, 5  ;;  %v8413_v50 = vrot.slane %v8411_v21, 3  ;;  %v8416_v9 = vrot.slane %v8414_v20, 4  ;;  %vm16803_vm8 = vcmask 130048   ;;  %9845 = vmatpush1.bf16.msra.mxu1 %v9914_v53 }
 0x334   : > { %v8082_v42 = vsel %vm16803_vm8, %v16802_v54, %v6957_v27  ;;  %vm16804_vm7 = vcmask 785408   ;;  %6271 = vst.msk [vmem:[#allocation3 + $0x74] sm:$0xf] %vm16805_vm11, %v9715_v3  ;;  %v7371_v14 = vshrl.u32 %v6127_v43, 16  ;;  %v7374_v60 = vshll.u32 %v6127_v43, 16  ;;  %8757 = vmatpush1.bf16.msra.mxu0 %v9914_v53  ;;  %9837 = vmatprep.subr.bf16.mxu1 %v16780_v19  ;;  %v16812_v27 = vld [vmem:[#allocation72_spill] sm:$0xff] }
 0x335   : > { %v14564_v40 = vsel %vm16804_vm7, %v8227_v49, %v14398_v15  ;;  %6303 = vst.msk [vmem:[#allocation3 + $0xf4] sm:$0xf] %vm16806_vm10, %v9715_v3  ;;  %v16807_v62 = vsel %vm16757_vm12, %v14350_v7, 0  ;;  %v14577_v33 = vor.u32 %v8416_v9, %v8413_v50  ;;  %vm16808_vm9 = vcmask 261120   ;;  %v14590_v7 = vpop.permute.xlu0 %7552  ;;  %v7551_v20 = vpop.permute.xlu1 %7550  ;;  %v14604_v3 = vld [vmem:[#allocation3 + $0x78] sm:$0xf]  ;;  %8758 = vmatprep.subr.bf16.mxu0 %v16780_v19 }
 0x336   : > { %v9565_v41 = vcombine.low %v6467_v52, %v16807_v62  ;;  %v8126_v21 = vsel %vm16808_vm9, %v8082_v42, %v14364_v16  ;;  %v15775_v55 = vrot.slane %v14503_v59, 5  ;;  %vm16809_vm0 = vcmask 1042432   ;;  %v9915_v53 = vld [vmem:[%s15400_s3 + $0x18] sm:$0xff]   ;;  %v16825_v15 = vld [vmem:[#allocation8_spill] sm:$0xff] }
 0x337   : > { %v14587_v28 = vsel %vm16809_vm0, %v8050_v11, %v15773_v34  ;;  %vm16810_vm8 = vcmask 392192   ;;  %v15774_v16 = vrot.slane %v14547_v61, 5  ;;  %v7380_v11 = vshrl.u32 %v14551_v13, 16  ;;  %vm16816_vm9 = vmmov %vm16809_vm0  ;;  %9846 = vmatpush1.bf16.msra.mxu1 %v9915_v53  ;;  %v6439_v26 = vld [vmem:[#allocation3 + $0xf8] sm:$0xf] }
 0x338   : > { %7237 = vrot.lane.b32.xlu1 %v9565_v41, %s10031_s23  ;;  %v8160_v52 = vsel %vm16810_vm8, %v8126_v21, %v14447_v1  ;;  %v7383_v43 = vshll.u32 %v14551_v13, 16  ;;  %vm16811_vm7 = vcmask 523264   ;;  %vm16813_vm11 = vnez %v16812_v27  ;;  %v14617_v62 = vld [vmem:[#allocation3 + $0x7c] sm:$0xf]  ;;  %v14624_v21 = vld [vmem:[#allocation3 + $0x70] sm:$0xf]  ;;  %9838 = vmatprep.subr.bf16.mxu1 %v16780_v19 }
 0x339   : > { %v8194_v1 = vsel %vm16811_vm7, %v8160_v52, %v14396_v0  ;;  %v7373_v9 = vrot.slane %v7371_v14, 4  ;;  %v7376_v54 = vrot.slane %v7374_v60, 5  ;;  %vm16814_vm10 = vcmask 654336   ;;  %v14633_v52 = vld [vmem:[#allocation3 + $0xf0] sm:$0xf]  ;;  %v14659_v34 = vpop.permute.xlu1 %7108  ;;  %8759 = vmatpush1.bf16.msra.mxu0 %v9915_v53 }
 0x33a   : > { %v8229_v42 = vsel %vm16814_vm10, %v8194_v1, %v7551_v20  ;;  %v16815_v0 = vrot.slane %v14352_v31, 5  ;;  %v16817_v14 = vrot.slane %v14375_v23, 5  ;;  %vm16818_vm8 = vcmask 785408   ;;  %v16821_v1 = vld [vmem:[#allocation12_spill] sm:$0xff]  ;;  %8760 = vmatprep.subr.bf16.mxu0 %v16780_v19 }
 0x33b   : > { %v14637_v20 = vsel %vm16818_vm8, %v8229_v42, %v14520_v35  ;;  %vm16819_vm7 = vsmask.f32 4352  ;;  %vm16822_vm10 = vcmp.ne.s16.totalorder %v16821_v1, 0  ;;  %v16823_v23 = vld [vmem:[#allocation16_spill] sm:$0xff]  ;;  %v7382_v1 = vrot.slane %v7380_v11, 4 }
 0x33c   : > { %v7531_v41 = vsel %vm16816_vm9, %v16815_v0, %v15775_v55  ;;  %v14631_v60 = vsel %vm16809_vm0, %v16817_v14, %v15774_v16  ;;  %v14642_v31 = vsel %vm16819_vm7, %v14498_v5, %v14577_v33  ;;  %v6405_v0 = vsel %vm16822_vm10, %v14604_v3, 0  ;;  %v14657_v5 = vpop.permute.xlu0 %7110  ;;  %v9916_v55 = vld [vmem:[%s15400_s3 + $0x10] sm:$0xff]  }
 0x33d   : > { %16820 = vst [vmem:[#allocation43_spill] sm:$0xff] %v14642_v31  ;;  %vm16824_vm9 = vnez %v16823_v23  ;;  %7564 = vrot.lane.b32.xlu1 %v7531_v41, %s10034_s29  ;;  %vm16826_vm0 = vnez %v16825_v15  ;;  %v7385_v50 = vrot.slane %v7383_v43, 5  ;;  %v14661_v23 = vld [vmem:[#allocation3 + $0x74] sm:$0xf]  ;;  %v6598_v15 = vsel %vm10128_vm1, %v14624_v21, 0  ;;  %v14686_v37 = vpop.permute.xlu1 %7669  ;;  %9847 = vmatpush1.bf16.msra.mxu1 %v9916_v55 }
 0x33e   : > { %v6406_v14 = vsel %vm16824_vm9, %v14617_v62, 0  ;;  %v6372_v35 = vsel %vm16826_vm0, %v14604_v3, 0  ;;  %v6373_v42 = vsel %vm16826_vm0, %v14617_v62, 0  ;;  %v14663_v41 = vld [vmem:[#allocation3 + $0xf4] sm:$0xf]  ;;  %v6599_v51 = vsel %vm10128_vm1, %v14661_v23, 0  ;;  %9839 = vmatprep.subr.bf16.mxu1 %v16780_v19  ;;  %8761 = vmatpush1.bf16.msra.mxu0 %v9916_v55 }
 0x33f   : > { %v9535_v13 = vcombine.low %v6405_v0, %v6406_v14  ;;  %v9519_v16 = vcombine.low %v6372_v35, %v6373_v42  ;;  %v6402_v11 = vsel %vm10128_vm1, %v14633_v52, 0  ;;  %v6403_v43 = vsel %vm10128_vm1, %v14663_v41, 0  ;;  %v6438_v42 = vld [vmem:[#allocation3 + $0x7c] sm:$0x8]  ;;  %8762 = vmatprep.subr.bf16.mxu0 %v16780_v19 }
 0x340   : > { %v9616_v53 = vcombine.low %v6598_v15, %v6599_v51  ;;  %v14682_v49 = vor.u32 %v7376_v54, %v7373_v9  ;;  %v14684_v31 = vpop.permute.xlu0 %7404  ;;  %v6568_v36 = vsel %vm16776_vm2, %v14604_v3, 0  ;;  %v9534_v46 = vcombine.low %v6402_v11, %v6403_v43 }
 0x341   : > { %v7061_v0 = vrot.slane %v9535_v13, 5  ;;  %v6802_v14 = vshrl.u32 %v9519_v16, 16  ;;  %v6805_v35 = vshll.u32 %v9519_v16, 16  ;;  %v6534_v9 = vsel %vm16787_vm6, %v14661_v23, 0  ;;  %v14716_v55 = vpop.permute.xlu1 %7227  ;;  %9848 = vmatpush1.bf16.msra.mxu1 %v9917_v24 }
 0x342   : > { %v7886_v16 = vshrl.u32 %v9616_v53, 16  ;;  %v7889_v13 = vshll.u32 %v9616_v53, 16  ;;  %v14696_v54 = vor.u32 %v7385_v50, %v7382_v1  ;;  %vm16828_vm8 = vcmp.ne.s16.totalorder %v16827_v17, 0  ;;  %8763 = vmatpush1.bf16.msra.mxu0 %v9917_v24  ;;  %9840 = vmatprep.subr.bf16.mxu1 %v16780_v19 }
 0x343   : > { %7094 = vrot.lane.b32.xlu0 %v7061_v0, %s10026_s18  ;;  %v6804_v15 = vrot.slane %v6802_v14, 4  ;;  %v6807_v29 = vrot.slane %v6805_v35, 5  ;;  %v6441_v25 = vsel %vm16828_vm8, %v6438_v42, 0  ;;  %vm16829_vm7 = vcmp.ne.s16.totalorder %v16797_v56, 0  ;;  %v16830_v14 = vld [vmem:[#allocation10_spill] sm:$0xff]  ;;  %8764 = vmatprep.subr.bf16.mxu0 %v16780_v19 }
 0x344   : > { %v6533_v11 = vsel %vm16829_vm7, %v14624_v21, 0  ;;  %v7888_v43 = vrot.slane %v7886_v16, 4  ;;  %v7891_v53 = vrot.slane %v7889_v13, 5  ;;  %v6567_v50 = vsel %vm16773_vm13, %v14661_v23, 0  ;;  %v7923_v51 = vpop.permute.xlu0 %7922 }
 0x345   : > { %v6936_v1 = vshrl.u32 %v9534_v46, 16  ;;  %v16831_v35 = vrot.slane %v16830_v14, 5  ;;  %vm16832_vm10 = vcmask 1042432   ;;  %vm16833_vm9 = vsmask.f32 3328  ;;  %9849 = vmatpush1.bf16.msra.mxu1 %v9918_v32 }
 0x346   : > { %v14714_v42 = vsel %vm16833_vm9, %v14269_v10, %v14682_v49  ;;  %v6939_v16 = vshll.u32 %v9534_v46, 16  ;;  %v14718_v13 = vcombine.low %v6533_v11, %v6534_v9  ;;  %v14724_v14 = vor.u32 %v7891_v53, %v7888_v43  ;;  %v16838_v43 = vld [vmem:[#allocation78_spill] sm:$0xff]  ;;  %8765 = vmatpush1.bf16.msra.mxu0 %v9918_v32  ;;  %9841 = vmatprep.subr.bf16.mxu1 %v16780_v19 }
 0x347   : > { %v7063_v17 = vsel %vm16832_vm10, %v7061_v0, %v16831_v35  ;;  %v16834_v0 = vld [vmem:[#allocation19_spill] sm:$0xff]  ;;  %vm16836_vm0 = vcmask 916480   ;;  %v6808_v9 = vor.u32 %v6807_v29, %v6804_v15  ;;  %v14737_v11 = vcombine.low %v6567_v50, %v6568_v36  ;;  %v16840_v50 = vld [vmem:[#allocation34_spill] sm:$0xff]  ;;  %8780 = vmatprep.subr.bf16.mxu0 %v16780_v19 }
 0x348   : > { %7096 = vrot.lane.b32.xlu0 %v7063_v17, %s10026_s18  ;;  %v16835_v35 = vsel %vm16538_vm5, %v16834_v0, 0  ;;  %v8297_v63 = vsel %vm16836_vm0, %v14564_v40, %v7923_v51  ;;  %vm16837_vm5 = vmmov %vm16833_vm9  ;;  %v6938_v40 = vrot.slane %v6936_v1, 4  ;;  %v6600_v51 = vsel %vm10128_vm1, %v14604_v3, 0  ;;  %v6959_v29 = vpop.permute.xlu0 %6958 }
 0x349   : > { %v14730_v10 = vcombine.low %v6441_v25, %v16835_v35  ;;  %v8428_v6 = vshrl.u32 %v8297_v63, 16  ;;  %v8431_v17 = vshll.u32 %v8297_v63, 16  ;;  %v7893_v25 = vsel %vm16837_vm5, %v14389_v30, %v14724_v14  ;;  %v7925_v63 = vpop.permute.xlu1 %7924  ;;  %vm16842_vm7 = vmmov %vm16836_vm0 }
 0x34a   : > { %v6601_v36 = vsel %vm10128_vm1, %v14617_v62, 0  ;;  %7938 = vrot.lane.b32.xlu1 %v7893_v25, %s10036_s17  ;;  %v6941_v24 = vrot.slane %v6939_v16, 5  ;;  %vm16839_vm8 = vcmp.ne.s16.totalorder %v16838_v43, 0  ;;  %vm16841_vm1 = vcmask 130048   ;;  %v16843_v16 = vld [vmem:[#allocation70_spill] sm:$0xff] }
 0x34b   : > { %v9617_v15 = vcombine.low %v6600_v51, %v6601_v36  ;;  %v6435_v53 = vsel %vm16839_vm8, %v14633_v52, 0  ;;  %v8430_v39 = vrot.slane %v8428_v6, 3  ;;  %v8085_v1 = vsel %vm16841_vm1, %v16840_v50, %v6959_v29 }
 0x34c   : > { %6944 = vrot.lane.b32.xlu0 %v6808_v9, %s10027_s19  ;;  %v8299_v35 = vsel %vm16842_vm7, %v14637_v20, %v7925_v63  ;;  %vm16844_vm10 = vnez %v16843_v16  ;;  %v8433_v46 = vrot.slane %v8431_v17, 4  ;;  %vm16845_vm9 = vcmask 261120   ;;  %v9919_v20 = vld [vmem:[%s15400_s3 + $0x40] sm:$0xff]   ;;  %v7672_v63 = vpop.permute.xlu0 %7671 }
 0x34d   : > { %v6436_v25 = vsel %vm16844_vm10, %v14663_v41, 0  ;;  %v8128_v51 = vsel %vm16845_vm9, %v8085_v1, %v14659_v34  ;;  %v8445_v36 = vshrl.u32 %v8299_v35, 16  ;;  %v8448_v30 = vshll.u32 %v8299_v35, 16  ;;  %v16847_v34 = vld [vmem:[#allocation22_spill] sm:$0xff]  ;;  %v16849_v1 = vld [vmem:[#allocation35_spill] sm:$0xff]  ;;  %9850 = vmatpush2.bf16.msra.mxu1 %v9919_v20  ;;  %8781 = vmatpush2.bf16.msra.mxu0 %v9919_v20 }
 0x34e   : > { %vm16846_vm0 = vcmask 392192   ;;  %v7895_v57 = vshrl.u32 %v9617_v15, 16  ;;  %v7898_v29 = vshll.u32 %v9617_v15, 16  ;;  %v14770_v50 = vcombine.low %v6435_v53, %v6436_v25  ;;  %7122 = vrot.lane.b32.xlu1 %v14631_v60, %s10026_s18  ;;  %v6961_v15 = vpop.permute.xlu1 %6960 }
 0x34f   : > { %v8162_v6 = vsel %vm16846_vm0, %v8128_v51, %v14556_v45  ;;  %v6817_v17 = vsel %vm16837_vm5, %v6808_v9, %v16847_v34  ;;  %v8447_v32 = vrot.slane %v8445_v36, 3  ;;  %v8450_v45 = vrot.slane %v8448_v30, 4 }
 0x350   : > { %vm16848_vm8 = vcmask 523264   ;;  %6946 = vrot.lane.b32.xlu0 %v6817_v17, %s10027_s19  ;;  %v8088_v35 = vsel %vm16841_vm1, %v16849_v1, %v6961_v15  ;;  %vm16850_vm7 = vcmask 654336   ;;  %v7897_v25 = vrot.slane %v7895_v57, 4 }
 0x351   : > { %v8196_v53 = vsel %vm16848_vm8, %v8162_v6, %v14480_v44  ;;  %v7900_v60 = vrot.slane %v7898_v29, 5  ;;  %v14788_v51 = vor.u32 %v6941_v24, %v6938_v40  ;;  %v8130_v9 = vsel %vm16845_vm9, %v8088_v35, %v14657_v5  ;;  %v7927_v5 = vpop.permute.xlu0 %7926 }
 0x352   : > { %v8231_v19 = vsel %vm16850_vm7, %v8196_v53, %v14590_v7  ;;  %v6536_v30 = vsel %vm16844_vm10, %v14617_v62, 0  ;;  %vm16851_vm0 = vcmask 785408   ;;  %v8434_v36 = vor.u32 %v8433_v46, %v8430_v39  ;;  %7416 = vrot.lane.b32.xlu1 %v14714_v42, %s10033_s8  ;;  %vm16853_vm10 = vmmov %vm16848_vm8 }
 0x353   : > { %v8266_v44 = vsel %vm16851_vm0, %v8231_v19, %v14686_v37  ;;  %vm16852_vm5 = vcmask 392192   ;;  %v7090_v57 = vrot.slane %v14770_v50, 5  ;;  %v6566_v40 = vsel %vm16757_vm12, %v14624_v21, 0  ;;  %v7555_v37 = vpop.permute.xlu1 %7554 }
 0x354   : > { %v8164_v7 = vsel %vm16852_vm5, %v8130_v9, %v14716_v55  ;;  %v16854_v46 = vsel %vm12394_vm3, %v14278_v48, 0  ;;  %v6470_v55 = vsel %vm16776_vm2, %v14633_v52, 0  ;;  %v16855_v8 = vrot.slane %v14718_v13, 5  ;;  %7211 = vrot.lane.b32.xlu0 %v14730_v10, %s10031_s23  ;;  %vm16859_vm3 = vmmov %vm16850_vm7 }
 0x355   : > { %v8198_v24 = vsel %vm16853_vm10, %v8164_v7, %v14684_v31  ;;  %v14811_v39 = vcombine.low %v16854_v46, %v6566_v40  ;;  %v16856_v16 = vrot.slane %v14503_v59, 5  ;;  %vm16857_vm12 = vcmask 1042432   ;;  %vm16860_vm2 = vmmov %vm16851_vm0  ;;  %v16875_v7 = vld [vmem:[#allocation64_spill] sm:$0xff] }
 0x356   : > { %v8451_v31 = vor.u32 %v8450_v45, %v8447_v32  ;;  %vm16858_vm8 = vcmask 916480   ;;  %v8233_v6 = vsel %vm16859_vm3, %v8198_v24, %v7555_v37  ;;  %v14827_v29 = vor.u32 %v7900_v60, %v7897_v25  ;;  %vm16864_vm7 = vmmov %vm16857_vm12  ;;  %7683 = vrot.lane.b32.xlu1 %v14737_v11, %s10035_s16  ;;  %v16872_v60 = vld [vmem:[#allocation9_spill] sm:$0xff] }
 0x357   : > { %v14821_v42 = vsel %vm16857_vm12, %v16856_v16, %v16855_v8  ;;  %v8301_v48 = vsel %vm16858_vm8, %v8266_v44, %v7927_v5  ;;  %v8268_v34 = vsel %vm16860_vm2, %v8233_v6, %v7672_v63  ;;  %v16861_v59 = vsel %vm16773_vm13, %v14362_v2, 0  ;;  %v16866_v63 = vld [vmem:[#allocation24_spill] sm:$0xff]  ;;  %v14860_v35 = vpop.permute.xlu1 %7112 }
 0x358   : > { %v8462_v18 = vshrl.u32 %v8301_v48, 16  ;;  %v8465_v20 = vshll.u32 %v8301_v48, 16  ;;  %v14834_v17 = vcombine.low %v16861_v59, %v6470_v55  ;;  %vm16862_vm1 = vsmask.f32 3328  ;;  %7388 = vrot.lane.b32.xlu0 %v16872_v60, %s10033_s8  ;;  %v16886_v59 = vld [vmem:[#allocation69_spill] sm:$0xff] }
 0x359   : > { %v14839_v10 = vsel %vm16862_vm1, %v14724_v14, %v14827_v29  ;;  %v16863_v32 = vrot.slane %v14547_v61, 5  ;;  %vm16865_vm9 = vmmov %vm16862_vm1  ;;  %vm16867_vm13 = vnez %v16866_v63  ;;  %v16868_v14 = vld [vmem:[#allocation52_spill] sm:$0xff]  ;;  %v16871_v25 = vsel %vm16613_vm4, %v16834_v0, 0 }
 0x35a   : > { %v14851_v47 = vsel %vm16865_vm9, %v14682_v49, %v14696_v54  ;;  %v6569_v15 = vsel %vm16867_vm13, %v14617_v62, 0  ;;  %vm16869_vm0 = vnez %v16868_v14  ;;  %v8464_v1 = vrot.slane %v8462_v18, 3  ;;  %vm16878_vm12 = vmmov %vm16862_vm1 }
 0x35b   : > { %v14846_v45 = vsel %vm16864_vm7, %v16863_v32, %v7090_v57  ;;  %v6472_v53 = vsel %vm16869_vm0, %v6439_v26, 0  ;;  %v8467_v61 = vrot.slane %v8465_v20, 4  ;;  %v14866_v49 = vcombine.low %v6569_v15, %v16871_v25  ;;  %v7929_v18 = vpop.permute.xlu1 %7928 }
 0x35c   : > { %v16873_v11 = vsel %vm16813_vm11, %v14663_v41, 0  ;;  %vm16874_vm5 = vcmp.ne.s16.totalorder %v16838_v43, 0  ;;  %vm16876_vm10 = vnez %v16875_v7  ;;  %v16877_v5 = vshrl.u32 %v14513_v58, 16  ;;  %v16894_v7 = vld [vmem:[#allocation56_spill] sm:$0xff] }
 0x35d   : > { %v9567_v9 = vcombine.low %v16873_v11, %v6472_v53  ;;  %v6535_v44 = vsel %vm16874_vm5, %v14604_v3, 0  ;;  %v6341_v40 = vsel %vm16876_vm10, %v14617_v62, 0  ;;  %v6943_v37 = vsel %vm16878_vm12, %v14472_v4, %v14788_v51 }
 0x35e   : > { %v8541_v24 = vrot.slane %v16877_v5, 3  ;;  %v14885_v46 = vcombine.low %v6535_v44, %v6536_v30  ;;  %v8468_v55 = vor.u32 %v8467_v61, %v8464_v1  ;;  %v16880_v16 = vsel %vm16366_vm15, %v16834_v0, 0  ;;  %6974 = vrot.lane.b32.xlu1 %v6943_v37, %s10027_s19  ;;  %v16893_v44 = vld [vmem:[#allocation76_spill] sm:$0xff] }
 0x35f   : > { %v14891_v43 = vcombine.low %v6341_v40, %v16880_v16  ;;  %v6370_v26 = vsel %vm16869_vm0, %v14633_v52, 0  ;;  %vm16881_vm8 = vsmask.f32 4352  ;;  %v16883_v4 = vshll.u32 %v14513_v58, 16  ;;  %v6963_v25 = vpop.permute.xlu1 %6962  ;;  %v16895_v40 = vld [vmem:[#allocation18_spill] sm:$0xff] }
 0x360   : > { %v14898_v48 = vsel %vm16881_vm8, %v14577_v33, %v8434_v36  ;;  %vm16882_vm3 = vmmov %vm16881_vm8  ;;  %v16884_v0 = vsel %vm16813_vm11, %v14362_v2, 0  ;;  %v8556_v33 = vshrl.u32 %v14587_v28, 16  ;;  %v16887_v58 = vrot.slane %v16886_v59, 5 }
 0x361   : > { %v14901_v6 = vsel %vm16882_vm3, %v8434_v36, %v8451_v31  ;;  %v8544_v30 = vrot.slane %v16883_v4, 4  ;;  %v14910_v20 = vcombine.low %v16884_v0, %v6370_v26  ;;  %vm16885_vm15 = vmmov %vm16882_vm3  ;;  %v8559_v36 = vshll.u32 %v14587_v28, 16  ;;  %v6404_v28 = vld [vmem:[#allocation3 + $0xf8] sm:$0x1]  ;;  %v16901_v4 = vld [vmem:[#allocation44_spill] sm:$0xff] }
 0x362   : > { %v14913_v52 = vsel %vm16885_vm15, %v8451_v31, %v8468_v55  ;;  %7538 = vrot.lane.b32.xlu0 %v16887_v58, %s10034_s29  ;;  %vm16888_vm2 = vcmask 916480   ;;  %vm16889_vm1 = vcmp.ne.s16.totalorder %v16754_v12, 0  ;;  %v6632_v27 = vsel %vm16752_vm14, %v14661_v23, 0  ;;  %vm16890_vm11 = vmmov %vm16882_vm3  ;;  %7241 = vrot.lane.b32.xlu1 %v9567_v9, %s10031_s23  ;;  %v16904_v0 = vld [vmem:[#allocation73_spill] sm:$0xff] }
 0x363   : > { %v8303_v32 = vsel %vm16888_vm2, %v8268_v34, %v7929_v18  ;;  %v8545_v63 = vor.u32 %v8544_v30, %v8541_v24  ;;  %v6631_v2 = vsel %vm16889_vm1, %v14624_v21, 0  ;;  %v8558_v14 = vrot.slane %v8556_v33, 3  ;;  %v16896_v24 = vld [vmem:[#allocation79_spill] sm:$0xff]  ;;  %vm16907_vm0 = vmmov %vm16882_vm3 }
 0x364   : > { %v8479_v31 = vshrl.u32 %v8303_v32, 16  ;;  %v8482_v15 = vshll.u32 %v8303_v32, 16  ;;  %v8561_v53 = vrot.slane %v8559_v36, 4  ;;  %v9632_v61 = vcombine.low %v6631_v2, %v6632_v27  ;;  %v7230_v32 = vpop.permute.xlu1 %7229  ;;  %vm16914_vm8 = vmmov %vm16907_vm0 }
 0x365   : > { %v14929_v1 = vsel %vm16890_vm11, %v14171_v38, %v8545_v63  ;;  %vm16891_vm7 = vcmp.ne.s16.totalorder %v16797_v56, 0  ;;  %v6634_v21 = vsel %vm16787_vm6, %v14617_v62, 0  ;;  %v7534_v38 = vrot.slane %v14885_v46, 5  ;;  %vm16898_vm6 = vmmov %vm16882_vm3  ;;  %v16954_v46 = vld [vmem:[#allocation50_spill] sm:$0xff] }
 0x366   : > { %v6633_v34 = vsel %vm16891_vm7, %v14604_v3, 0  ;;  %v8481_v22 = vrot.slane %v8479_v31, 3  ;;  %v8484_v23 = vrot.slane %v8482_v15, 4  ;;  %v8562_v60 = vor.u32 %v8561_v53, %v8558_v14  ;;  %7655 = vrot.lane.b32.xlu0 %v16893_v44, %s10035_s16  ;;  %v16909_v31 = vld [vmem:[#allocation28_spill] sm:$0xff]  ;;  %vm16916_vm15 = vmmov %vm16907_vm0 }
 0x367   : > { %v9633_v11 = vcombine.low %v6633_v34, %v6634_v21  ;;  %v14943_v56 = vor.u32 %v16895_v40, %v16894_v7  ;;  %v8054_v5 = vrot.slane %v9632_v61, 5  ;;  %vm16897_vm14 = vnez %v16896_v24  ;;  %vm16917_vm2 = vmmov %vm16907_vm0 }
 0x368   : > { %v6437_v62 = vsel %vm16897_vm14, %v6404_v28, 0  ;;  %v14947_v37 = vor.u32 %v8484_v23, %v8481_v22  ;;  %v14950_v9 = vsel %vm16898_vm6, %v8545_v63, %v8562_v60  ;;  %v16899_v16 = vrot.slane %v14718_v13, 5  ;;  %v16910_v28 = vld [vmem:[#allocation68_spill] sm:$0xff]  ;;  %v7407_v7 = vpop.permute.xlu1 %7406  ;;  %vm16918_vm1 = vmmov %vm16907_vm0 }
 0x369   : > { %v8056_v8 = vrot.slane %v9633_v11, 5  ;;  %vm16900_vm9 = vcmask 1042432   ;;  %v16902_v30 = vrot.slane %v16901_v4, 5  ;;  %v16905_v33 = vshrl.u32 %v16904_v0, 16 }
 0x36a   : > { %v7535_v26 = vsel %vm16900_vm9, %v16899_v16, %v7534_v38  ;;  %vm16903_vm13 = vmmov %vm16900_vm9  ;;  %v16906_v59 = vshll.u32 %v16904_v0, 16  ;;  %v14967_v63 = vsel %vm16907_vm0, %v8468_v55, %v14947_v37  ;;  %7912 = vrot.lane.b32.xlu0 %v16909_v31, %s10036_s17  ;;  %v9551_v15 = vcombine.low %v6437_v62, %v6437_v62  ;;  %v16913_v16 = vld [vmem:[#allocation41_spill] sm:$0xff] }
 0x36b   : > { %v8055_v18 = vsel %vm16903_vm13, %v16902_v30, %v8054_v5  ;;  %v8626_v36 = vrot.slane %v16905_v33, 3  ;;  %7568 = vrot.lane.b32.xlu1 %v7535_v26, %s10034_s29  ;;  %vm16908_vm5 = vmmov %vm16900_vm9  ;;  %v16911_v61 = vrot.slane %v16910_v28, 5  ;;  %v7911_v55 = vsel %vm16878_vm12, %v14827_v29, %v14943_v56 }
 0x36c   : > { %v8629_v58 = vrot.slane %v16906_v59, 4  ;;  %v8573_v13 = vshrl.u32 %v8055_v18, 16  ;;  %v8576_v2 = vshll.u32 %v8055_v18, 16  ;;  %v8057_v27 = vsel %vm16908_vm5, %v8054_v5, %v8056_v8  ;;  %vm16912_vm10 = vmmov %vm16908_vm5  ;;  %v7557_v33 = vpop.permute.xlu1 %7556 }
 0x36d   : > { %v8590_v14 = vshrl.u32 %v8057_v27, 16  ;;  %v8593_v53 = vshll.u32 %v8057_v27, 16  ;;  %v8059_v34 = vsel %vm16912_vm10, %v8056_v8, %v16911_v61  ;;  %v7092_v8 = vrot.slane %v9551_v15, 5  ;;  %vm16915_vm3 = vmmov %vm16908_vm5  ;;  %v16925_v15 = vld [vmem:[#allocation49_spill] sm:$0xff] }
 0x36e   : > { %v8575_v12 = vrot.slane %v8573_v13, 3  ;;  %v8578_v21 = vrot.slane %v8576_v2, 4  ;;  %v8607_v22 = vshrl.u32 %v8059_v34, 16  ;;  %v8610_v23 = vshll.u32 %v8059_v34, 16  ;;  %6964 = vrot.lane.b32.xlu0 %v16913_v16, %s10027_s19  ;;  %vm16933_vm12 = vmmov %vm16918_vm1  ;;  %v16939_v16 = vld [vmem:[#allocation36_spill] sm:$0xff] }
 0x36f   : > { %v8592_v11 = vrot.slane %v8590_v14, 3  ;;  %v8595_v44 = vrot.slane %v8593_v53, 4  ;;  %7942 = vrot.lane.b32.xlu1 %v7911_v55, %s10036_s17  ;;  %v8630_v18 = vor.u32 %v8629_v58, %v8626_v36  ;;  %v7093_v29 = vsel %vm16915_vm3, %v7090_v57, %v7092_v8  ;;  %v16920_v36 = vld [vmem:[#allocation37_spill] sm:$0xff]  ;;  %v9960_v58 = vld [vmem:[#allocation3 + $0x84] sm:$0xf]  ;;  %v16941_v8 = vld [vmem:[#allocation30_spill] sm:$0xff] }
 0x370   : > { %v8579_v40 = vor.u32 %v8578_v21, %v8575_v12  ;;  %v8609_v5 = vrot.slane %v8607_v22, 3  ;;  %v8612_v62 = vrot.slane %v8610_v23, 4  ;;  %vm16921_vm11 = vcmask 130048   ;;  %v16922_v57 = vld [vmem:[#allocation61_spill] sm:$0xff]  ;;  %v7674_v31 = vpop.permute.xlu1 %7673 }
 0x371   : > { %v8596_v26 = vor.u32 %v8595_v44, %v8592_v11  ;;  %v8091_v50 = vsel %vm16921_vm11, %v16920_v36, %v6963_v25  ;;  %vm16923_vm7 = vcmp.ne.s16.totalorder %v16922_v57, 0  ;;  %vm16924_vm6 = vcmask 261120   ;;  %v16934_v44 = vld [vmem:[#allocation58_spill] sm:$0xff]  ;;  %vm16945_vm3 = vmmov %vm16921_vm11 }
 0x372   : > { %v14982_v4 = vsel %vm16914_vm8, %v8562_v60, %v8579_v40  ;;  %v8613_v30 = vor.u32 %v8612_v62, %v8609_v5  ;;  %v16919_v60 = vld [vmem:[#allocation55_spill] sm:$0xff]  ;;  %v6571_v2 = vsel %vm16923_vm7, %v9960_v58, 0  ;;  %v8132_v27 = vsel %vm16924_vm6, %v8091_v50, %v14860_v35  ;;  %v16938_v62 = vld [vmem:[#allocation13_spill] sm:$0xff] }
 0x373   : > { %v14988_v0 = vsel %vm16916_vm15, %v8579_v40, %v8596_v26  ;;  %7126 = vrot.lane.b32.xlu1 %v7093_v29, %s10026_s18  ;;  %7231 = vrot.lane.b32.xlu0 %v16919_v60, %s10031_s23  ;;  %vm16926_vm9 = vcmask 392192   ;;  %v9602_v53 = vcombine.low %v6571_v2, %v6571_v2  ;;  %vm16927_vm13 = vcmask 523264   ;;  %v16936_v40 = vld [vmem:[#allocation31_spill] sm:$0xff]  ;;  %vm16947_vm15 = vmmov %vm16924_vm6 }
 0x374   : > { %v14992_v59 = vsel %vm16917_vm2, %v8596_v26, %v8613_v30  ;;  %v14995_v13 = vsel %vm16918_vm1, %v8613_v30, %v8630_v18  ;;  %v8166_v14 = vsel %vm16926_vm9, %v8132_v27, %v7230_v32  ;;  %vm16928_vm0 = vcmask 654336   ;;  %v7931_v34 = vpop.permute.xlu1 %7930  ;;  %v16932_v32 = vld [vmem:[#allocation53_spill] sm:$0xff]  ;;  %v16937_v5 = vld [vmem:[#allocation27_spill] sm:$0xff]  ;;  %vm16949_vm2 = vmmov %vm16926_vm9 }
 0x375   : > { %v8200_v28 = vsel %vm16927_vm13, %v8166_v14, %v7407_v7  ;;  %vm16929_vm5 = vcmask 785408   ;;  %vm16931_vm10 = vcmask 916480   ;;  %v16935_v7 = vld [vmem:[#allocation74_spill] sm:$0xff]  ;;  %v16942_v26 = vld [vmem:[#allocation33_spill] sm:$0xff]  ;;  %v6504_v29 = vld [vmem:[#allocation3 + $0x80] sm:$0x1] }
 0x376   : > { %v8235_v25 = vsel %vm16928_vm0, %v8200_v28, %v7557_v33  ;;  %v16943_v60 = vld [vmem:[#allocation15_spill] sm:$0xff]  ;;  %vm16951_vm1 = vmmov %vm16927_vm13 }
 0x377   : > { %7420 = vrot.lane.b32.xlu1 %v14696_v54, %s10033_s8  ;;  %7558 = vrot.lane.b32.xlu0 %v16925_v15, %s10034_s29  ;;  %v8270_v61 = vsel %vm16929_vm5, %v8235_v25, %v7674_v31  ;;  %v16930_v54 = vld [vmem:[#allocation60_spill] sm:$0xff]  ;;  %vm16944_vm8 = vcmp.ne.s16.totalorder %v16943_v60, 0  ;;  %v16950_v15 = vld [vmem:[#allocation39_spill] sm:$0xff]  ;;  %v6306_v25 = vld [vmem:[#allocation3 + $0x74] sm:$0x8] }
 0x378   : > { %v8305_v35 = vsel %vm16931_vm10, %v8270_v61, %v7931_v34  ;;  %v15052_v30 = vpop.permute.xlu1 %7114  ;;  %v16952_v61 = vld [vmem:[#allocation46_spill] sm:$0xff]  ;;  %vm16953_vm11 = vmmov %vm16928_vm0 }
 0x379   : > { %v8496_v12 = vshrl.u32 %v8305_v35, 16  ;;  %v8499_v21 = vshll.u32 %v8305_v35, 16  ;;  %vm16955_vm7 = vmmov %vm16929_vm5  ;;  %v16956_v34 = vld [vmem:[#allocation54_spill] sm:$0xff]  ;;  %v16958_v35 = vld [vmem:[#allocation11_spill] sm:$0xff] }
 0x37a   : > { %vm16957_vm6 = vmmov %vm16931_vm10  ;;  %vm16959_vm9 = vcmp.ne.s16.totalorder %v16958_v35, 0  ;;  %v16981_v35 = vld [vmem:[#allocation57_spill] sm:$0xff] }
 0x37b   : > { %7687 = vrot.lane.b32.xlu1 %v9602_v53, %s10035_s16  ;;  %7932 = vrot.lane.b32.xlu0 %v16930_v54, %s10036_s17  ;;  %v8498_v22 = vrot.slane %v8496_v12, 3  ;;  %v8501_v23 = vrot.slane %v8499_v21, 4  ;;  %v6339_v12 = vsel %vm16959_vm9, %v6306_v25, 0  ;;  %vm16960_vm13 = vmmov %vm16945_vm3 }
 0x37c   : > { %vm16962_vm0 = vmmov %vm16933_vm12 }
 0x37d   : > { %v15019_v55 = vor.u32 %v8501_v23, %v8498_v22  ;;  %vm16963_vm5 = vmmov %vm16947_vm15 }
 0x37e   : > { %vm16965_vm10 = vmmov %vm16945_vm3 }
 0x37f   : > { %7116 = vrot.lane.b32.xlu0 %v16932_v32, %s10026_s18  ;;  %v15024_v11 = vsel %vm16933_vm12, %v14947_v37, %v15019_v55  ;;  %v16940_v37 = vld [vmem:[#allocation47_spill] sm:$0xff]  ;;  %v6340_v32 = vsel %vm16613_vm4, %v14604_v3, 0  ;;  %vm16966_vm4 = vmmov %vm16949_vm2 }
 0x380   : > { %vm16967_vm12 = vmmov %vm16951_vm1 }
 0x383   : > { %7410 = vrot.lane.b32.xlu0 %v16934_v44, %s10033_s8 }
 0x387   : > { %7677 = vrot.lane.b32.xlu0 %v16935_v7, %s10035_s16 }
 0x38b   : > { %6968 = vrot.lane.b32.xlu0 %v16936_v40, %s10027_s19 }
 0x38f   : > { %7235 = vrot.lane.b32.xlu0 %v16937_v5, %s10031_s23 }
 0x393   : > { %7562 = vrot.lane.b32.xlu0 %v16938_v62, %s10034_s29 }
 0x397   : > { %7936 = vrot.lane.b32.xlu0 %v16939_v16, %s10036_s17 }
 0x39b   : > { %7120 = vrot.lane.b32.xlu0 %v16940_v37, %s10026_s18  ;;  %v16961_v37 = vld [vmem:[#allocation71_spill] sm:$0xff] }
 0x39f   : > { %7414 = vrot.lane.b32.xlu0 %v16941_v8, %s10033_s8 }
 0x3a3   : > { %7681 = vrot.lane.b32.xlu0 %v14811_v39, %s10035_s16  ;;  %v15058_v39 = vpop.permute.xlu1 %7408 }
 0x3a7   : > { %6972 = vrot.lane.b32.xlu0 %v16942_v26, %s10027_s19  ;;  %v15064_v33 = vpop.permute.xlu1 %7675 }
 0x3ab   : > { %7239 = vrot.lane.b32.xlu0 %v14834_v17, %s10031_s23  ;;  %v6440_v17 = vld [vmem:[#allocation3 + $0xfc] sm:$0xf]  ;;  %v15071_v58 = vpop.permute.xlu1 %6966 }
 0x3af   : > { %7566 = vrot.lane.b32.xlu0 %v14821_v42, %s10034_s29  ;;  %v15084_v28 = vpop.permute.xlu1 %7233 }
 0x3b3   : > { %7940 = vrot.lane.b32.xlu0 %v14839_v10, %s10036_s17  ;;  %v6537_v10 = vsel %vm16897_vm14, %v6504_v29, 0  ;;  %vm16946_vm14 = vcmask 1042432   ;;  %v7561_v40 = vpop.permute.xlu1 %7560 }
 0x3b5   : > { %v7095_v18 = vpop.permute.xlu0 %7094 }
 0x3b7   : > { %7124 = vrot.lane.b32.xlu0 %v14846_v45, %s10026_s18  ;;  %v6473_v45 = vsel %vm16944_vm8, %v6440_v17, 0  ;;  %v16964_v17 = vld [vmem:[#allocation25_spill] sm:$0xff]  ;;  %v7935_v19 = vpop.permute.xlu1 %7934  ;;  %vm16968_vm8 = vmmov %vm16953_vm11  ;;  %s15347_s18 = scalar_lea.hbm %s15404_s7, %s9718_s9 }
 0x3b8   : > { %v9568_v50 = vcombine.low %v6473_v45, %v6473_v45 }
 0x3ba   : > { %v7097_v42 = vpop.permute.xlu0 %7096 }
 0x3bb   : > { %7418 = vrot.lane.b32.xlu0 %v14851_v47, %s10033_s8  ;;  %v9585_v47 = vcombine.low %v6537_v10, %v6537_v10 }
 0x3be   : > { %v6945_v36 = vpop.permute.xlu0 %6944 }
 0x3bf   : > { %7685 = vrot.lane.b32.xlu0 %v14866_v49, %s10035_s16  ;;  %v7536_v49 = vrot.slane %v9585_v47, 5 }
 0x3c1   : > { %v7537_v2 = vsel %vm16946_vm14, %v7534_v38, %v7536_v49  ;;  %vm16970_vm14 = vmmov %vm16957_vm6 }
 0x3c2   : > { %v6947_v57 = vpop.permute.xlu0 %6946 }
 0x3c3   : > { %6976 = vrot.lane.b32.xlu0 %v14788_v51, %s10027_s19  ;;  %v8067_v24 = vsel %vm16945_vm3, %v14891_v43, %v6947_v57  ;;  %v16948_v51 = vld [vmem:[#allocation48_spill] sm:$0xff]  ;;  %vm16969_vm3 = vmmov %vm16955_vm7  ;;  %v7119_v57 = vpop.permute.xlu1 %7118 }
 0x3c4   : > { %v8116_v27 = vsel %vm16947_vm15, %v8067_v24, %v7097_v42  ;;  %vm16973_vm15 = vmmov %vm16965_vm10 }
 0x3c5   : > { %v8150_v31 = vsel %vm16949_vm2, %v8116_v27, %v16948_v51  ;;  %v16972_v51 = vld [vmem:[#allocation7_spill] sm:$0xff]  ;;  %vm16975_vm2 = vmmov %vm16965_vm10 }
 0x3c6   : > { %v8184_v14 = vsel %vm16951_vm1, %v8150_v31, %v16950_v15  ;;  %v7212_v53 = vpop.permute.xlu0 %7211  ;;  %v16974_v31 = vld [vmem:[#allocation45_spill] sm:$0xff]  ;;  %vm16976_vm1 = vmmov %vm16963_vm5 }
 0x3c7   : > { %7243 = vrot.lane.b32.xlu0 %v9568_v50, %s10031_s23  ;;  %v8219_v43 = vsel %vm16953_vm11, %v8184_v14, %v16952_v61  ;;  %vm16977_vm11 = vmmov %vm16962_vm0  ;;  %s10037_s23 = smov [#allocation4]  }
 0x3c8   : > { %v8254_v38 = vsel %vm16955_vm7, %v8219_v43, %v16954_v46  ;;  %v7413_v43 = vpop.permute.xlu1 %7412  ;;  %vm16978_vm7 = vmmov %vm16966_vm4  ;;  %s9965_s8 = sshll.u32 %s10037_s23, 4  ;;  %s9966_s8 = int_to_ptr.vmem [resolvable:$false] %s9965_s8 }
 0x3c9   : > { %v8289_v54 = vsel %vm16957_vm6, %v8254_v38, %v16956_v34  ;;  %v16979_v38 = vld [vmem:[#allocation43_spill] sm:$0xff]  ;;  %vm16980_vm6 = vmmov %vm16967_vm12 }
 0x3ca   : > { %v7389_v21 = vpop.permute.xlu0 %7388  ;;  %v8352_v22 = vshrl.u32 %v8289_v54, 16  ;;  %v8355_v23 = vshll.u32 %v8289_v54, 16  ;;  %vm16982_vm9 = vmmov %vm16975_vm2 }
 0x3cb   : > { %7570 = vrot.lane.b32.xlu0 %v7537_v2, %s10034_s29  ;;  %s269_s29 = sand.u32 1, %s10013_s25  }
 0x3cc   : > { %v8354_v44 = vrot.slane %v8352_v22, 3  ;;  %v8357_v7 = vrot.slane %v8355_v23, 4  ;;  %s9295_s16 = sshll.u32 %s269_s29, 8  ;;  %s15356_s28 = scalar_lea.sflag [#allocation5], %s269_s29 }
 0x3cd   : > { %s15280_s22 = scalar_lea.vmem [#allocation4], %s9295_s16  ;;  %s9967_s16 = scalar_lea.vmem %s9966_s8, 8192 }
 0x3ce   : > { %v8358_v62 = vor.u32 %v8357_v7, %v8354_v44  ;;  %v16986_v7 = vld [vmem:[#allocation59_spill] sm:$0xff]  ;;  %s9229_s13 = sshll.u32 %s15280_s22, 4  ;;  %s15351_s13 = int_to_ptr.vmem [resolvable:$true] %s9229_s13 }
 0x3cf   : > { %7944 = vrot.lane.b32.xlu0 %v14943_v56, %s10036_s17  ;;  %v9502_v56 = vcombine.low %v6339_v12, %v6340_v32  ;;  %s9961_s19 = scalar_lea.vmem %s15351_s13, 4096  ;;  %p9968_p0 = scmp.lt.s32.totalorder %s15351_s13, %s9966_s8 }
 0x3d0   : > { %v8384_v8 = vsel %vm16962_vm0, %v8358_v62, %v16961_v37  ;;  %vm16984_vm0 = vmmov %vm16969_vm3  ;;  %p9962_p11 = scmp.ne.s32.totalorder %s15351_s13, %s9961_s19  ;;  %p9969_p1 = scmp.lt.s32.totalorder %s9967_s16, %s9961_s19 }
 0x3d1   : > { %v8064_v16 = vsel %vm16960_vm13, %v9502_v56, %v6945_v36  ;;  %8791 = vmatmul.mubr.bf16.vlgmr.msra.gmra.mxu1 %v8384_v8  ;;  %vm16983_vm13 = vmmov %vm16968_vm8 }
 0x3d2   : > { %v8114_v26 = vsel %vm16963_vm5, %v8064_v16, %v7095_v18  ;;  %9648 = vmatprep.mubr.msk.bf16.mxu1 %vm16965_vm10, %v16964_v17  ;;  %v16971_v18 = vld [vmem:[#allocation29_spill] sm:$0xff]  ;;  %vm16985_vm5 = vmmov %vm16970_vm14  ;;  %p9963_p12 = pnand %p9962_p11, %p10117_p5  ;;  %p9970_p2 = por %p9969_p1, %p9968_p0 }
 0x3d3   : > { %v8148_v3 = vsel %vm16966_vm4, %v8114_v26, %v7212_v53  ;;  %vm16987_vm10 = vmmov %vm16975_vm2  ;;  %v16988_v16 = vld [vmem:[#allocation65_spill] sm:$0xff] }
 0x3d4   : > { %v7539_v5 = vpop.permute.xlu0 %7538  ;;  %v8182_v42 = vsel %vm16967_vm12, %v8148_v3, %v7389_v21  ;;  %v7680_v21 = vpop.permute.xlu1 %7679  ;;  %vm16989_vm4 = vmmov %vm16975_vm2  ;;  %p9964_p13 = pneg %p9963_p12 }
 0x3d5   : > { %v8217_v10 = vsel %vm16968_vm8, %v8182_v42, %v7539_v5  ;;  %vm16990_vm12 = vmmov %vm16976_vm1 }
 0x3d6   : > { %vm16991_vm8 = vmmov %vm16978_vm7  ;;  %p9971_p3 = pnand %p9970_p2, %p9964_p13 }
 0x3d8   : > { %v7656_v29 = vpop.permute.xlu0 %7655  ;;  %v6971_v37 = vpop.permute.xlu1 %6970 }
 0x3d9   : > { %v8252_v45 = vsel %vm16969_vm3, %v8217_v10, %v7656_v29  ;;  %8799 = vmatmul.mubr.bf16.gmra.mxu1 %v16971_v18  ;;  %vm16992_vm3 = vmmov %vm16977_vm11  ;;  %v16995_v10 = vld [vmem:[#allocation66_spill] sm:$0xff] }
 0x3da   : > { %9649 = vmatprep.mubr.msk.bf16.mxu1 %vm16973_vm15, %v16972_v51  ;;  %vm16994_vm15 = vmmov %vm16983_vm13  ;;  %v17001_v51 = vld [vmem:[#allocation32_spill] sm:$0xff] }
 0x3dc   : > { %v7913_v47 = vpop.permute.xlu0 %7912 }
 0x3dd   : > { %v8287_v36 = vsel %vm16970_vm14, %v8252_v45, %v7913_v47  ;;  %vm16993_vm14 = vmmov %vm16980_vm6 }
 0x3de   : > { %v8345_v50 = vshrl.u32 %v8287_v36, 16  ;;  %v8348_v49 = vshll.u32 %v8287_v36, 16 }
 0x3e0   : > { %v8347_v24 = vrot.slane %v8345_v50, 3  ;;  %v8350_v2 = vrot.slane %v8348_v49, 4  ;;  %v6965_v27 = vpop.permute.xlu0 %6964 }
 0x3e1   : > { %v8094_v15 = vsel %vm16975_vm2, %v16974_v31, %v6965_v27  ;;  %8807 = vmatmul.mubr.bf16.gmra.mxu1 %v16979_v38 }
 0x3e2   : > { %v8351_v14 = vor.u32 %v8350_v2, %v8347_v24  ;;  %v8134_v25 = vsel %vm16976_vm1, %v8094_v15, %v15052_v30  ;;  %9650 = vmatprep.mubr.msk.bf16.mxu1 %vm16982_vm9, %v16981_v35  ;;  %vm16996_vm1 = vmmov %vm16984_vm0  ;;  %v16998_v24 = vld [vmem:[#allocation67_spill] sm:$0xff] }
 0x3e3   : > { %vm17002_vm9 = vmmov %vm16975_vm2  ;;  %v17011_v35 = vld [vmem:[#allocation75_spill] sm:$0xff] }
 0x3e4   : > { %v8359_v61 = vsel %vm16977_vm11, %v8351_v14, %v8358_v62  ;;  %vm16997_vm11 = vmmov %vm16985_vm5 }
 0x3e5   : > { %v7232_v53 = vpop.permute.xlu0 %7231  ;;  %8783 = vmatmul.mubr.bf16.vlgmr.msra.gmra.mxu0 %v8359_v61 }
 0x3e6   : > { %v8168_v46 = vsel %vm16978_vm7, %v8134_v25, %v7232_v53  ;;  %vm16999_vm7 = vmmov %vm16975_vm2 }
 0x3e7   : > { %v8202_v54 = vsel %vm16980_vm6, %v8168_v46, %v15058_v39  ;;  %v8097_v39 = vsel %vm16987_vm10, %v16986_v7, %v15071_v58  ;;  %v7238_v58 = vpop.permute.xlu1 %7237  ;;  %vm17000_vm6 = vmmov %vm16990_vm12  ;;  %v17008_v46 = vld [vmem:[#allocation38_spill] sm:$0xff]  ;;  %v17015_v7 = vld [vmem:[#allocation77_spill] sm:$0xff] }
 0x3e8   : > { %vm17006_vm10 = vmmov %vm16994_vm15 }
 0x3e9   : > { %v7559_v34 = vpop.permute.xlu0 %7558  ;;  %8815 = vmatmul.mubr.bf16.gmra.mxu1 %v14898_v48 }
 0x3ea   : > { %v8237_v12 = vsel %vm16983_vm13, %v8202_v54, %v7559_v34  ;;  %9651 = vmatprep.mubr.msk.bf16.mxu1 %vm16989_vm4, %v16988_v16  ;;  %vm17003_vm13 = vmmov %vm16991_vm8 }
 0x3eb   : > { %v8272_v30 = vsel %vm16984_vm0, %v8237_v12, %v15064_v33  ;;  %v7565_v49 = vpop.permute.xlu1 %7564  ;;  %vm17004_vm0 = vmmov %vm16992_vm3 }
 0x3ec   : > { %vm17007_vm4 = vmmov %vm16996_vm1 }
 0x3ed   : > { %v7933_v22 = vpop.permute.xlu0 %7932 }
 0x3ee   : > { %v8307_v23 = vsel %vm16985_vm5, %v8272_v30, %v7933_v22  ;;  %vm17005_vm5 = vmmov %vm16993_vm14 }
 0x3ef   : > { %v8513_v32 = vshrl.u32 %v8307_v23, 16  ;;  %v8516_v44 = vshll.u32 %v8307_v23, 16  ;;  %v7939_v15 = vpop.permute.xlu1 %7938 }
 0x3f1   : > { %v8515_v56 = vrot.slane %v8513_v32, 3  ;;  %v8518_v5 = vrot.slane %v8516_v44, 4  ;;  %v7117_v62 = vpop.permute.xlu0 %7116  ;;  %8823 = vmatmul.mubr.bf16.gmra.mxu1 %v14901_v6 }
 0x3f2   : > { %v8136_v8 = vsel %vm16990_vm12, %v8097_v39, %v7117_v62  ;;  %9652 = vmatprep.mubr.msk.bf16.mxu1 %vm16975_vm2, %v16995_v10  ;;  %vm17009_vm12 = vmmov %vm16975_vm2 }
 0x3f3   : > { %v8519_v33 = vor.u32 %v8518_v5, %v8515_v56  ;;  %v8170_v29 = vsel %vm16991_vm8, %v8136_v8, %v15084_v28  ;;  %vm17010_vm8 = vmmov %vm16997_vm11 }
 0x3f5   : > { %v7411_v26 = vpop.permute.xlu0 %7410  ;;  %v8520_v48 = vsel %vm16992_vm3, %v15019_v55, %v8519_v33  ;;  %vm17012_vm3 = vmmov %vm16975_vm2 }
 0x3f6   : > { %v8204_v17 = vsel %vm16993_vm14, %v8170_v29, %v7411_v26  ;;  %v8103_v12 = vsel %vm17012_vm3, %v17011_v35, %v6971_v37  ;;  %vm17013_vm14 = vmmov %vm17000_vm6 }
 0x3f7   : > { %v8239_v42 = vsel %vm16994_vm15, %v8204_v17, %v7561_v40  ;;  %vm17014_vm15 = vmmov %vm17003_vm13 }
 0x3f9   : > { %v7678_v3 = vpop.permute.xlu0 %7677  ;;  %8831 = vmatmul.mubr.bf16.gmra.mxu1 %v14913_v52 }
 0x3fa   : > { %v8274_v45 = vsel %vm16996_vm1, %v8239_v42, %v7678_v3  ;;  %9653 = vmatprep.mubr.msk.bf16.mxu1 %vm17002_vm9, %v17001_v51  ;;  %vm17016_vm1 = vmmov %vm17004_vm0 }
 0x3fb   : > { %v8309_v47 = vsel %vm16997_vm11, %v8274_v45, %v7935_v19  ;;  %vm17017_vm11 = vmmov %vm17005_vm5 }
 0x3fc   : > { %v8530_v36 = vshrl.u32 %v8309_v47, 16  ;;  %v8533_v28 = vshll.u32 %v8309_v47, 16  ;;  %vm17020_vm9 = vmmov %vm17010_vm8 }
 0x3fd   : > { %v6969_v50 = vpop.permute.xlu0 %6968 }
 0x3fe   : > { %v8532_v55 = vrot.slane %v8530_v36, 3  ;;  %v8535_v18 = vrot.slane %v8533_v28, 4  ;;  %v8100_v2 = vsel %vm16999_vm7, %v16998_v24, %v6969_v50  ;;  %vm17018_vm7 = vmmov %vm17006_vm10 }
 0x3ff   : > { %v8138_v27 = vsel %vm17000_vm6, %v8100_v2, %v7119_v57  ;;  %v7123_v57 = vpop.permute.xlu1 %7122  ;;  %vm17019_vm6 = vmmov %vm17007_vm4 }
 0x400   : > { %v8536_v6 = vor.u32 %v8535_v18, %v8532_v55  ;;  %vm17029_vm3 = vmmov %vm17018_vm7 }
 0x401   : > { %v7236_v40 = vpop.permute.xlu0 %7235  ;;  %8839 = vmatmul.mubr.bf16.gmra.mxu1 %v14967_v63 }
 0x402   : > { %v8172_v19 = vsel %vm17003_vm13, %v8138_v27, %v7236_v40  ;;  %v8537_v31 = vsel %vm17004_vm0, %v8519_v33, %v8536_v6  ;;  %9654 = vmatprep.mubr.msk.bf16.mxu1 %vm17009_vm12, %v17008_v46  ;;  %vm17021_vm13 = vmmov %vm16975_vm2 }
 0x403   : > { %v8206_v53 = vsel %vm17005_vm5, %v8172_v19, %v7413_v43  ;;  %v7417_v32 = vpop.permute.xlu1 %7416  ;;  %vm17023_vm0 = vmmov %vm16975_vm2 }
 0x404   : > { %vm17024_vm5 = vmmov %vm17013_vm14 }
 0x405   : > { %v7563_v14 = vpop.permute.xlu0 %7562  ;;  %vm17027_vm12 = vmmov %vm17017_vm11 }
 0x406   : > { %v8241_v25 = vsel %vm17006_vm10, %v8206_v53, %v7563_v14  ;;  %vm17025_vm10 = vmmov %vm17014_vm15 }
 0x407   : > { %v8276_v61 = vsel %vm17007_vm4, %v8241_v25, %v7680_v21  ;;  %v7684_v16 = vpop.permute.xlu1 %7683  ;;  %vm17026_vm4 = vmmov %vm17016_vm1 }
 0x409   : > { %v7937_v52 = vpop.permute.xlu0 %7936  ;;  %8847 = vmatmul.mubr.bf16.gmra.mxu1 %v15024_v11 }
 0x40a   : > { %v8311_v38 = vsel %vm17010_vm8, %v8276_v61, %v7937_v52  ;;  %9655 = vmatprep.mubr.msk.bf16.mxu1 %vm16975_vm2, %v17015_v7  ;;  %vm17028_vm8 = vmmov %vm17023_vm0 }
 0x40b   : > { %v8547_v34 = vshrl.u32 %v8311_v38, 16  ;;  %v8550_v54 = vshll.u32 %v8311_v38, 16  ;;  %v6975_v42 = vpop.permute.xlu1 %6974  ;;  %vm17032_vm2 = vmmov %vm17023_vm0 }
 0x40c   : > { %v8109_v27 = vsel %vm17032_vm2, %v14910_v20, %v6975_v42 }
 0x40d   : > { %v8549_v22 = vrot.slane %v8547_v34, 3  ;;  %v8552_v43 = vrot.slane %v8550_v54, 4  ;;  %v7121_v30 = vpop.permute.xlu0 %7120 }
 0x40e   : > { %v8140_v23 = vsel %vm17013_vm14, %v8103_v12, %v7121_v30  ;;  %vm17030_vm14 = vmmov %vm17019_vm6 }
 0x40f   : > { %v8553_v63 = vor.u32 %v8552_v43, %v8549_v22  ;;  %v8174_v44 = vsel %vm17014_vm15, %v8140_v23, %v7238_v58  ;;  %v17022_v58 = vld [vmem:[#allocation40_spill] sm:$0xff]  ;;  %vm17031_vm15 = vmmov %vm17020_vm9 }
 0x411   : > { %v7415_v21 = vpop.permute.xlu0 %7414  ;;  %v8554_v39 = vsel %vm17016_vm1, %v8536_v6, %v8553_v63  ;;  %8855 = vmatmul.mubr.bf16.gmra.mxu1 %v8520_v48  ;;  %vm17033_vm1 = vmmov %vm17023_vm0 }
 0x412   : > { %v8208_v56 = vsel %vm17017_vm11, %v8174_v44, %v7415_v21  ;;  %9656 = vmatprep.mubr.msk.bf16.mxu1 %vm17021_vm13, %v14929_v1  ;;  %v7242_v1 = vpop.permute.xlu1 %7241  ;;  %vm17034_vm11 = vmmov %vm17024_vm5 }
 0x413   : > { %v8243_v62 = vsel %vm17018_vm7, %v8208_v56, %v7565_v49  ;;  %vm17035_vm7 = vmmov %vm17025_vm10 }
 0x414   : > { %vm17038_vm13 = vmmov %vm17029_vm3 }
 0x415   : > { %v7682_v5 = vpop.permute.xlu0 %7681 }
 0x416   : > { %v8278_v37 = vsel %vm17019_vm6, %v8243_v62, %v7682_v5  ;;  %v7569_v40 = vpop.permute.xlu1 %7568  ;;  %vm17036_vm6 = vmmov %vm17026_vm4 }
 0x417   : > { %v8313_v8 = vsel %vm17020_vm9, %v8278_v37, %v7939_v15  ;;  %vm17037_vm9 = vmmov %vm17027_vm12 }
 0x418   : > { %v8564_v33 = vshrl.u32 %v8313_v8, 16  ;;  %v8567_v11 = vshll.u32 %v8313_v8, 16  ;;  %vm17047_vm2 = vmmov %vm17037_vm9 }
 0x419   : > { %v6973_v26 = vpop.permute.xlu0 %6972  ;;  %8863 = vmatmul.mubr.bf16.gmra.mxu1 %v8537_v31 }
 0x41a   : > { %v8566_v29 = vrot.slane %v8564_v33, 3  ;;  %v8569_v17 = vrot.slane %v8567_v11, 4  ;;  %v8106_v3 = vsel %vm17023_vm0, %v17022_v58, %v6973_v26  ;;  %9657 = vmatprep.mubr.msk.bf16.mxu1 %vm17028_vm8, %v14950_v9  ;;  %v7943_v52 = vpop.permute.xlu1 %7942  ;;  %vm17043_vm8 = vmmov %vm17034_vm11 }
 0x41b   : > { %v8142_v47 = vsel %vm17024_vm5, %v8106_v3, %v7123_v57  ;;  %vm17039_vm5 = vcmp.ne.s16.totalorder %v16943_v60, 0  ;;  %v9920_v57 = vld [vmem:[%s15402_s5] sm:$0xff]  }
 0x41c   : > { %v8570_v10 = vor.u32 %v8569_v17, %v8566_v29  ;;  %9799 = vmatprep.subr.bf16.mxu0 %v9920_v57 }
 0x41d   : > { %v7240_v45 = vpop.permute.xlu0 %7239  ;;  %9800 = vmatpush3.bf16.msra.mxu0 %v9920_v57 }
 0x41e   : > { %v8176_v36 = vsel %vm17025_vm10, %v8142_v47, %v7240_v45  ;;  %v8571_v28 = vsel %vm17026_vm4, %v8553_v63, %v8570_v10  ;;  %vm17040_vm10 = vmmov %vm17030_vm14  ;;  %v7127_v54 = vpop.permute.xlu1 %7126 }
 0x41f   : > { %v8210_v50 = vsel %vm17027_vm12, %v8176_v36, %v7417_v32  ;;  %vm17041_vm4 = vmmov %vm17031_vm15 }
 0x420   : > { %vm17042_vm12 = vmmov %vm17023_vm0 }
 0x421   : > { %v7567_v48 = vpop.permute.xlu0 %7566  ;;  %8871 = vmatmul.mubr.bf16.gmra.mxu1 %v8554_v39 }
 0x422   : > { %v8245_v49 = vsel %vm17029_vm3, %v8210_v50, %v7567_v48  ;;  %9658 = vmatprep.mubr.msk.bf16.mxu1 %vm17033_vm1, %v14982_v4  ;;  %v6371_v4 = vsel %vm17039_vm5, %v14663_v41, 0  ;;  %vm17044_vm3 = vmmov %vm17023_vm0  ;;  %v7421_v32 = vpop.permute.xlu1 %7420 }
 0x423   : > { %v8280_v18 = vsel %vm17030_vm14, %v8245_v49, %v7684_v16  ;;  %v9518_v22 = vcombine.low %v6371_v4, %v6371_v4  ;;  %vm17045_vm14 = vmmov %vm17035_vm7 }
 0x424   : > { %vm17048_vm1 = vmmov %vm17038_vm13 }
 0x425   : > { %v7941_v55 = vpop.permute.xlu0 %7940  ;;  %vm17054_vm5 = vmmov %vm17023_vm0 }
 0x426   : > { %v8315_v24 = vsel %vm17031_vm15, %v8280_v18, %v7941_v55  ;;  %vm17046_vm15 = vmmov %vm17036_vm6  ;;  %v7688_v5 = vpop.permute.xlu1 %7687 }
 0x427   : > { %v8581_v2 = vshrl.u32 %v8315_v24, 16  ;;  %v8584_v6 = vshll.u32 %v8315_v24, 16 }
 0x429   : > { %v8583_v51 = vrot.slane %v8581_v2, 3  ;;  %v8586_v19 = vrot.slane %v8584_v6, 4  ;;  %v7125_v31 = vpop.permute.xlu0 %7124  ;;  %8879 = vmatmul.mubr.bf16.gmra.mxu1 %v8571_v28 }
 0x42a   : > { %v8144_v9 = vsel %vm17034_vm11, %v8109_v27, %v7125_v31  ;;  %9659 = vmatprep.mubr.msk.bf16.mxu1 %vm17023_vm0, %v14988_v0  ;;  %vm17049_vm11 = vmmov %vm17040_vm10 }
 0x42b   : > { %v8587_v15 = vor.u32 %v8586_v19, %v8583_v51  ;;  %v8178_v53 = vsel %vm17035_vm7, %v8144_v9, %v7242_v1  ;;  %vm17050_vm7 = vmmov %vm17023_vm0 }
 0x42d   : > { %v7419_v14 = vpop.permute.xlu0 %7418  ;;  %v8588_v25 = vsel %vm17036_vm6, %v8570_v10, %v8587_v15  ;;  %vm17051_vm6 = vmmov %vm17041_vm4 }
 0x42e   : > { %v8212_v61 = vsel %vm17037_vm9, %v8178_v53, %v7419_v14  ;;  %vm17052_vm9 = vmmov %vm17046_vm15 }
 0x42f   : > { %v8247_v20 = vsel %vm17038_vm13, %v8212_v61, %v7569_v40  ;;  %vm17053_vm13 = vmmov %vm17023_vm0 }
 0x431   : > { %v7686_v46 = vpop.permute.xlu0 %7685  ;;  %8887 = vmatmul.mubr.bf16.gmra.mxu1 %v8588_v25 }
 0x432   : > { %v8282_v38 = vsel %vm17040_vm10, %v8247_v20, %v7686_v46  ;;  %9660 = vmatprep.mubr.msk.bf16.mxu1 %vm17044_vm3, %v14992_v59  ;;  %vm17055_vm10 = vmmov %vm17023_vm0 }
 0x433   : > { %v8317_v34 = vsel %vm17041_vm4, %v8282_v38, %v7943_v52  ;;  %vm17056_vm4 = vmmov %vm17023_vm0 }
 0x434   : > { %v8598_v35 = vshrl.u32 %v8317_v34, 16  ;;  %v8601_v12 = vshll.u32 %v8317_v34, 16  ;;  %vm17059_vm3 = vmmov %vm17023_vm0 }
 0x435   : > { %v6977_v43 = vpop.permute.xlu0 %6976 }
 0x436   : > { %v8600_v0 = vrot.slane %v8598_v35, 3  ;;  %v8603_v30 = vrot.slane %v8601_v12, 4  ;;  %v8112_v60 = vsel %vm17042_vm12, %v9518_v22, %v6977_v43  ;;  %vm17057_vm12 = vmmov %vm17023_vm0 }
 0x437   : > { %v8146_v63 = vsel %vm17043_vm8, %v8112_v60, %v7127_v54  ;;  %vm17058_vm8 = vmmov %vm17023_vm0 }
 0x438   : > { %v8604_v41 = vor.u32 %v8603_v30, %v8600_v0 }
 0x439   : > { %v7244_v23 = vpop.permute.xlu0 %7243 }
 0x43a   : > { %v8180_v21 = vsel %vm17045_vm14, %v8146_v63, %v7244_v23  ;;  %v8605_v44 = vsel %vm17046_vm15, %v8587_v15, %v8604_v41  ;;  %vm17060_vm14 = vmmov %vm17023_vm0 }
 0x43b   : > { %v8214_v39 = vsel %vm17047_vm2, %v8180_v21, %v7421_v32  ;;  %8895 = vmatmul.mubr.bf16.gmra.mxu1 %v8605_v44  ;;  %vm17061_vm15 = vmmov %vm17023_vm0 }
 0x43c   : > { %9661 = vmatprep.mubr.msk.bf16.mxu1 %vm17050_vm7, %v14995_v13  ;;  %v15221_v13 = vld [vmem:[%s15401_s4] ss:$0 sm:$0xff]  ;;  %vm17062_vm2 = vmmov %vm17023_vm0 }
 0x43d   : > { %v7571_v7 = vpop.permute.xlu0 %7570  ;;  %vm17065_vm7 = vmmov %vm17023_vm0 }
 0x43e   : > { %v8249_v56 = vsel %vm17048_vm1, %v8214_v39, %v7571_v7  ;;  %vm17063_vm1 = vmmov %vm17023_vm0 }
 0x43f   : > { %v8284_v16 = vsel %vm17049_vm11, %v8249_v56, %v7688_v5  ;;  %vm17064_vm11 = vmmov %vm17023_vm0 }
 0x441   : > { %v7945_v62 = vpop.permute.xlu0 %7944 }
 0x442   : > { %v8319_v59 = vsel %vm17051_vm6, %v8284_v16, %v7945_v62  ;;  %vm17066_vm6 = vmmov %vm17023_vm0 }
 0x443   : > { %v8615_v37 = vshrl.u32 %v8319_v59, 16  ;;  %v8618_v8 = vshll.u32 %v8319_v59, 16 }
 0x445   : > { %v8617_v33 = vrot.slane %v8615_v37, 3  ;;  %v8620_v11 = vrot.slane %v8618_v8, 4 }
 0x447   : > { %v8621_v26 = vor.u32 %v8620_v11, %v8617_v33 }
 0x449   : > { %v8622_v29 = vsel %vm17052_vm9, %v8604_v41, %v8621_v26  ;;  %vm17067_vm9 = vmmov %vm17023_vm0 }
 0x44a   : > { %8903 = vmatmul.mubr.bf16.gmra.mxu1 %v8622_v29 }
 0x491   : > { %v8792_v17 = vpop.f32.mrf.mxu1 }
 0x492   : > { %v8793_v18 = vadd.f32 %v15221_v13, %v8792_v17 }
 0x493   : > { %v8794_v58 = vpop.f32.mrf.mxu1 }
 0x494   : > { %v8913_v14 = vmax.f32 %v8793_v18, 0.0 }
 0x495   : > { %v8795_v3 = vpop.f32.mrf.mxu1 }
 0x496   : > { %v8796_v48 = vadd.f32 %v15221_v13, %v8795_v3 }
 0x497   : > { %v8797_v42 = vpop.f32.mrf.mxu1 }
 0x498   : > { %v8914_v27 = vmax.f32 %v8796_v48, 0.0 }
 0x499   : > { %v8800_v10 = vpop.f32.mrf.mxu1 }
 0x49a   : > { %v8801_v6 = vadd.f32 %v15221_v13, %v8800_v10  ;;  %v8944_v61 = vpack.c.bf16 %v8914_v27, %v8913_v14 }
 0x49b   : > { %v8802_v45 = vpop.f32.mrf.mxu1 }
 0x49c   : > { %v8915_v25 = vmax.f32 %v8801_v6, 0.0 }
 0x49d   : > { %v8803_v47 = vpop.f32.mrf.mxu1 }
 0x49e   : > { %v8804_v49 = vadd.f32 %v15221_v13, %v8803_v47 }
 0x49f   : > { %v8805_v28 = vpop.f32.mrf.mxu1 }
 0x4a0   : > { %v8916_v31 = vmax.f32 %v8804_v49, 0.0 }
 0x4a1   : > { %v8808_v1 = vpop.f32.mrf.mxu1 }
 0x4a2   : > { %v8945_v4 = vpack.c.bf16 %v8916_v31, %v8915_v25  ;;  %v8809_v57 = vadd.f32 %v15221_v13, %v8808_v1 }
 0x4a3   : > { %v8810_v2 = vpop.f32.mrf.mxu1 }
 0x4a4   : > { %v8917_v22 = vmax.f32 %v8809_v57, 0.0 }
 0x4a5   : > { %v8784_v36 = vpop.f32.mrf.mxu0  ;;  %v8811_v19 = vpop.f32.mrf.mxu1 }
 0x4a6   : > { %v8785_v55 = vadd.f32 %v15221_v13, %v8784_v36  ;;  %v8812_v46 = vadd.f32 %v15221_v13, %v8811_v19 }
 0x4a7   : > { %v8786_v50 = vpop.f32.mrf.mxu0  ;;  %v8813_v53 = vpop.f32.mrf.mxu1 }
 0x4a8   : > { %v8911_v9 = vmax.f32 %v8785_v55, 0.0  ;;  %v8918_v54 = vmax.f32 %v8812_v46, 0.0 }
 0x4a9   : > { %v8787_v24 = vpop.f32.mrf.mxu0  ;;  %v8816_v20 = vpop.f32.mrf.mxu1 }
 0x4aa   : > { %v8788_v40 = vadd.f32 %v15221_v13, %v8787_v24  ;;  %v8817_v34 = vadd.f32 %v15221_v13, %v8816_v20  ;;  %v8946_v60 = vpack.c.bf16 %v8918_v54, %v8917_v22 }
 0x4ab   : > { %v8789_v51 = vpop.f32.mrf.mxu0  ;;  %v8818_v38 = vpop.f32.mrf.mxu1 }
 0x4ac   : > { %v8912_v15 = vmax.f32 %v8788_v40, 0.0  ;;  %v8919_v0 = vmax.f32 %v8817_v34, 0.0 }
 0x4ad   : > { %v8819_v35 = vpop.f32.mrf.mxu1 }
 0x4ae   : > { %v8943_v52 = vpack.c.bf16 %v8912_v15, %v8911_v9  ;;  %v8820_v12 = vadd.f32 %v15221_v13, %v8819_v35 }
 0x4af   : > { %v8821_v43 = vpop.f32.mrf.mxu1 }
 0x4b0   : > { %9801 = vmatprep.mubr.msk.bf16.mxu0 %vm17053_vm13, %v8943_v52  ;;  %v8920_v30 = vmax.f32 %v8820_v12, 0.0 }
 0x4b1   : > { %9802 = vmatmul.mubr.msk.bf16.vlgmr.msra.gmra.mxu0 %vm17023_vm0, %v8944_v61  ;;  %v8824_v41 = vpop.f32.mrf.mxu1 }
 0x4b2   : > { %9805 = vmatprep.mubr.msk.bf16.mxu0 %vm17054_vm5, %v8945_v4  ;;  %v8947_v23 = vpack.c.bf16 %v8920_v30, %v8919_v0  ;;  %v8825_v32 = vadd.f32 %v15221_v13, %v8824_v41 }
 0x4b3   : > { %v8826_v63 = vpop.f32.mrf.mxu1 }
 0x4b4   : > { %v8921_v39 = vmax.f32 %v8825_v32, 0.0 }
 0x4b5   : > { %v8827_v21 = vpop.f32.mrf.mxu1 }
 0x4b6   : > { %v8828_v44 = vadd.f32 %v15221_v13, %v8827_v21 }
 0x4b7   : > { %v8829_v7 = vpop.f32.mrf.mxu1 }
 0x4b8   : > { %v8922_v56 = vmax.f32 %v8828_v44, 0.0 }
 0x4b9   : > { %9806 = vmatmul.mubr.msk.bf16.gmra.mxu0 %vm17055_vm10, %v8946_v60  ;;  %v8832_v5 = vpop.f32.mrf.mxu1 }
 0x4ba   : > { %9809 = vmatprep.mubr.msk.bf16.mxu0 %vm17056_vm4, %v8947_v23  ;;  %v8948_v62 = vpack.c.bf16 %v8922_v56, %v8921_v39  ;;  %v8833_v59 = vadd.f32 %v15221_v13, %v8832_v5 }
 0x4bb   : > { %v8834_v16 = vpop.f32.mrf.mxu1 }
 0x4bc   : > { %v8923_v11 = vmax.f32 %v8833_v59, 0.0 }
 0x4bd   : > { %v8835_v37 = vpop.f32.mrf.mxu1 }
 0x4be   : > { %v8836_v8 = vadd.f32 %v15221_v13, %v8835_v37 }
 0x4bf   : > { %v8837_v33 = vpop.f32.mrf.mxu1 }
 0x4c0   : > { %v8924_v26 = vmax.f32 %v8836_v8, 0.0 }
 0x4c1   : > { %9810 = vmatmul.mubr.msk.bf16.gmra.mxu0 %vm17057_vm12, %v8948_v62  ;;  %v8840_v29 = vpop.f32.mrf.mxu1 }
 0x4c2   : > { %v8949_v17 = vpack.c.bf16 %v8924_v26, %v8923_v11  ;;  %v8841_v3 = vadd.f32 %v15221_v13, %v8840_v29 }
 0x4c3   : > { %v8842_v58 = vpop.f32.mrf.mxu1 }
 0x4c4   : > { %9813 = vmatprep.mubr.msk.bf16.mxu0 %vm17058_vm8, %v8949_v17  ;;  %v8925_v47 = vmax.f32 %v8841_v3, 0.0 }
 0x4c5   : > { %v8843_v42 = vpop.f32.mrf.mxu1 }
 0x4c6   : > { %v8844_v10 = vadd.f32 %v15221_v13, %v8843_v42 }
 0x4c7   : > { %v8845_v45 = vpop.f32.mrf.mxu1 }
 0x4c8   : > { %v8926_v36 = vmax.f32 %v8844_v10, 0.0 }
 0x4c9   : > { %v8848_v28 = vpop.f32.mrf.mxu1 }
 0x4ca   : > { %v8950_v48 = vpack.c.bf16 %v8926_v36, %v8925_v47  ;;  %v8849_v1 = vadd.f32 %v15221_v13, %v8848_v28 }
 0x4cb   : > { %v8850_v50 = vpop.f32.mrf.mxu1 }
 0x4cc   : > { %9814 = vmatmul.mubr.msk.bf16.gmra.mxu0 %vm17059_vm3, %v8950_v48  ;;  %v8927_v24 = vmax.f32 %v8849_v1, 0.0 }
 0x4cd   : > { %v8851_v49 = vpop.f32.mrf.mxu1 }
 0x4ce   : > { %v8852_v55 = vadd.f32 %v15221_v13, %v8851_v49 }
 0x4cf   : > { %v8853_v18 = vpop.f32.mrf.mxu1 }
 0x4d0   : > { %v8928_v2 = vmax.f32 %v8852_v55, 0.0 }
 0x4d1   : > { %v8856_v6 = vpop.f32.mrf.mxu1 }
 0x4d2   : > { %v8951_v40 = vpack.c.bf16 %v8928_v2, %v8927_v24  ;;  %v8857_v51 = vadd.f32 %v15221_v13, %v8856_v6 }
 0x4d3   : > { %v8858_v27 = vpop.f32.mrf.mxu1 }
 0x4d4   : > { %9817 = vmatprep.mubr.msk.bf16.mxu0 %vm17060_vm14, %v8951_v40  ;;  %v8929_v15 = vmax.f32 %v8857_v51, 0.0  ;;  %v15277_v40 = vld [vmem:[%s15403_s6] ss:$0 sm:$0xff] }
 0x4d5   : > { %v8859_v19 = vpop.f32.mrf.mxu1 }
 0x4d6   : > { %v8860_v31 = vadd.f32 %v15221_v13, %v8859_v19 }
 0x4d7   : > { %v8861_v9 = vpop.f32.mrf.mxu1 }
 0x4d8   : > { %v8930_v14 = vmax.f32 %v8860_v31, 0.0 }
 0x4d9   : > { %v8864_v53 = vpop.f32.mrf.mxu1 }
 0x4da   : > { %v8952_v25 = vpack.c.bf16 %v8930_v14, %v8929_v15  ;;  %v8865_v61 = vadd.f32 %v15221_v13, %v8864_v53 }
 0x4db   : > { %v8866_v52 = vpop.f32.mrf.mxu1 }
 0x4dc   : > { %9818 = vmatmul.mubr.msk.bf16.gmra.mxu0 %vm17061_vm15, %v8952_v25  ;;  %v8931_v57 = vmax.f32 %v8865_v61, 0.0 }
 0x4dd   : > { %v8867_v46 = vpop.f32.mrf.mxu1 }
 0x4de   : > { %v8868_v20 = vadd.f32 %v15221_v13, %v8867_v46 }
 0x4df   : > { %v8869_v4 = vpop.f32.mrf.mxu1 }
 0x4e0   : > { %v8932_v38 = vmax.f32 %v8868_v20, 0.0 }
 0x4e1   : > { %v8872_v34 = vpop.f32.mrf.mxu1 }
 0x4e2   : > { %v8953_v54 = vpack.c.bf16 %v8932_v38, %v8931_v57  ;;  %v8873_v12 = vadd.f32 %v15221_v13, %v8872_v34 }
 0x4e3   : > { %v8874_v35 = vpop.f32.mrf.mxu1 }
 0x4e4   : > { %9821 = vmatprep.mubr.msk.bf16.mxu0 %vm17062_vm2, %v8953_v54  ;;  %v8933_v30 = vmax.f32 %v8873_v12, 0.0 }
 0x4e5   : > { %v8875_v22 = vpop.f32.mrf.mxu1 }
 0x4e6   : > { %v8876_v43 = vadd.f32 %v15221_v13, %v8875_v22 }
 0x4e7   : > { %v8877_v0 = vpop.f32.mrf.mxu1 }
 0x4e8   : > { %v8934_v60 = vmax.f32 %v8876_v43, 0.0 }
 0x4e9   : > { %v8880_v41 = vpop.f32.mrf.mxu1 }
 0x4ea   : > { %v8954_v23 = vpack.c.bf16 %v8934_v60, %v8933_v30  ;;  %v8881_v32 = vadd.f32 %v15221_v13, %v8880_v41 }
 0x4eb   : > { %v8882_v63 = vpop.f32.mrf.mxu1 }
 0x4ec   : > { %9822 = vmatmul.mubr.msk.bf16.gmra.mxu0 %vm17063_vm1, %v8954_v23  ;;  %v8935_v39 = vmax.f32 %v8881_v32, 0.0 }
 0x4ed   : > { %v8883_v21 = vpop.f32.mrf.mxu1 }
 0x4ee   : > { %v8884_v44 = vadd.f32 %v15221_v13, %v8883_v21 }
 0x4ef   : > { %v8885_v7 = vpop.f32.mrf.mxu1 }
 0x4f0   : > { %v8936_v56 = vmax.f32 %v8884_v44, 0.0 }
 0x4f1   : > { %v8888_v5 = vpop.f32.mrf.mxu1 }
 0x4f2   : > { %v8955_v62 = vpack.c.bf16 %v8936_v56, %v8935_v39  ;;  %v8889_v59 = vadd.f32 %v15221_v13, %v8888_v5 }
 0x4f3   : > { %v8890_v16 = vpop.f32.mrf.mxu1 }
 0x4f4   : > { %9825 = vmatprep.mubr.msk.bf16.mxu0 %vm17064_vm11, %v8955_v62  ;;  %v8937_v11 = vmax.f32 %v8889_v59, 0.0 }
 0x4f5   : > { %v8891_v37 = vpop.f32.mrf.mxu1 }
 0x4f6   : > { %v8892_v8 = vadd.f32 %v15221_v13, %v8891_v37 }
 0x4f7   : > { %v8893_v33 = vpop.f32.mrf.mxu1 }
 0x4f8   : > { %v8938_v26 = vmax.f32 %v8892_v8, 0.0 }
 0x4fa   : > { %v8956_v17 = vpack.c.bf16 %v8938_v26, %v8937_v11 }
 0x4fb   : > { %v8896_v29 = vpop.f32.mrf.mxu1 }
 0x4fc   : > { %v8897_v3 = vadd.f32 %v15221_v13, %v8896_v29  ;;  %9826 = vmatmul.mubr.msk.bf16.gmra.mxu0 %vm17065_vm7, %v8956_v17 }
 0x4fd   : > { %v8898_v58 = vpop.f32.mrf.mxu1 }
 0x4fe   : > { %v8939_v47 = vmax.f32 %v8897_v3, 0.0 }
 0x4ff   : > { %v8899_v42 = vpop.f32.mrf.mxu1 }
 0x500   : > { %v8900_v10 = vadd.f32 %v15221_v13, %v8899_v42 }
 0x501   : > { %v8901_v45 = vpop.f32.mrf.mxu1 }
 0x502   : > { %v8940_v36 = vmax.f32 %v8900_v10, 0.0 }
 0x504   : > { %v8957_v28 = vpack.c.bf16 %v8940_v36, %v8939_v47 }
 0x506   : > { %9829 = vmatprep.mubr.msk.bf16.mxu0 %vm17066_vm6, %v8957_v28 }
 0x50a   : > { %v8904_v48 = vpop.f32.mrf.mxu1 }
 0x50b   : > { %v8905_v1 = vadd.f32 %v15221_v13, %v8904_v48 }
 0x50c   : > { %v8906_v50 = vpop.f32.mrf.mxu1 }
 0x50d   : > { %v8941_v24 = vmax.f32 %v8905_v1, 0.0 }
 0x50e   : > { %v8907_v49 = vpop.f32.mrf.mxu1 }
 0x50f   : > { %v8908_v55 = vadd.f32 %v15221_v13, %v8907_v49 }
 0x510   : > { %v8909_v18 = vpop.f32.mrf.mxu1 }
 0x511   : > { %v8942_v2 = vmax.f32 %v8908_v55, 0.0 }
 0x513   : > { %v8958_v6 = vpack.c.bf16 %v8942_v2, %v8941_v24 }
 0x515   : > { %9830 = vmatmul.mubr.msk.bf16.gmra.mxu0 %vm17067_vm9, %v8958_v6 }
 0x571   : > { %v9803_v27 = vpop.f32.mrf.mxu0 }
 0x572   : > { %v9065_v51 = vadd.f32 %v9803_v27, %v15277_v40 }
 0x573   : > { %v9056_v19 = vpop.f32.mrf.mxu0 }
 0x574   : > { %9185 = vst [vmem:[%s15280_s22 + $0x10] sm:$0xff] %v9065_v51  ;;  %v9057_v13 = vadd.f32 %v15277_v40, %v9056_v19 }
 0x575   : > { %v9804_v31 = vpop.f32.mrf.mxu0 }
 0x576   : > { %9183 = vst [vmem:[%s15280_s22] sm:$0xff] %v9057_v13  ;;  %v9068_v9 = vadd.f32 %v9804_v31, %v15277_v40 }
 0x577   : > { %v9059_v15 = vpop.f32.mrf.mxu0 }
 0x578   : > { %9186 = vst [vmem:[%s15280_s22 + $0x18] sm:$0xff] %v9068_v9  ;;  %v9060_v14 = vadd.f32 %v15277_v40, %v9059_v15 }
 0x579   : > { %v9807_v53 = vpop.f32.mrf.mxu0 }
 0x57a   : > { %9184 = vst [vmem:[%s15280_s22 + $0x8] sm:$0xff] %v9060_v14  ;;  %v9081_v25 = vadd.f32 %v9807_v53, %v15277_v40 }
 0x57b   : > { %v9072_v52 = vpop.f32.mrf.mxu0 }
 0x57c   : > { %9189 = vst [vmem:[%s15280_s22 + $0x30] sm:$0xff] %v9081_v25  ;;  %v9073_v61 = vadd.f32 %v15277_v40, %v9072_v52 }
 0x57d   : > { %v9808_v46 = vpop.f32.mrf.mxu0 }
 0x57e   : > { %9187 = vst [vmem:[%s15280_s22 + $0x20] sm:$0xff] %v9073_v61  ;;  %v9084_v20 = vadd.f32 %v9808_v46, %v15277_v40 }
 0x57f   : > { %v9075_v4 = vpop.f32.mrf.mxu0 }
 0x580   : > { %9190 = vst [vmem:[%s15280_s22 + $0x38] sm:$0xff] %v9084_v20  ;;  %v9076_v57 = vadd.f32 %v15277_v40, %v9075_v4 }
 0x581   : > { %v9811_v38 = vpop.f32.mrf.mxu0 }
 0x582   : > { %9188 = vst [vmem:[%s15280_s22 + $0x28] sm:$0xff] %v9076_v57  ;;  %v9097_v34 = vadd.f32 %v9811_v38, %v15277_v40 }
 0x583   : > { %v9088_v54 = vpop.f32.mrf.mxu0 }
 0x584   : > { %9193 = vst [vmem:[%s15280_s22 + $0x50] sm:$0xff] %v9097_v34  ;;  %v9089_v35 = vadd.f32 %v15277_v40, %v9088_v54 }
 0x585   : > { %v9812_v12 = vpop.f32.mrf.mxu0 }
 0x586   : > { %9191 = vst [vmem:[%s15280_s22 + $0x40] sm:$0xff] %v9089_v35  ;;  %v9100_v22 = vadd.f32 %v9812_v12, %v15277_v40 }
 0x587   : > { %v9091_v43 = vpop.f32.mrf.mxu0 }
 0x588   : > { %9194 = vst [vmem:[%s15280_s22 + $0x58] sm:$0xff] %v9100_v22  ;;  %v9092_v0 = vadd.f32 %v15277_v40, %v9091_v43 }
 0x58a   : > { %9192 = vst [vmem:[%s15280_s22 + $0x48] sm:$0xff] %v9092_v0 }
 0x58c   : > { %v9815_v30 = vpop.f32.mrf.mxu0 }
 0x58d   : > { %v9113_v60 = vadd.f32 %v9815_v30, %v15277_v40 }
 0x58e   : > { %v9104_v41 = vpop.f32.mrf.mxu0 }
 0x58f   : > { %9197 = vst [vmem:[%s15280_s22 + $0x70] sm:$0xff] %v9113_v60  ;;  %v9105_v23 = vadd.f32 %v15277_v40, %v9104_v41 }
 0x590   : > { %v9816_v63 = vpop.f32.mrf.mxu0 }
 0x591   : > { %9195 = vst [vmem:[%s15280_s22 + $0x60] sm:$0xff] %v9105_v23  ;;  %v9116_v32 = vadd.f32 %v9816_v63, %v15277_v40 }
 0x592   : > { %v9107_v21 = vpop.f32.mrf.mxu0 }
 0x593   : > { %9198 = vst [vmem:[%s15280_s22 + $0x78] sm:$0xff] %v9116_v32  ;;  %v9108_v44 = vadd.f32 %v15277_v40, %v9107_v21 }
 0x595   : > { %9196 = vst [vmem:[%s15280_s22 + $0x68] sm:$0xff] %v9108_v44 }
 0x59c   : > { %v9819_v7 = vpop.f32.mrf.mxu0 }
 0x59d   : > { %v9129_v39 = vadd.f32 %v9819_v7, %v15277_v40 }
 0x59e   : > { %v9120_v56 = vpop.f32.mrf.mxu0 }
 0x59f   : > { %9201 = vst [vmem:[%s15280_s22 + $0x90] sm:$0xff] %v9129_v39  ;;  %v9121_v5 = vadd.f32 %v15277_v40, %v9120_v56 }
 0x5a0   : > { %v9820_v62 = vpop.f32.mrf.mxu0 }
 0x5a1   : > { %9199 = vst [vmem:[%s15280_s22 + $0x80] sm:$0xff] %v9121_v5  ;;  %v9132_v16 = vadd.f32 %v9820_v62, %v15277_v40 }
 0x5a2   : > { %v9123_v59 = vpop.f32.mrf.mxu0 }
 0x5a3   : > { %9202 = vst [vmem:[%s15280_s22 + $0x98] sm:$0xff] %v9132_v16  ;;  %v9124_v37 = vadd.f32 %v15277_v40, %v9123_v59 }
 0x5a5   : > { %9200 = vst [vmem:[%s15280_s22 + $0x88] sm:$0xff] %v9124_v37 }
 0x5ac   : > { %v9823_v8 = vpop.f32.mrf.mxu0 }
 0x5ad   : > { %v9145_v33 = vadd.f32 %v9823_v8, %v15277_v40 }
 0x5ae   : > { %v9136_v11 = vpop.f32.mrf.mxu0 }
 0x5af   : > { %9205 = vst [vmem:[%s15280_s22 + $0xb0] sm:$0xff] %v9145_v33  ;;  %v9137_v26 = vadd.f32 %v15277_v40, %v9136_v11 }
 0x5b0   : > { %v9824_v29 = vpop.f32.mrf.mxu0 }
 0x5b1   : > { %9203 = vst [vmem:[%s15280_s22 + $0xa0] sm:$0xff] %v9137_v26  ;;  %v9148_v17 = vadd.f32 %v9824_v29, %v15277_v40 }
 0x5b2   : > { %v9139_v58 = vpop.f32.mrf.mxu0 }
 0x5b3   : > { %9206 = vst [vmem:[%s15280_s22 + $0xb8] sm:$0xff] %v9148_v17  ;;  %v9140_v3 = vadd.f32 %v15277_v40, %v9139_v58 }
 0x5b5   : > { %9204 = vst [vmem:[%s15280_s22 + $0xa8] sm:$0xff] %v9140_v3 }
 0x5bc   : > { %v9827_v42 = vpop.f32.mrf.mxu0 }
 0x5bd   : > { %v9161_v10 = vadd.f32 %v9827_v42, %v15277_v40 }
 0x5be   : > { %v9152_v45 = vpop.f32.mrf.mxu0 }
 0x5bf   : > { %9209 = vst [vmem:[%s15280_s22 + $0xd0] sm:$0xff] %v9161_v10  ;;  %v9153_v47 = vadd.f32 %v15277_v40, %v9152_v45 }
 0x5c0   : > { %v9828_v36 = vpop.f32.mrf.mxu0 }
 0x5c1   : > { %9207 = vst [vmem:[%s15280_s22 + $0xc0] sm:$0xff] %v9153_v47  ;;  %v9164_v28 = vadd.f32 %v9828_v36, %v15277_v40 }
 0x5c2   : > { %v9155_v48 = vpop.f32.mrf.mxu0 }
 0x5c3   : > { %9210 = vst [vmem:[%s15280_s22 + $0xd8] sm:$0xff] %v9164_v28  ;;  %v9156_v50 = vadd.f32 %v15277_v40, %v9155_v48 }
 0x5c5   : > { %9208 = vst [vmem:[%s15280_s22 + $0xc8] sm:$0xff] %v9156_v50 }
 0x5d5   : > { %v9831_v1 = vpop.f32.mrf.mxu0 }
 0x5d6   : > { %v9177_v49 = vadd.f32 %v9831_v1, %v15277_v40 }
 0x5d7   : > { %v9168_v55 = vpop.f32.mrf.mxu0 }
 0x5d8   : > { %9213 = vst [vmem:[%s15280_s22 + $0xf0] sm:$0xff] %v9177_v49  ;;  %v9169_v18 = vadd.f32 %v15277_v40, %v9168_v55 }
 0x5d9   : > { %v9832_v24 = vpop.f32.mrf.mxu0 }
 0x5da   : > { %9211 = vst [vmem:[%s15280_s22 + $0xe0] sm:$0xff] %v9169_v18  ;;  %v9180_v2 = vadd.f32 %v9832_v24, %v15277_v40 }
 0x5db   : > { %v9171_v6 = vpop.f32.mrf.mxu0 }
 0x5dc   : > { %9214 = vst [vmem:[%s15280_s22 + $0xf8] sm:$0xff] %v9180_v2  ;;  %v9172_v27 = vadd.f32 %v15277_v40, %v9171_v6 }
 0x5de   : > { %9212 = vst [vmem:[%s15280_s22 + $0xe8] sm:$0xff] %v9172_v27 }
 0x5df   : > { %9974 = shalt.err (!%p9971_p3)
}
 0x5e0   : > { %s9975_s29 = scalar_lea.hbm %s15347_s18, 4096  ;;  %s9979_s22 = scalar_lea.hbm %s15404_s7, 8192 }
 0x5e1   : > { %p9976_p4 = scmp.ne.s32.totalorder %s15347_s18, %s9975_s29  ;;  %p9980_p9 = scmp.lt.s32.totalorder %s15347_s18, %s15404_s7 }
 0x5e2   : > { %p9981_p10 = scmp.lt.s32.totalorder %s9979_s22, %s9975_s29 }
 0x5e3   : > { %p9977_p7 = pnand %p9976_p4, %p10117_p5 }
 0x5e4   : > { %p9982_p11 = por %p9981_p10, %p9980_p9 }
 0x5e5   : > { %p9978_p8 = pneg %p9977_p7 }
 0x5e7   : > { %p9983_p12 = pnand %p9982_p11, %p9978_p8 }
 0x5e9   : > { %9986 = shalt.err (!%p9983_p12)
}
 0x5ea   : > { %s10038_s15 = smov 128  }
 0x5eb   : > { %9852 = dma.vmem_to_hbm [thread:$0]  (%p10117_p5), %s15351_s13, 4096, %s15347_s18, %s15356_s28, %s10038_s15, %s10038_s15, %s10029_s21  }
 0x5ec PF: > { %p9858_p13 = scmp.ge.s32.totalorder %s10021_s27, 2  ;;  %s9244_s19 = sand.u32 1, %s10009_s24  }
 0x5ed   : > { %s9245_s23 = scalar_lea.sflag [#allocation5], %s9244_s19 }
 0x5ee   : > { %p9855_p0 = pnand %p9858_p13, %p10121_p6 }
 0x5f0   : > { %p9856_p1 = pneg %p9855_p0 }
 0x5f2   : > { %10004 = dma.done.wait (%p9856_p1), %s9245_s23, 4096  }
 0x5f3   : > { %10006 = vsyncadd (%p9856_p1), %s9245_s23, 4294963200  ;;  %p17_p2 = scmp.ge.s32.totalorder %s10104_s30, 4   ;;  %s17068_s24 = smov %s10013_s25 }
 0x5f4   : > { %s17069_s25 = smov %s10017_s26  ;;  %s17070_s26 = smov %s10115_s10 }
 0x5f5   : > { %s17071_s27 = smov %s10104_s30  ;;  %19 = sbr.rel (!%p17_p2) target bundleno = 3 (0x3), region = 83 }
 0x5fa   :  { %9250 = vsyncpa [#allocation5], 1 }
 0x5fb   :  { %9252 = vsyncpa [#allocation5 + $0x1], 1 }

</bundles_post_ra>
